<compile_context>
chip_gen: v5e
topology: v5e:2x2
jax: 0.10.0
libtpu: 0.0.40
codegen_flags: <defaults>
</compile_context>

<pallas_src>
import functools

import jax
import jax.numpy as jnp
import numpy as np
from jax.experimental import pallas as pl
from jax.experimental.pallas import tpu as pltpu


def _gru_kernel(x_ref, wi_ref, wh_ref, out_ref, h_ref, *, time_block, hp):
    """One grid step = `time_block` timesteps for the whole (padded) batch.

    x_ref   : (Bp, Tb, D)   batch-first input block
    wi_ref  : (D, 3*Hp)     fused [W_ir | W_iz | W_in] (VMEM resident)
    wh_ref  : (Hp, 3*Hp)    fused [W_hr | W_hz | W_hn] (VMEM resident)
    out_ref : (Bp, Tb, Hp)  batch-first output block
    h_ref   : (Bp, Hp) f32  hidden state scratch, persists across grid steps
    """
    tb = pl.program_id(0)

    # h_0 = 0 (PyTorch default when no initial hidden state is supplied).
    @pl.when(tb == 0)
    def _():
        h_ref[...] = jnp.zeros_like(h_ref)

    bp = x_ref.shape[0]
    d = x_ref.shape[2]

    # Hoisted input projection: one big MXU-friendly matmul per time block
    # instead of three tiny matmuls on the per-timestep serial path.
    x_blk = x_ref[...]                                        # (Bp, Tb, D)
    xp = jnp.dot(x_blk.reshape(bp * time_block, d), wi_ref[...],
                 preferred_element_type=jnp.float32)          # (Bp*Tb, 3Hp)
    xp = xp.reshape(bp, time_block, 3 * hp)

    wh = wh_ref[...]
    h = h_ref[...]                                            # f32 accumulator

    # Fully unrolled recurrence over the time block (static indices).
    for tt in range(time_block):
        # Single fused hidden projection for all three gates.
        g = jnp.dot(h.astype(wh.dtype), wh,
                    preferred_element_type=jnp.float32)       # (Bp, 3Hp)
        xi = xp[:, tt, :]                                     # (Bp, 3Hp)

        # PyTorch GRU cell (bias=False), gate order [r, z, n]:
        #   r = sigmoid(W_ir x + W_hr h)
        #   z = sigmoid(W_iz x + W_hz h)
        #   n = tanh(W_in x + r * (W_hn h))
        #   h' = (1 - z) * n + z * h
        r = jax.nn.sigmoid(xi[:, :hp] + g[:, :hp])
        z = jax.nn.sigmoid(xi[:, hp:2 * hp] + g[:, hp:2 * hp])
        n = jnp.tanh(xi[:, 2 * hp:] + r * g[:, 2 * hp:])
        h = (1.0 - z) * n + z * h

        out_ref[:, tt, :] = h.astype(out_ref.dtype)           # 128-lane dense

    h_ref[...] = h


def gru_layer_pallas(x, w_ih, w_hh, *, time_block=8):
    """x: (B, T, D_in) batch-first.  w_ih: (3H, D_in), w_hh: (3H, H) in
    PyTorch gate order [r, z, n].  Returns out: (B, T, H)."""
    B, T, D = x.shape
    H = w_hh.shape[1]

    # Lane/sublane-friendly padded sizes.
    Hp = pl.cdiv(H, 128) * 128          # lane-dense outputs & aligned gate slices
    Bp = pl.cdiv(B, 8) * 8              # sublane multiple
    Tb = min(time_block, max(T, 1))
    Tp = pl.cdiv(T, Tb) * Tb

    # bf16 operands hit the fast MXU path on v6e/v7x; f32 otherwise.
    compute_dtype = jnp.bfloat16 if x.dtype == jnp.bfloat16 else jnp.float32

    # Fused, zero-padded gate weights: gate g occupies columns [g*Hp, g*Hp+H).
    # Zero padding keeps the padded hidden lanes exactly 0 through the whole
    # recurrence, so results are bit-equivalent to the unpadded GRU.
    def fuse(gates, rows, rows_pad):
        w = jnp.zeros((rows_pad, 3 * Hp), compute_dtype)
        for gi, wg in enumerate(gates):
            w = w.at[:rows, gi * Hp:gi * Hp + H].set(wg.T.astype(compute_dtype))
        return w

    w_i = fuse([w_ih[0:H], w_ih[H:2 * H], w_ih[2 * H:3 * H]], D, D)    # (D, 3Hp)
    w_h = fuse([w_hh[0:H], w_hh[H:2 * H], w_hh[2 * H:3 * H]], H, Hp)   # (Hp, 3Hp)

    x_p = x.astype(compute_dtype)
    if (Bp, Tp) != (B, T):
        x_p = jnp.zeros((Bp, Tp, D), compute_dtype).at[:B, :T, :].set(x_p)

    kernel = functools.partial(_gru_kernel, time_block=Tb, hp=Hp)

    out_p = pl.pallas_call(
        kernel,
        out_shape=jax.ShapeDtypeStruct((Bp, Tp, Hp), x.dtype),
        grid_spec=pltpu.PrefetchScalarGridSpec(
            num_scalar_prefetch=0,
            grid=(Tp // Tb,),
            in_specs=[
                pl.BlockSpec((Bp, Tb, D), lambda t: (0, t, 0)),   # x time block
                pl.BlockSpec((D, 3 * Hp), lambda t: (0, 0)),      # fused W_i*
                pl.BlockSpec((Hp, 3 * Hp), lambda t: (0, 0)),     # fused W_h*
            ],
            out_specs=pl.BlockSpec((Bp, Tb, Hp), lambda t: (0, t, 0)),
            scratch_shapes=[pltpu.VMEM((Bp, Hp), jnp.float32)],   # hidden state
        ),
        compiler_params=pltpu.CompilerParams(
            dimension_semantics=("arbitrary",)),   # sequential recurrence
    )(x_p, w_i, w_h)

    return out_p[:B, :T, :H].astype(x.dtype)


def gru_layer_ref(x, w_ih, w_hh):
    """Pure-JAX reference matching torch.nn.GRU(bias=False, batch_first=True)."""
    B, T, D = x.shape
    H = w_hh.shape[1]
    w_ir, w_iz, w_in = w_ih[0:H], w_ih[H:2 * H], w_ih[2 * H:3 * H]
    w_hr, w_hz, w_hn = w_hh[0:H], w_hh[H:2 * H], w_hh[2 * H:3 * H]

    def step(h, x_t):
        r = jax.nn.sigmoid(x_t @ w_ir.T + h @ w_hr.T)
        z = jax.nn.sigmoid(x_t @ w_iz.T + h @ w_hz.T)
        n = jnp.tanh(x_t @ w_in.T + r * (h @ w_hn.T))
        h_new = (1.0 - z) * n + z * h
        return h_new, h_new

    h0 = jnp.zeros((B, H), jnp.float32)
    _, ys = jax.lax.scan(step, h0, jnp.transpose(x, (1, 0, 2)).astype(jnp.float32))
    return jnp.transpose(ys, (1, 0, 2)).astype(x.dtype)


if __name__ == "__main__":
    # Small deterministic setup: batch=8, seq=16, input_dim=16, hidden=32.
    # T=16 with time_block=8 exercises the hidden-state carry across grid steps.
    B, T, D, H = 8, 16, 16, 32
    key = jax.random.PRNGKey(0)
    kx, kih, khh = jax.random.split(key, 3)

    x = jax.random.normal(kx, (B, T, D), dtype=jnp.float32)
    # PyTorch-style uniform(-1/sqrt(H), 1/sqrt(H)) init, deterministic here.
    bound = 1.0 / np.sqrt(H)
    w_ih = jax.random.uniform(kih, (3 * H, D), jnp.float32, -bound, bound)
    w_hh = jax.random.uniform(khh, (3 * H, H), jnp.float32, -bound, bound)

    out = jax.block_until_ready(gru_layer_pallas(x, w_ih, w_hh))

    ref = gru_layer_ref(x, w_ih, w_hh)
    np.testing.assert_allclose(np.asarray(out), np.asarray(ref),
                               rtol=1e-4, atol=2e-5)
    print("KERNEL_OK")
</pallas_src>

<mosaic_0001>
module attributes {stable_mosaic.version = 11 : i64} {
  func.func @_gru_kernel(%arg0: i32, %arg1: memref<8x8x16xf32, #tpu.memory_space<vmem>>, %arg2: memref<16x384xf32, #tpu.memory_space<vmem>>, %arg3: memref<128x384xf32, #tpu.memory_space<vmem>>, %arg4: memref<8x8x128xf32, #tpu.memory_space<vmem>>, %arg5: memref<8x128xf32, #tpu.memory_space<vmem>>) attributes {dimension_semantics = [#tpu.dimension_semantics<arbitrary>], iteration_bounds = array<i64: 2>, scalar_prefetch = 0 : i64, scratch_operands = 1 : i64, tpu.core_type = #tpu.core_type<tc>, window_params = [{transform_indices = @transform_0, window_bounds = array<i64: 8, 8, 16>}, {pipeline_mode = #tpu.pipeline_mode<synchronous>, transform_indices = @transform_1, window_bounds = array<i64: 16, 384>}, {pipeline_mode = #tpu.pipeline_mode<synchronous>, transform_indices = @transform_2, window_bounds = array<i64: 128, 384>}, {transform_indices = @transform_3, window_bounds = array<i64: 8, 8, 128>}]} {
    %c0_i32 = arith.constant 0 : i32
    %0 = arith.cmpi eq, %arg0, %c0_i32 : i32
    %1 = arith.extui %0 : i1 to i32
    %c0_i32_0 = arith.constant 0 : i32
    %2 = arith.cmpi ne, %1, %c0_i32_0 : i32
    scf.if %2 {
      %cst_60 = arith.constant 0.000000e+00 : f32
      %267 = vector.broadcast %cst_60 : f32 to vector<8x128xf32>
      %c0_61 = arith.constant 0 : index
      %c0_62 = arith.constant 0 : index
      %268 = vector.load %arg5[%c0_61, %c0_62] : memref<8x128xf32, #tpu.memory_space<vmem>>, vector<8x128xf32>
      tpu.vector_store %arg5[%c0_61, %c0_62], %267 {strides = array<i32>} : memref<8x128xf32, #tpu.memory_space<vmem>>, vector<8x128xf32>,
    } else {
    }
    %c0 = arith.constant 0 : index
    %c0_1 = arith.constant 0 : index
    %c0_2 = arith.constant 0 : index
    %3 = vector.load %arg1[%c0, %c0_1, %c0_2] : memref<8x8x16xf32, #tpu.memory_space<vmem>>, vector<8x8x16xf32>
    %4 = vector.shape_cast %3 : vector<8x8x16xf32> to vector<64x16xf32>
    %c0_3 = arith.constant 0 : index
    %c0_4 = arith.constant 0 : index
    %5 = vector.load %arg2[%c0_3, %c0_4] : memref<16x384xf32, #tpu.memory_space<vmem>>, vector<16x384xf32>
    %cst = arith.constant dense<0.000000e+00> : vector<64x384xf32>
    %6 = tpu.matmul %4, %5, %cst {dimension_numbers = #tpu.dot_dimension_numbers<[1], [0], [0], [1], [0, 0, 1, 1], [], []>} : vector<64x16xf32>, vector<16x384xf32>, vector<64x384xf32> -> vector<64x384xf32>
    %7 = vector.shape_cast %6 : vector<64x384xf32> to vector<8x8x384xf32>
    %c0_5 = arith.constant 0 : index
    %c0_6 = arith.constant 0 : index
    %8 = vector.load %arg3[%c0_5, %c0_6] : memref<128x384xf32, #tpu.memory_space<vmem>>, vector<128x384xf32>
    %c0_7 = arith.constant 0 : index
    %c0_8 = arith.constant 0 : index
    %9 = vector.load %arg5[%c0_7, %c0_8] : memref<8x128xf32, #tpu.memory_space<vmem>>, vector<8x128xf32>
    %cst_9 = arith.constant dense<0.000000e+00> : vector<8x384xf32>
    %10 = tpu.matmul %9, %8, %cst_9 {dimension_numbers = #tpu.dot_dimension_numbers<[1], [0], [0], [1], [0, 0, 1, 1], [], []>} : vector<8x128xf32>, vector<128x384xf32>, vector<8x384xf32> -> vector<8x384xf32>
    %11 = vector.extract_strided_slice %7 {offsets = [0, 0, 0], sizes = [8, 1, 384], strides = [1, 1, 1]} : vector<8x8x384xf32> to vector<8x1x384xf32>
    %12 = vector.shape_cast %11 : vector<8x1x384xf32> to vector<8x384xf32>
    %13 = vector.extract_strided_slice %12 {offsets = [0, 0], sizes = [8, 128], strides = [1, 1]} : vector<8x384xf32> to vector<8x128xf32>
    %14 = vector.extract_strided_slice %10 {offsets = [0, 0], sizes = [8, 128], strides = [1, 1]} : vector<8x384xf32> to vector<8x128xf32>
    %15 = arith.addf %13, %14 : vector<8x128xf32>
    %16 = arith.negf %15 : vector<8x128xf32>
    %17 = math.exp %16 : vector<8x128xf32>
    %cst_10 = arith.constant 1.000000e+00 : f32
    %18 = vector.broadcast %cst_10 : f32 to vector<8x128xf32>
    %19 = arith.addf %18, %17 : vector<8x128xf32>
    %20 = arith.divf %18, %19 : vector<8x128xf32>
    %21 = vector.extract_strided_slice %12 {offsets = [0, 128], sizes = [8, 128], strides = [1, 1]} : vector<8x384xf32> to vector<8x128xf32>
    %22 = vector.extract_strided_slice %10 {offsets = [0, 128], sizes = [8, 128], strides = [1, 1]} : vector<8x384xf32> to vector<8x128xf32>
    %23 = arith.addf %21, %22 : vector<8x128xf32>
    %24 = arith.negf %23 : vector<8x128xf32>
    %25 = math.exp %24 : vector<8x128xf32>
    %cst_11 = arith.constant 1.000000e+00 : f32
    %26 = vector.broadcast %cst_11 : f32 to vector<8x128xf32>
    %27 = arith.addf %26, %25 : vector<8x128xf32>
    %28 = arith.divf %26, %27 : vector<8x128xf32>
    %29 = vector.extract_strided_slice %12 {offsets = [0, 256], sizes = [8, 128], strides = [1, 1]} : vector<8x384xf32> to vector<8x128xf32>
    %30 = vector.extract_strided_slice %10 {offsets = [0, 256], sizes = [8, 128], strides = [1, 1]} : vector<8x384xf32> to vector<8x128xf32>
    %31 = arith.mulf %20, %30 : vector<8x128xf32>
    %32 = arith.addf %29, %31 : vector<8x128xf32>
    %33 = math.tanh %32 : vector<8x128xf32>
    %cst_12 = arith.constant 1.000000e+00 : f32
    %34 = vector.broadcast %cst_12 : f32 to vector<8x128xf32>
    %35 = arith.subf %34, %28 : vector<8x128xf32>
    %36 = arith.mulf %35, %33 : vector<8x128xf32>
    %37 = arith.mulf %28, %9 : vector<8x128xf32>
    %38 = arith.addf %36, %37 : vector<8x128xf32>
    %c0_13 = arith.constant 0 : index
    %c0_14 = arith.constant 0 : index
    %c0_15 = arith.constant 0 : index
    %39 = vector.load %arg4[%c0_13, %c0_14, %c0_15] : memref<8x8x128xf32, #tpu.memory_space<vmem>>, vector<8x1x128xf32>
    %40 = vector.shape_cast %39 : vector<8x1x128xf32> to vector<8x128xf32>
    %41 = vector.shape_cast %38 : vector<8x128xf32> to vector<8x1x128xf32>
    tpu.vector_store %arg4[%c0_13, %c0_14, %c0_15], %41 {strides = array<i32>} : memref<8x8x128xf32, #tpu.memory_space<vmem>>, vector<8x1x128xf32>,
    %cst_16 = arith.constant dense<0.000000e+00> : vector<8x384xf32>
    %42 = tpu.matmul %38, %8, %cst_16 {dimension_numbers = #tpu.dot_dimension_numbers<[1], [0], [0], [1], [0, 0, 1, 1], [], []>} : vector<8x128xf32>, vector<128x384xf32>, vector<8x384xf32> -> vector<8x384xf32>
    %43 = vector.extract_strided_slice %7 {offsets = [0, 1, 0], sizes = [8, 1, 384], strides = [1, 1, 1]} : vector<8x8x384xf32> to vector<8x1x384xf32>
    %44 = vector.shape_cast %43 : vector<8x1x384xf32> to vector<8x384xf32>
    %45 = vector.extract_strided_slice %44 {offsets = [0, 0], sizes = [8, 128], strides = [1, 1]} : vector<8x384xf32> to vector<8x128xf32>
    %46 = vector.extract_strided_slice %42 {offsets = [0, 0], sizes = [8, 128], strides = [1, 1]} : vector<8x384xf32> to vector<8x128xf32>
    %47 = arith.addf %45, %46 : vector<8x128xf32>
    %48 = arith.negf %47 : vector<8x128xf32>
    %49 = math.exp %48 : vector<8x128xf32>
    %cst_17 = arith.constant 1.000000e+00 : f32
    %50 = vector.broadcast %cst_17 : f32 to vector<8x128xf32>
    %51 = arith.addf %50, %49 : vector<8x128xf32>
    %52 = arith.divf %50, %51 : vector<8x128xf32>
    %53 = vector.extract_strided_slice %44 {offsets = [0, 128], sizes = [8, 128], strides = [1, 1]} : vector<8x384xf32> to vector<8x128xf32>
    %54 = vector.extract_strided_slice %42 {offsets = [0, 128], sizes = [8, 128], strides = [1, 1]} : vector<8x384xf32> to vector<8x128xf32>
    %55 = arith.addf %53, %54 : vector<8x128xf32>
    %56 = arith.negf %55 : vector<8x128xf32>
    %57 = math.exp %56 : vector<8x128xf32>
    %cst_18 = arith.constant 1.000000e+00 : f32
    %58 = vector.broadcast %cst_18 : f32 to vector<8x128xf32>
    %59 = arith.addf %58, %57 : vector<8x128xf32>
    %60 = arith.divf %58, %59 : vector<8x128xf32>
    %61 = vector.extract_strided_slice %44 {offsets = [0, 256], sizes = [8, 128], strides = [1, 1]} : vector<8x384xf32> to vector<8x128xf32>
    %62 = vector.extract_strided_slice %42 {offsets = [0, 256], sizes = [8, 128], strides = [1, 1]} : vector<8x384xf32> to vector<8x128xf32>
    %63 = arith.mulf %52, %62 : vector<8x128xf32>
    %64 = arith.addf %61, %63 : vector<8x128xf32>
    %65 = math.tanh %64 : vector<8x128xf32>
    %cst_19 = arith.constant 1.000000e+00 : f32
    %66 = vector.broadcast %cst_19 : f32 to vector<8x128xf32>
    %67 = arith.subf %66, %60 : vector<8x128xf32>
    %68 = arith.mulf %67, %65 : vector<8x128xf32>
    %69 = arith.mulf %60, %38 : vector<8x128xf32>
    %70 = arith.addf %68, %69 : vector<8x128xf32>
    %c0_20 = arith.constant 0 : index
    %c1 = arith.constant 1 : index
    %c0_21 = arith.constant 0 : index
    %71 = vector.load %arg4[%c0_20, %c1, %c0_21] : memref<8x8x128xf32, #tpu.memory_space<vmem>>, vector<8x1x128xf32>
    %72 = vector.shape_cast %71 : vector<8x1x128xf32> to vector<8x128xf32>
    %73 = vector.shape_cast %70 : vector<8x128xf32> to vector<8x1x128xf32>
    tpu.vector_store %arg4[%c0_20, %c1, %c0_21], %73 {strides = array<i32>} : memref<8x8x128xf32, #tpu.memory_space<vmem>>, vector<8x1x128xf32>,
    %cst_22 = arith.constant dense<0.000000e+00> : vector<8x384xf32>
    %74 = tpu.matmul %70, %8, %cst_22 {dimension_numbers = #tpu.dot_dimension_numbers<[1], [0], [0], [1], [0, 0, 1, 1], [], []>} : vector<8x128xf32>, vector<128x384xf32>, vector<8x384xf32> -> vector<8x384xf32>
    %75 = vector.extract_strided_slice %7 {offsets = [0, 2, 0], sizes = [8, 1, 384], strides = [1, 1, 1]} : vector<8x8x384xf32> to vector<8x1x384xf32>
    %76 = vector.shape_cast %75 : vector<8x1x384xf32> to vector<8x384xf32>
    %77 = vector.extract_strided_slice %76 {offsets = [0, 0], sizes = [8, 128], strides = [1, 1]} : vector<8x384xf32> to vector<8x128xf32>
    %78 = vector.extract_strided_slice %74 {offsets = [0, 0], sizes = [8, 128], strides = [1, 1]} : vector<8x384xf32> to vector<8x128xf32>
    %79 = arith.addf %77, %78 : vector<8x128xf32>
    %80 = arith.negf %79 : vector<8x128xf32>
    %81 = math.exp %80 : vector<8x128xf32>
    %cst_23 = arith.constant 1.000000e+00 : f32
    %82 = vector.broadcast %cst_23 : f32 to vector<8x128xf32>
    %83 = arith.addf %82, %81 : vector<8x128xf32>
    %84 = arith.divf %82, %83 : vector<8x128xf32>
    %85 = vector.extract_strided_slice %76 {offsets = [0, 128], sizes = [8, 128], strides = [1, 1]} : vector<8x384xf32> to vector<8x128xf32>
    %86 = vector.extract_strided_slice %74 {offsets = [0, 128], sizes = [8, 128], strides = [1, 1]} : vector<8x384xf32> to vector<8x128xf32>
    %87 = arith.addf %85, %86 : vector<8x128xf32>
    %88 = arith.negf %87 : vector<8x128xf32>
    %89 = math.exp %88 : vector<8x128xf32>
    %cst_24 = arith.constant 1.000000e+00 : f32
    %90 = vector.broadcast %cst_24 : f32 to vector<8x128xf32>
    %91 = arith.addf %90, %89 : vector<8x128xf32>
    %92 = arith.divf %90, %91 : vector<8x128xf32>
    %93 = vector.extract_strided_slice %76 {offsets = [0, 256], sizes = [8, 128], strides = [1, 1]} : vector<8x384xf32> to vector<8x128xf32>
    %94 = vector.extract_strided_slice %74 {offsets = [0, 256], sizes = [8, 128], strides = [1, 1]} : vector<8x384xf32> to vector<8x128xf32>
    %95 = arith.mulf %84, %94 : vector<8x128xf32>
    %96 = arith.addf %93, %95 : vector<8x128xf32>
    %97 = math.tanh %96 : vector<8x128xf32>
    %cst_25 = arith.constant 1.000000e+00 : f32
    %98 = vector.broadcast %cst_25 : f32 to vector<8x128xf32>
    %99 = arith.subf %98, %92 : vector<8x128xf32>
    %100 = arith.mulf %99, %97 : vector<8x128xf32>
    %101 = arith.mulf %92, %70 : vector<8x128xf32>
    %102 = arith.addf %100, %101 : vector<8x128xf32>
    %c0_26 = arith.constant 0 : index
    %c2 = arith.constant 2 : index
    %c0_27 = arith.constant 0 : index
    %103 = vector.load %arg4[%c0_26, %c2, %c0_27] : memref<8x8x128xf32, #tpu.memory_space<vmem>>, vector<8x1x128xf32>
    %104 = vector.shape_cast %103 : vector<8x1x128xf32> to vector<8x128xf32>
    %105 = vector.shape_cast %102 : vector<8x128xf32> to vector<8x1x128xf32>
    tpu.vector_store %arg4[%c0_26, %c2, %c0_27], %105 {strides = array<i32>} : memref<8x8x128xf32, #tpu.memory_space<vmem>>, vector<8x1x128xf32>,
    %cst_28 = arith.constant dense<0.000000e+00> : vector<8x384xf32>
    %106 = tpu.matmul %102, %8, %cst_28 {dimension_numbers = #tpu.dot_dimension_numbers<[1], [0], [0], [1], [0, 0, 1, 1], [], []>} : vector<8x128xf32>, vector<128x384xf32>, vector<8x384xf32> -> vector<8x384xf32>
    %107 = vector.extract_strided_slice %7 {offsets = [0, 3, 0], sizes = [8, 1, 384], strides = [1, 1, 1]} : vector<8x8x384xf32> to vector<8x1x384xf32>
    %108 = vector.shape_cast %107 : vector<8x1x384xf32> to vector<8x384xf32>
    %109 = vector.extract_strided_slice %108 {offsets = [0, 0], sizes = [8, 128], strides = [1, 1]} : vector<8x384xf32> to vector<8x128xf32>
    %110 = vector.extract_strided_slice %106 {offsets = [0, 0], sizes = [8, 128], strides = [1, 1]} : vector<8x384xf32> to vector<8x128xf32>
    %111 = arith.addf %109, %110 : vector<8x128xf32>
    %112 = arith.negf %111 : vector<8x128xf32>
    %113 = math.exp %112 : vector<8x128xf32>
    %cst_29 = arith.constant 1.000000e+00 : f32
    %114 = vector.broadcast %cst_29 : f32 to vector<8x128xf32>
    %115 = arith.addf %114, %113 : vector<8x128xf32>
    %116 = arith.divf %114, %115 : vector<8x128xf32>
    %117 = vector.extract_strided_slice %108 {offsets = [0, 128], sizes = [8, 128], strides = [1, 1]} : vector<8x384xf32> to vector<8x128xf32>
    %118 = vector.extract_strided_slice %106 {offsets = [0, 128], sizes = [8, 128], strides = [1, 1]} : vector<8x384xf32> to vector<8x128xf32>
    %119 = arith.addf %117, %118 : vector<8x128xf32>
    %120 = arith.negf %119 : vector<8x128xf32>
    %121 = math.exp %120 : vector<8x128xf32>
    %cst_30 = arith.constant 1.000000e+00 : f32
    %122 = vector.broadcast %cst_30 : f32 to vector<8x128xf32>
    %123 = arith.addf %122, %121 : vector<8x128xf32>
    %124 = arith.divf %122, %123 : vector<8x128xf32>
    %125 = vector.extract_strided_slice %108 {offsets = [0, 256], sizes = [8, 128], strides = [1, 1]} : vector<8x384xf32> to vector<8x128xf32>
    %126 = vector.extract_strided_slice %106 {offsets = [0, 256], sizes = [8, 128], strides = [1, 1]} : vector<8x384xf32> to vector<8x128xf32>
    %127 = arith.mulf %116, %126 : vector<8x128xf32>
    %128 = arith.addf %125, %127 : vector<8x128xf32>
    %129 = math.tanh %128 : vector<8x128xf32>
    %cst_31 = arith.constant 1.000000e+00 : f32
    %130 = vector.broadcast %cst_31 : f32 to vector<8x128xf32>
    %131 = arith.subf %130, %124 : vector<8x128xf32>
    %132 = arith.mulf %131, %129 : vector<8x128xf32>
    %133 = arith.mulf %124, %102 : vector<8x128xf32>
    %134 = arith.addf %132, %133 : vector<8x128xf32>
    %c0_32 = arith.constant 0 : index
    %c3 = arith.constant 3 : index
    %c0_33 = arith.constant 0 : index
    %135 = vector.load %arg4[%c0_32, %c3, %c0_33] : memref<8x8x128xf32, #tpu.memory_space<vmem>>, vector<8x1x128xf32>
    %136 = vector.shape_cast %135 : vector<8x1x128xf32> to vector<8x128xf32>
    %137 = vector.shape_cast %134 : vector<8x128xf32> to vector<8x1x128xf32>
    tpu.vector_store %arg4[%c0_32, %c3, %c0_33], %137 {strides = array<i32>} : memref<8x8x128xf32, #tpu.memory_space<vmem>>, vector<8x1x128xf32>,
    %cst_34 = arith.constant dense<0.000000e+00> : vector<8x384xf32>
    %138 = tpu.matmul %134, %8, %cst_34 {dimension_numbers = #tpu.dot_dimension_numbers<[1], [0], [0], [1], [0, 0, 1, 1], [], []>} : vector<8x128xf32>, vector<128x384xf32>, vector<8x384xf32> -> vector<8x384xf32>
    %139 = vector.extract_strided_slice %7 {offsets = [0, 4, 0], sizes = [8, 1, 384], strides = [1, 1, 1]} : vector<8x8x384xf32> to vector<8x1x384xf32>
    %140 = vector.shape_cast %139 : vector<8x1x384xf32> to vector<8x384xf32>
    %141 = vector.extract_strided_slice %140 {offsets = [0, 0], sizes = [8, 128], strides = [1, 1]} : vector<8x384xf32> to vector<8x128xf32>
    %142 = vector.extract_strided_slice %138 {offsets = [0, 0], sizes = [8, 128], strides = [1, 1]} : vector<8x384xf32> to vector<8x128xf32>
    %143 = arith.addf %141, %142 : vector<8x128xf32>
    %144 = arith.negf %143 : vector<8x128xf32>
    %145 = math.exp %144 : vector<8x128xf32>
    %cst_35 = arith.constant 1.000000e+00 : f32
    %146 = vector.broadcast %cst_35 : f32 to vector<8x128xf32>
    %147 = arith.addf %146, %145 : vector<8x128xf32>
    %148 = arith.divf %146, %147 : vector<8x128xf32>
    %149 = vector.extract_strided_slice %140 {offsets = [0, 128], sizes = [8, 128], strides = [1, 1]} : vector<8x384xf32> to vector<8x128xf32>
    %150 = vector.extract_strided_slice %138 {offsets = [0, 128], sizes = [8, 128], strides = [1, 1]} : vector<8x384xf32> to vector<8x128xf32>
    %151 = arith.addf %149, %150 : vector<8x128xf32>
    %152 = arith.negf %151 : vector<8x128xf32>
    %153 = math.exp %152 : vector<8x128xf32>
    %cst_36 = arith.constant 1.000000e+00 : f32
    %154 = vector.broadcast %cst_36 : f32 to vector<8x128xf32>
    %155 = arith.addf %154, %153 : vector<8x128xf32>
    %156 = arith.divf %154, %155 : vector<8x128xf32>
    %157 = vector.extract_strided_slice %140 {offsets = [0, 256], sizes = [8, 128], strides = [1, 1]} : vector<8x384xf32> to vector<8x128xf32>
    %158 = vector.extract_strided_slice %138 {offsets = [0, 256], sizes = [8, 128], strides = [1, 1]} : vector<8x384xf32> to vector<8x128xf32>
    %159 = arith.mulf %148, %158 : vector<8x128xf32>
    %160 = arith.addf %157, %159 : vector<8x128xf32>
    %161 = math.tanh %160 : vector<8x128xf32>
    %cst_37 = arith.constant 1.000000e+00 : f32
    %162 = vector.broadcast %cst_37 : f32 to vector<8x128xf32>
    %163 = arith.subf %162, %156 : vector<8x128xf32>
    %164 = arith.mulf %163, %161 : vector<8x128xf32>
    %165 = arith.mulf %156, %134 : vector<8x128xf32>
    %166 = arith.addf %164, %165 : vector<8x128xf32>
    %c0_38 = arith.constant 0 : index
    %c4 = arith.constant 4 : index
    %c0_39 = arith.constant 0 : index
    %167 = vector.load %arg4[%c0_38, %c4, %c0_39] : memref<8x8x128xf32, #tpu.memory_space<vmem>>, vector<8x1x128xf32>
    %168 = vector.shape_cast %167 : vector<8x1x128xf32> to vector<8x128xf32>
    %169 = vector.shape_cast %166 : vector<8x128xf32> to vector<8x1x128xf32>
    tpu.vector_store %arg4[%c0_38, %c4, %c0_39], %169 {strides = array<i32>} : memref<8x8x128xf32, #tpu.memory_space<vmem>>, vector<8x1x128xf32>,
    %cst_40 = arith.constant dense<0.000000e+00> : vector<8x384xf32>
    %170 = tpu.matmul %166, %8, %cst_40 {dimension_numbers = #tpu.dot_dimension_numbers<[1], [0], [0], [1], [0, 0, 1, 1], [], []>} : vector<8x128xf32>, vector<128x384xf32>, vector<8x384xf32> -> vector<8x384xf32>
    %171 = vector.extract_strided_slice %7 {offsets = [0, 5, 0], sizes = [8, 1, 384], strides = [1, 1, 1]} : vector<8x8x384xf32> to vector<8x1x384xf32>
    %172 = vector.shape_cast %171 : vector<8x1x384xf32> to vector<8x384xf32>
    %173 = vector.extract_strided_slice %172 {offsets = [0, 0], sizes = [8, 128], strides = [1, 1]} : vector<8x384xf32> to vector<8x128xf32>
    %174 = vector.extract_strided_slice %170 {offsets = [0, 0], sizes = [8, 128], strides = [1, 1]} : vector<8x384xf32> to vector<8x128xf32>
    %175 = arith.addf %173, %174 : vector<8x128xf32>
    %176 = arith.negf %175 : vector<8x128xf32>
    %177 = math.exp %176 : vector<8x128xf32>
    %cst_41 = arith.constant 1.000000e+00 : f32
    %178 = vector.broadcast %cst_41 : f32 to vector<8x128xf32>
    %179 = arith.addf %178, %177 : vector<8x128xf32>
    %180 = arith.divf %178, %179 : vector<8x128xf32>
    %181 = vector.extract_strided_slice %172 {offsets = [0, 128], sizes = [8, 128], strides = [1, 1]} : vector<8x384xf32> to vector<8x128xf32>
    %182 = vector.extract_strided_slice %170 {offsets = [0, 128], sizes = [8, 128], strides = [1, 1]} : vector<8x384xf32> to vector<8x128xf32>
    %183 = arith.addf %181, %182 : vector<8x128xf32>
    %184 = arith.negf %183 : vector<8x128xf32>
    %185 = math.exp %184 : vector<8x128xf32>
    %cst_42 = arith.constant 1.000000e+00 : f32
    %186 = vector.broadcast %cst_42 : f32 to vector<8x128xf32>
    %187 = arith.addf %186, %185 : vector<8x128xf32>
    %188 = arith.divf %186, %187 : vector<8x128xf32>
    %189 = vector.extract_strided_slice %172 {offsets = [0, 256], sizes = [8, 128], strides = [1, 1]} : vector<8x384xf32> to vector<8x128xf32>
    %190 = vector.extract_strided_slice %170 {offsets = [0, 256], sizes = [8, 128], strides = [1, 1]} : vector<8x384xf32> to vector<8x128xf32>
    %191 = arith.mulf %180, %190 : vector<8x128xf32>
    %192 = arith.addf %189, %191 : vector<8x128xf32>
    %193 = math.tanh %192 : vector<8x128xf32>
    %cst_43 = arith.constant 1.000000e+00 : f32
    %194 = vector.broadcast %cst_43 : f32 to vector<8x128xf32>
    %195 = arith.subf %194, %188 : vector<8x128xf32>
    %196 = arith.mulf %195, %193 : vector<8x128xf32>
    %197 = arith.mulf %188, %166 : vector<8x128xf32>
    %198 = arith.addf %196, %197 : vector<8x128xf32>
    %c0_44 = arith.constant 0 : index
    %c5 = arith.constant 5 : index
    %c0_45 = arith.constant 0 : index
    %199 = vector.load %arg4[%c0_44, %c5, %c0_45] : memref<8x8x128xf32, #tpu.memory_space<vmem>>, vector<8x1x128xf32>
    %200 = vector.shape_cast %199 : vector<8x1x128xf32> to vector<8x128xf32>
    %201 = vector.shape_cast %198 : vector<8x128xf32> to vector<8x1x128xf32>
    tpu.vector_store %arg4[%c0_44, %c5, %c0_45], %201 {strides = array<i32>} : memref<8x8x128xf32, #tpu.memory_space<vmem>>, vector<8x1x128xf32>,
    %cst_46 = arith.constant dense<0.000000e+00> : vector<8x384xf32>
    %202 = tpu.matmul %198, %8, %cst_46 {dimension_numbers = #tpu.dot_dimension_numbers<[1], [0], [0], [1], [0, 0, 1, 1], [], []>} : vector<8x128xf32>, vector<128x384xf32>, vector<8x384xf32> -> vector<8x384xf32>
    %203 = vector.extract_strided_slice %7 {offsets = [0, 6, 0], sizes = [8, 1, 384], strides = [1, 1, 1]} : vector<8x8x384xf32> to vector<8x1x384xf32>
    %204 = vector.shape_cast %203 : vector<8x1x384xf32> to vector<8x384xf32>
    %205 = vector.extract_strided_slice %204 {offsets = [0, 0], sizes = [8, 128], strides = [1, 1]} : vector<8x384xf32> to vector<8x128xf32>
    %206 = vector.extract_strided_slice %202 {offsets = [0, 0], sizes = [8, 128], strides = [1, 1]} : vector<8x384xf32> to vector<8x128xf32>
    %207 = arith.addf %205, %206 : vector<8x128xf32>
    %208 = arith.negf %207 : vector<8x128xf32>
    %209 = math.exp %208 : vector<8x128xf32>
    %cst_47 = arith.constant 1.000000e+00 : f32
    %210 = vector.broadcast %cst_47 : f32 to vector<8x128xf32>
    %211 = arith.addf %210, %209 : vector<8x128xf32>
    %212 = arith.divf %210, %211 : vector<8x128xf32>
    %213 = vector.extract_strided_slice %204 {offsets = [0, 128], sizes = [8, 128], strides = [1, 1]} : vector<8x384xf32> to vector<8x128xf32>
    %214 = vector.extract_strided_slice %202 {offsets = [0, 128], sizes = [8, 128], strides = [1, 1]} : vector<8x384xf32> to vector<8x128xf32>
    %215 = arith.addf %213, %214 : vector<8x128xf32>
    %216 = arith.negf %215 : vector<8x128xf32>
    %217 = math.exp %216 : vector<8x128xf32>
    %cst_48 = arith.constant 1.000000e+00 : f32
    %218 = vector.broadcast %cst_48 : f32 to vector<8x128xf32>
    %219 = arith.addf %218, %217 : vector<8x128xf32>
    %220 = arith.divf %218, %219 : vector<8x128xf32>
    %221 = vector.extract_strided_slice %204 {offsets = [0, 256], sizes = [8, 128], strides = [1, 1]} : vector<8x384xf32> to vector<8x128xf32>
    %222 = vector.extract_strided_slice %202 {offsets = [0, 256], sizes = [8, 128], strides = [1, 1]} : vector<8x384xf32> to vector<8x128xf32>
    %223 = arith.mulf %212, %222 : vector<8x128xf32>
    %224 = arith.addf %221, %223 : vector<8x128xf32>
    %225 = math.tanh %224 : vector<8x128xf32>
    %cst_49 = arith.constant 1.000000e+00 : f32
    %226 = vector.broadcast %cst_49 : f32 to vector<8x128xf32>
    %227 = arith.subf %226, %220 : vector<8x128xf32>
    %228 = arith.mulf %227, %225 : vector<8x128xf32>
    %229 = arith.mulf %220, %198 : vector<8x128xf32>
    %230 = arith.addf %228, %229 : vector<8x128xf32>
    %c0_50 = arith.constant 0 : index
    %c6 = arith.constant 6 : index
    %c0_51 = arith.constant 0 : index
    %231 = vector.load %arg4[%c0_50, %c6, %c0_51] : memref<8x8x128xf32, #tpu.memory_space<vmem>>, vector<8x1x128xf32>
    %232 = vector.shape_cast %231 : vector<8x1x128xf32> to vector<8x128xf32>
    %233 = vector.shape_cast %230 : vector<8x128xf32> to vector<8x1x128xf32>
    tpu.vector_store %arg4[%c0_50, %c6, %c0_51], %233 {strides = array<i32>} : memref<8x8x128xf32, #tpu.memory_space<vmem>>, vector<8x1x128xf32>,
    %cst_52 = arith.constant dense<0.000000e+00> : vector<8x384xf32>
    %234 = tpu.matmul %230, %8, %cst_52 {dimension_numbers = #tpu.dot_dimension_numbers<[1], [0], [0], [1], [0, 0, 1, 1], [], []>} : vector<8x128xf32>, vector<128x384xf32>, vector<8x384xf32> -> vector<8x384xf32>
    %235 = vector.extract_strided_slice %7 {offsets = [0, 7, 0], sizes = [8, 1, 384], strides = [1, 1, 1]} : vector<8x8x384xf32> to vector<8x1x384xf32>
    %236 = vector.shape_cast %235 : vector<8x1x384xf32> to vector<8x384xf32>
    %237 = vector.extract_strided_slice %236 {offsets = [0, 0], sizes = [8, 128], strides = [1, 1]} : vector<8x384xf32> to vector<8x128xf32>
    %238 = vector.extract_strided_slice %234 {offsets = [0, 0], sizes = [8, 128], strides = [1, 1]} : vector<8x384xf32> to vector<8x128xf32>
    %239 = arith.addf %237, %238 : vector<8x128xf32>
    %240 = arith.negf %239 : vector<8x128xf32>
    %241 = math.exp %240 : vector<8x128xf32>
    %cst_53 = arith.constant 1.000000e+00 : f32
    %242 = vector.broadcast %cst_53 : f32 to vector<8x128xf32>
    %243 = arith.addf %242, %241 : vector<8x128xf32>
    %244 = arith.divf %242, %243 : vector<8x128xf32>
    %245 = vector.extract_strided_slice %236 {offsets = [0, 128], sizes = [8, 128], strides = [1, 1]} : vector<8x384xf32> to vector<8x128xf32>
    %246 = vector.extract_strided_slice %234 {offsets = [0, 128], sizes = [8, 128], strides = [1, 1]} : vector<8x384xf32> to vector<8x128xf32>
    %247 = arith.addf %245, %246 : vector<8x128xf32>
    %248 = arith.negf %247 : vector<8x128xf32>
    %249 = math.exp %248 : vector<8x128xf32>
    %cst_54 = arith.constant 1.000000e+00 : f32
    %250 = vector.broadcast %cst_54 : f32 to vector<8x128xf32>
    %251 = arith.addf %250, %249 : vector<8x128xf32>
    %252 = arith.divf %250, %251 : vector<8x128xf32>
    %253 = vector.extract_strided_slice %236 {offsets = [0, 256], sizes = [8, 128], strides = [1, 1]} : vector<8x384xf32> to vector<8x128xf32>
    %254 = vector.extract_strided_slice %234 {offsets = [0, 256], sizes = [8, 128], strides = [1, 1]} : vector<8x384xf32> to vector<8x128xf32>
    %255 = arith.mulf %244, %254 : vector<8x128xf32>
    %256 = arith.addf %253, %255 : vector<8x128xf32>
    %257 = math.tanh %256 : vector<8x128xf32>
    %cst_55 = arith.constant 1.000000e+00 : f32
    %258 = vector.broadcast %cst_55 : f32 to vector<8x128xf32>
    %259 = arith.subf %258, %252 : vector<8x128xf32>
    %260 = arith.mulf %259, %257 : vector<8x128xf32>
    %261 = arith.mulf %252, %230 : vector<8x128xf32>
    %262 = arith.addf %260, %261 : vector<8x128xf32>
    %c0_56 = arith.constant 0 : index
    %c7 = arith.constant 7 : index
    %c0_57 = arith.constant 0 : index
    %263 = vector.load %arg4[%c0_56, %c7, %c0_57] : memref<8x8x128xf32, #tpu.memory_space<vmem>>, vector<8x1x128xf32>
    %264 = vector.shape_cast %263 : vector<8x1x128xf32> to vector<8x128xf32>
    %265 = vector.shape_cast %262 : vector<8x128xf32> to vector<8x1x128xf32>
    tpu.vector_store %arg4[%c0_56, %c7, %c0_57], %265 {strides = array<i32>} : memref<8x8x128xf32, #tpu.memory_space<vmem>>, vector<8x1x128xf32>,
    %c0_58 = arith.constant 0 : index
    %c0_59 = arith.constant 0 : index
    %266 = vector.load %arg5[%c0_58, %c0_59] : memref<8x128xf32, #tpu.memory_space<vmem>>, vector<8x128xf32>
    tpu.vector_store %arg5[%c0_58, %c0_59], %262 {strides = array<i32>} : memref<8x128xf32, #tpu.memory_space<vmem>>, vector<8x128xf32>,
    return
  }
  func.func @transform_0(%arg0: i32) -> (i32, i32, i32) {
    %c0_i32 = arith.constant 0 : i32
    %c0_i32_0 = arith.constant 0 : i32
    %c0_i32_1 = arith.constant 0 : i32
    return %c0_i32, %arg0, %c0_i32_0 : i32, i32, i32
  }
  func.func @transform_1(%arg0: i32) -> (i32, i32) {
    %c0_i32 = arith.constant 0 : i32
    %c0_i32_0 = arith.constant 0 : i32
    %c0_i32_1 = arith.constant 0 : i32
    return %c0_i32, %c0_i32_0 : i32, i32
  }
  func.func @transform_2(%arg0: i32) -> (i32, i32) {
    %c0_i32 = arith.constant 0 : i32
    %c0_i32_0 = arith.constant 0 : i32
    %c0_i32_1 = arith.constant 0 : i32
    return %c0_i32, %c0_i32_0 : i32, i32
  }
  func.func @transform_3(%arg0: i32) -> (i32, i32, i32) {
    %c0_i32 = arith.constant 0 : i32
    %c0_i32_0 = arith.constant 0 : i32
    %c0_i32_1 = arith.constant 0 : i32
    return %c0_i32, %arg0, %c0_i32_0 : i32, i32, i32
  }
}

</mosaic_0001>

<bundles_post_ra>
// kernel: tpu_custom_call.1
= control target key start
LH: loop header
LB: loop body
LE: loop exit
PB: predicated region body
PF: predicated region fallthrough
CT: control target
= control target key end

     0   :  { %8 = vsyncpa [#allocation4], 0  ;;  %s11366_s0 = inlined_call_operand.hbm [shape: f32[8,16,16], index: 0, kind: input, shape index: {}]   ;;  %s11367_s1 = inlined_call_operand.hbm [shape: f32[16,384], index: 1, kind: input, shape index: {}]   ;;  %s11368_s2 = inlined_call_operand.hbm [shape: f32[128,384], index: 2, kind: input, shape index: {}]   ;;  %s11369_s3 = inlined_call_operand.hbm [shape: f32[8,16,128], index: 3, kind: output, shape index: {}]  }
   0x1   :  { %10 = vsyncpa [#allocation4 + $0x1], 0 }
   0x2   :  { %11 = vsyncpa [#allocation7], 0 }
   0x3   :  { %12 = vsyncpa [#allocation5], 0 }
   0x4   :  { %14 = vsyncpa [#allocation5 + $0x1], 0  ;;  %s5991_s12 = smov 0   ;;  %s5993_s13 = smov 0  }
   0x5   :  { %s5995_s14 = smov 0   ;;  %s5997_s15 = smov 0  }
   0x6 LB: > { %s6012_s16 = sadd.s32 4294967295, %s5958_s15   ;;  %s4796_s17 = sadd.s32 4294967294, %s5958_s15   ;;  %s5958_s15 = sphi %s5997_s15, %s12371_s15   ;;  %s5954_s14 = sphi %s5995_s14, %s12370_s14   ;;  %s5950_s13 = sphi %s5993_s13, %s12369_s13   ;;  %s5946_s12 = sphi %s5991_s12, %s12368_s12  }
   0x7   : > { %p40_p0 = scmp.ne.s32.totalorder %s5950_s13, %s5946_s12  ;;  %p41_p1 = scmp.eq.s32.totalorder %s6012_s16, 0 }
   0x8   : > { %p106_p2 = scmp.eq.s32.totalorder %s6012_s16, 1  ;;  %p112_p3 = scmp.eq.s32.totalorder %s4796_s17, 1 }
   0x9   : > { %p6021_p4 = por %p41_p1, %p40_p0  ;;  %p4797_p5 = scmp.ge.s32.totalorder %s5958_s15, 1 }
   0xa   : > { %p6026_p6 = por %p112_p3, %p40_p0  ;;  %p119_p7 = scmp.lt.s32.totalorder %s5958_s15, 3 }
   0xb   : > { %s130_s22 = sshll.u32 %s11367_s1, 4  ;;  %s5960_s24 = smov [#allocation6]   ;;  %s131_s22 = int_to_ptr.hbm [resolvable:$true] %s130_s22 }
   0xc   : > { %p6035_p9 = pnand %p4797_p5, %p119_p7  ;;  %s132_s25 = sshll.u32 %s5960_s24, 4  ;;  %s133_s25 = int_to_ptr.vmem [resolvable:$true] %s132_s25 }
   0xd   : > { %s144_s28 = sshll.u32 %s11368_s2, 4  ;;  %s5961_s29 = smov 384   ;;  %s145_s28 = int_to_ptr.hbm [resolvable:$true] %s144_s28 }
   0xe   : > { %p4981_p10 = pneg %p6035_p9  ;;  %s5962_s30 = smov 24  }
   0xf   : > { %s5963_s4 = smov [#allocation8]   ;;  %s6048_s6 = sadd.s32 1, %s5958_s15  }
  0x10   : > { %p4982_p11 = pnand %p4981_p10, %p41_p1  ;;  %s146_s5 = sshll.u32 %s5963_s4, 4  ;;  %s147_s5 = int_to_ptr.vmem [resolvable:$true] %s146_s5 }
  0x11   : > { %s27_s7 = sadd.s32 1, %s5954_s14  ;;  %s24_s8 = ssub.s32 %s5958_s15, %s6048_s6 }
  0x12   : > { %4984 = dma.hbm_to_vmem [thread:$0]  (!%p4982_p11), %s131_s22, 768, %s133_s25, [#allocation7], %s5961_s29, %s5961_s29, %s5962_s30  }
  0x13   : > { %4987 = dma.hbm_to_vmem [thread:$0]  (!%p4982_p11), %s145_s28, 6144, %s147_s5, [#allocation7], %s5961_s29, %s5961_s29, %s5962_s30  }
  0x14   : > { %p34_p13 = scmp.ne.s32.totalorder %s5954_s14, %s5950_s13  ;;  %p25_p0 = scmp.eq.s32.totalorder %s24_s8, 0 }
  0x15   : > { %p35_p3 = scmp.eq.s32.totalorder %s5958_s15, 0  ;;  %p4998_p7 = scmp.lt.s32.totalorder %s5958_s15, 2 }
  0x16   : > { %p6058_p5 = por %p106_p2, %p34_p13  ;;  %s160_s11 = sand.u32 1, %s5954_s14  }
  0x17   : > { %s6064_s10 = scalar_select %p25_p0, %s5954_s14, %s27_s7  }
  0x18   : > { %p36_p10 = por %p35_p3, %p34_p13  ;;  %s4801_s17 = sshll.u32 %s160_s11, 6 }
  0x19   : > { %s4802_s20 = sshll.u32 %s5958_s15, 3  ;;  %s164_s25 = scalar_lea.vmem [#allocation3], %s4801_s17 }
  0x1a   : > { %s168_s24 = scalar_lea.hbm %s11366_s0, %s4802_s20  ;;  %s171_s26 = sshll.u32 %s164_s25, 4  ;;  %s172_s26 = int_to_ptr.vmem [resolvable:$true] %s171_s26 }
  0x1b   : > { %s169_s27 = sshll.u32 %s168_s24, 4  ;;  %p6071_p2 = pnand %p4998_p7, %p36_p10  ;;  %s170_s27 = int_to_ptr.hbm [resolvable:$true] %s169_s27 }
  0x1c   : > { %s161_s29 = scalar_lea.sflag [#allocation4], %s160_s11  ;;  %s5858_s30 = sshra.s32 %s170_s27, 4  ;;  %s5859_s30 = int_to_ptr.hbm [resolvable:$true] %s5858_s30 }
  0x1d   : > { %s5860_s4 = scalar_lea.hbm %s5859_s30, 64  ;;  %p5862_p13 = pneg %p6071_p2 }
  0x1e   : > { %p5861_p11 = scmp.ne.s32.totalorder %s5859_s30, %s5860_s4  ;;  %s5865_s8 = scalar_lea.hbm %s11366_s0, 128 }
  0x1f   : > { %p5866_p7 = scmp.lt.s32.totalorder %s5859_s30, %s11366_s0  ;;  %p5867_p10 = scmp.lt.s32.totalorder %s5865_s8, %s5860_s4 }
  0x20   : > { %p5863_p0 = pnand %p5862_p13, %p5861_p11 }
  0x21   : > { %p5868_p12 = por %p5867_p10, %p5866_p7 }
  0x22   : > { %p5864_p3 = pneg %p5863_p0 }
  0x24   : > { %p5869_p8 = pnand %p5868_p12, %p5864_p3 }
  0x26   : > { %5872 = shalt.err (!%p5869_p8)
}
  0x27   : > { %s5964_s11 = smov 256   ;;  %s5965_s21 = smov 128  }
  0x28   : > { %s5966_s22 = smov 8   ;;  %183 = sbr.rel (%p6035_p9) target bundleno = 1917 (0x77d), region = 32 }
  0x29   : > { %4991 = dma.hbm_to_vmem [thread:$0]  (!%p6071_p2), %s170_s27, 1024, %s172_s26, %s161_s29, %s5964_s11, %s5965_s21, %s5966_s22  }
  0x2d   : > { %s6088_s24 = sand.u32 1, %s5950_s13  }
  0x2e   : > { %s4804_s25 = sshll.u32 %s6088_s24, 6  ;;  %s186_s30 = scalar_lea.sflag [#allocation4], %s6088_s24 }
  0x2f   : > { %s6092_s4 = scalar_lea.vmem [#allocation3], %s4804_s25 }
  0x30   : > { %5933 = dma.done.wait (%p6021_p4), %s186_s30, 1024  }
  0x31   : > { %5935 = vsyncadd (%p6021_p4), %s186_s30, 4294966272 }
  0x32   : > { %5937 = dma.done.wait (%p41_p1), [#allocation7], 6912  }
  0x33   : > { %5939 = vsyncadd (%p41_p1), [#allocation7], 4294960384  ;;  %s6102_s23 = scalar_lea.vmem [#allocation9], %s4804_s25  ;;  %p11547_p8 = scmp.ne.s32.totalorder %s6012_s16, 0 }
  0x35   : > { %226 = sbr.rel (%p11547_p8) target bundleno = 60 (0x3c), region = 48 }
  0x3a   : > { %v5967_v0 = vmov 0.0  }
  0x3b   : > { %227 = vst [vmem:[#allocation2] sm:$0xff] %v5967_v0 }
  0x3c PF: > { %v239_v1 = vld [vmem:[#allocation6 + $0x18] sm:$0xff]  ;;  %v236_v3 = vld [vmem:[#allocation6] sm:$0xff]  ;;  %vm242_vm0 = vcmask 130048   ;;  %v6117_v7 = vld [vmem:[#allocation8 + $0x138] sm:$0xff]  ;;  %s4962_s18 = sshll.u32 %s6012_s16, 3  ;;  %s4701_s28 = sshll.u32 %s6102_s23, 4  ;;  %s4702_s28 = int_to_ptr.vmem [resolvable:$true] %s4701_s28 }
  0x3d   : > { %v6106_v2 = vld [vmem:[#allocation8 + $0x168] sm:$0xff]  ;;  %281 = vmatpush.msra.mxu0 %v239_v1  ;;  %4965 = vmatpush.msra.mxu2 %v239_v1  ;;  %v6108_v4 = vld [vmem:[#allocation8 + $0x150] sm:$0xff]  ;;  %v6124_v9 = vld [vmem:[#allocation8 + $0x120] sm:$0xff]  ;;  %s4700_s27 = scalar_lea.hbm %s11369_s3, %s4962_s18  ;;  %s4690_s5 = scalar_lea.sflag [#allocation5], %s6088_s24 }
  0x3e   : > { %v6111_v5 = vld [vmem:[%s6092_s4] sm:$0xff]  ;;  %439 = vmatpush.msra.mxu3 %v6106_v2  ;;  %v6115_v6 = vld [vmem:[%s6092_s4 + $0x38] sm:$0xff]  ;;  %v237_v10 = vld [vmem:[#allocation6 + $0x8] sm:$0xff]  ;;  %s4703_s29 = sshll.u32 %s4700_s27, 4  ;;  %s5908_s11 = scalar_lea.hbm %s11369_s3, 128  ;;  %s4704_s29 = int_to_ptr.hbm [resolvable:$true] %s4703_s29 }
  0x3f   : > { %282 = vmatpush.msra.mxu0 %v236_v3  ;;  %4966 = vmatpush.msra.mxu2 %v236_v3  ;;  %v240_v8 = vld [vmem:[#allocation6 + $0x20] sm:$0xff]  ;;  %v241_v11 = vld [vmem:[#allocation6 + $0x28] sm:$0xff]  ;;  %v6127_v12 = vld [vmem:[#allocation8 + $0x108] sm:$0xff]  ;;  %s5902_s7 = sshra.s32 %s4704_s29, 4  ;;  %s5903_s7 = int_to_ptr.hbm [resolvable:$true] %s5902_s7 }
  0x40   : > { %440 = vmatpush.msra.mxu3 %v6108_v4  ;;  %4809 = vmatmul.msk.f32.vlgmr.msra.gmra.mxu0 %vm242_vm0, %v6111_v5  ;;  %v238_v13 = vld [vmem:[#allocation6 + $0x10] sm:$0xff]  ;;  %v6130_v14 = vld [vmem:[#allocation8 + $0xf0] sm:$0xff]  ;;  %v6133_v15 = vld [vmem:[%s6092_s4 + $0x8] sm:$0xff]  ;;  %s5904_s8 = scalar_lea.hbm %s5903_s7, 64  ;;  %p5909_p12 = scmp.lt.s32.totalorder %s5903_s7, %s11369_s3 }
  0x41   : > { %4816 = vmatmul.msk.f32.vlgmr.msra.gmra.mxu2 %vm242_vm0, %v6115_v6  ;;  %322 = vmatpush.msra.mxu1 %v240_v8  ;;  %v6138_v16 = vld [vmem:[#allocation8 + $0x178] sm:$0xff]  ;;  %v6144_v18 = vld [vmem:[#allocation8 + $0x160] sm:$0xff]  ;;  %v6149_v19 = vld [vmem:[#allocation8 + $0x148] sm:$0xff]  ;;  %p5905_p1 = scmp.ne.s32.totalorder %s5903_s7, %s5904_s8  ;;  %p5910_p2 = scmp.lt.s32.totalorder %s5908_s11, %s5904_s8 }
  0x42   : > { %441 = vmatpush.msra.mxu3 %v6117_v7  ;;  %4967 = vmatpush.msrb.mxu2 %v240_v8  ;;  %v6141_v17 = vld [vmem:[#allocation8 + $0xd8] sm:$0xff]  ;;  %v6153_v20 = vld [vmem:[#allocation8 + $0xc0] sm:$0xff]  ;;  %v6155_v21 = vld [vmem:[#allocation8 + $0x170] sm:$0xff] }
  0x43   : > { %323 = vmatpush.msra.mxu1 %v237_v10  ;;  %479 = vmatpush.msrb.mxu0 %v6138_v16  ;;  %v6159_v22 = vld [vmem:[#allocation8 + $0x130] sm:$0xff]  ;;  %v6162_v23 = vld [vmem:[#allocation8 + $0xa8] sm:$0xff]  ;;  %v6164_v24 = vld [vmem:[#allocation8 + $0x158] sm:$0xff]  ;;  %p5906_p4 = pnand %p5905_p1, %p6058_p5  ;;  %p5911_p11 = por %p5910_p2, %p5909_p12 }
  0x44   : > { %442 = vmatpush.msra.mxu3 %v6124_v9  ;;  %4968 = vmatpush.msrb.mxu2 %v237_v10  ;;  %v6169_v25 = vld [vmem:[#allocation8 + $0x118] sm:$0xff]  ;;  %v6172_v26 = vld [vmem:[#allocation8 + $0x90] sm:$0xff]  ;;  %v6175_v27 = vld [vmem:[%s6092_s4 + $0x10] sm:$0xff] }
  0x45   : > { %4817 = vmatmul.msk.f32.vlgmr.msra.gmra.mxu1 %vm242_vm0, %v6111_v5  ;;  %480 = vmatpush.msrb.mxu0 %v6144_v18  ;;  %v6179_v28 = vld [vmem:[#allocation8 + $0x140] sm:$0xff]  ;;  %v6186_v30 = vld [vmem:[#allocation8 + $0x78] sm:$0xff]  ;;  %v6193_v31 = vld [vmem:[#allocation8 + $0xe8] sm:$0xff]  ;;  %p5907_p9 = pneg %p5906_p4 }
  0x46   : > { %363 = vmatpush.msra.mxu2 %v241_v11  ;;  %443 = vmatpush.msra.mxu3 %v6127_v12  ;;  %v6183_v29 = vld [vmem:[#allocation8 + $0x100] sm:$0xff]  ;;  %v6199_v33 = vld [vmem:[#allocation8 + $0x128] sm:$0xff]  ;;  %v6203_v34 = vld [vmem:[#allocation8 + $0xd0] sm:$0xff] }
  0x47   : > { %977 = vmatpush.msrb.mxu1 %v6106_v2  ;;  %481 = vmatpush.msrb.mxu0 %v6149_v19  ;;  %v6197_v32 = vld [vmem:[#allocation8 + $0x60] sm:$0xff]  ;;  %v6206_v35 = vld [vmem:[#allocation8 + $0x48] sm:$0xff]  ;;  %v6208_v36 = vld [vmem:[#allocation8 + $0x110] sm:$0xff]  ;;  %p5912_p13 = pnand %p5911_p11, %p5907_p9 }
  0x48   : > { %364 = vmatpush.msra.mxu2 %v238_v13  ;;  %444 = vmatpush.msra.mxu3 %v6130_v14  ;;  %v6213_v37 = vld [vmem:[#allocation8 + $0xb8] sm:$0xff]  ;;  %v6216_v38 = vld [vmem:[#allocation8 + $0x30] sm:$0xff]  ;;  %v231_v39 = vld [vmem:[%s6092_s4 + $0x18] sm:$0xff] }
  0x49   : > { %4810 = vmatmul.msk.f32.gmra.mxu0 %vm242_vm0, %v6133_v15  ;;  %4824 = vmatmul.msk.f32.vlgmr.msrb.gmra.mxu2 %vm242_vm0, %v6115_v6  ;;  %v6223_v40 = vld [vmem:[#allocation8 + $0xf8] sm:$0xff]  ;;  %v6225_v41 = vld [vmem:[#allocation8 + $0xa0] sm:$0xff]  ;;  %v6234_v43 = vld [vmem:[#allocation8 + $0x88] sm:$0xff] }
  0x4a   : > { %445 = vmatpush.msra.mxu3 %v6141_v17  ;;  %997 = vmatpush.msrb.mxu2 %v6155_v21  ;;  %v6228_v42 = vld [vmem:[#allocation8 + $0x18] sm:$0xff]  ;;  %v6238_v44 = vld [vmem:[#allocation8] sm:$0xff]  ;;  %v6242_v45 = vld [vmem:[#allocation2] sm:$0xff] }
  0x4b   : > { %978 = vmatpush.msrb.mxu1 %v6108_v4  ;;  %482 = vmatpush.msrb.mxu0 %v6159_v22  ;;  %v6244_v46 = vld [vmem:[#allocation8 + $0xe0] sm:$0xff]  ;;  %v6248_v47 = vld [vmem:[#allocation8 + $0x70] sm:$0xff]  ;;  %v6257_v49 = vld [vmem:[#allocation8 + $0xc8] sm:$0xff] }
  0x4c   : > { %446 = vmatpush.msra.mxu3 %v6153_v20  ;;  %998 = vmatpush.msrb.mxu2 %v6164_v24  ;;  %v232_v48 = vld [vmem:[%s6092_s4 + $0x20] sm:$0xff]  ;;  %v6260_v50 = vld [vmem:[#allocation8 + $0x58] sm:$0xff]  ;;  %v6266_v51 = vld [vmem:[#allocation8 + $0x40] sm:$0xff] }
  0x4d   : > { %4818 = vmatmul.msk.f32.gmra.mxu1 %vm242_vm0, %v6133_v15  ;;  %483 = vmatpush.msrb.mxu0 %v6169_v25  ;;  %v6270_v52 = vld [vmem:[#allocation8 + $0xb0] sm:$0xff]  ;;  %v6274_v53 = vld [vmem:[#allocation8 + $0x28] sm:$0xff]  ;;  %v6277_v54 = vld [vmem:[#allocation8 + $0x98] sm:$0xff] }
  0x4e   : > { %447 = vmatpush.msra.mxu3 %v6162_v23  ;;  %999 = vmatpush.msrb.mxu2 %v6179_v28  ;;  %v6282_v55 = vld [vmem:[#allocation8 + $0x10] sm:$0xff]  ;;  %v233_v56 = vld [vmem:[%s6092_s4 + $0x28] sm:$0xff]  ;;  %v6289_v57 = vld [vmem:[#allocation8 + $0x80] sm:$0xff] }
  0x4f   : > { %979 = vmatpush.msrb.mxu1 %v6117_v7  ;;  %484 = vmatpush.msrb.mxu0 %v6183_v29  ;;  %v6297_v58 = vld [vmem:[#allocation8 + $0x68] sm:$0xff]  ;;  %v6302_v59 = vld [vmem:[#allocation8 + $0x50] sm:$0xff]  ;;  %v234_v60 = vld [vmem:[%s6092_s4 + $0x30] sm:$0xff] }
  0x50   : > { %448 = vmatpush.msra.mxu3 %v6172_v26  ;;  %1000 = vmatpush.msrb.mxu2 %v6199_v33  ;;  %v6312_v61 = vld [vmem:[#allocation8 + $0x38] sm:$0xff]  ;;  %v6320_v62 = vld [vmem:[#allocation8 + $0x20] sm:$0xff]  ;;  %v6325_v63 = vld [vmem:[#allocation8 + $0x8] sm:$0xff] }
  0x51   : > { %4811 = vmatmul.msk.f32.gmra.mxu0 %vm242_vm0, %v6175_v27  ;;  %4825 = vmatmul.msk.f32.vlgmr.msra.gmra.mxu2 %vm242_vm0, %v6111_v5 }
  0x52   : > { %449 = vmatpush.msra.mxu3 %v6186_v30  ;;  %485 = vmatpush.msrb.mxu0 %v6193_v31 }
  0x53   : > { %980 = vmatpush.msrb.mxu1 %v6124_v9  ;;  %1001 = vmatpush.msrb.mxu2 %v6208_v36 }
  0x54   : > { %450 = vmatpush.msra.mxu3 %v6197_v32  ;;  %486 = vmatpush.msrb.mxu0 %v6203_v34 }
  0x55   : > { %4819 = vmatmul.msk.f32.gmra.mxu1 %vm242_vm0, %v6175_v27  ;;  %1002 = vmatpush.msrb.mxu2 %v6223_v40 }
  0x56   : > { %451 = vmatpush.msra.mxu3 %v6206_v35  ;;  %981 = vmatpush.msrb.mxu1 %v6127_v12 }
  0x57   : > { %487 = vmatpush.msrb.mxu0 %v6213_v37  ;;  %1003 = vmatpush.msrb.mxu2 %v6244_v46 }
  0x58   : > { %452 = vmatpush.msra.mxu3 %v6216_v38  ;;  %982 = vmatpush.msrb.mxu1 %v6130_v14 }
  0x59   : > { %4812 = vmatmul.msk.f32.gmra.mxu0 %vm242_vm0, %v231_v39  ;;  %4826 = vmatmul.msk.f32.gmra.mxu2 %vm242_vm0, %v6133_v15 }
  0x5a   : > { %488 = vmatpush.msrb.mxu0 %v6225_v41  ;;  %453 = vmatpush.msra.mxu3 %v6228_v42 }
  0x5b   : > { %983 = vmatpush.msrb.mxu1 %v6141_v17  ;;  %1004 = vmatpush.msrb.mxu2 %v6257_v49 }
  0x5c   : > { %489 = vmatpush.msrb.mxu0 %v6234_v43  ;;  %454 = vmatpush.msra.mxu3 %v6238_v44 }
  0x5d   : > { %455 = vmatmul.f32.vlgmr.msra.gmra.mxu3 %v6242_v45  ;;  %4820 = vmatmul.msk.f32.gmra.mxu1 %vm242_vm0, %v231_v39 }
  0x5e   : > { %459 = vmatpush.msrb.mxu3 %v6155_v21  ;;  %490 = vmatpush.msrb.mxu0 %v6248_v47 }
  0x5f   : > { %984 = vmatpush.msrb.mxu1 %v6153_v20  ;;  %1005 = vmatpush.msrb.mxu2 %v6270_v52 }
  0x60   : > { %460 = vmatpush.msrb.mxu3 %v6164_v24  ;;  %491 = vmatpush.msrb.mxu0 %v6260_v50 }
  0x61   : > { %4813 = vmatmul.msk.f32.gmra.mxu0 %vm242_vm0, %v232_v48  ;;  %4827 = vmatmul.msk.f32.gmra.mxu2 %vm242_vm0, %v6175_v27 }
  0x62   : > { %461 = vmatpush.msrb.mxu3 %v6179_v28  ;;  %492 = vmatpush.msrb.mxu0 %v6266_v51 }
  0x63   : > { %985 = vmatpush.msrb.mxu1 %v6162_v23  ;;  %1006 = vmatpush.msrb.mxu2 %v6277_v54 }
  0x64   : > { %462 = vmatpush.msrb.mxu3 %v6199_v33  ;;  %493 = vmatpush.msrb.mxu0 %v6274_v53 }
  0x65   : > { %4821 = vmatmul.msk.f32.gmra.mxu1 %vm242_vm0, %v232_v48  ;;  %1007 = vmatpush.msrb.mxu2 %v6289_v57 }
  0x66   : > { %463 = vmatpush.msrb.mxu3 %v6208_v36  ;;  %986 = vmatpush.msrb.mxu1 %v6172_v26 }
  0x67   : > { %494 = vmatpush.msrb.mxu0 %v6282_v55  ;;  %1008 = vmatpush.msrb.mxu2 %v6297_v58 }
  0x68   : > { %464 = vmatpush.msrb.mxu3 %v6223_v40  ;;  %987 = vmatpush.msrb.mxu1 %v6186_v30 }
  0x69   : > { %4814 = vmatmul.msk.f32.gmra.mxu0 %vm242_vm0, %v233_v56  ;;  %4828 = vmatmul.msk.f32.gmra.mxu2 %vm242_vm0, %v231_v39 }
  0x6a   : > { %465 = vmatpush.msrb.mxu3 %v6244_v46  ;;  %988 = vmatpush.msrb.mxu1 %v6197_v32 }
  0x6b   : > { %1507 = vmatpush.msra.mxu0 %v6106_v2  ;;  %1009 = vmatpush.msrb.mxu2 %v6302_v59 }
  0x6c   : > { %466 = vmatpush.msrb.mxu3 %v6257_v49  ;;  %989 = vmatpush.msrb.mxu1 %v6206_v35 }
  0x6d   : > { %4822 = vmatmul.msk.f32.gmra.mxu1 %vm242_vm0, %v233_v56  ;;  %1508 = vmatpush.msra.mxu0 %v6108_v4 }
  0x6e   : > { %467 = vmatpush.msrb.mxu3 %v6270_v52  ;;  %1010 = vmatpush.msrb.mxu2 %v6312_v61 }
  0x6f   : > { %1509 = vmatpush.msra.mxu0 %v6117_v7  ;;  %990 = vmatpush.msrb.mxu1 %v6216_v38 }
  0x70   : > { %468 = vmatpush.msrb.mxu3 %v6277_v54  ;;  %1011 = vmatpush.msrb.mxu2 %v6320_v62 }
  0x71   : > { %4815 = vmatmul.msk.f32.gmra.mxu0 %vm242_vm0, %v234_v60  ;;  %4829 = vmatmul.msk.f32.gmra.mxu2 %vm242_vm0, %v232_v48 }
  0x72   : > { %469 = vmatpush.msrb.mxu3 %v6289_v57  ;;  %991 = vmatpush.msrb.mxu1 %v6228_v42 }
  0x73   : > { %1510 = vmatpush.msra.mxu0 %v6124_v9  ;;  %1012 = vmatpush.msrb.mxu2 %v6325_v63 }
  0x74   : > { %470 = vmatpush.msrb.mxu3 %v6297_v58  ;;  %992 = vmatpush.msrb.mxu1 %v6238_v44 }
  0x75   : > { %4823 = vmatmul.msk.f32.gmra.mxu1 %vm242_vm0, %v234_v60  ;;  %1547 = vmatpush.msra.mxu2 %v6138_v16 }
  0x76   : > { %471 = vmatpush.msrb.mxu3 %v6302_v59  ;;  %1527 = vmatpush.msra.mxu1 %v6155_v21 }
  0x77   : > { %1548 = vmatpush.msra.mxu2 %v6144_v18  ;;  %1511 = vmatpush.msra.mxu0 %v6127_v12 }
  0x78   : > { %472 = vmatpush.msrb.mxu3 %v6312_v61  ;;  %1528 = vmatpush.msra.mxu1 %v6164_v24 }
  0x79   : > { %495 = vmatmul.f32.vlgmr.msrb.gmra.mxu0 %v6242_v45  ;;  %4830 = vmatmul.msk.f32.gmra.mxu2 %vm242_vm0, %v233_v56 }
  0x7a   : > { %473 = vmatpush.msrb.mxu3 %v6320_v62  ;;  %1549 = vmatpush.msra.mxu2 %v6149_v19 }
  0x7b   : > { %1529 = vmatpush.msra.mxu1 %v6179_v28  ;;  %1512 = vmatpush.msra.mxu0 %v6130_v14 }
  0x7c   : > { %474 = vmatpush.msrb.mxu3 %v6325_v63  ;;  %1550 = vmatpush.msra.mxu2 %v6159_v22 }
  0x7d   : > { %475 = vmatmul.f32.vlgmr.msrb.gmra.mxu3 %v6242_v45  ;;  %1530 = vmatpush.msra.mxu1 %v6199_v33 }
  0x7e   : > { %1017 = vmatpush.msra.mxu3 %v6138_v16  ;;  %1551 = vmatpush.msra.mxu2 %v6169_v25 }
  0x7f   : > { %1531 = vmatpush.msra.mxu1 %v6208_v36  ;;  %1513 = vmatpush.msra.mxu0 %v6141_v17 }
  0x80   : > { %1018 = vmatpush.msra.mxu3 %v6144_v18  ;;  %1552 = vmatpush.msra.mxu2 %v6183_v29 }
  0x81   : > { %4831 = vmatmul.msk.f32.gmra.mxu2 %vm242_vm0, %v234_v60  ;;  %1532 = vmatpush.msra.mxu1 %v6223_v40 }
  0x82   : > { %1019 = vmatpush.msra.mxu3 %v6149_v19  ;;  %1553 = vmatpush.msra.mxu2 %v6193_v31 }
  0x83   : > { %1533 = vmatpush.msra.mxu1 %v6244_v46  ;;  %1514 = vmatpush.msra.mxu0 %v6153_v20 }
  0x84   : > { %1020 = vmatpush.msra.mxu3 %v6159_v22  ;;  %1554 = vmatpush.msra.mxu2 %v6203_v34 }
  0x85   : > { %1534 = vmatpush.msra.mxu1 %v6257_v49  ;;  %1515 = vmatpush.msra.mxu0 %v6162_v23 }
  0x86   : > { %1021 = vmatpush.msra.mxu3 %v6169_v25  ;;  %1555 = vmatpush.msra.mxu2 %v6213_v37 }
  0x87   : > { %1535 = vmatpush.msra.mxu1 %v6270_v52  ;;  %1516 = vmatpush.msra.mxu0 %v6172_v26 }
  0x88   : > { %1022 = vmatpush.msra.mxu3 %v6183_v29  ;;  %1556 = vmatpush.msra.mxu2 %v6225_v41 }
  0x89   : > { %4832 = vmatmul.msk.f32.gmra.mxu2 %vm242_vm0, %v6115_v6  ;;  %1536 = vmatpush.msra.mxu1 %v6277_v54 }
  0x8a   : > { %1023 = vmatpush.msra.mxu3 %v6193_v31  ;;  %1517 = vmatpush.msra.mxu0 %v6186_v30 }
  0x8b   : > { %1537 = vmatpush.msra.mxu1 %v6289_v57  ;;  %1557 = vmatpush.msra.mxu2 %v6234_v43 }
  0x8c   : > { %1024 = vmatpush.msra.mxu3 %v6203_v34  ;;  %1518 = vmatpush.msra.mxu0 %v6197_v32 }
  0x8d   : > { %1538 = vmatpush.msra.mxu1 %v6297_v58  ;;  %1558 = vmatpush.msra.mxu2 %v6248_v47 }
  0x8e   : > { %1025 = vmatpush.msra.mxu3 %v6213_v37  ;;  %1519 = vmatpush.msra.mxu0 %v6206_v35 }
  0x8f   : > { %1539 = vmatpush.msra.mxu1 %v6302_v59  ;;  %1559 = vmatpush.msra.mxu2 %v6260_v50 }
  0x90   : > { %1026 = vmatpush.msra.mxu3 %v6225_v41  ;;  %1520 = vmatpush.msra.mxu0 %v6216_v38 }
  0x91   : > { %1540 = vmatpush.msra.mxu1 %v6312_v61  ;;  %1560 = vmatpush.msra.mxu2 %v6266_v51 }
  0x92   : > { %1027 = vmatpush.msra.mxu3 %v6234_v43  ;;  %1521 = vmatpush.msra.mxu0 %v6228_v42 }
  0x93   : > { %1541 = vmatpush.msra.mxu1 %v6320_v62  ;;  %1561 = vmatpush.msra.mxu2 %v6274_v53 }
  0x94   : > { %1028 = vmatpush.msra.mxu3 %v6248_v47  ;;  %1522 = vmatpush.msra.mxu0 %v6238_v44 }
  0x95   : > { %1542 = vmatpush.msra.mxu1 %v6325_v63  ;;  %1562 = vmatpush.msra.mxu2 %v6282_v55 }
  0x96   : > { %1029 = vmatpush.msra.mxu3 %v6260_v50  ;;  %2057 = vmatpush.msrb.mxu0 %v6155_v21 }
  0x98   : > { %1030 = vmatpush.msra.mxu3 %v6266_v51  ;;  %2058 = vmatpush.msrb.mxu0 %v6164_v24 }
  0x9a   : > { %1031 = vmatpush.msra.mxu3 %v6274_v53  ;;  %2059 = vmatpush.msrb.mxu0 %v6179_v28 }
  0x9c   : > { %1032 = vmatpush.msra.mxu3 %v6282_v55  ;;  %2060 = vmatpush.msrb.mxu0 %v6199_v33 }
  0x9e   : > { %2037 = vmatpush.msrb.mxu3 %v6106_v2  ;;  %2061 = vmatpush.msrb.mxu0 %v6208_v36 }
  0xa0   : > { %2038 = vmatpush.msrb.mxu3 %v6108_v4  ;;  %2062 = vmatpush.msrb.mxu0 %v6223_v40 }
  0xa2   : > { %2039 = vmatpush.msrb.mxu3 %v6117_v7  ;;  %2063 = vmatpush.msrb.mxu0 %v6244_v46 }
  0xa4   : > { %2040 = vmatpush.msrb.mxu3 %v6124_v9  ;;  %2064 = vmatpush.msrb.mxu0 %v6257_v49 }
  0xa6   : > { %2041 = vmatpush.msrb.mxu3 %v6127_v12  ;;  %2065 = vmatpush.msrb.mxu0 %v6270_v52 }
  0xa8   : > { %2042 = vmatpush.msrb.mxu3 %v6130_v14  ;;  %2066 = vmatpush.msrb.mxu0 %v6277_v54 }
  0xaa   : > { %2043 = vmatpush.msrb.mxu3 %v6141_v17  ;;  %2067 = vmatpush.msrb.mxu0 %v6289_v57 }
  0xac   : > { %2044 = vmatpush.msrb.mxu3 %v6153_v20  ;;  %2068 = vmatpush.msrb.mxu0 %v6297_v58 }
  0xae   : > { %2045 = vmatpush.msrb.mxu3 %v6162_v23  ;;  %2069 = vmatpush.msrb.mxu0 %v6302_v59 }
  0xb0   : > { %2046 = vmatpush.msrb.mxu3 %v6172_v26  ;;  %2070 = vmatpush.msrb.mxu0 %v6312_v61 }
  0xb2   : > { %2047 = vmatpush.msrb.mxu3 %v6186_v30  ;;  %2071 = vmatpush.msrb.mxu0 %v6320_v62 }
  0xb4   : > { %2048 = vmatpush.msrb.mxu3 %v6197_v32  ;;  %2072 = vmatpush.msrb.mxu0 %v6325_v63 }
  0xb6   : > { %2049 = vmatpush.msrb.mxu3 %v6206_v35 }
  0xb8   : > { %2050 = vmatpush.msrb.mxu3 %v6216_v38 }
  0xba   : > { %2051 = vmatpush.msrb.mxu3 %v6228_v42 }
  0xbc   : > { %2052 = vmatpush.msrb.mxu3 %v6238_v44 }
  0xbd   : > { %v6435_v0 = vpop.f32.mrf.mxu0 }
  0xbe   : > { %11548 = vst [vmem:[#allocation13_spill] sm:$0xff] %v6435_v0 }
  0xc2   : > { %v6445_v5 = vpop.f32.mrf.mxu1 }
  0xc3   : > { %11553 = vst [vmem:[#allocation18_spill] sm:$0xff] %v6445_v5 }
  0xc4   : > { %v6437_v1 = vpop.f32.mrf.mxu2 }
  0xc5   : > { %11549 = vst [vmem:[#allocation14_spill] sm:$0xff] %v6437_v1 }
  0xc6   : > { %v6439_v2 = vpop.f32.mrf.mxu0 }
  0xc7   : > { %11550 = vst [vmem:[#allocation15_spill] sm:$0xff] %v6439_v2 }
  0xca   : > { %v6451_v8 = vpop.f32.mrf.mxu1 }
  0xcb   : > { %11555 = vst [vmem:[#allocation20_spill] sm:$0xff] %v6451_v8 }
  0xcc   : > { %v6441_v3 = vpop.f32.mrf.mxu2 }
  0xcd   : > { %11551 = vst [vmem:[#allocation16_spill] sm:$0xff] %v6441_v3 }
  0xce   : > { %v6443_v4 = vpop.f32.mrf.mxu0 }
  0xcf   : > { %11552 = vst [vmem:[#allocation17_spill] sm:$0xff] %v6443_v4 }
  0xd2   : > { %v6463_v25 = vpop.f32.mrf.mxu1 }
  0xd3   : > { %11557 = vst [vmem:[#allocation22_spill] sm:$0xff] %v6463_v25 }
  0xd4   : > { %v6449_v7 = vpop.f32.mrf.mxu2 }
  0xd6   : > { %v6447_v6 = vpop.f32.mrf.mxu0 }
  0xd7   : > { %11554 = vst [vmem:[#allocation19_spill] sm:$0xff] %v6447_v6 }
  0xda   : > { %v6476_v42 = vpop.f32.mrf.mxu1 }
  0xdb   : > { %11561 = vst [vmem:[#allocation26_spill] sm:$0xff] %v6476_v42 }
  0xdc   : > { %v6455_v11 = vpop.f32.mrf.mxu2 }
  0xde   : > { %v6453_v9 = vpop.f32.mrf.mxu0 }
  0xdf   : > { %11556 = vst [vmem:[#allocation21_spill] sm:$0xff] %v6453_v9 }
  0xe0   : > { %v456_v10 = vpop.f32.mrf.mxu3 }
  0xe1   : > { %v500_v12 = vrot.slane %v456_v10, 1  ;;  %v501_v13 = vrot.slane %v456_v10, 2  ;;  %v502_v14 = vrot.slane %v456_v10, 3  ;;  %v503_v15 = vrot.slane %v456_v10, 4 }
  0xe2   : > { %v504_v16 = vrot.slane %v456_v10, 5  ;;  %v506_v17 = vrot.slane %v456_v10, 7  ;;  %v515_v18 = vadd.f32 %v456_v10, %v6435_v0  ;;  %v505_v34 = vrot.slane %v456_v10, 6 }
  0xe3   : > { %v516_v19 = vadd.f32 %v500_v12, %v6439_v2  ;;  %v517_v20 = vadd.f32 %v501_v13, %v6443_v4  ;;  %v518_v21 = vadd.f32 %v502_v14, %v6447_v6  ;;  %v519_v22 = vadd.f32 %v503_v15, %v6453_v9 }
  0xe4   : > { %v522_v23 = vadd.f32 %v506_v17, %v6437_v1  ;;  %v4833_v24 = vmul.f32 -1.442695, %v515_v18  ;;  %v6468_v35 = vpop.f32.mrf.mxu2  ;;  %v6522_v18 = vpop.f32.mrf.mxu1 }
  0xe5   : > { %v4834_v26 = vmul.f32 -1.442695, %v516_v19  ;;  %v4835_v27 = vmul.f32 -1.442695, %v517_v20  ;;  %v4836_v28 = vmul.f32 -1.442695, %v518_v21 }
  0xe6   : > { %v6465_v29 = vpop.f32.mrf.mxu0  ;;  %5045 = vpow2.f32 %v4833_v24  ;;  %v4837_v30 = vmul.f32 -1.442695, %v519_v22  ;;  %v4840_v32 = vmul.f32 -1.442695, %v522_v23  ;;  %11559 = vst [vmem:[#allocation24_spill] sm:$0xff] %v6468_v35 }
  0xe7   : > { %11558 = vst [vmem:[#allocation23_spill] sm:$0xff] %v6465_v29  ;;  %v520_v31 = vadd.f32 %v504_v16, %v6465_v29  ;;  %5047 = vpow2.f32 %v4834_v26 }
  0xe8   : > { %5049 = vpow2.f32 %v4835_v27  ;;  %11565 = vst [vmem:[#allocation28_spill] sm:$0xff] %v6522_v18 }
  0xe9   : > { %v4838_v33 = vmul.f32 -1.442695, %v520_v31  ;;  %5051 = vpow2.f32 %v4836_v28 }
  0xea   : > { %5053 = vpow2.f32 %v4837_v30 }
  0xeb   : > { %5055 = vpow2.f32 %v4840_v32 }
  0xec   : > { %v5046_v36 = vpop.eup %5045  ;;  %5057 = vpow2.f32 %v4838_v33  ;;  %v6504_v61 = vpop.f32.mrf.mxu2 }
  0xed   : > { %v5048_v37 = vpop.eup %5047  ;;  %v6470_v38 = vadd.f32 1.0, %v5046_v36  ;;  %11562 = vst [vmem:[#allocation27_spill] sm:$0xff] %v6504_v61 }
  0xee   : > { %v6472_v39 = vpop.f32.mrf.mxu0  ;;  %v5050_v40 = vpop.eup %5049  ;;  %v6474_v41 = vadd.f32 1.0, %v5048_v37 }
  0xef   : > { %11560 = vst [vmem:[#allocation25_spill] sm:$0xff] %v6472_v39  ;;  %v521_v43 = vadd.f32 %v505_v34, %v6472_v39  ;;  %v5052_v44 = vpop.eup %5051  ;;  %v6479_v45 = vadd.f32 1.0, %v5050_v40  ;;  %5059 = vrcp.f32 %v6470_v38  ;;  %v566_v53 = vand.u32 2147483648, %v6470_v38 }
  0xf0   : > { %v5054_v46 = vpop.eup %5053  ;;  %v6482_v47 = vadd.f32 1.0, %v5052_v44  ;;  %5061 = vrcp.f32 %v6474_v41  ;;  %v564_v55 = vand.u32 2147483647, %v6470_v38  ;;  %v581_v56 = vand.u32 2147483648, %v6474_v41 }
  0xf1   : > { %v5056_v48 = vpop.eup %5055  ;;  %v6485_v49 = vadd.f32 1.0, %v5054_v46  ;;  %5063 = vrcp.f32 %v6479_v45  ;;  %v4839_v52 = vmul.f32 -1.442695, %v521_v43  ;;  %v579_v57 = vand.u32 2147483647, %v6474_v41 }
  0xf2   : > { %v5058_v50 = vpop.eup %5057  ;;  %v6488_v51 = vadd.f32 1.0, %v5056_v48  ;;  %5065 = vrcp.f32 %v6482_v47  ;;  %v594_v58 = vand.u32 2147483647, %v6479_v45  ;;  %v596_v59 = vand.u32 2147483648, %v6479_v45 }
  0xf3   : > { %5067 = vrcp.f32 %v6485_v49  ;;  %v6493_v54 = vadd.f32 1.0, %v5058_v50  ;;  %vm560_vm1 = vweird.f32 %v6470_v38  ;;  %vm575_vm2 = vweird.f32 %v6474_v41 }
  0xf4   : > { %5069 = vrcp.f32 %v6488_v51  ;;  %v609_v62 = vand.u32 2147483647, %v6482_v47  ;;  %v567_v12 = vor.u32 1.1754944e-38, %v566_v53  ;;  %vm590_vm3 = vweird.f32 %v6479_v45 }
  0xf5   : > { %v6501_v60 = vpop.eup %5059  ;;  %5071 = vrcp.f32 %v6493_v54  ;;  %vm6515_vm5 = vcmp.eq.f32.partialorder %v564_v55, 8.507059e+37  ;;  %v582_v16 = vor.u32 1.1754944e-38, %v581_v56  ;;  %vm605_vm6 = vweird.f32 %v6482_v47 }
  0xf6   : > { %v6509_v63 = vpop.eup %5061  ;;  %5073 = vpow2.f32 %v4839_v52  ;;  %v556_v10 = vmul.f32 %v6501_v60, %v6470_v38  ;;  %vm561_vm4 = vweird.f32 %v6501_v60  ;;  %vm6525_vm8 = vcmp.eq.f32.partialorder %v579_v57, 8.507059e+37 }
  0xf7   : > { %v5064_v13 = vpop.eup %5063  ;;  %v571_v15 = vmul.f32 %v6509_v63, %v6474_v41  ;;  %vm576_vm7 = vweird.f32 %v6509_v63  ;;  %vm6530_vm9 = vcmp.eq.f32.partialorder %v594_v58, 8.507059e+37  ;;  %v597_v23 = vor.u32 1.1754944e-38, %v596_v59  ;;  %vm6555_vm14 = vmor %vm560_vm1, %vm561_vm4 }
  0xf8   : > { %v5066_v17 = vpop.eup %5065  ;;  %v557_v19 = vsub.f32 1.0, %v556_v10  ;;  %v586_v21 = vmul.f32 %v5064_v13, %v6479_v45  ;;  %vm591_vm10 = vweird.f32 %v5064_v13  ;;  %vm6535_vm11 = vcmp.eq.f32.partialorder %v609_v62, 8.507059e+37  ;;  %vm6569_vm0 = vmor %vm575_vm2, %vm576_vm7 }
  0xf9   : > { %v5068_v24 = vpop.eup %5067  ;;  %v572_v26 = vsub.f32 1.0, %v571_v15  ;;  %v601_v27 = vmul.f32 %v5066_v17, %v6482_v47  ;;  %v611_v30 = vand.u32 2147483648, %v6482_v47  ;;  %vm606_vm12 = vweird.f32 %v5066_v17  ;;  %v6573_v15 = vpop.f32.mrf.mxu2  ;;  %vm592_vm1 = vmor %vm590_vm3, %vm591_vm10 }
  0xfa   : > { %v6540_v31 = vpop.eup %5069  ;;  %v558_v32 = vmul.f32 %v6501_v60, %v557_v19  ;;  %v587_v33 = vsub.f32 1.0, %v586_v21  ;;  %v616_v34 = vmul.f32 %v5068_v24, %v6485_v49  ;;  %vm620_vm13 = vweird.f32 %v6485_v49  ;;  %11576 = vst [vmem:[#allocation29_spill] sm:$0xff] %v6573_v15  ;;  %vm607_vm2 = vmor %vm605_vm6, %vm606_vm12 }
  0xfb   : > { %v6544_v36 = vpop.eup %5071  ;;  %v573_v37 = vmul.f32 %v6509_v63, %v572_v26  ;;  %v602_v40 = vsub.f32 1.0, %v601_v27  ;;  %v624_v43 = vand.u32 2147483647, %v6485_v49  ;;  %v626_v52 = vand.u32 2147483648, %v6485_v49  ;;  %v6585_v26 = vpop.f32.mrf.mxu0 }
  0xfc   : > { %v5074_v44 = vpop.eup %5073  ;;  %v559_v46 = vadd.f32 %v6501_v60, %v558_v32  ;;  %v588_v48 = vmul.f32 %v5064_v13, %v587_v33  ;;  %v617_v50 = vsub.f32 1.0, %v616_v34  ;;  %v612_v57 = vor.u32 1.1754944e-38, %v611_v30 }
  0xfd   : > { %v574_v55 = vadd.f32 %v6509_v63, %v573_v37  ;;  %v603_v56 = vmul.f32 %v5066_v17, %v602_v40  ;;  %vm621_vm15 = vweird.f32 %v5068_v24  ;;  %v6560_v58 = vadd.f32 1.0, %v5074_v44 }
  0xfe   : > { %v563_v59 = vsel %vm6555_vm14, %v6501_v60, %v559_v46  ;;  %v589_v62 = vadd.f32 %v5064_v13, %v588_v48  ;;  %v618_v10 = vmul.f32 %v5068_v24, %v617_v50  ;;  %vm6581_vm4 = vcmp.eq.f32.partialorder %v624_v43, 8.507059e+37  ;;  %vm622_vm3 = vmor %vm620_vm13, %vm621_vm15 }
  0xff   : > { %v578_v19 = vsel %vm6569_vm0, %v6509_v63, %v574_v55  ;;  %v604_v60 = vadd.f32 %v5066_v17, %v603_v56  ;;  %v627_v41 = vor.u32 1.1754944e-38, %v626_v52  ;;  %v568_v27 = vsel %vm6515_vm5, %v567_v12, %v563_v59  ;;  %v6602_v12 = vpop.f32.mrf.mxu1 }
 0x100   : > { %v593_v30 = vsel %vm592_vm1, %v5064_v13, %v589_v62  ;;  %v619_v63 = vadd.f32 %v5068_v24, %v618_v10  ;;  %v631_v45 = vmul.f32 %v6544_v36, %v6493_v54  ;;  %v583_v32 = vsel %vm6525_vm8, %v582_v16, %v578_v19  ;;  %11579 = vst [vmem:[#allocation30_spill] sm:$0xff] %v6602_v12  ;;  %v476_v37 = vpop.f32.mrf.mxu3 }
 0x101   : > { %v598_v33 = vsel %vm6530_vm9, %v597_v23, %v593_v30  ;;  %v608_v34 = vsel %vm607_vm2, %v5066_v17, %v604_v60  ;;  %vm635_vm5 = vweird.f32 %v6493_v54  ;;  %vm636_vm6 = vweird.f32 %v6544_v36  ;;  %v6631_v38 = vpop.f32.mrf.mxu2 }
 0x102   : > { %v613_v47 = vsel %vm6535_vm11, %v612_v57, %v608_v34  ;;  %v623_v13 = vsel %vm622_vm3, %v5068_v24, %v619_v63  ;;  %v632_v14 = vsub.f32 1.0, %v631_v45  ;;  %v639_v16 = vand.u32 2147483647, %v6493_v54  ;;  %vm6620_vm7 = vmor %vm635_vm5, %vm636_vm6  ;;  %11584 = vst [vmem:[#allocation31_spill] sm:$0xff] %v6631_v38 }
 0x103   : > { %v641_v20 = vand.u32 2147483648, %v6493_v54  ;;  %v852_v17 = vrot.slane %v6585_v26, 1  ;;  %v853_v49 = vrot.slane %v6585_v26, 2  ;;  %v628_v22 = vsel %vm6581_vm4, %v627_v41, %v623_v13 }
 0x104   : > { %v633_v23 = vmul.f32 %v6544_v36, %v632_v14  ;;  %v854_v28 = vrot.slane %v6585_v26, 3  ;;  %v855_v24 = vrot.slane %v6585_v26, 4  ;;  %5075 = vrcp.f32 %v6560_v58 }
 0x105   : > { %v867_v44 = vmul.f32 %v568_v27, %v6585_v26  ;;  %v868_v46 = vmul.f32 %v852_v17, %v583_v32  ;;  %v869_v48 = vmul.f32 %v853_v49, %v598_v33  ;;  %vm6625_vm8 = vcmp.eq.f32.partialorder %v639_v16, 8.507059e+37 }
 0x106   : > { %v634_v40 = vadd.f32 %v6544_v36, %v633_v23  ;;  %v642_v52 = vor.u32 1.1754944e-38, %v641_v20  ;;  %v870_v53 = vmul.f32 %v854_v28, %v613_v47  ;;  %v871_v55 = vmul.f32 %v855_v24, %v628_v22 }
 0x107   : > { %v875_v56 = vadd.f32 %v867_v44, %v6449_v7  ;;  %v876_v57 = vadd.f32 %v868_v46, %v6455_v11  ;;  %v676_v54 = vrot.slane %v476_v37, 1  ;;  %v677_v59 = vrot.slane %v476_v37, 2  ;;  %v6647_v13 = vpop.f32.mrf.mxu1 }
 0x108   : > { %v638_v62 = vsel %vm6620_vm7, %v6544_v36, %v634_v40  ;;  %v856_v10 = vrot.slane %v6585_v26, 5  ;;  %v877_v19 = vadd.f32 %v869_v48, %v6468_v35  ;;  %v678_v60 = vrot.slane %v476_v37, 3  ;;  %11585 = vst [vmem:[#allocation32_spill] sm:$0xff] %v6647_v13 }
 0x109   : > { %v878_v21 = vadd.f32 %v870_v53, %v6504_v61  ;;  %v879_v41 = vadd.f32 %v871_v55, %v6573_v15  ;;  %v679_v27 = vrot.slane %v476_v37, 4  ;;  %v680_v30 = vrot.slane %v476_v37, 5 }
 0x10a   : > { %v6640_v63 = vpop.eup %5075  ;;  %5077 = vtanh.f32 %v875_v56  ;;  %v681_v45 = vrot.slane %v476_v37, 6  ;;  %v682_v32 = vrot.slane %v476_v37, 7  ;;  %v691_v33 = vadd.f32 %v476_v37, %v6445_v5 }
 0x10b   : > { %v643_v36 = vsel %vm6625_vm8, %v642_v52, %v638_v62  ;;  %5079 = vtanh.f32 %v876_v57  ;;  %v692_v34 = vadd.f32 %v676_v54, %v6451_v8  ;;  %v693_v47 = vadd.f32 %v677_v59, %v6463_v25  ;;  %v6665_v59 = vpop.f32.mrf.mxu2 }
 0x10c   : > { %5081 = vtanh.f32 %v877_v19  ;;  %v694_v14 = vadd.f32 %v678_v60, %v6476_v42  ;;  %v695_v16 = vadd.f32 %v679_v27, %v6522_v18  ;;  %v696_v20 = vadd.f32 %v680_v30, %v6602_v12  ;;  %11586 = vst [vmem:[#allocation33_spill] sm:$0xff] %v6665_v59 }
 0x10d   : > { %5083 = vtanh.f32 %v878_v21  ;;  %v698_v17 = vadd.f32 %v682_v32, %v6441_v3  ;;  %v4841_v49 = vmul.f32 -1.442695, %v691_v33  ;;  %v4842_v22 = vmul.f32 -1.442695, %v692_v34 }
 0x10e   : > { %5085 = vtanh.f32 %v879_v41  ;;  %v4843_v23 = vmul.f32 -1.442695, %v693_v47  ;;  %v4844_v28 = vmul.f32 -1.442695, %v694_v14  ;;  %v697_v24 = vadd.f32 %v681_v45, %v6647_v13 }
 0x10f   : > { %v857_v37 = vrot.slane %v6585_v26, 6  ;;  %5087 = vpow2.f32 %v4841_v49  ;;  %v4845_v40 = vmul.f32 -1.442695, %v695_v16  ;;  %v646_v43 = vmul.f32 %v6640_v63, %v6560_v58 }
 0x110   : > { %v6657_v44 = vpop.eup %5077  ;;  %v858_v46 = vrot.slane %v6585_v26, 7  ;;  %v872_v48 = vmul.f32 %v856_v10, %v643_v36  ;;  %5089 = vpow2.f32 %v4842_v22  ;;  %v4846_v50 = vmul.f32 -1.442695, %v696_v20 }
 0x111   : > { %v6660_v52 = vpop.eup %5079  ;;  %5091 = vpow2.f32 %v4843_v23  ;;  %v4848_v53 = vmul.f32 -1.442695, %v698_v17  ;;  %v647_v55 = vsub.f32 1.0, %v646_v43  ;;  %v656_v56 = vand.u32 2147483648, %v6560_v58 }
 0x112   : > { %v6663_v57 = vpop.eup %5081  ;;  %5093 = vpow2.f32 %v4844_v28  ;;  %v4847_v54 = vmul.f32 -1.442695, %v697_v24  ;;  %vm650_vm9 = vweird.f32 %v6560_v58  ;;  %v661_v62 = vmul.f32 %v6540_v31, %v6488_v51 }
 0x113   : > { %v6670_v10 = vpop.eup %5083  ;;  %5095 = vpow2.f32 %v4845_v40  ;;  %v648_v19 = vmul.f32 %v6640_v63, %v647_v55  ;;  %vm651_vm10 = vweird.f32 %v6640_v63  ;;  %v654_v60 = vand.u32 2147483647, %v6560_v58 }
 0x114   : > { %v6675_v21 = vpop.eup %5085  ;;  %v880_v41 = vadd.f32 %v872_v48, %v6631_v38  ;;  %5097 = vpow2.f32 %v4846_v50  ;;  %v662_v27 = vsub.f32 1.0, %v661_v62  ;;  %vm666_vm11 = vweird.f32 %v6540_v31  ;;  %vm652_vm12 = vmor %vm650_vm9, %vm651_vm10  ;;  %v6712_v62 = vpop.f32.mrf.mxu2 }
 0x115   : > { %v5088_v30 = vpop.eup %5087  ;;  %5099 = vpow2.f32 %v4848_v53  ;;  %v649_v45 = vadd.f32 %v6640_v63, %v648_v19  ;;  %v657_v32 = vor.u32 1.1754944e-38, %v656_v56  ;;  %v671_v33 = vand.u32 2147483648, %v6488_v51  ;;  %11587 = vst [vmem:[#allocation34_spill] sm:$0xff] %v6712_v62 }
 0x116   : > { %v5090_v36 = vpop.eup %5089  ;;  %v6681_v34 = vadd.f32 1.0, %v5088_v30  ;;  %5101 = vpow2.f32 %v4847_v54  ;;  %v663_v47 = vmul.f32 %v6540_v31, %v662_v27  ;;  %v669_v14 = vand.u32 2147483647, %v6488_v51 }
 0x117   : > { %v5092_v16 = vpop.eup %5091  ;;  %v6689_v20 = vadd.f32 1.0, %v5090_v36  ;;  %v653_v17 = vsel %vm652_vm12, %v6640_v63, %v649_v45  ;;  %vm655_vm13 = vcmp.eq.f32.partialorder %v654_v60, 8.507059e+37  ;;  %vm665_vm14 = vweird.f32 %v6488_v51 }
 0x118   : > { %v5094_v49 = vpop.eup %5093  ;;  %v6693_v22 = vadd.f32 1.0, %v5092_v16  ;;  %5103 = vrcp.f32 %v6681_v34  ;;  %v658_v23 = vsel %vm655_vm13, %v657_v32, %v653_v17  ;;  %v664_v58 = vadd.f32 %v6540_v31, %v663_v47  ;;  %vm667_vm15 = vmor %vm665_vm14, %vm666_vm11 }
 0x119   : > { %v5096_v28 = vpop.eup %5095  ;;  %v6697_v24 = vadd.f32 1.0, %v5094_v49  ;;  %5105 = vrcp.f32 %v6689_v20  ;;  %v873_v40 = vmul.f32 %v857_v37, %v658_v23  ;;  %v672_v63 = vor.u32 1.1754944e-38, %v671_v33 }
 0x11a   : > { %v5098_v43 = vpop.eup %5097  ;;  %v6702_v51 = vadd.f32 1.0, %v5096_v28  ;;  %5107 = vrcp.f32 %v6693_v22  ;;  %v668_v48 = vsel %vm667_vm15, %v6540_v31, %v664_v58  ;;  %vm670_vm0 = vcmp.eq.f32.partialorder %v669_v14, 8.507059e+37 }
 0x11b   : > { %v5100_v50 = vpop.eup %5099  ;;  %v6706_v53 = vadd.f32 1.0, %v5098_v43  ;;  %5109 = vrcp.f32 %v6697_v24  ;;  %v673_v55 = vsel %vm670_vm0, %v672_v63, %v668_v48  ;;  %v881_v54 = vadd.f32 %v873_v40, %v6665_v59 }
 0x11c   : > { %v5102_v56 = vpop.eup %5101  ;;  %v6709_v37 = vadd.f32 1.0, %v5100_v50  ;;  %v740_v19 = vand.u32 2147483647, %v6681_v34  ;;  %5111 = vtanh.f32 %v880_v41  ;;  %v874_v60 = vmul.f32 %v858_v46, %v673_v55 }
 0x11d   : > { %5113 = vrcp.f32 %v6702_v51  ;;  %v6716_v31 = vadd.f32 1.0, %v5102_v56  ;;  %v742_v27 = vand.u32 2147483648, %v6681_v34  ;;  %vm736_vm1 = vweird.f32 %v6681_v34 }
 0x11e   : > { %v5104_v30 = vpop.eup %5103  ;;  %5115 = vrcp.f32 %v6706_v53  ;;  %v755_v45 = vand.u32 2147483647, %v6689_v20  ;;  %v757_v32 = vand.u32 2147483648, %v6689_v20  ;;  %v6729_v41 = vadd.f32 %v874_v60, %v6712_v62 }
 0x11f   : > { %v6725_v33 = vpop.eup %5105  ;;  %5117 = vrcp.f32 %v6709_v37  ;;  %v732_v26 = vmul.f32 %v5104_v30, %v6681_v34  ;;  %vm751_vm4 = vweird.f32 %v6689_v20  ;;  %vm737_vm2 = vweird.f32 %v5104_v30 }
 0x120   : > { %v6733_v46 = vpop.eup %5107  ;;  %5119 = vrcp.f32 %v6716_v31  ;;  %vm6736_vm3 = vcmp.eq.f32.partialorder %v740_v19, 8.507059e+37  ;;  %v743_v47 = vor.u32 1.1754944e-38, %v742_v27  ;;  %v747_v14 = vmul.f32 %v6725_v33, %v6689_v20  ;;  %vm6774_vm10 = vmor %vm736_vm1, %vm737_vm2 }
 0x121   : > { %v6742_v16 = vpop.eup %5109  ;;  %5121 = vtanh.f32 %v881_v54  ;;  %v733_v17 = vsub.f32 1.0, %v732_v26  ;;  %vm752_vm5 = vweird.f32 %v6725_v33  ;;  %v762_v49 = vmul.f32 %v6733_v46, %v6693_v22 }
 0x122   : > { %v6747_v23 = vpop.eup %5111  ;;  %v748_v58 = vsub.f32 1.0, %v747_v14  ;;  %vm6749_vm6 = vcmp.eq.f32.partialorder %v755_v45, 8.507059e+37  ;;  %v758_v40 = vor.u32 1.1754944e-38, %v757_v32  ;;  %v770_v63 = vand.u32 2147483647, %v6693_v22  ;;  %vm6794_vm12 = vmor %vm751_vm4, %vm752_vm5 }
 0x123   : > { %v6754_v43 = vpop.eup %5113  ;;  %v734_v48 = vmul.f32 %v5104_v30, %v733_v17  ;;  %v763_v50 = vsub.f32 1.0, %v762_v49  ;;  %vm766_vm7 = vweird.f32 %v6693_v22  ;;  %v777_v55 = vmul.f32 %v6742_v16, %v6697_v24 }
 0x124   : > { %v6759_v56 = vpop.eup %5115  ;;  %v749_v54 = vmul.f32 %v6725_v33, %v748_v58  ;;  %vm767_vm8 = vweird.f32 %v6733_v46  ;;  %v772_v19 = vand.u32 2147483648, %v6693_v22  ;;  %vm781_vm9 = vweird.f32 %v6697_v24 }
 0x125   : > { %v6765_v60 = vpop.eup %5117  ;;  %v735_v27 = vadd.f32 %v5104_v30, %v734_v48  ;;  %v764_v45 = vmul.f32 %v6733_v46, %v763_v50  ;;  %v778_v32 = vsub.f32 1.0, %v777_v55  ;;  %v785_v26 = vand.u32 2147483647, %v6697_v24  ;;  %vm6808_vm14 = vmor %vm766_vm7, %vm767_vm8 }
 0x126   : > { %v6769_v14 = vpop.eup %5119  ;;  %v750_v49 = vadd.f32 %v6725_v33, %v749_v54  ;;  %vm6779_vm11 = vcmp.eq.f32.partialorder %v770_v63, 8.507059e+37  ;;  %v787_v48 = vand.u32 2147483648, %v6697_v24  ;;  %v792_v50 = vmul.f32 %v6754_v43, %v6702_v51 }
 0x127   : > { %v6786_v55 = vpop.eup %5121  ;;  %v739_v34 = vsel %vm6774_vm10, %v5104_v30, %v735_v27  ;;  %v765_v63 = vadd.f32 %v6733_v46, %v764_v45  ;;  %v779_v62 = vmul.f32 %v6742_v16, %v778_v32  ;;  %vm782_vm13 = vweird.f32 %v6742_v16 }
 0x128   : > { %v754_v59 = vsel %vm6794_vm12, %v6725_v33, %v750_v49  ;;  %v773_v30 = vor.u32 1.1754944e-38, %v772_v19  ;;  %v793_v27 = vsub.f32 1.0, %v792_v50  ;;  %vm796_vm15 = vweird.f32 %v6702_v51  ;;  %vm6827_vm1 = vmor %vm781_vm9, %vm782_vm13 }
 0x129   : > { %v6815_v45 = vsel %vm6736_vm3, %v743_v47, %v739_v34  ;;  %v769_v33 = vsel %vm6808_vm14, %v6733_v46, %v765_v63  ;;  %v780_v32 = vadd.f32 %v6742_v16, %v779_v62  ;;  %vm6821_vm0 = vcmp.eq.f32.partialorder %v785_v26, 8.507059e+37 }
 0x12a   : > { %v788_v17 = vor.u32 1.1754944e-38, %v787_v48  ;;  %v794_v36 = vmul.f32 %v6754_v43, %v793_v27  ;;  %vm797_vm4 = vweird.f32 %v6754_v43  ;;  %v802_v47 = vand.u32 2147483648, %v6702_v51 }
 0x12b   : > { %v6836_v62 = vsel %vm6749_vm6, %v758_v40, %v754_v59  ;;  %v784_v46 = vsel %vm6827_vm1, %v6742_v16, %v780_v32  ;;  %v800_v24 = vand.u32 2147483647, %v6702_v51  ;;  %v807_v26 = vmul.f32 %v6759_v56, %v6706_v53  ;;  %vm798_vm5 = vmor %vm796_vm15, %vm797_vm4 }
 0x12c   : > { %v6846_v49 = vsel %vm6779_vm11, %v773_v30, %v769_v33  ;;  %v795_v48 = vadd.f32 %v6754_v43, %v794_v36  ;;  %vm811_vm2 = vweird.f32 %v6706_v53  ;;  %vm812_vm3 = vweird.f32 %v6759_v56 }
 0x12d   : > { %v808_v59 = vsub.f32 1.0, %v807_v26  ;;  %v815_v16 = vand.u32 2147483647, %v6706_v53  ;;  %v817_v28 = vand.u32 2147483648, %v6706_v53  ;;  %v822_v40 = vmul.f32 %v6769_v14, %v6716_v31  ;;  %vm813_vm10 = vmor %vm811_vm2, %vm812_vm3 }
 0x12e   : > { %v6859_v58 = vsel %vm6821_vm0, %v788_v17, %v784_v46  ;;  %v799_v50 = vsel %vm798_vm5, %v6754_v43, %v795_v48  ;;  %v803_v34 = vor.u32 1.1754944e-38, %v802_v47  ;;  %v830_v54 = vand.u32 2147483647, %v6716_v31 }
 0x12f   : > { %vm801_vm6 = vcmp.eq.f32.partialorder %v800_v24, 8.507059e+37  ;;  %v809_v51 = vmul.f32 %v6759_v56, %v808_v59  ;;  %vm826_vm7 = vweird.f32 %v6716_v31  ;;  %vm827_vm8 = vweird.f32 %v6769_v14 }
 0x130   : > { %v804_v63 = vsel %vm801_vm6, %v803_v34, %v799_v50  ;;  %v823_v20 = vsub.f32 1.0, %v822_v40  ;;  %v832_v30 = vand.u32 2147483648, %v6716_v31  ;;  %v837_v27 = vmul.f32 %v6765_v60, %v6709_v37  ;;  %vm828_vm14 = vmor %vm826_vm7, %vm827_vm8 }
 0x131   : > { %v810_v33 = vadd.f32 %v6759_v56, %v809_v51  ;;  %vm816_vm9 = vcmp.eq.f32.partialorder %v815_v16, 8.507059e+37  ;;  %v818_v43 = vor.u32 1.1754944e-38, %v817_v28  ;;  %v845_v32 = vand.u32 2147483647, %v6709_v37 }
 0x132   : > { %v824_v22 = vmul.f32 %v6769_v14, %v823_v20  ;;  %vm6876_vm11 = vcmp.eq.f32.partialorder %v830_v54, 8.507059e+37  ;;  %v838_v17 = vsub.f32 1.0, %v837_v27  ;;  %v847_v36 = vand.u32 2147483648, %v6709_v37 }
 0x133   : > { %v814_v47 = vsel %vm813_vm10, %v6759_v56, %v810_v33  ;;  %vm841_vm12 = vweird.f32 %v6709_v37  ;;  %vm842_vm13 = vweird.f32 %v6765_v60  ;;  %v891_v46 = vsub.f32 1.0, %v6815_v45 }
 0x134   : > { %v819_v24 = vsel %vm816_vm9, %v818_v43, %v814_v47  ;;  %v825_v53 = vadd.f32 %v6769_v14, %v824_v22  ;;  %v833_v26 = vor.u32 1.1754944e-38, %v832_v30  ;;  %v839_v48 = vmul.f32 %v6765_v60, %v838_v17  ;;  %vm843_vm0 = vmor %vm841_vm12, %vm842_vm13  ;;  %v5685_v43 = vld [vmem:[#allocation2] sm:$0xff] }
 0x135   : > { %vm6891_vm15 = vcmp.eq.f32.partialorder %v845_v32, 8.507059e+37  ;;  %5123 = vtanh.f32 %v6729_v41  ;;  %v892_v56 = vsub.f32 1.0, %v6836_v62  ;;  %v893_v16 = vsub.f32 1.0, %v6846_v49 }
 0x136   : > { %v829_v28 = vsel %vm828_vm14, %v6769_v14, %v825_v53  ;;  %v840_v40 = vadd.f32 %v6765_v60, %v839_v48  ;;  %v848_v50 = vor.u32 1.1754944e-38, %v847_v36  ;;  %v894_v34 = vsub.f32 1.0, %v6859_v58 }
 0x137   : > { %v834_v31 = vsel %vm6876_vm11, %v833_v26, %v829_v28  ;;  %v895_v41 = vsub.f32 1.0, %v804_v63  ;;  %v896_v54 = vsub.f32 1.0, %v819_v24  ;;  %v899_v51 = vmul.f32 %v6657_v44, %v891_v46 }
 0x138   : > { %v844_v20 = vsel %vm843_vm0, %v6765_v60, %v840_v40  ;;  %v897_v14 = vsub.f32 1.0, %v834_v31  ;;  %v900_v30 = vmul.f32 %v6660_v52, %v892_v56  ;;  %v901_v27 = vmul.f32 %v6663_v57, %v893_v16 }
 0x139   : > { %v849_v33 = vsel %vm6891_vm15, %v848_v50, %v844_v20  ;;  %v908_v32 = vrot.slane %v5685_v43, 1  ;;  %v909_v22 = vrot.slane %v5685_v43, 2  ;;  %v910_v19 = vrot.slane %v5685_v43, 3 }
 0x13a   : > { %v898_v37 = vsub.f32 1.0, %v849_v33  ;;  %v902_v17 = vmul.f32 %v6670_v10, %v894_v34  ;;  %v911_v36 = vrot.slane %v5685_v43, 4  ;;  %v912_v47 = vrot.slane %v5685_v43, 5 }
 0x13b   : > { %v5124_v44 = vpop.eup %5123  ;;  %v903_v60 = vmul.f32 %v6675_v21, %v895_v41  ;;  %v913_v46 = vrot.slane %v5685_v43, 6  ;;  %v914_v53 = vrot.slane %v5685_v43, 7  ;;  %v923_v52 = vmul.f32 %v5685_v43, %v6815_v45 }
 0x13c   : > { %v904_v57 = vmul.f32 %v6747_v23, %v896_v54  ;;  %v924_v26 = vmul.f32 %v908_v32, %v6836_v62  ;;  %v925_v48 = vmul.f32 %v909_v22, %v6846_v49  ;;  %v926_v59 = vmul.f32 %v910_v19, %v6859_v58  ;;  %v6970_v19 = vld [vmem:[#allocation8 + $0x178] sm:$0xff] }
 0x13d   : > { %v905_v10 = vmul.f32 %v6786_v55, %v897_v14  ;;  %v906_v56 = vmul.f32 %v5124_v44, %v898_v37  ;;  %v927_v16 = vmul.f32 %v911_v36, %v804_v63  ;;  %v6921_v28 = vadd.f32 %v923_v52, %v899_v51  ;;  %v6973_v37 = vld [vmem:[#allocation8 + $0x168] sm:$0xff]  ;;  %v6979_v36 = vld [vmem:[#allocation8 + $0x160] sm:$0xff]  ;;  %v6985_v44 = vld [vmem:[#allocation8 + $0x158] sm:$0xff] }
 0x13e   : > { %v928_v21 = vmul.f32 %v912_v47, %v819_v24  ;;  %v6923_v40 = vadd.f32 %v924_v26, %v900_v30  ;;  %v6925_v45 = vadd.f32 %v925_v48, %v901_v27  ;;  %v6927_v23 = vadd.f32 %v926_v59, %v902_v17  ;;  %v6976_v17 = vld [vmem:[#allocation8 + $0x170] sm:$0xff]  ;;  %11609 = vst [vmem:[#allocation36_spill] sm:$0xff] %v6985_v44  ;;  %v7003_v26 = vld [vmem:[#allocation8 + $0x128] sm:$0xff]  ;;  %v7006_v48 = vld [vmem:[#allocation8 + $0x118] sm:$0xff] }
 0x13f   : > { %v929_v62 = vmul.f32 %v913_v46, %v834_v31  ;;  %v930_v49 = vmul.f32 %v914_v53, %v849_v33  ;;  %v6929_v50 = vadd.f32 %v927_v16, %v903_v60  ;;  %939 = vst [vmem:[%s6102_s23] sm:$0x1] %v6921_v28  ;;  %vm11527_vm1 = vcmask 1041409   ;;  %v6982_v47 = vld [vmem:[#allocation8 + $0x150] sm:$0xff]  ;;  %v6988_v60 = vld [vmem:[#allocation8 + $0x148] sm:$0xff]  ;;  %v6991_v46 = vld [vmem:[#allocation8 + $0x138] sm:$0xff] }
 0x140   : > { %v6933_v55 = vadd.f32 %v928_v21, %v904_v57  ;;  %940 = vst [vmem:[%s6102_s23 + $0x8] sm:$0x1] %v6923_v40  ;;  %v11374_v58 = vrot.slane %v6923_v40, 7  ;;  %v958_v63 = vrot.slane %v6925_v45, 6  ;;  %vm11526_vm4 = vcmask 1042434   ;;  %v6994_v53 = vld [vmem:[#allocation8 + $0x140] sm:$0xff] }
 0x141   : > { %v6939_v24 = vadd.f32 %v929_v62, %v905_v10  ;;  %941 = vst [vmem:[%s6102_s23 + $0x10] sm:$0x1] %v6925_v45  ;;  %vm11525_vm2 = vcmask 1043459   ;;  %v6943_v34 = vadd.f32 %v930_v49, %v906_v56  ;;  %v961_v41 = vrot.slane %v6927_v23, 5  ;;  %v6997_v52 = vld [vmem:[#allocation8 + $0x130] sm:$0xff]  ;;  %v7000_v57 = vld [vmem:[#allocation8 + $0x120] sm:$0xff] }
 0x142   : > { %942 = vst [vmem:[%s6102_s23 + $0x18] sm:$0x1] %v6927_v23  ;;  %v957_v31 = vsel %vm11527_vm1, %v11374_v58, %v6921_v28  ;;  %vm11446_vm3 = vcmask 1044484   ;;  %v964_v51 = vrot.slane %v6929_v50, 4  ;;  %vm11445_vm5 = vcmask 1045509   ;;  %v7009_v59 = vld [vmem:[#allocation8 + $0x108] sm:$0xff] }
 0x143   : > { %943 = vst [vmem:[%s6102_s23 + $0x20] sm:$0x1] %v6929_v50  ;;  %v960_v54 = vsel %vm11526_vm4, %v958_v63, %v957_v31  ;;  %v967_v14 = vrot.slane %v6933_v55, 3  ;;  %vm11444_vm6 = vcmask 1046534   ;;  %v970_v27 = vrot.slane %v6939_v24, 2  ;;  %v7012_v10 = vld [vmem:[#allocation8 + $0x110] sm:$0xff] }
 0x144   : > { %944 = vst [vmem:[%s6102_s23 + $0x28] sm:$0x1] %v6933_v55  ;;  %v963_v20 = vsel %vm11525_vm2, %v961_v41, %v960_v54  ;;  %vm11443_vm7 = vcmask 1047559   ;;  %v973_v43 = vrot.slane %v6943_v34, 1  ;;  %v7015_v56 = vld [vmem:[#allocation8 + $0x100] sm:$0xff]  ;;  %v7018_v16 = vld [vmem:[#allocation8 + $0xf0] sm:$0xff] }
 0x145   : > { %945 = vst [vmem:[%s6102_s23 + $0x30] sm:$0x1] %v6939_v24  ;;  %v966_v30 = vsel %vm11446_vm3, %v964_v51, %v963_v20  ;;  %v7021_v21 = vld [vmem:[#allocation8 + $0xf8] sm:$0xff]  ;;  %v7024_v62 = vld [vmem:[#allocation8 + $0xe8] sm:$0xff]  ;;  %v7030_v63 = vld [vmem:[#allocation8 + $0xe0] sm:$0xff] }
 0x146   : > { %946 = vst [vmem:[%s6102_s23 + $0x38] sm:$0x1] %v6943_v34  ;;  %v969_v33 = vsel %vm11445_vm5, %v967_v14, %v966_v30  ;;  %v7027_v49 = vld [vmem:[#allocation8 + $0xd8] sm:$0xff]  ;;  %v7033_v31 = vld [vmem:[#allocation8 + $0xd0] sm:$0xff]  ;;  %v7036_v41 = vld [vmem:[#allocation8 + $0xc0] sm:$0xff] }
 0x147   : > { %v972_v32 = vsel %vm11444_vm6, %v970_v27, %v969_v33  ;;  %11608 = vst [vmem:[#allocation35_spill] sm:$0xff] %v6982_v47  ;;  %v7039_v54 = vld [vmem:[#allocation8 + $0xc8] sm:$0xff]  ;;  %v7042_v51 = vld [vmem:[#allocation8 + $0xb8] sm:$0xff]  ;;  %v7048_v14 = vld [vmem:[#allocation8 + $0xb0] sm:$0xff] }
 0x148   : > { %v975_v22 = vsel %vm11443_vm7, %v973_v43, %v972_v32  ;;  %11610 = vst [vmem:[#allocation37_spill] sm:$0xff] %v6988_v60  ;;  %v7045_v20 = vld [vmem:[#allocation8 + $0xa8] sm:$0xff]  ;;  %v7051_v30 = vld [vmem:[#allocation8 + $0xa0] sm:$0xff]  ;;  %v7054_v27 = vld [vmem:[#allocation8 + $0x90] sm:$0xff] }
 0x149   : > { %993 = vmatmul.f32.vlgmr.msrb.gmra.mxu1 %v975_v22  ;;  %1013 = vmatmul.f32.vlgmr.msrb.gmra.mxu2 %v975_v22  ;;  %11611 = vst [vmem:[#allocation38_spill] sm:$0xff] %v6991_v46  ;;  %v7057_v33 = vld [vmem:[#allocation8 + $0x98] sm:$0xff]  ;;  %v7060_v43 = vld [vmem:[#allocation8 + $0x88] sm:$0xff]  ;;  %v7069_v58 = vld [vmem:[#allocation8 + $0x70] sm:$0xff] }
 0x14a   : > { %1033 = vmatmul.f32.vlgmr.msra.gmra.mxu3 %v975_v22  ;;  %2077 = vmatpush.msrb.mxu1 %v6970_v19  ;;  %11612 = vst [vmem:[#allocation39_spill] sm:$0xff] %v6994_v53  ;;  %v7063_v32 = vld [vmem:[#allocation8 + $0x78] sm:$0xff]  ;;  %v7066_v22 = vld [vmem:[#allocation8 + $0x80] sm:$0xff] }
 0x14b   : > { %2567 = vmatpush.msrb.mxu2 %v6973_v37  ;;  %2587 = vmatpush.msra.mxu3 %v6976_v17  ;;  %11613 = vst [vmem:[#allocation40_spill] sm:$0xff] %v6997_v52 }
 0x14c   : > { %2078 = vmatpush.msrb.mxu1 %v6979_v36  ;;  %11614 = vst [vmem:[#allocation41_spill] sm:$0xff] %v7000_v57 }
 0x14d   : > { %2568 = vmatpush.msrb.mxu2 %v6982_v47  ;;  %2588 = vmatpush.msra.mxu3 %v6985_v44  ;;  %11615 = vst [vmem:[#allocation42_spill] sm:$0xff] %v7003_v26 }
 0x14e   : > { %2079 = vmatpush.msrb.mxu1 %v6988_v60  ;;  %11616 = vst [vmem:[#allocation43_spill] sm:$0xff] %v7006_v48 }
 0x14f   : > { %2569 = vmatpush.msrb.mxu2 %v6991_v46  ;;  %2589 = vmatpush.msra.mxu3 %v6994_v53  ;;  %11617 = vst [vmem:[#allocation44_spill] sm:$0xff] %v7009_v59 }
 0x150   : > { %2080 = vmatpush.msrb.mxu1 %v6997_v52  ;;  %11618 = vst [vmem:[#allocation45_spill] sm:$0xff] %v7012_v10 }
 0x151   : > { %2570 = vmatpush.msrb.mxu2 %v7000_v57  ;;  %2590 = vmatpush.msra.mxu3 %v7003_v26  ;;  %11619 = vst [vmem:[#allocation46_spill] sm:$0xff] %v7015_v56 }
 0x152   : > { %2081 = vmatpush.msrb.mxu1 %v7006_v48  ;;  %11620 = vst [vmem:[#allocation47_spill] sm:$0xff] %v7018_v16 }
 0x153   : > { %2571 = vmatpush.msrb.mxu2 %v7009_v59  ;;  %2591 = vmatpush.msra.mxu3 %v7012_v10  ;;  %11621 = vst [vmem:[#allocation48_spill] sm:$0xff] %v7021_v21 }
 0x154   : > { %2082 = vmatpush.msrb.mxu1 %v7015_v56  ;;  %11622 = vst [vmem:[#allocation49_spill] sm:$0xff] %v7024_v62 }
 0x155   : > { %2572 = vmatpush.msrb.mxu2 %v7018_v16  ;;  %2592 = vmatpush.msra.mxu3 %v7021_v21  ;;  %11623 = vst [vmem:[#allocation50_spill] sm:$0xff] %v7027_v49 }
 0x156   : > { %2083 = vmatpush.msrb.mxu1 %v7024_v62  ;;  %11624 = vst [vmem:[#allocation51_spill] sm:$0xff] %v7030_v63 }
 0x157   : > { %2573 = vmatpush.msrb.mxu2 %v7027_v49  ;;  %2593 = vmatpush.msra.mxu3 %v7030_v63  ;;  %11625 = vst [vmem:[#allocation52_spill] sm:$0xff] %v7033_v31 }
 0x158   : > { %2084 = vmatpush.msrb.mxu1 %v7033_v31  ;;  %11626 = vst [vmem:[#allocation53_spill] sm:$0xff] %v7036_v41 }
 0x159   : > { %2574 = vmatpush.msrb.mxu2 %v7036_v41  ;;  %11627 = vst [vmem:[#allocation54_spill] sm:$0xff] %v7039_v54  ;;  %2594 = vmatpush.msra.mxu3 %v7039_v54 }
 0x15a   : > { %11628 = vst [vmem:[#allocation55_spill] sm:$0xff] %v7042_v51  ;;  %2085 = vmatpush.msrb.mxu1 %v7042_v51 }
 0x15b   : > { %11629 = vst [vmem:[#allocation56_spill] sm:$0xff] %v7045_v20  ;;  %2575 = vmatpush.msrb.mxu2 %v7045_v20  ;;  %2595 = vmatpush.msra.mxu3 %v7048_v14 }
 0x15c   : > { %11630 = vst [vmem:[#allocation57_spill] sm:$0xff] %v7048_v14  ;;  %2086 = vmatpush.msrb.mxu1 %v7051_v30 }
 0x15d   : > { %11631 = vst [vmem:[#allocation58_spill] sm:$0xff] %v7051_v30  ;;  %2576 = vmatpush.msrb.mxu2 %v7054_v27  ;;  %2596 = vmatpush.msra.mxu3 %v7057_v33 }
 0x15e   : > { %11632 = vst [vmem:[#allocation59_spill] sm:$0xff] %v7054_v27  ;;  %2087 = vmatpush.msrb.mxu1 %v7060_v43  ;;  %v7072_v27 = vld [vmem:[#allocation8 + $0x60] sm:$0xff] }
 0x15f   : > { %11633 = vst [vmem:[#allocation60_spill] sm:$0xff] %v7057_v33  ;;  %2577 = vmatpush.msrb.mxu2 %v7063_v32  ;;  %2597 = vmatpush.msra.mxu3 %v7066_v22  ;;  %v7075_v33 = vld [vmem:[#allocation8 + $0x68] sm:$0xff] }
 0x160   : > { %11634 = vst [vmem:[#allocation61_spill] sm:$0xff] %v7060_v43  ;;  %2088 = vmatpush.msrb.mxu1 %v7069_v58  ;;  %v7078_v43 = vld [vmem:[#allocation8 + $0x58] sm:$0xff] }
 0x161   : > { %11635 = vst [vmem:[#allocation62_spill] sm:$0xff] %v7063_v32  ;;  %2578 = vmatpush.msrb.mxu2 %v7072_v27  ;;  %2598 = vmatpush.msra.mxu3 %v7075_v33  ;;  %v7081_v32 = vld [vmem:[#allocation8 + $0x48] sm:$0xff] }
 0x162   : > { %11636 = vst [vmem:[#allocation63_spill] sm:$0xff] %v7066_v22  ;;  %2089 = vmatpush.msrb.mxu1 %v7078_v43  ;;  %v7084_v22 = vld [vmem:[#allocation8 + $0x50] sm:$0xff] }
 0x163   : > { %11637 = vst [vmem:[#allocation64_spill] sm:$0xff] %v7069_v58  ;;  %2579 = vmatpush.msrb.mxu2 %v7081_v32  ;;  %2599 = vmatpush.msra.mxu3 %v7084_v22  ;;  %v7087_v58 = vld [vmem:[#allocation8 + $0x40] sm:$0xff] }
 0x164   : > { %11638 = vst [vmem:[#allocation65_spill] sm:$0xff] %v7072_v27  ;;  %2090 = vmatpush.msrb.mxu1 %v7087_v58  ;;  %v7090_v27 = vld [vmem:[#allocation8 + $0x30] sm:$0xff] }
 0x165   : > { %11639 = vst [vmem:[#allocation66_spill] sm:$0xff] %v7075_v33  ;;  %2580 = vmatpush.msrb.mxu2 %v7090_v27  ;;  %v7093_v33 = vld [vmem:[#allocation8 + $0x38] sm:$0xff] }
 0x166   : > { %11640 = vst [vmem:[#allocation67_spill] sm:$0xff] %v7078_v43  ;;  %2600 = vmatpush.msra.mxu3 %v7093_v33  ;;  %v7096_v43 = vld [vmem:[#allocation8 + $0x28] sm:$0xff] }
 0x167   : > { %11641 = vst [vmem:[#allocation68_spill] sm:$0xff] %v7081_v32  ;;  %2091 = vmatpush.msrb.mxu1 %v7096_v43  ;;  %v7099_v32 = vld [vmem:[#allocation8 + $0x18] sm:$0xff] }
 0x168   : > { %11642 = vst [vmem:[#allocation69_spill] sm:$0xff] %v7084_v22  ;;  %2581 = vmatpush.msrb.mxu2 %v7099_v32  ;;  %v7102_v22 = vld [vmem:[#allocation8 + $0x20] sm:$0xff] }
 0x169   : > { %11643 = vst [vmem:[#allocation70_spill] sm:$0xff] %v7087_v58  ;;  %2601 = vmatpush.msra.mxu3 %v7102_v22  ;;  %v7105_v58 = vld [vmem:[#allocation8 + $0x10] sm:$0xff] }
 0x16a   : > { %11644 = vst [vmem:[#allocation71_spill] sm:$0xff] %v7090_v27  ;;  %2092 = vmatpush.msrb.mxu1 %v7105_v58  ;;  %v7108_v27 = vld [vmem:[#allocation8] sm:$0xff] }
 0x16b   : > { %11645 = vst [vmem:[#allocation72_spill] sm:$0xff] %v7093_v33  ;;  %2582 = vmatpush.msrb.mxu2 %v7108_v27  ;;  %v7111_v33 = vld [vmem:[#allocation8 + $0x8] sm:$0xff] }
 0x16c   : > { %11646 = vst [vmem:[#allocation73_spill] sm:$0xff] %v7096_v43  ;;  %2602 = vmatpush.msra.mxu3 %v7111_v33 }
 0x16d   : > { %11647 = vst [vmem:[#allocation74_spill] sm:$0xff] %v7099_v32 }
 0x16e   : > { %11648 = vst [vmem:[#allocation75_spill] sm:$0xff] %v7102_v22 }
 0x16f   : > { %11649 = vst [vmem:[#allocation76_spill] sm:$0xff] %v7105_v58 }
 0x170   : > { %11650 = vst [vmem:[#allocation77_spill] sm:$0xff] %v7108_v27 }
 0x171   : > { %11651 = vst [vmem:[#allocation78_spill] sm:$0xff] %v7111_v33 }
 0x1c6   : > { %v994_v43 = vpop.f32.mrf.mxu1 }
 0x1c7   : > { %v1038_v30 = vrot.slane %v994_v43, 7  ;;  %v1039_v14 = vrot.slane %v994_v43, 1  ;;  %v1040_v32 = vrot.slane %v994_v43, 2  ;;  %v1041_v20 = vrot.slane %v994_v43, 3 }
 0x1c8   : > { %v1042_v51 = vrot.slane %v994_v43, 4  ;;  %v1043_v54 = vrot.slane %v994_v43, 5  ;;  %v1044_v22 = vrot.slane %v994_v43, 6  ;;  %v1054_v41 = vadd.f32 %v994_v43, %v6439_v2 }
 0x1c9   : > { %v1053_v58 = vadd.f32 %v1038_v30, %v6435_v0  ;;  %v1055_v31 = vadd.f32 %v1039_v14, %v6443_v4  ;;  %v1056_v27 = vadd.f32 %v1040_v32, %v6447_v6  ;;  %v1057_v63 = vadd.f32 %v1041_v20, %v6453_v9 }
 0x1ca   : > { %v1058_v49 = vadd.f32 %v1042_v51, %v6465_v29  ;;  %v1059_v62 = vadd.f32 %v1043_v54, %v6472_v39  ;;  %v4850_v21 = vmul.f32 -1.442695, %v1054_v41  ;;  %v1060_v16 = vadd.f32 %v1044_v22, %v6437_v1 }
 0x1cb   : > { %v4849_v56 = vmul.f32 -1.442695, %v1053_v58  ;;  %v4851_v10 = vmul.f32 -1.442695, %v1055_v31  ;;  %v4852_v43 = vmul.f32 -1.442695, %v1056_v27 }
 0x1cc   : > { %5125 = vpow2.f32 %v4850_v21  ;;  %v4853_v32 = vmul.f32 -1.442695, %v1057_v63  ;;  %v1014_v6 = vpop.f32.mrf.mxu2  ;;  %v4854_v33 = vmul.f32 -1.442695, %v1058_v49  ;;  %v4855_v54 = vmul.f32 -1.442695, %v1059_v62 }
 0x1cd   : > { %5127 = vpow2.f32 %v4849_v56  ;;  %v1214_v51 = vrot.slane %v1014_v6, 7  ;;  %v1215_v41 = vrot.slane %v1014_v6, 1  ;;  %v1216_v39 = vrot.slane %v1014_v6, 2 }
 0x1ce   : > { %5129 = vpow2.f32 %v4851_v10  ;;  %v4856_v58 = vmul.f32 -1.442695, %v1060_v16  ;;  %v1217_v31 = vrot.slane %v1014_v6, 3  ;;  %v1218_v21 = vrot.slane %v1014_v6, 4 }
 0x1cf   : > { %5131 = vpow2.f32 %v4852_v43  ;;  %v1229_v27 = vadd.f32 %v1214_v51, %v6445_v5  ;;  %v1219_v63 = vrot.slane %v1014_v6, 5  ;;  %v1220_v56 = vrot.slane %v1014_v6, 6 }
 0x1d0   : > { %5133 = vpow2.f32 %v4853_v32  ;;  %v1230_v49 = vadd.f32 %v1014_v6, %v6451_v8  ;;  %v1231_v62 = vadd.f32 %v1215_v41, %v6463_v25  ;;  %v1232_v16 = vadd.f32 %v1216_v39, %v6476_v42 }
 0x1d1   : > { %5135 = vpow2.f32 %v4854_v33  ;;  %v4857_v43 = vmul.f32 -1.442695, %v1229_v27  ;;  %v1233_v32 = vadd.f32 %v1217_v31, %v6522_v18  ;;  %v1234_v6 = vadd.f32 %v1218_v21, %v6602_v12 }
 0x1d2   : > { %v5126_v10 = vpop.eup %5125  ;;  %5137 = vpow2.f32 %v4855_v54  ;;  %v1235_v54 = vadd.f32 %v1219_v63, %v6647_v13  ;;  %v1236_v39 = vadd.f32 %v1220_v56, %v6441_v3 }
 0x1d3   : > { %v5128_v20 = vpop.eup %5127  ;;  %5139 = vpow2.f32 %v4856_v58  ;;  %v7132_v51 = vadd.f32 1.0, %v5126_v10  ;;  %v4858_v58 = vmul.f32 -1.442695, %v1230_v49  ;;  %v4860_v10 = vmul.f32 -1.442695, %v1232_v16 }
 0x1d4   : > { %v5130_v14 = vpop.eup %5129  ;;  %v7136_v33 = vadd.f32 1.0, %v5128_v20  ;;  %5141 = vpow2.f32 %v4857_v43  ;;  %v4859_v20 = vmul.f32 -1.442695, %v1231_v62  ;;  %v4861_v63 = vmul.f32 -1.442695, %v1233_v32 }
 0x1d5   : > { %v5132_v41 = vpop.eup %5131  ;;  %v7140_v30 = vadd.f32 1.0, %v5130_v14  ;;  %5143 = vrcp.f32 %v7132_v51  ;;  %v4862_v56 = vmul.f32 -1.442695, %v1234_v6  ;;  %v4863_v49 = vmul.f32 -1.442695, %v1235_v54 }
 0x1d6   : > { %v5134_v27 = vpop.eup %5133  ;;  %v7144_v31 = vadd.f32 1.0, %v5132_v41  ;;  %5145 = vrcp.f32 %v7136_v33  ;;  %v1104_v14 = vand.u32 2147483648, %v7136_v33  ;;  %v4864_v62 = vmul.f32 -1.442695, %v1236_v39 }
 0x1d7   : > { %v5136_v22 = vpop.eup %5135  ;;  %v7147_v21 = vadd.f32 1.0, %v5134_v27  ;;  %5147 = vrcp.f32 %v7140_v30  ;;  %v1119_v16 = vand.u32 2147483648, %v7132_v51  ;;  %v1117_v32 = vand.u32 2147483647, %v7132_v51 }
 0x1d8   : > { %v5138_v43 = vpop.eup %5137  ;;  %v7151_v13 = vadd.f32 1.0, %v5136_v22  ;;  %5149 = vrcp.f32 %v7144_v31  ;;  %v1102_v22 = vand.u32 2147483647, %v7136_v33  ;;  %vm1098_vm8 = vweird.f32 %v7136_v33 }
 0x1d9   : > { %v5140_v41 = vpop.eup %5139  ;;  %v7154_v3 = vadd.f32 1.0, %v5138_v43  ;;  %5151 = vrcp.f32 %v7147_v21  ;;  %v7167_v6 = vor.u32 1.1754944e-38, %v1104_v14  ;;  %vm1113_vm9 = vweird.f32 %v7132_v51 }
 0x1da   : > { %v5142_v27 = vpop.eup %5141  ;;  %v7158_v12 = vadd.f32 1.0, %v5140_v41  ;;  %5153 = vrcp.f32 %v7151_v13  ;;  %v1132_v54 = vand.u32 2147483647, %v7140_v30  ;;  %v1120_v42 = vor.u32 1.1754944e-38, %v1119_v16 }
 0x1db   : > { %v7163_v18 = vpop.eup %5143  ;;  %5155 = vrcp.f32 %v7154_v3  ;;  %v7174_v43 = vadd.f32 1.0, %v5142_v27  ;;  %vm1128_vm10 = vweird.f32 %v7140_v30  ;;  %v1134_v8 = vand.u32 2147483648, %v7140_v30 }
 0x1dc   : > { %v7171_v39 = vpop.eup %5145  ;;  %5157 = vrcp.f32 %v7158_v12  ;;  %v1109_v41 = vmul.f32 %v7163_v18, %v7132_v51  ;;  %vm1114_vm11 = vweird.f32 %v7163_v18  ;;  %vm7188_vm13 = vcmp.eq.f32.partialorder %v1102_v22, 8.507059e+37 }
 0x1dd   : > { %v7179_v25 = vpop.eup %5147  ;;  %5159 = vpow2.f32 %v4858_v58  ;;  %v1094_v14 = vmul.f32 %v7171_v39, %v7136_v33  ;;  %vm1099_vm12 = vweird.f32 %v7171_v39  ;;  %vm7192_vm14 = vcmp.eq.f32.partialorder %v1117_v32, 8.507059e+37  ;;  %vm7223_vm6 = vmor %vm1113_vm9, %vm1114_vm11 }
 0x1de   : > { %v7185_v5 = vpop.eup %5149  ;;  %5161 = vpow2.f32 %v4859_v20  ;;  %v1110_v16 = vsub.f32 1.0, %v1109_v41  ;;  %v1124_v58 = vmul.f32 %v7179_v25, %v7140_v30  ;;  %vm7200_vm15 = vcmp.eq.f32.partialorder %v1132_v54, 8.507059e+37  ;;  %vm7236_vm3 = vmor %vm1098_vm8, %vm1099_vm12 }
 0x1df   : > { %v7198_v29 = vpop.eup %5151  ;;  %5163 = vpow2.f32 %v4860_v10  ;;  %v1095_v9 = vsub.f32 1.0, %v1094_v14  ;;  %v1139_v22 = vmul.f32 %v7185_v5, %v7144_v31  ;;  %vm1129_vm0 = vweird.f32 %v7179_v25 }
 0x1e0   : > { %v7206_v2 = vpop.eup %5153  ;;  %5165 = vpow2.f32 %v4861_v63  ;;  %v1111_v32 = vmul.f32 %v7163_v18, %v1110_v16  ;;  %v1125_v41 = vsub.f32 1.0, %v1124_v58  ;;  %v1135_v54 = vor.u32 1.1754944e-38, %v1134_v8  ;;  %vm7253_vm8 = vmor %vm1128_vm10, %vm1129_vm0 }
 0x1e1   : > { %v7210_v0 = vpop.eup %5155  ;;  %5167 = vpow2.f32 %v4862_v56  ;;  %v1096_v10 = vmul.f32 %v7171_v39, %v1095_v9  ;;  %v1140_v14 = vsub.f32 1.0, %v1139_v22  ;;  %vm1143_vm7 = vweird.f32 %v7144_v31 }
 0x1e2   : > { %v7213_v4 = vpop.eup %5157  ;;  %5169 = vpow2.f32 %v4863_v49  ;;  %v1112_v59 = vadd.f32 %v7163_v18, %v1111_v32  ;;  %v1126_v48 = vmul.f32 %v7179_v25, %v1125_v41  ;;  %vm1144_vm5 = vweird.f32 %v7185_v5 }
 0x1e3   : > { %v5160_v63 = vpop.eup %5159  ;;  %5171 = vpow2.f32 %v4864_v62  ;;  %v1097_v16 = vadd.f32 %v7171_v39, %v1096_v10  ;;  %v1141_v9 = vmul.f32 %v7185_v5, %v1140_v14  ;;  %v1147_v14 = vand.u32 2147483647, %v7144_v31 }
 0x1e4   : > { %v5162_v56 = vpop.eup %5161  ;;  %v7229_v49 = vadd.f32 1.0, %v5160_v63  ;;  %5173 = vrcp.f32 %v7174_v43  ;;  %v1116_v51 = vsel %vm7223_vm6, %v7163_v18, %v1112_v59  ;;  %v1127_v58 = vadd.f32 %v7179_v25, %v1126_v48 }
 0x1e5   : > { %v5164_v22 = vpop.eup %5163  ;;  %v7244_v32 = vadd.f32 1.0, %v5162_v56  ;;  %v1101_v41 = vsel %vm7236_vm3, %v7171_v39, %v1097_v16  ;;  %v1142_v10 = vadd.f32 %v7185_v5, %v1141_v9  ;;  %v1149_v18 = vand.u32 2147483648, %v7144_v31  ;;  %vm7282_vm3 = vmor %vm1143_vm7, %vm1144_vm5 }
 0x1e6   : > { %v5166_v48 = vpop.eup %5165  ;;  %v7259_v59 = vadd.f32 1.0, %v5164_v22  ;;  %5175 = vrcp.f32 %v7229_v49  ;;  %v1131_v39 = vsel %vm7253_vm8, %v7179_v25, %v1127_v58  ;;  %v7272_v16 = vsel %vm7188_vm13, %v7167_v6, %v1101_v41 }
 0x1e7   : > { %v5168_v30 = vpop.eup %5167  ;;  %v7266_v63 = vadd.f32 1.0, %v5166_v48  ;;  %5177 = vrcp.f32 %v7244_v32  ;;  %v7276_v8 = vsel %vm7192_vm14, %v1120_v42, %v1116_v51  ;;  %v7291_v6 = vsel %vm7200_vm15, %v1135_v54, %v1131_v39 }
 0x1e8   : > { %v5170_v9 = vpop.eup %5169  ;;  %v7286_v56 = vadd.f32 1.0, %v5168_v30  ;;  %5179 = vrcp.f32 %v7259_v59  ;;  %v1146_v1 = vsel %vm7282_vm3, %v7185_v5, %v1142_v10  ;;  %v1150_v31 = vor.u32 1.1754944e-38, %v1149_v18 }
 0x1e9   : > { %v5172_v42 = vpop.eup %5171  ;;  %v7296_v27 = vadd.f32 1.0, %v5170_v9  ;;  %5181 = vrcp.f32 %v7266_v63  ;;  %v1154_v62 = vmul.f32 %v7198_v29, %v7147_v21  ;;  %vm1148_vm5 = vcmp.eq.f32.partialorder %v1147_v14, 8.507059e+37 }
 0x1ea   : > { %v7301_v51 = vpop.eup %5173  ;;  %v7303_v58 = vadd.f32 1.0, %v5172_v42  ;;  %5183 = vrcp.f32 %v7286_v56  ;;  %vm1158_vm6 = vweird.f32 %v7147_v21  ;;  %v7311_v20 = vsel %vm1148_vm5, %v1150_v31, %v1146_v1 }
 0x1eb   : > { %v7309_v5 = vmul.f32 %v7301_v51, %v7174_v43  ;;  %v1155_v54 = vsub.f32 1.0, %v1154_v62  ;;  %v1162_v22 = vand.u32 2147483647, %v7147_v21  ;;  %5185 = vrcp.f32 %v7296_v27 }
 0x1ec   : > { %v7314_v41 = vpop.eup %5175  ;;  %vm1159_vm7 = vweird.f32 %v7198_v29  ;;  %v1164_v33 = vand.u32 2147483648, %v7147_v21  ;;  %v1169_v10 = vmul.f32 %v7206_v2, %v7151_v13  ;;  %vm1173_vm9 = vweird.f32 %v7151_v13  ;;  %v1034_v21 = vpop.f32.mrf.mxu3 }
 0x1ed   : > { %v7321_v18 = vpop.eup %5177  ;;  %v7326_v39 = vmul.f32 %v7314_v41, %v7229_v49  ;;  %v1156_v14 = vmul.f32 %v7198_v29, %v1155_v54  ;;  %vm7332_vm10 = vcmp.eq.f32.partialorder %v1162_v22, 8.507059e+37  ;;  %v1177_v42 = vand.u32 2147483647, %v7151_v13  ;;  %vm1160_vm12 = vmor %vm1158_vm6, %vm1159_vm7 }
 0x1ee   : > { %v7330_v30 = vpop.eup %5179  ;;  %v1165_v9 = vor.u32 1.1754944e-38, %v1164_v33  ;;  %v1170_v1 = vsub.f32 1.0, %v1169_v10  ;;  %vm1174_vm11 = vweird.f32 %v7206_v2  ;;  %v1179_v54 = vand.u32 2147483648, %v7151_v13 }
 0x1ef   : > { %v7337_v31 = vpop.eup %5181  ;;  %v1157_v62 = vadd.f32 %v7198_v29, %v1156_v14  ;;  %v1184_v48 = vmul.f32 %v7210_v0, %v7154_v3  ;;  %vm7351_vm13 = vcmp.eq.f32.partialorder %v1177_v42, 8.507059e+37  ;;  %vm1188_vm14 = vweird.f32 %v7154_v3  ;;  %vm1175_vm0 = vmor %vm1173_vm9, %vm1174_vm11 }
 0x1f0   : > { %v7344_v26 = vpop.eup %5183  ;;  %v1171_v22 = vmul.f32 %v7206_v2, %v1170_v1  ;;  %v1192_v10 = vand.u32 2147483647, %v7154_v3  ;;  %vm1189_vm15 = vweird.f32 %v7210_v0  ;;  %v1194_v52 = vand.u32 2147483648, %v7154_v3 }
 0x1f1   : > { %v1161_v14 = vsel %vm1160_vm12, %v7198_v29, %v1157_v62  ;;  %v1185_v57 = vsub.f32 1.0, %v1184_v48  ;;  %v7360_v53 = vpop.eup %5185  ;;  %v1180_v46 = vor.u32 1.1754944e-38, %v1179_v54  ;;  %v1199_v60 = vmul.f32 %v7213_v4, %v7158_v12  ;;  %vm1190_vm6 = vmor %vm1188_vm14, %vm1189_vm15 }
 0x1f2   : > { %v1166_v1 = vsel %vm7332_vm10, %v1165_v9, %v1161_v14  ;;  %v1172_v42 = vadd.f32 %v7206_v2, %v1171_v22  ;;  %vm7372_vm8 = vcmp.eq.f32.partialorder %v1192_v10, 8.507059e+37  ;;  %v1195_v62 = vor.u32 1.1754944e-38, %v1194_v52 }
 0x1f3   : > { %v1186_v29 = vmul.f32 %v7210_v0, %v1185_v57  ;;  %vm1203_vm3 = vweird.f32 %v7158_v12  ;;  %v1200_v9 = vsub.f32 1.0, %v1199_v60  ;;  %v1207_v54 = vand.u32 2147483647, %v7158_v12  ;;  %v11675_v60 = vld [vmem:[#allocation33_spill] sm:$0xff] }
 0x1f4   : > { %v1176_v25 = vsel %vm1175_vm0, %v7206_v2, %v1172_v42  ;;  %v1209_v22 = vand.u32 2147483648, %v7158_v12  ;;  %vm1204_vm5 = vweird.f32 %v7213_v4  ;;  %v1390_v57 = vrot.slane %v1034_v21, 7 }
 0x1f5   : > { %v1181_v13 = vsel %vm7351_vm13, %v1180_v46, %v1176_v25  ;;  %v1187_v14 = vadd.f32 %v7210_v0, %v1186_v29  ;;  %v1201_v2 = vmul.f32 %v7213_v4, %v1200_v9  ;;  %vm7389_vm7 = vcmp.eq.f32.partialorder %v1207_v54, 8.507059e+37  ;;  %vm1205_vm9 = vmor %vm1203_vm3, %vm1204_vm5 }
 0x1f6   : > { %v1210_v52 = vor.u32 1.1754944e-38, %v1209_v22  ;;  %v1391_v10 = vrot.slane %v1034_v21, 1  ;;  %v1392_v33 = vrot.slane %v1034_v21, 2  ;;  %v1393_v42 = vrot.slane %v1034_v21, 3 }
 0x1f7   : > { %v1191_v46 = vsel %vm1190_vm6, %v7210_v0, %v1187_v14  ;;  %v1394_v29 = vrot.slane %v1034_v21, 4  ;;  %v1202_v44 = vadd.f32 %v7213_v4, %v1201_v2  ;;  %v1395_v3 = vrot.slane %v1034_v21, 5 }
 0x1f8   : > { %v1196_v25 = vsel %vm7372_vm8, %v1195_v62, %v1191_v46  ;;  %v1405_v47 = vmul.f32 %v1390_v57, %v7272_v16  ;;  %v1406_v9 = vmul.f32 %v7276_v8, %v1034_v21  ;;  %v1407_v0 = vmul.f32 %v1391_v10, %v7291_v6 }
 0x1f9   : > { %v1408_v54 = vmul.f32 %v1392_v33, %v7311_v20  ;;  %v1409_v22 = vmul.f32 %v1393_v42, %v1166_v1  ;;  %v1206_v48 = vsel %vm1205_vm9, %v7213_v4, %v1202_v44  ;;  %v1396_v62 = vrot.slane %v1034_v21, 6 }
 0x1fa   : > { %v1410_v14 = vmul.f32 %v1394_v29, %v1181_v13  ;;  %v1413_v2 = vadd.f32 %v1405_v47, %v6449_v7  ;;  %v1211_v16 = vsel %vm7389_vm7, %v1210_v52, %v1206_v48  ;;  %v1411_v57 = vmul.f32 %v1395_v3, %v1196_v25 }
 0x1fb   : > { %v1414_v12 = vadd.f32 %v1406_v9, %v6455_v11  ;;  %v1415_v46 = vadd.f32 %v1407_v0, %v6468_v35  ;;  %5187 = vrcp.f32 %v7303_v58  ;;  %v7412_v8 = vmul.f32 %v1396_v62, %v1211_v16 }
 0x1fc   : > { %v1416_v6 = vadd.f32 %v1408_v54, %v6504_v61  ;;  %v1417_v4 = vadd.f32 %v1409_v22, %v6573_v15  ;;  %v1418_v44 = vadd.f32 %v1410_v14, %v6631_v38  ;;  %5189 = vtanh.f32 %v1413_v2 }
 0x1fd   : > { %v11674_v47 = vsub.f32 1.0, %v7309_v5  ;;  %vm1275_vm10 = vweird.f32 %v7301_v51  ;;  %5191 = vtanh.f32 %v1414_v12  ;;  %v1278_v21 = vand.u32 2147483647, %v7174_v43 }
 0x1fe   : > { %v1280_v1 = vand.u32 2147483648, %v7174_v43  ;;  %v1286_v13 = vsub.f32 1.0, %v7326_v39  ;;  %v7425_v52 = vadd.f32 %v1411_v57, %v11675_v60  ;;  %5193 = vtanh.f32 %v1415_v46 }
 0x1ff   : > { %v1272_v20 = vmul.f32 %v7301_v51, %v11674_v47  ;;  %vm1274_vm11 = vweird.f32 %v7174_v43  ;;  %5195 = vtanh.f32 %v1416_v6  ;;  %vm1289_vm13 = vweird.f32 %v7229_v49 }
 0x200   : > { %vm7429_vm12 = vmor %vm1274_vm11, %vm1275_vm10  ;;  %v1287_v33 = vmul.f32 %v7314_v41, %v1286_v13  ;;  %vm1290_vm14 = vweird.f32 %v7314_v41  ;;  %v1281_v42 = vor.u32 1.1754944e-38, %v1280_v1  ;;  %v1293_v29 = vand.u32 2147483647, %v7229_v49 }
 0x201   : > { %v1273_v10 = vadd.f32 %v7301_v51, %v1272_v20  ;;  %v1295_v43 = vand.u32 2147483648, %v7229_v49  ;;  %v7441_v25 = vpop.eup %5187  ;;  %5197 = vtanh.f32 %v1417_v4  ;;  %vm1279_vm15 = vcmp.eq.f32.partialorder %v1278_v21, 8.507059e+37  ;;  %vm1291_vm0 = vmor %vm1289_vm13, %vm1290_vm14 }
 0x202   : > { %v1288_v3 = vadd.f32 %v7314_v41, %v1287_v33  ;;  %v1300_v9 = vmul.f32 %v7321_v18, %v7244_v32  ;;  %v7446_v0 = vpop.eup %5189  ;;  %5199 = vtanh.f32 %v1418_v44  ;;  %vm1294_vm8 = vcmp.eq.f32.partialorder %v1293_v29, 8.507059e+37 }
 0x203   : > { %v1277_v39 = vsel %vm7429_vm12, %v7301_v51, %v1273_v10  ;;  %v1296_v51 = vor.u32 1.1754944e-38, %v1295_v43  ;;  %v7450_v22 = vpop.eup %5191  ;;  %v1308_v62 = vand.u32 2147483647, %v7244_v32  ;;  %v1310_v14 = vand.u32 2147483648, %v7244_v32 }
 0x204   : > { %v7448_v54 = vsel %vm1279_vm15, %v1281_v42, %v1277_v39  ;;  %v1292_v49 = vsel %vm1291_vm0, %v7314_v41, %v1288_v3  ;;  %v1301_v48 = vsub.f32 1.0, %v1300_v9  ;;  %v7455_v2 = vpop.eup %5193  ;;  %vm1304_vm3 = vweird.f32 %v7244_v32 }
 0x205   : > { %v7457_v16 = vsel %vm1294_vm8, %v1296_v51, %v1292_v49  ;;  %vm1305_vm5 = vweird.f32 %v7321_v18  ;;  %v1315_v57 = vmul.f32 %v7330_v30, %v7259_v59  ;;  %v7463_v12 = vpop.eup %5195  ;;  %vm1319_vm6 = vweird.f32 %v7259_v59 }
 0x206   : > { %v1302_v41 = vmul.f32 %v7321_v18, %v1301_v48  ;;  %vm1320_vm7 = vweird.f32 %v7330_v30  ;;  %v1323_v46 = vand.u32 2147483647, %v7259_v59  ;;  %vm7469_vm9 = vcmp.eq.f32.partialorder %v1308_v62, 8.507059e+37  ;;  %vm1306_vm11 = vmor %vm1304_vm3, %vm1305_vm5 }
 0x207   : > { %v1316_v4 = vsub.f32 1.0, %v1315_v57  ;;  %v1325_v44 = vand.u32 2147483648, %v7259_v59  ;;  %v1330_v47 = vmul.f32 %v7337_v31, %v7266_v63  ;;  %v7476_v20 = vpop.eup %5197  ;;  %v1311_v1 = vor.u32 1.1754944e-38, %v1310_v14  ;;  %vm1321_vm0 = vmor %vm1319_vm6, %vm1320_vm7 }
 0x208   : > { %v1303_v21 = vadd.f32 %v7321_v18, %v1302_v41  ;;  %vm1334_vm10 = vweird.f32 %v7266_v63  ;;  %v1338_v13 = vand.u32 2147483647, %v7266_v63  ;;  %v7481_v10 = vpop.eup %5199  ;;  %vm7488_vm12 = vcmp.eq.f32.partialorder %v1323_v46, 8.507059e+37 }
 0x209   : > { %v1317_v5 = vmul.f32 %v7330_v30, %v1316_v4  ;;  %v1331_v39 = vsub.f32 1.0, %v1330_v47  ;;  %v1340_v42 = vand.u32 2147483648, %v7266_v63  ;;  %v1326_v43 = vor.u32 1.1754944e-38, %v1325_v44 }
 0x20a   : > { %v1307_v29 = vsel %vm1306_vm11, %v7321_v18, %v1303_v21  ;;  %vm1335_vm13 = vweird.f32 %v7337_v31  ;;  %v1345_v3 = vmul.f32 %v7344_v26, %v7286_v56  ;;  %vm7499_vm14 = vcmp.eq.f32.partialorder %v1338_v13, 8.507059e+37 }
 0x20b   : > { %v1318_v32 = vadd.f32 %v7330_v30, %v1317_v5  ;;  %v1332_v9 = vmul.f32 %v7337_v31, %v1331_v39  ;;  %vm1349_vm15 = vweird.f32 %v7286_v56  ;;  %v7506_v49 = vsel %vm7469_vm9, %v1311_v1, %v1307_v29  ;;  %vm1336_vm8 = vmor %vm1334_vm10, %vm1335_vm13 }
 0x20c   : > { %v1346_v18 = vsub.f32 1.0, %v1345_v3  ;;  %v1353_v48 = vand.u32 2147483647, %v7286_v56  ;;  %v1355_v62 = vand.u32 2147483648, %v7286_v56  ;;  %v1341_v41 = vor.u32 1.1754944e-38, %v1340_v42  ;;  %v11688_v3 = vld [vmem:[#allocation34_spill] sm:$0xff] }
 0x20d   : > { %v1322_v14 = vsel %vm1321_vm0, %v7330_v30, %v1318_v32  ;;  %v1333_v57 = vadd.f32 %v7337_v31, %v1332_v9  ;;  %v1360_v46 = vmul.f32 %v7360_v53, %v7296_v27  ;;  %vm1350_vm3 = vweird.f32 %v7344_v26 }
 0x20e   : > { %v1327_v6 = vsel %vm7488_vm12, %v1326_v43, %v1322_v14  ;;  %v1347_v59 = vmul.f32 %v7344_v26, %v1346_v18  ;;  %vm1364_vm5 = vweird.f32 %v7296_v27  ;;  %vm7528_vm6 = vcmp.eq.f32.partialorder %v1353_v48, 8.507059e+37  ;;  %vm1351_vm7 = vmor %vm1349_vm15, %vm1350_vm3 }
 0x20f   : > { %v1337_v30 = vsel %vm1336_vm8, %v7337_v31, %v1333_v57  ;;  %v1361_v44 = vsub.f32 1.0, %v1360_v46  ;;  %v1368_v47 = vand.u32 2147483647, %v7296_v27  ;;  %v1356_v1 = vor.u32 1.1754944e-38, %v1355_v62 }
 0x210   : > { %v1348_v21 = vadd.f32 %v7344_v26, %v1347_v59  ;;  %v1370_v63 = vand.u32 2147483648, %v7296_v27  ;;  %v1375_v13 = vmul.f32 %v7441_v25, %v7303_v58  ;;  %v1342_v5 = vsel %vm7499_vm14, %v1341_v41, %v1337_v30 }
 0x211   : > { %v1362_v31 = vmul.f32 %v7360_v53, %v1361_v44  ;;  %vm1365_vm9 = vweird.f32 %v7360_v53  ;;  %vm7543_vm10 = vcmp.eq.f32.partialorder %v1368_v47, 8.507059e+37  ;;  %vm1379_vm11 = vweird.f32 %v7303_v58 }
 0x212   : > { %v1352_v39 = vsel %vm1351_vm7, %v7344_v26, %v1348_v21  ;;  %v1376_v42 = vsub.f32 1.0, %v1375_v13  ;;  %v1383_v29 = vand.u32 2147483647, %v7303_v58  ;;  %vm1380_vm12 = vweird.f32 %v7441_v25  ;;  %vm1366_vm13 = vmor %vm1364_vm5, %vm1365_vm9 }
 0x213   : > { %v1363_v43 = vadd.f32 %v7360_v53, %v1362_v31  ;;  %v1385_v56 = vand.u32 2147483648, %v7303_v58  ;;  %v1420_v32 = vadd.f32 %v7412_v8, %v11688_v3  ;;  %v1357_v9 = vsel %vm7528_vm6, %v1356_v1, %v1352_v39  ;;  %vm1381_vm15 = vmor %vm1379_vm11, %vm1380_vm12 }
 0x214   : > { %v1371_v26 = vor.u32 1.1754944e-38, %v1370_v63  ;;  %v1377_v51 = vmul.f32 %v7441_v25, %v1376_v42  ;;  %5201 = vtanh.f32 %v7425_v52  ;;  %vm7562_vm14 = vcmp.eq.f32.partialorder %v1383_v29, 8.507059e+37 }
 0x215   : > { %v1367_v18 = vsel %vm1366_vm13, %v7360_v53, %v1363_v43  ;;  %5203 = vtanh.f32 %v1420_v32  ;;  %v1429_v8 = vsub.f32 1.0, %v7448_v54  ;;  %v1386_v14 = vor.u32 1.1754944e-38, %v1385_v56 }
 0x216   : > { %v1372_v62 = vsel %vm7543_vm10, %v1371_v26, %v1367_v18  ;;  %v1378_v27 = vadd.f32 %v7441_v25, %v1377_v51  ;;  %v1430_v57 = vsub.f32 1.0, %v7457_v16  ;;  %v1431_v53 = vsub.f32 1.0, %v7506_v49 }
 0x217   : > { %v1432_v52 = vsub.f32 1.0, %v1327_v6  ;;  %v1433_v41 = vsub.f32 1.0, %v1342_v5  ;;  %v1434_v46 = vsub.f32 1.0, %v1357_v9  ;;  %v1435_v30 = vsub.f32 1.0, %v1372_v62 }
 0x218   : > { %v1382_v59 = vsel %vm1381_vm15, %v7441_v25, %v1378_v27  ;;  %v1437_v4 = vmul.f32 %v7446_v0, %v1429_v8  ;;  %v1438_v44 = vmul.f32 %v7450_v22, %v1430_v57  ;;  %v1439_v21 = vmul.f32 %v7455_v2, %v1431_v53 }
 0x219   : > { %v1387_v47 = vsel %vm7562_vm14, %v1386_v14, %v1382_v59  ;;  %v1440_v58 = vmul.f32 %v7463_v12, %v1432_v52  ;;  %v1441_v1 = vmul.f32 %v7476_v20, %v1433_v41  ;;  %v1442_v31 = vmul.f32 %v7481_v10, %v1434_v46  ;;  %v11703_v59 = vld [vmem:[#allocation35_spill] sm:$0xff] }
 0x21a   : > { %v5202_v63 = vpop.eup %5201  ;;  %v1436_v13 = vsub.f32 1.0, %v1387_v47  ;;  %v11691_v25 = vrot.slane %v6921_v28, 7  ;;  %v11692_v0 = vrot.slane %v6923_v40, 7  ;;  %v11693_v2 = vrot.slane %v6925_v45, 7 }
 0x21b   : > { %v5204_v39 = vpop.eup %5203  ;;  %v1443_v42 = vmul.f32 %v5202_v63, %v1435_v30  ;;  %v11694_v20 = vrot.slane %v6927_v23, 7  ;;  %v11695_v10 = vrot.slane %v6929_v50, 7  ;;  %v11697_v32 = vrot.slane %v6939_v24, 7  ;;  %v11704_v30 = vld [vmem:[#allocation36_spill] sm:$0xff]  ;;  %v11715_v63 = vld [vmem:[#allocation47_spill] sm:$0xff] }
 0x21c   : > { %v1460_v33 = vmul.f32 %v11691_v25, %v7448_v54  ;;  %v1461_v22 = vmul.f32 %v7457_v16, %v11692_v0  ;;  %v1462_v12 = vmul.f32 %v11693_v2, %v7506_v49  ;;  %v1444_v28 = vmul.f32 %v5204_v39, %v1436_v13  ;;  %v11716_v13 = vld [vmem:[#allocation48_spill] sm:$0xff]  ;;  %v11718_v25 = vld [vmem:[#allocation50_spill] sm:$0xff] }
 0x21d   : > { %v1463_v29 = vmul.f32 %v11694_v20, %v1327_v6  ;;  %v1464_v43 = vmul.f32 %v11695_v10, %v1342_v5  ;;  %v11696_v54 = vrot.slane %v6933_v55, 7  ;;  %v1466_v45 = vmul.f32 %v11697_v32, %v1372_v62  ;;  %v11720_v0 = vld [vmem:[#allocation52_spill] sm:$0xff]  ;;  %v11722_v39 = vld [vmem:[#allocation54_spill] sm:$0xff]  ;;  %v11733_v32 = vld [vmem:[#allocation65_spill] sm:$0xff] }
 0x21e   : > { %v7600_v16 = vadd.f32 %v1460_v33, %v1437_v4  ;;  %v7602_v56 = vadd.f32 %v1461_v22, %v1438_v44  ;;  %v7606_v49 = vadd.f32 %v1462_v12, %v1439_v21  ;;  %v11698_v6 = vrot.slane %v6943_v34, 7  ;;  %v11705_v4 = vld [vmem:[#allocation37_spill] sm:$0xff]  ;;  %v11706_v44 = vld [vmem:[#allocation38_spill] sm:$0xff]  ;;  %v11708_v21 = vld [vmem:[#allocation40_spill] sm:$0xff] }
 0x21f   : > { %v1465_v40 = vmul.f32 %v11696_v54, %v1357_v9  ;;  %v7608_v23 = vadd.f32 %v1463_v29, %v1440_v58  ;;  %v7610_v50 = vadd.f32 %v1464_v43, %v1441_v1  ;;  %v7619_v24 = vadd.f32 %v1466_v45, %v1443_v42  ;;  %v11709_v58 = vld [vmem:[#allocation41_spill] sm:$0xff]  ;;  %v11714_v1 = vld [vmem:[#allocation46_spill] sm:$0xff]  ;;  %v11719_v33 = vld [vmem:[#allocation51_spill] sm:$0xff] }
 0x220   : > { %v1467_v55 = vmul.f32 %v11698_v6, %v1387_v47  ;;  %1476 = vst [vmem:[%s6102_s23] sm:$0x2] %v7600_v16  ;;  %v1492_v9 = vrot.slane %v7600_v16, 1  ;;  %v11455_v26 = vrot.slane %v7606_v49, 7  ;;  %vm11699_vm0 = vcmask 1044484   ;;  %v11707_v47 = vld [vmem:[#allocation39_spill] sm:$0xff]  ;;  %v11721_v22 = vld [vmem:[#allocation53_spill] sm:$0xff] }
 0x221   : > { %v7614_v5 = vadd.f32 %v1465_v40, %v1442_v31  ;;  %1477 = vst [vmem:[%s6102_s23 + $0x8] sm:$0x2] %v7602_v56  ;;  %v1496_v18 = vrot.slane %v7608_v23, 6  ;;  %v1498_v8 = vrot.slane %v7610_v50, 5  ;;  %v1502_v57 = vrot.slane %v7619_v24, 3  ;;  %v11717_v31 = vld [vmem:[#allocation49_spill] sm:$0xff] }
 0x222   : > { %v7624_v51 = vadd.f32 %v1467_v55, %v1444_v28  ;;  %1478 = vst [vmem:[%s6102_s23 + $0x10] sm:$0x2] %v7606_v49  ;;  %v1493_v34 = vsel %vm11527_vm1, %v7602_v56, %v1492_v9  ;;  %vm11700_vm8 = vcmask 1045509   ;;  %vm11701_vm3 = vcmask 1046534   ;;  %v11723_v42 = vld [vmem:[#allocation55_spill] sm:$0xff]  ;;  %v11724_v2 = vld [vmem:[#allocation56_spill] sm:$0xff] }
 0x223   : > { %1479 = vst [vmem:[%s6102_s23 + $0x18] sm:$0x2] %v7608_v23  ;;  %v1495_v48 = vsel %vm11526_vm4, %v11455_v26, %v1493_v34  ;;  %v1500_v27 = vrot.slane %v7614_v5, 4  ;;  %vm11702_vm5 = vcmask 1047559   ;;  %v11725_v12 = vld [vmem:[#allocation57_spill] sm:$0xff]  ;;  %v11726_v20 = vld [vmem:[#allocation58_spill] sm:$0xff] }
 0x224   : > { %1480 = vst [vmem:[%s6102_s23 + $0x20] sm:$0x2] %v7610_v50  ;;  %v1497_v62 = vsel %vm11525_vm2, %v1496_v18, %v1495_v48  ;;  %v1504_v52 = vrot.slane %v7624_v51, 2  ;;  %v11727_v29 = vld [vmem:[#allocation59_spill] sm:$0xff]  ;;  %v11728_v10 = vld [vmem:[#allocation60_spill] sm:$0xff]  ;;  %v11729_v43 = vld [vmem:[#allocation61_spill] sm:$0xff] }
 0x225   : > { %1481 = vst [vmem:[%s6102_s23 + $0x28] sm:$0x2] %v7614_v5  ;;  %v1499_v14 = vsel %vm11699_vm0, %v1498_v8, %v1497_v62  ;;  %v11730_v28 = vld [vmem:[#allocation62_spill] sm:$0xff]  ;;  %v11731_v54 = vld [vmem:[#allocation63_spill] sm:$0xff]  ;;  %v11732_v40 = vld [vmem:[#allocation64_spill] sm:$0xff] }
 0x226   : > { %1482 = vst [vmem:[%s6102_s23 + $0x30] sm:$0x2] %v7619_v24  ;;  %v1501_v53 = vsel %vm11700_vm8, %v1500_v27, %v1499_v14  ;;  %v11734_v45 = vld [vmem:[#allocation66_spill] sm:$0xff]  ;;  %v11735_v6 = vld [vmem:[#allocation67_spill] sm:$0xff]  ;;  %v11736_v55 = vld [vmem:[#allocation68_spill] sm:$0xff] }
 0x227   : > { %1483 = vst [vmem:[%s6102_s23 + $0x38] sm:$0x2] %v7624_v51  ;;  %v1503_v41 = vsel %vm11701_vm3, %v1502_v57, %v1501_v53  ;;  %v11737_v9 = vld [vmem:[#allocation69_spill] sm:$0xff]  ;;  %v11738_v34 = vld [vmem:[#allocation70_spill] sm:$0xff]  ;;  %v11739_v18 = vld [vmem:[#allocation71_spill] sm:$0xff] }
 0x228   : > { %v1505_v46 = vsel %vm11702_vm5, %v1504_v52, %v1503_v41  ;;  %v11740_v48 = vld [vmem:[#allocation72_spill] sm:$0xff]  ;;  %v11741_v8 = vld [vmem:[#allocation73_spill] sm:$0xff]  ;;  %v11742_v62 = vld [vmem:[#allocation74_spill] sm:$0xff] }
 0x229   : > { %1523 = vmatmul.f32.vlgmr.msra.gmra.mxu0 %v1505_v46  ;;  %1543 = vmatmul.f32.vlgmr.msra.gmra.mxu1 %v1505_v46  ;;  %v11743_v27 = vld [vmem:[#allocation75_spill] sm:$0xff]  ;;  %v11744_v14 = vld [vmem:[#allocation76_spill] sm:$0xff]  ;;  %v11745_v57 = vld [vmem:[#allocation77_spill] sm:$0xff] }
 0x22a   : > { %1563 = vmatmul.f32.vlgmr.msra.gmra.mxu2 %v1505_v46  ;;  %2607 = vmatpush.msra.mxu0 %v6970_v19  ;;  %v11710_v19 = vld [vmem:[#allocation42_spill] sm:$0xff] }
 0x22b   : > { %3097 = vmatpush.msra.mxu1 %v6973_v37  ;;  %3117 = vmatpush.msra.mxu2 %v6976_v17  ;;  %v11711_v37 = vld [vmem:[#allocation43_spill] sm:$0xff]  ;;  %v11712_v17 = vld [vmem:[#allocation44_spill] sm:$0xff]  ;;  %v11746_v53 = vld [vmem:[#allocation78_spill] sm:$0xff] }
 0x22c   : > { %2608 = vmatpush.msra.mxu0 %v6979_v36  ;;  %v11713_v36 = vld [vmem:[#allocation45_spill] sm:$0xff] }
 0x22d   : > { %3098 = vmatpush.msra.mxu1 %v11703_v59  ;;  %3118 = vmatpush.msra.mxu2 %v11704_v30 }
 0x22e   : > { %2609 = vmatpush.msra.mxu0 %v11705_v4 }
 0x22f   : > { %3099 = vmatpush.msra.mxu1 %v11706_v44  ;;  %3119 = vmatpush.msra.mxu2 %v11707_v47 }
 0x230   : > { %2610 = vmatpush.msra.mxu0 %v11708_v21 }
 0x231   : > { %3100 = vmatpush.msra.mxu1 %v11709_v58  ;;  %3120 = vmatpush.msra.mxu2 %v11710_v19  ;;  %v11747_v58 = vld [vmem:[#allocation17_spill] sm:$0xff] }
 0x232   : > { %2611 = vmatpush.msra.mxu0 %v11711_v37  ;;  %v11748_v37 = vld [vmem:[#allocation13_spill] sm:$0xff] }
 0x233   : > { %3101 = vmatpush.msra.mxu1 %v11712_v17  ;;  %3121 = vmatpush.msra.mxu2 %v11713_v36  ;;  %v11749_v36 = vld [vmem:[#allocation15_spill] sm:$0xff] }
 0x234   : > { %2612 = vmatpush.msra.mxu0 %v11714_v1 }
 0x235   : > { %3102 = vmatpush.msra.mxu1 %v11715_v63  ;;  %3122 = vmatpush.msra.mxu2 %v11716_v13  ;;  %v11750_v63 = vld [vmem:[#allocation19_spill] sm:$0xff] }
 0x236   : > { %2613 = vmatpush.msra.mxu0 %v11717_v31  ;;  %v11751_v31 = vld [vmem:[#allocation21_spill] sm:$0xff] }
 0x237   : > { %3103 = vmatpush.msra.mxu1 %v11718_v25  ;;  %3123 = vmatpush.msra.mxu2 %v11719_v33  ;;  %v11752_v33 = vld [vmem:[#allocation23_spill] sm:$0xff] }
 0x238   : > { %2614 = vmatpush.msra.mxu0 %v11720_v0 }
 0x239   : > { %3104 = vmatpush.msra.mxu1 %v11721_v22  ;;  %3124 = vmatpush.msra.mxu2 %v11722_v39  ;;  %v11753_v22 = vld [vmem:[#allocation25_spill] sm:$0xff] }
 0x23a   : > { %2615 = vmatpush.msra.mxu0 %v11723_v42  ;;  %v11754_v42 = vld [vmem:[#allocation14_spill] sm:$0xff] }
 0x23b   : > { %3105 = vmatpush.msra.mxu1 %v11724_v2  ;;  %3125 = vmatpush.msra.mxu2 %v11725_v12 }
 0x23c   : > { %2616 = vmatpush.msra.mxu0 %v11726_v20 }
 0x23d   : > { %3106 = vmatpush.msra.mxu1 %v11727_v29  ;;  %3126 = vmatpush.msra.mxu2 %v11728_v10 }
 0x23e   : > { %2617 = vmatpush.msra.mxu0 %v11729_v43 }
 0x23f   : > { %3107 = vmatpush.msra.mxu1 %v11730_v28  ;;  %3127 = vmatpush.msra.mxu2 %v11731_v54 }
 0x240   : > { %2618 = vmatpush.msra.mxu0 %v11732_v40 }
 0x241   : > { %3108 = vmatpush.msra.mxu1 %v11733_v32  ;;  %3128 = vmatpush.msra.mxu2 %v11734_v45 }
 0x242   : > { %2619 = vmatpush.msra.mxu0 %v11735_v6 }
 0x243   : > { %3109 = vmatpush.msra.mxu1 %v11736_v55  ;;  %3129 = vmatpush.msra.mxu2 %v11737_v9 }
 0x244   : > { %2620 = vmatpush.msra.mxu0 %v11738_v34 }
 0x245   : > { %3110 = vmatpush.msra.mxu1 %v11739_v18  ;;  %3130 = vmatpush.msra.mxu2 %v11740_v48 }
 0x246   : > { %2621 = vmatpush.msra.mxu0 %v11741_v8  ;;  %v11755_v8 = vld [vmem:[#allocation18_spill] sm:$0xff] }
 0x247   : > { %3111 = vmatpush.msra.mxu1 %v11742_v62  ;;  %3131 = vmatpush.msra.mxu2 %v11743_v27 }
 0x248   : > { %2622 = vmatpush.msra.mxu0 %v11744_v14 }
 0x249   : > { %3112 = vmatpush.msra.mxu1 %v11745_v57  ;;  %3132 = vmatpush.msra.mxu2 %v11746_v53 }
 0x2a6   : > { %v1524_v41 = vpop.f32.mrf.mxu0  ;;  %v1544_v20 = vpop.f32.mrf.mxu1 }
 0x2a7   : > { %v1568_v46 = vrot.slane %v1524_v41, 6  ;;  %v1569_v59 = vrot.slane %v1524_v41, 7  ;;  %v1570_v30 = vrot.slane %v1524_v41, 1  ;;  %v1571_v4 = vrot.slane %v1524_v41, 2 }
 0x2a8   : > { %v1572_v44 = vrot.slane %v1524_v41, 3  ;;  %v1573_v47 = vrot.slane %v1524_v41, 4  ;;  %v1574_v21 = vrot.slane %v1524_v41, 5  ;;  %v1585_v19 = vadd.f32 %v1524_v41, %v11747_v58  ;;  %v11756_v41 = vld [vmem:[#allocation20_spill] sm:$0xff] }
 0x2a9   : > { %v1583_v17 = vadd.f32 %v1568_v46, %v11748_v37  ;;  %v1584_v1 = vadd.f32 %v1569_v59, %v11749_v36  ;;  %v1586_v13 = vadd.f32 %v1570_v30, %v11750_v63  ;;  %v1587_v25 = vadd.f32 %v1571_v4, %v11751_v31  ;;  %v11757_v4 = vld [vmem:[#allocation22_spill] sm:$0xff] }
 0x2aa   : > { %v1588_v0 = vadd.f32 %v1572_v44, %v11752_v33  ;;  %v1589_v39 = vadd.f32 %v1573_v47, %v11753_v22  ;;  %v1590_v2 = vadd.f32 %v1574_v21, %v11754_v42  ;;  %v4867_v12 = vmul.f32 -1.442695, %v1585_v19  ;;  %v11758_v47 = vld [vmem:[#allocation26_spill] sm:$0xff] }
 0x2ab   : > { %v4865_v29 = vmul.f32 -1.442695, %v1583_v17  ;;  %v4866_v10 = vmul.f32 -1.442695, %v1584_v1  ;;  %v4868_v43 = vmul.f32 -1.442695, %v1586_v13  ;;  %v1761_v44 = vadd.f32 %v1544_v20, %v11757_v4 }
 0x2ac   : > { %5205 = vpow2.f32 %v4867_v12  ;;  %v4869_v28 = vmul.f32 -1.442695, %v1587_v25  ;;  %v4870_v32 = vmul.f32 -1.442695, %v1588_v0  ;;  %v1744_v45 = vrot.slane %v1544_v20, 6  ;;  %v11759_v13 = vld [vmem:[#allocation28_spill] sm:$0xff] }
 0x2ad   : > { %5207 = vpow2.f32 %v4865_v29  ;;  %v1745_v6 = vrot.slane %v1544_v20, 7  ;;  %v4871_v55 = vmul.f32 -1.442695, %v1589_v39  ;;  %v4872_v9 = vmul.f32 -1.442695, %v1590_v2  ;;  %v11760_v0 = vld [vmem:[#allocation30_spill] sm:$0xff] }
 0x2ae   : > { %5209 = vpow2.f32 %v4866_v10  ;;  %v1746_v34 = vrot.slane %v1544_v20, 1  ;;  %v1747_v18 = vrot.slane %v1544_v20, 2  ;;  %v1748_v48 = vrot.slane %v1544_v20, 3  ;;  %v11761_v29 = vld [vmem:[#allocation32_spill] sm:$0xff] }
 0x2af   : > { %5211 = vpow2.f32 %v4868_v43  ;;  %v1759_v62 = vadd.f32 %v1744_v45, %v11755_v8  ;;  %v1749_v27 = vrot.slane %v1544_v20, 4  ;;  %v1750_v53 = vrot.slane %v1544_v20, 5 }
 0x2b0   : > { %5213 = vpow2.f32 %v4869_v28  ;;  %v1760_v46 = vadd.f32 %v1745_v6, %v11756_v41  ;;  %v1762_v21 = vadd.f32 %v1746_v34, %v11758_v47  ;;  %v1763_v25 = vadd.f32 %v1747_v18, %v11759_v13 }
 0x2b1   : > { %5215 = vpow2.f32 %v4870_v32  ;;  %v4873_v19 = vmul.f32 -1.442695, %v1759_v62  ;;  %v1764_v39 = vadd.f32 %v1748_v48, %v11760_v0  ;;  %v1765_v10 = vadd.f32 %v1749_v27, %v11761_v29  ;;  %v11762_v32 = vld [vmem:[#allocation16_spill] sm:$0xff]  ;;  %v1564_v29 = vpop.f32.mrf.mxu2 }
 0x2b2   : > { %v5206_v30 = vpop.eup %5205  ;;  %5217 = vpow2.f32 %v4871_v55  ;;  %v1766_v45 = vadd.f32 %v1750_v53, %v11762_v32  ;;  %v4874_v6 = vmul.f32 -1.442695, %v1760_v46  ;;  %v4875_v34 = vmul.f32 -1.442695, %v1761_v44 }
 0x2b3   : > { %v5208_v17 = vpop.eup %5207  ;;  %5219 = vpow2.f32 %v4872_v9  ;;  %v7719_v1 = vadd.f32 1.0, %v5206_v30  ;;  %v4876_v18 = vmul.f32 -1.442695, %v1762_v21  ;;  %v4877_v27 = vmul.f32 -1.442695, %v1763_v25 }
 0x2b4   : > { %v5210_v2 = vpop.eup %5209  ;;  %v7723_v12 = vadd.f32 1.0, %v5208_v17  ;;  %5221 = vpow2.f32 %v4873_v19  ;;  %v4878_v30 = vmul.f32 -1.442695, %v1764_v39  ;;  %v4879_v53 = vmul.f32 -1.442695, %v1765_v10 }
 0x2b5   : > { %v5212_v20 = vpop.eup %5211  ;;  %v7727_v28 = vadd.f32 1.0, %v5210_v2  ;;  %5223 = vrcp.f32 %v7719_v1  ;;  %v4880_v44 = vmul.f32 -1.442695, %v1766_v45  ;;  %vm1658_vm6 = vweird.f32 %v7719_v1 }
 0x2b6   : > { %v5214_v55 = vpop.eup %5213  ;;  %v7731_v9 = vadd.f32 1.0, %v5212_v20  ;;  %5225 = vrcp.f32 %v7723_v12  ;;  %v1634_v46 = vand.u32 2147483648, %v7723_v12  ;;  %v1632_v25 = vand.u32 2147483647, %v7723_v12 }
 0x2b7   : > { %v5216_v48 = vpop.eup %5215  ;;  %v7734_v62 = vadd.f32 1.0, %v5214_v55  ;;  %5227 = vrcp.f32 %v7727_v28  ;;  %v1649_v21 = vand.u32 2147483648, %v7727_v28  ;;  %v1662_v39 = vand.u32 2147483647, %v7719_v1 }
 0x2b8   : > { %v5218_v19 = vpop.eup %5217  ;;  %v7737_v17 = vadd.f32 1.0, %v5216_v48  ;;  %5229 = vrcp.f32 %v7731_v9  ;;  %vm1628_vm7 = vweird.f32 %v7723_v12  ;;  %v1647_v45 = vand.u32 2147483647, %v7727_v28 }
 0x2b9   : > { %v5220_v2 = vpop.eup %5219  ;;  %v7741_v20 = vadd.f32 1.0, %v5218_v19  ;;  %5231 = vrcp.f32 %v7734_v62  ;;  %v1664_v48 = vand.u32 2147483648, %v7719_v1  ;;  %v7762_v59 = vor.u32 1.1754944e-38, %v1634_v46 }
 0x2ba   : > { %v5222_v55 = vpop.eup %5221  ;;  %v7745_v43 = vadd.f32 1.0, %v5220_v2  ;;  %5233 = vrcp.f32 %v7737_v17  ;;  %vm1643_vm9 = vweird.f32 %v7727_v28  ;;  %v1650_v26 = vor.u32 1.1754944e-38, %v1649_v21 }
 0x2bb   : > { %v7751_v10 = vpop.eup %5223  ;;  %5235 = vrcp.f32 %v7741_v20  ;;  %v7760_v2 = vadd.f32 1.0, %v5222_v55  ;;  %vm7775_vm12 = vcmp.eq.f32.partialorder %v1632_v25, 8.507059e+37  ;;  %vm7781_vm13 = vcmp.eq.f32.partialorder %v1662_v39, 8.507059e+37 }
 0x2bc   : > { %v7757_v19 = vpop.eup %5225  ;;  %5237 = vrcp.f32 %v7745_v43  ;;  %v1654_v57 = vmul.f32 %v7751_v10, %v7719_v1  ;;  %vm1659_vm10 = vweird.f32 %v7751_v10  ;;  %vm7787_vm14 = vcmp.eq.f32.partialorder %v1647_v45, 8.507059e+37 }
 0x2bd   : > { %v7767_v14 = vpop.eup %5227  ;;  %5239 = vpow2.f32 %v4874_v6  ;;  %v1624_v40 = vmul.f32 %v7757_v19, %v7723_v12  ;;  %vm1629_vm11 = vweird.f32 %v7757_v19  ;;  %v1665_v25 = vor.u32 1.1754944e-38, %v1664_v48  ;;  %vm7811_vm8 = vmor %vm1658_vm6, %vm1659_vm10 }
 0x2be   : > { %v7772_v52 = vpop.eup %5229  ;;  %5241 = vpow2.f32 %v4875_v34  ;;  %v1639_v55 = vmul.f32 %v7767_v14, %v7727_v28  ;;  %v1655_v54 = vsub.f32 1.0, %v1654_v57  ;;  %vm1644_vm15 = vweird.f32 %v7767_v14  ;;  %vm7824_vm5 = vmor %vm1628_vm7, %vm1629_vm11 }
 0x2bf   : > { %v7785_v21 = vpop.eup %5231  ;;  %5243 = vpow2.f32 %v4876_v18  ;;  %v1625_v42 = vsub.f32 1.0, %v1624_v40  ;;  %v1669_v22 = vmul.f32 %v7772_v52, %v7731_v9  ;;  %vm1673_vm0 = vweird.f32 %v7731_v9  ;;  %vm7841_vm6 = vmor %vm1643_vm9, %vm1644_vm15 }
 0x2c0   : > { %v7793_v33 = vpop.eup %5233  ;;  %5245 = vpow2.f32 %v4877_v27  ;;  %v1640_v57 = vsub.f32 1.0, %v1639_v55  ;;  %v1656_v39 = vmul.f32 %v7751_v10, %v1655_v54  ;;  %v1677_v55 = vand.u32 2147483647, %v7731_v9 }
 0x2c1   : > { %v7797_v31 = vpop.eup %5235  ;;  %5247 = vpow2.f32 %v4878_v30  ;;  %v1626_v40 = vmul.f32 %v7757_v19, %v1625_v42  ;;  %v1670_v18 = vsub.f32 1.0, %v1669_v22  ;;  %vm1674_vm3 = vweird.f32 %v7772_v52 }
 0x2c2   : > { %v7801_v45 = vpop.eup %5237  ;;  %5249 = vpow2.f32 %v4879_v53  ;;  %v1641_v48 = vmul.f32 %v7767_v14, %v1640_v57  ;;  %v1657_v27 = vadd.f32 %v7751_v10, %v1656_v39  ;;  %vm7853_vm7 = vcmp.eq.f32.partialorder %v1677_v55, 8.507059e+37  ;;  %vm7880_vm9 = vmor %vm1673_vm0, %vm1674_vm3 }
 0x2c3   : > { %v5240_v63 = vpop.eup %5239  ;;  %5251 = vpow2.f32 %v4880_v44  ;;  %v1627_v54 = vadd.f32 %v7757_v19, %v1626_v40  ;;  %v1671_v42 = vmul.f32 %v7772_v52, %v1670_v18  ;;  %v1684_v46 = vmul.f32 %v7785_v21, %v7734_v62 }
 0x2c4   : > { %v5242_v30 = vpop.eup %5241  ;;  %v7817_v53 = vadd.f32 1.0, %v5240_v63  ;;  %5253 = vrcp.f32 %v7760_v2  ;;  %v1642_v1 = vadd.f32 %v7767_v14, %v1641_v48  ;;  %v1661_v57 = vsel %vm7811_vm8, %v7751_v10, %v1657_v27 }
 0x2c5   : > { %v5244_v39 = vpop.eup %5243  ;;  %v7832_v40 = vadd.f32 1.0, %v5242_v30  ;;  %v1631_v63 = vsel %vm7824_vm5, %v7757_v19, %v1627_v54  ;;  %v1672_v18 = vadd.f32 %v7772_v52, %v1671_v42  ;;  %v1679_v48 = vand.u32 2147483648, %v7731_v9 }
 0x2c6   : > { %v5246_v10 = vpop.eup %5245  ;;  %v7847_v27 = vadd.f32 1.0, %v5244_v39  ;;  %5255 = vrcp.f32 %v7817_v53  ;;  %v1646_v19 = vsel %vm7841_vm6, %v7767_v14, %v1642_v1  ;;  %v7863_v42 = vsel %vm7775_vm12, %v7762_v59, %v1631_v63 }
 0x2c7   : > { %v5248_v28 = vpop.eup %5247  ;;  %v7857_v22 = vadd.f32 1.0, %v5246_v10  ;;  %5257 = vrcp.f32 %v7832_v40  ;;  %v7867_v30 = vsel %vm7781_vm13, %v1665_v25, %v1661_v57  ;;  %v7874_v55 = vsel %vm7787_vm14, %v1650_v26, %v1646_v19 }
 0x2c8   : > { %v5250_v44 = vpop.eup %5249  ;;  %v7869_v14 = vadd.f32 1.0, %v5248_v28  ;;  %5259 = vrcp.f32 %v7847_v27  ;;  %v1676_v26 = vsel %vm7880_vm9, %v7772_v52, %v1672_v18  ;;  %v1680_v34 = vor.u32 1.1754944e-38, %v1679_v48 }
 0x2c9   : > { %v5252_v6 = vpop.eup %5251  ;;  %v7886_v25 = vadd.f32 1.0, %v5250_v44  ;;  %5261 = vrcp.f32 %v7857_v22  ;;  %v1685_v57 = vsub.f32 1.0, %v1684_v46  ;;  %vm1688_vm10 = vweird.f32 %v7734_v62 }
 0x2ca   : > { %v7892_v1 = vpop.eup %5253  ;;  %v7894_v9 = vadd.f32 1.0, %v5252_v6  ;;  %vm1689_vm11 = vweird.f32 %v7785_v21  ;;  %5263 = vrcp.f32 %v7869_v14  ;;  %v1692_v63 = vand.u32 2147483647, %v7734_v62 }
 0x2cb   : > { %v7900_v39 = vmul.f32 %v7892_v1, %v7760_v2  ;;  %v1694_v52 = vand.u32 2147483648, %v7734_v62  ;;  %5265 = vrcp.f32 %v7886_v25  ;;  %v7910_v18 = vsel %vm7853_vm7, %v1680_v34, %v1676_v26  ;;  %vm1690_vm14 = vmor %vm1688_vm10, %vm1689_vm11 }
 0x2cc   : > { %v7905_v12 = vpop.eup %5255  ;;  %v1686_v48 = vmul.f32 %v7785_v21, %v1685_v57  ;;  %v1699_v10 = vmul.f32 %v7793_v33, %v7737_v17  ;;  %vm7922_vm12 = vcmp.eq.f32.partialorder %v1692_v63, 8.507059e+37  ;;  %vm1703_vm13 = vweird.f32 %v7737_v17 }
 0x2cd   : > { %v7915_v19 = vpop.eup %5257  ;;  %v7920_v44 = vmul.f32 %v7905_v12, %v7817_v53  ;;  %v1695_v6 = vor.u32 1.1754944e-38, %v1694_v52  ;;  %v1707_v34 = vand.u32 2147483647, %v7737_v17  ;;  %vm1704_vm15 = vweird.f32 %v7793_v33 }
 0x2ce   : > { %v7927_v54 = vpop.eup %5259  ;;  %v1687_v46 = vadd.f32 %v7785_v21, %v1686_v48  ;;  %v1700_v26 = vsub.f32 1.0, %v1699_v10  ;;  %v1709_v63 = vand.u32 2147483648, %v7737_v17  ;;  %v1714_v48 = vmul.f32 %v7797_v31, %v7741_v20  ;;  %vm1705_vm5 = vmor %vm1703_vm13, %vm1704_vm15 }
 0x2cf   : > { %v7931_v57 = vpop.eup %5261  ;;  %vm7944_vm0 = vcmp.eq.f32.partialorder %v1707_v34, 8.507059e+37  ;;  %vm1718_vm8 = vweird.f32 %v7741_v20  ;;  %vm1719_vm3 = vweird.f32 %v7797_v31  ;;  %v1722_v37 = vand.u32 2147483647, %v7741_v20 }
 0x2d0   : > { %v1691_v52 = vsel %vm1690_vm14, %v7785_v21, %v1687_v46  ;;  %v1701_v10 = vmul.f32 %v7793_v33, %v1700_v26  ;;  %v7949_v28 = vpop.eup %5263  ;;  %v1715_v36 = vsub.f32 1.0, %v1714_v48  ;;  %v1710_v46 = vor.u32 1.1754944e-38, %v1709_v63  ;;  %vm1720_vm11 = vmor %vm1718_vm8, %vm1719_vm3 }
 0x2d1   : > { %v1696_v62 = vsel %vm7922_vm12, %v1695_v6, %v1691_v52  ;;  %v7955_v32 = vpop.eup %5265  ;;  %v1724_v26 = vand.u32 2147483648, %v7741_v20  ;;  %v1729_v34 = vmul.f32 %v7801_v45, %v7745_v43  ;;  %vm7966_vm6 = vcmp.eq.f32.partialorder %v1722_v37, 8.507059e+37 }
 0x2d2   : > { %v1702_v21 = vadd.f32 %v7793_v33, %v1701_v10  ;;  %v1716_v59 = vmul.f32 %v7797_v31, %v1715_v36  ;;  %vm1733_vm7 = vweird.f32 %v7745_v43  ;;  %v1737_v63 = vand.u32 2147483647, %v7745_v43 }
 0x2d3   : > { %v1730_v52 = vsub.f32 1.0, %v1729_v34  ;;  %vm1734_vm9 = vweird.f32 %v7801_v45  ;;  %v1739_v10 = vand.u32 2147483648, %v7745_v43  ;;  %v1725_v37 = vor.u32 1.1754944e-38, %v1724_v26 }
 0x2d4   : > { %v1706_v48 = vsel %vm1705_vm5, %v7793_v33, %v1702_v21  ;;  %v1717_v36 = vadd.f32 %v7797_v31, %v1716_v59  ;;  %vm7978_vm10 = vcmp.eq.f32.partialorder %v1737_v63, 8.507059e+37  ;;  %v1920_v34 = vrot.slane %v1564_v29, 6  ;;  %vm1735_vm12 = vmor %vm1733_vm7, %vm1734_vm9 }
 0x2d5   : > { %v1711_v17 = vsel %vm7944_vm0, %v1710_v46, %v1706_v48  ;;  %v1731_v33 = vmul.f32 %v7801_v45, %v1730_v52  ;;  %v1740_v21 = vor.u32 1.1754944e-38, %v1739_v10  ;;  %v1921_v13 = vrot.slane %v1564_v29, 7 }
 0x2d6   : > { %v1721_v58 = vsel %vm1720_vm11, %v7797_v31, %v1717_v36  ;;  %v1922_v46 = vrot.slane %v1564_v29, 1  ;;  %v1923_v48 = vrot.slane %v1564_v29, 2  ;;  %v1924_v59 = vrot.slane %v1564_v29, 3 }
 0x2d7   : > { %v1726_v26 = vsel %vm7966_vm6, %v1725_v37, %v1721_v58  ;;  %v1732_v63 = vadd.f32 %v7801_v45, %v1731_v33  ;;  %v1925_v4 = vrot.slane %v1564_v29, 4  ;;  %v1935_v41 = vmul.f32 %v1920_v34, %v7863_v42 }
 0x2d8   : > { %v1936_v20 = vmul.f32 %v1921_v13, %v7874_v55  ;;  %v1937_v31 = vmul.f32 %v7867_v30, %v1564_v29  ;;  %v1938_v52 = vmul.f32 %v1922_v46, %v7910_v18  ;;  %v1939_v10 = vmul.f32 %v1923_v48, %v1696_v62 }
 0x2d9   : > { %v1736_v6 = vsel %vm1735_vm12, %v7801_v45, %v1732_v63  ;;  %v1926_v36 = vrot.slane %v1564_v29, 5  ;;  %v1940_v37 = vmul.f32 %v1924_v59, %v1711_v17  ;;  %v1943_v33 = vadd.f32 %v1935_v41, %v6449_v7 }
 0x2da   : > { %5267 = vrcp.f32 %v7894_v9  ;;  %v1741_v42 = vsel %vm7978_vm10, %v1740_v21, %v1736_v6  ;;  %v1944_v43 = vadd.f32 %v1936_v20, %v6455_v11  ;;  %v1945_v13 = vadd.f32 %v1937_v31, %v6468_v35 }
 0x2db   : > { %v1941_v55 = vmul.f32 %v1925_v4, %v1726_v26  ;;  %v8006_v30 = vmul.f32 %v1926_v36, %v1741_v42  ;;  %v1946_v18 = vadd.f32 %v1938_v52, %v6504_v61  ;;  %v1947_v45 = vadd.f32 %v1939_v10, %v6573_v15 }
 0x2dc   : > { %v1948_v29 = vadd.f32 %v1940_v37, %v6631_v38  ;;  %5269 = vtanh.f32 %v1943_v33  ;;  %v11787_v41 = vsub.f32 1.0, %v7900_v39  ;;  %vm1805_vm13 = vweird.f32 %v7892_v1 }
 0x2dd   : > { %5271 = vtanh.f32 %v1944_v43  ;;  %v1808_v0 = vand.u32 2147483647, %v7760_v2  ;;  %v1810_v4 = vand.u32 2147483648, %v7760_v2  ;;  %v11788_v17 = vsub.f32 1.0, %v7920_v44 }
 0x2de   : > { %v1802_v62 = vmul.f32 %v7892_v1, %v11787_v41  ;;  %5273 = vtanh.f32 %v1945_v13  ;;  %vm1804_vm14 = vweird.f32 %v7760_v2  ;;  %vm1820_vm15 = vweird.f32 %v7905_v12 }
 0x2df   : > { %v1817_v21 = vmul.f32 %v7905_v12, %v11788_v17  ;;  %v8024_v39 = vadd.f32 %v1941_v55, %v11675_v60  ;;  %5275 = vtanh.f32 %v1946_v18  ;;  %vm8026_vm0 = vmor %vm1804_vm14, %vm1805_vm13  ;;  %vm1819_vm8 = vweird.f32 %v7817_v53 }
 0x2e0   : > { %v1803_v34 = vadd.f32 %v7892_v1, %v1802_v62  ;;  %v8032_v44 = vpop.eup %5267  ;;  %v1811_v48 = vor.u32 1.1754944e-38, %v1810_v4  ;;  %vm8037_vm3 = vmor %vm1819_vm8, %vm1820_vm15  ;;  %v1823_v26 = vand.u32 2147483647, %v7817_v53  ;;  %v1825_v63 = vand.u32 2147483648, %v7817_v53 }
 0x2e1   : > { %v1818_v46 = vadd.f32 %v7905_v12, %v1817_v21  ;;  %5277 = vtanh.f32 %v1947_v45  ;;  %vm1809_vm5 = vcmp.eq.f32.partialorder %v1808_v0, 8.507059e+37  ;;  %v1830_v31 = vmul.f32 %v7915_v19, %v7832_v40 }
 0x2e2   : > { %v1807_v2 = vsel %vm8026_vm0, %v7892_v1, %v1803_v34  ;;  %v8048_v52 = vpop.eup %5269  ;;  %5279 = vtanh.f32 %v1948_v29  ;;  %vm1824_vm6 = vcmp.eq.f32.partialorder %v1823_v26, 8.507059e+37  ;;  %v1826_v10 = vor.u32 1.1754944e-38, %v1825_v63 }
 0x2e3   : > { %v1822_v20 = vsel %vm8037_vm3, %v7905_v12, %v1818_v46  ;;  %v8050_v1 = vsel %vm1809_vm5, %v1811_v48, %v1807_v2  ;;  %v8052_v6 = vpop.eup %5271  ;;  %v1831_v36 = vsub.f32 1.0, %v1830_v31  ;;  %v1838_v53 = vand.u32 2147483647, %v7832_v40 }
 0x2e4   : > { %v1840_v37 = vand.u32 2147483648, %v7832_v40  ;;  %v1845_v12 = vmul.f32 %v7927_v54, %v7847_v27  ;;  %v8058_v33 = vpop.eup %5273  ;;  %v8060_v42 = vsel %vm1824_vm6, %v1826_v10, %v1822_v20  ;;  %vm1834_vm7 = vweird.f32 %v7832_v40 }
 0x2e5   : > { %vm1835_vm9 = vweird.f32 %v7915_v19  ;;  %v1853_v43 = vand.u32 2147483647, %v7847_v27  ;;  %v8065_v13 = vpop.eup %5275  ;;  %v1832_v55 = vmul.f32 %v7915_v19, %v1831_v36  ;;  %vm1849_vm10 = vweird.f32 %v7847_v27 }
 0x2e6   : > { %v1846_v18 = vsub.f32 1.0, %v1845_v12  ;;  %vm1850_vm11 = vweird.f32 %v7927_v54  ;;  %vm8070_vm12 = vcmp.eq.f32.partialorder %v1838_v53, 8.507059e+37  ;;  %v1841_v29 = vor.u32 1.1754944e-38, %v1840_v37  ;;  %vm1836_vm14 = vmor %vm1834_vm7, %vm1835_vm9 }
 0x2e7   : > { %v1855_v41 = vand.u32 2147483648, %v7847_v27  ;;  %v1860_v62 = vmul.f32 %v7931_v57, %v7857_v22  ;;  %v8077_v0 = vpop.eup %5277  ;;  %v1833_v4 = vadd.f32 %v7915_v19, %v1832_v55  ;;  %vm8081_vm13 = vcmp.eq.f32.partialorder %v1853_v43, 8.507059e+37  ;;  %vm1851_vm8 = vmor %vm1849_vm10, %vm1850_vm11 }
 0x2e8   : > { %v1847_v17 = vmul.f32 %v7927_v54, %v1846_v18  ;;  %v1868_v34 = vand.u32 2147483647, %v7857_v22  ;;  %v8086_v58 = vpop.eup %5279  ;;  %vm1864_vm15 = vweird.f32 %v7857_v22  ;;  %vm1865_vm0 = vweird.f32 %v7931_v57 }
 0x2e9   : > { %v1861_v46 = vsub.f32 1.0, %v1860_v62  ;;  %v1875_v2 = vmul.f32 %v7949_v28, %v7869_v14  ;;  %v1837_v48 = vsel %vm1836_vm14, %v7915_v19, %v1833_v4  ;;  %v1856_v26 = vor.u32 1.1754944e-38, %v1855_v41  ;;  %vm1866_vm7 = vmor %vm1864_vm15, %vm1865_vm0 }
 0x2ea   : > { %v1848_v59 = vadd.f32 %v7927_v54, %v1847_v17  ;;  %v1870_v63 = vand.u32 2147483648, %v7857_v22  ;;  %vm8104_vm3 = vcmp.eq.f32.partialorder %v1868_v34, 8.507059e+37  ;;  %vm1879_vm5 = vweird.f32 %v7869_v14 }
 0x2eb   : > { %v1862_v40 = vmul.f32 %v7931_v57, %v1861_v46  ;;  %v1876_v31 = vsub.f32 1.0, %v1875_v2  ;;  %v8111_v19 = vsel %vm8070_vm12, %v1841_v29, %v1837_v48  ;;  %v1883_v36 = vand.u32 2147483647, %v7869_v14 }
 0x2ec   : > { %v1852_v10 = vsel %vm1851_vm8, %v7927_v54, %v1848_v59  ;;  %v1885_v27 = vand.u32 2147483648, %v7869_v14  ;;  %vm1880_vm6 = vweird.f32 %v7949_v28  ;;  %v1890_v12 = vmul.f32 %v7955_v32, %v7886_v25 }
 0x2ed   : > { %v1863_v53 = vadd.f32 %v7931_v57, %v1862_v40  ;;  %v1877_v37 = vmul.f32 %v7949_v28, %v1876_v31  ;;  %v1857_v43 = vsel %vm8081_vm13, %v1856_v26, %v1852_v10  ;;  %v1871_v54 = vor.u32 1.1754944e-38, %v1870_v63  ;;  %vm8136_vm10 = vmor %vm1879_vm5, %vm1880_vm6 }
 0x2ee   : > { %vm8127_vm9 = vcmp.eq.f32.partialorder %v1883_v36, 8.507059e+37  ;;  %v1886_v18 = vor.u32 1.1754944e-38, %v1885_v27  ;;  %v1891_v41 = vsub.f32 1.0, %v1890_v12  ;;  %v1898_v62 = vand.u32 2147483647, %v7886_v25 }
 0x2ef   : > { %v1867_v45 = vsel %vm1866_vm7, %v7931_v57, %v1863_v53  ;;  %v1878_v29 = vadd.f32 %v7949_v28, %v1877_v37  ;;  %vm1894_vm11 = vweird.f32 %v7886_v25  ;;  %vm1895_vm12 = vweird.f32 %v7955_v32 }
 0x2f0   : > { %v1900_v22 = vand.u32 2147483648, %v7886_v25  ;;  %v1905_v57 = vmul.f32 %v8032_v44, %v7894_v9  ;;  %v1872_v17 = vsel %vm8104_vm3, %v1871_v54, %v1867_v45  ;;  %v1892_v21 = vmul.f32 %v7955_v32, %v1891_v41  ;;  %vm1896_vm0 = vmor %vm1894_vm11, %vm1895_vm12 }
 0x2f1   : > { %v1882_v14 = vsel %vm8136_vm10, %v7949_v28, %v1878_v29  ;;  %vm1909_vm13 = vweird.f32 %v7894_v9  ;;  %vm8152_vm14 = vcmp.eq.f32.partialorder %v1898_v62, 8.507059e+37  ;;  %vm1910_vm15 = vweird.f32 %v8032_v44 }
 0x2f2   : > { %v1906_v46 = vsub.f32 1.0, %v1905_v57  ;;  %v1913_v2 = vand.u32 2147483647, %v7894_v9  ;;  %v1893_v48 = vadd.f32 %v7955_v32, %v1892_v21  ;;  %v1915_v59 = vand.u32 2147483648, %v7894_v9  ;;  %vm1911_vm3 = vmor %vm1909_vm13, %vm1910_vm15 }
 0x2f3   : > { %v1950_v28 = vadd.f32 %v8006_v30, %v11688_v3  ;;  %5281 = vtanh.f32 %v8024_v39  ;;  %v1887_v26 = vsel %vm8127_vm9, %v1886_v18, %v1882_v14  ;;  %v1901_v63 = vor.u32 1.1754944e-38, %v1900_v22 }
 0x2f4   : > { %v1907_v40 = vmul.f32 %v8032_v44, %v1906_v46  ;;  %vm8170_vm8 = vcmp.eq.f32.partialorder %v1913_v2, 8.507059e+37  ;;  %v1897_v31 = vsel %vm1896_vm0, %v7955_v32, %v1893_v48  ;;  %v1959_v30 = vsub.f32 1.0, %v8050_v1 }
 0x2f5   : > { %5283 = vtanh.f32 %v1950_v28  ;;  %v1960_v39 = vsub.f32 1.0, %v8060_v42  ;;  %v1902_v10 = vsel %vm8152_vm14, %v1901_v63, %v1897_v31  ;;  %v1916_v36 = vor.u32 1.1754944e-38, %v1915_v59 }
 0x2f6   : > { %v1908_v25 = vadd.f32 %v8032_v44, %v1907_v40  ;;  %v1961_v27 = vsub.f32 1.0, %v8111_v19  ;;  %v1962_v53 = vsub.f32 1.0, %v1857_v43  ;;  %v1963_v32 = vsub.f32 1.0, %v1872_v17 }
 0x2f7   : > { %v1964_v37 = vsub.f32 1.0, %v1887_v26  ;;  %v1965_v12 = vsub.f32 1.0, %v1902_v10  ;;  %v1967_v55 = vmul.f32 %v8048_v52, %v1959_v30  ;;  %v1968_v18 = vmul.f32 %v8052_v6, %v1960_v39 }
 0x2f8   : > { %v1912_v54 = vsel %vm1911_vm3, %v8032_v44, %v1908_v25  ;;  %v1969_v45 = vmul.f32 %v8058_v33, %v1961_v27  ;;  %v1970_v62 = vmul.f32 %v8065_v13, %v1962_v53  ;;  %v1971_v9 = vmul.f32 %v8077_v0, %v1963_v32  ;;  %v8262_v32 = vld [vmem:[#allocation8 + $0x178] sm:$0xff] }
 0x2f9   : > { %v5282_v29 = vpop.eup %5281  ;;  %v1917_v41 = vsel %vm8170_vm8, %v1916_v36, %v1912_v54  ;;  %v1972_v4 = vmul.f32 %v8086_v58, %v1964_v37  ;;  %v11807_v44 = vrot.slane %v7600_v16, 7  ;;  %v11808_v52 = vrot.slane %v7602_v56, 7  ;;  %11827 = vst [vmem:[#allocation43_spill] sm:$0xff] %v8262_v32  ;;  %v8265_v37 = vld [vmem:[#allocation8 + $0x168] sm:$0xff]  ;;  %v8271_v54 = vld [vmem:[#allocation8 + $0x160] sm:$0xff] }
 0x2fa   : > { %v1966_v22 = vsub.f32 1.0, %v1917_v41  ;;  %v11809_v33 = vrot.slane %v7606_v49, 7  ;;  %v1973_v13 = vmul.f32 %v5282_v29, %v1965_v12  ;;  %v11810_v0 = vrot.slane %v7608_v23, 7  ;;  %11828 = vst [vmem:[#allocation44_spill] sm:$0xff] %v8265_v37  ;;  %v8268_v12 = vld [vmem:[#allocation8 + $0x170] sm:$0xff]  ;;  %v8283_v29 = vld [vmem:[#allocation8 + $0x138] sm:$0xff] }
 0x2fb   : > { %v1990_v57 = vmul.f32 %v11807_v44, %v8050_v1  ;;  %v1991_v6 = vmul.f32 %v11808_v52, %v8060_v42  ;;  %v5284_v21 = vpop.eup %5283  ;;  %v11811_v58 = vrot.slane %v7610_v50, 7  ;;  %v11812_v16 = vrot.slane %v7614_v5, 7  ;;  %11829 = vst [vmem:[#allocation45_spill] sm:$0xff] %v8268_v12  ;;  %v8301_v44 = vld [vmem:[#allocation8 + $0x108] sm:$0xff]  ;;  %v8307_v52 = vld [vmem:[#allocation8 + $0x100] sm:$0xff] }
 0x2fc   : > { %v1992_v14 = vmul.f32 %v8111_v19, %v11809_v33  ;;  %v1993_v34 = vmul.f32 %v11810_v0, %v1857_v43  ;;  %v1974_v56 = vmul.f32 %v5284_v21, %v1966_v22  ;;  %v11816_v2 = vrot.slane %v7619_v24, 7  ;;  %11830 = vst [vmem:[#allocation46_spill] sm:$0xff] %v8271_v54  ;;  %v8298_v22 = vld [vmem:[#allocation8 + $0x118] sm:$0xff]  ;;  %v8325_v0 = vld [vmem:[#allocation8 + $0xd0] sm:$0xff] }
 0x2fd   : > { %v1994_v46 = vmul.f32 %v11811_v58, %v1872_v17  ;;  %v1995_v1 = vmul.f32 %v11812_v16, %v1887_v26  ;;  %v8209_v42 = vadd.f32 %v1990_v57, %v1967_v55  ;;  %v8211_v49 = vadd.f32 %v1991_v6, %v1968_v18  ;;  %v8274_v55 = vld [vmem:[#allocation8 + $0x150] sm:$0xff]  ;;  %v8277_v18 = vld [vmem:[#allocation8 + $0x158] sm:$0xff]  ;;  %11834 = vst [vmem:[#allocation50_spill] sm:$0xff] %v8283_v29  ;;  %v8331_v58 = vld [vmem:[#allocation8 + $0xc8] sm:$0xff] }
 0x2fe   : > { %v8213_v19 = vadd.f32 %v1992_v14, %v1969_v45  ;;  %v1996_v23 = vmul.f32 %v11816_v2, %v1902_v10  ;;  %v8217_v43 = vadd.f32 %v1993_v34, %v1970_v62  ;;  %v11819_v5 = vrot.slane %v7624_v51, 7  ;;  %11831 = vst [vmem:[#allocation47_spill] sm:$0xff] %v8274_v55  ;;  %v8280_v45 = vld [vmem:[#allocation8 + $0x148] sm:$0xff]  ;;  %v8289_v62 = vld [vmem:[#allocation8 + $0x130] sm:$0xff]  ;;  %v8313_v33 = vld [vmem:[#allocation8 + $0xf8] sm:$0xff] }
 0x2ff   : > { %11813 = vst [vmem:[#allocation35_spill] sm:$0xff] %v8209_v42  ;;  %v8219_v50 = vadd.f32 %v1994_v46, %v1971_v9  ;;  %v8223_v48 = vadd.f32 %v1995_v1, %v1972_v4  ;;  %v2022_v59 = vrot.slane %v8209_v42, 2  ;;  %v2023_v28 = vrot.slane %v8211_v49, 1  ;;  %v8292_v9 = vld [vmem:[#allocation8 + $0x120] sm:$0xff]  ;;  %v8295_v4 = vld [vmem:[#allocation8 + $0x128] sm:$0xff]  ;;  %v8304_v57 = vld [vmem:[#allocation8 + $0x110] sm:$0xff] }
 0x300   : > { %11814 = vst [vmem:[#allocation36_spill] sm:$0xff] %v8211_v49  ;;  %v1997_v17 = vmul.f32 %v11819_v5, %v1917_v41  ;;  %v8229_v24 = vadd.f32 %v1996_v23, %v1973_v13  ;;  %v11456_v63 = vrot.slane %v8217_v43, 7  ;;  %vm11823_vm5 = vcmask 1044484   ;;  %v8286_v41 = vld [vmem:[#allocation8 + $0x140] sm:$0xff]  ;;  %v8310_v6 = vld [vmem:[#allocation8 + $0xf0] sm:$0xff]  ;;  %v8316_v14 = vld [vmem:[#allocation8 + $0xe8] sm:$0xff] }
 0x301   : > { %11815 = vst [vmem:[#allocation37_spill] sm:$0xff] %v8213_v19  ;;  %v2024_v51 = vsel %vm11527_vm1, %v2023_v28, %v2022_v59  ;;  %v2028_v20 = vrot.slane %v8219_v50, 6  ;;  %v2030_v30 = vrot.slane %v8223_v48, 5  ;;  %vm11824_vm6 = vcmask 1045509   ;;  %v8319_v21 = vld [vmem:[#allocation8 + $0xd8] sm:$0xff]  ;;  %v8322_v13 = vld [vmem:[#allocation8 + $0xe0] sm:$0xff] }
 0x302   : > { %11817 = vst [vmem:[#allocation38_spill] sm:$0xff] %v8217_v43  ;;  %v8233_v26 = vadd.f32 %v1997_v17, %v1974_v56  ;;  %v2025_v40 = vsel %vm11526_vm4, %v8213_v19, %v2024_v51  ;;  %v2032_v10 = vrot.slane %v8229_v24, 4  ;;  %vm11825_vm7 = vcmask 1046534   ;;  %v8328_v34 = vld [vmem:[#allocation8 + $0xc0] sm:$0xff]  ;;  %v8334_v46 = vld [vmem:[#allocation8 + $0xb8] sm:$0xff]  ;;  %v8337_v16 = vld [vmem:[#allocation8 + $0xa8] sm:$0xff] }
 0x303   : > { %11818 = vst [vmem:[#allocation39_spill] sm:$0xff] %v8219_v50  ;;  %v2027_v31 = vsel %vm11525_vm2, %v11456_v63, %v2025_v40  ;;  %vm11826_vm9 = vcmask 1047559   ;;  %v8340_v1 = vld [vmem:[#allocation8 + $0xb0] sm:$0xff]  ;;  %v8343_v56 = vld [vmem:[#allocation8 + $0xa0] sm:$0xff]  ;;  %v8349_v23 = vld [vmem:[#allocation8 + $0x98] sm:$0xff] }
 0x304   : > { %11820 = vst [vmem:[#allocation40_spill] sm:$0xff] %v8223_v48  ;;  %v2029_v39 = vsel %vm11823_vm5, %v2028_v20, %v2027_v31  ;;  %v2034_v36 = vrot.slane %v8233_v26, 3  ;;  %v8346_v2 = vld [vmem:[#allocation8 + $0x90] sm:$0xff]  ;;  %v8352_v5 = vld [vmem:[#allocation8 + $0x88] sm:$0xff]  ;;  %v8355_v17 = vld [vmem:[#allocation8 + $0x78] sm:$0xff] }
 0x305   : > { %2006 = vst [vmem:[%s6102_s23] sm:$0x4] %v8209_v42  ;;  %v2031_v25 = vsel %vm11824_vm6, %v2030_v30, %v2029_v39  ;;  %v8358_v59 = vld [vmem:[#allocation8 + $0x80] sm:$0xff]  ;;  %v8361_v28 = vld [vmem:[#allocation8 + $0x70] sm:$0xff]  ;;  %v8367_v40 = vld [vmem:[#allocation8 + $0x68] sm:$0xff] }
 0x306   : > { %11821 = vst [vmem:[#allocation41_spill] sm:$0xff] %v8229_v24  ;;  %v2033_v27 = vsel %vm11825_vm7, %v2032_v10, %v2031_v25  ;;  %v8364_v51 = vld [vmem:[#allocation8 + $0x60] sm:$0xff]  ;;  %v8370_v20 = vld [vmem:[#allocation8 + $0x58] sm:$0xff]  ;;  %v8373_v31 = vld [vmem:[#allocation8 + $0x48] sm:$0xff] }
 0x307   : > { %2007 = vst [vmem:[%s6102_s23 + $0x8] sm:$0x4] %v8211_v49  ;;  %v2035_v53 = vsel %vm11826_vm9, %v2034_v36, %v2033_v27  ;;  %v8376_v30 = vld [vmem:[#allocation8 + $0x50] sm:$0xff]  ;;  %v8379_v39 = vld [vmem:[#allocation8 + $0x40] sm:$0xff]  ;;  %v8385_v25 = vld [vmem:[#allocation8 + $0x38] sm:$0xff] }
 0x308   : > { %11822 = vst [vmem:[#allocation42_spill] sm:$0xff] %v8233_v26  ;;  %2053 = vmatmul.f32.vlgmr.msrb.gmra.mxu3 %v2035_v53  ;;  %2073 = vmatmul.f32.vlgmr.msrb.gmra.mxu0 %v2035_v53  ;;  %v8382_v10 = vld [vmem:[#allocation8 + $0x30] sm:$0xff]  ;;  %v8388_v36 = vld [vmem:[#allocation8 + $0x28] sm:$0xff]  ;;  %v8391_v27 = vld [vmem:[#allocation8 + $0x18] sm:$0xff] }
 0x309   : > { %2008 = vst [vmem:[%s6102_s23 + $0x10] sm:$0x4] %v8213_v19  ;;  %2093 = vmatmul.f32.vlgmr.msrb.gmra.mxu1 %v2035_v53  ;;  %3137 = vmatpush.msrb.mxu3 %v8262_v32  ;;  %v8394_v53 = vld [vmem:[#allocation8 + $0x20] sm:$0xff]  ;;  %v8397_v63 = vld [vmem:[#allocation8 + $0x10] sm:$0xff] }
 0x30a   : > { %2009 = vst [vmem:[%s6102_s23 + $0x18] sm:$0x4] %v8217_v43  ;;  %3627 = vmatpush.msrb.mxu0 %v8265_v37  ;;  %3647 = vmatpush.msrb.mxu1 %v8268_v12 }
 0x30b   : > { %2010 = vst [vmem:[%s6102_s23 + $0x20] sm:$0x4] %v8219_v50  ;;  %3138 = vmatpush.msrb.mxu3 %v8271_v54 }
 0x30c   : > { %2011 = vst [vmem:[%s6102_s23 + $0x28] sm:$0x4] %v8223_v48  ;;  %3628 = vmatpush.msrb.mxu0 %v8274_v55  ;;  %3648 = vmatpush.msrb.mxu1 %v8277_v18 }
 0x30d   : > { %2012 = vst [vmem:[%s6102_s23 + $0x30] sm:$0x4] %v8229_v24  ;;  %3139 = vmatpush.msrb.mxu3 %v8280_v45 }
 0x30e   : > { %2013 = vst [vmem:[%s6102_s23 + $0x38] sm:$0x4] %v8233_v26  ;;  %3629 = vmatpush.msrb.mxu0 %v8283_v29  ;;  %3649 = vmatpush.msrb.mxu1 %v8286_v41 }
 0x30f   : > { %11832 = vst [vmem:[#allocation48_spill] sm:$0xff] %v8277_v18  ;;  %3140 = vmatpush.msrb.mxu3 %v8289_v62 }
 0x310   : > { %11833 = vst [vmem:[#allocation49_spill] sm:$0xff] %v8280_v45  ;;  %3630 = vmatpush.msrb.mxu0 %v8292_v9  ;;  %3650 = vmatpush.msrb.mxu1 %v8295_v4 }
 0x311   : > { %11835 = vst [vmem:[#allocation51_spill] sm:$0xff] %v8286_v41  ;;  %3141 = vmatpush.msrb.mxu3 %v8298_v22 }
 0x312   : > { %11836 = vst [vmem:[#allocation52_spill] sm:$0xff] %v8289_v62  ;;  %3631 = vmatpush.msrb.mxu0 %v8301_v44  ;;  %3651 = vmatpush.msrb.mxu1 %v8304_v57 }
 0x313   : > { %11837 = vst [vmem:[#allocation53_spill] sm:$0xff] %v8292_v9  ;;  %3142 = vmatpush.msrb.mxu3 %v8307_v52 }
 0x314   : > { %11838 = vst [vmem:[#allocation54_spill] sm:$0xff] %v8295_v4  ;;  %3632 = vmatpush.msrb.mxu0 %v8310_v6  ;;  %3652 = vmatpush.msrb.mxu1 %v8313_v33 }
 0x315   : > { %11839 = vst [vmem:[#allocation55_spill] sm:$0xff] %v8298_v22  ;;  %3143 = vmatpush.msrb.mxu3 %v8316_v14 }
 0x316   : > { %11840 = vst [vmem:[#allocation56_spill] sm:$0xff] %v8301_v44  ;;  %3633 = vmatpush.msrb.mxu0 %v8319_v21  ;;  %3653 = vmatpush.msrb.mxu1 %v8322_v13 }
 0x317   : > { %11841 = vst [vmem:[#allocation57_spill] sm:$0xff] %v8304_v57  ;;  %3144 = vmatpush.msrb.mxu3 %v8325_v0 }
 0x318   : > { %11842 = vst [vmem:[#allocation58_spill] sm:$0xff] %v8307_v52  ;;  %3634 = vmatpush.msrb.mxu0 %v8328_v34  ;;  %3654 = vmatpush.msrb.mxu1 %v8331_v58 }
 0x319   : > { %11843 = vst [vmem:[#allocation59_spill] sm:$0xff] %v8310_v6  ;;  %3145 = vmatpush.msrb.mxu3 %v8334_v46 }
 0x31a   : > { %11844 = vst [vmem:[#allocation60_spill] sm:$0xff] %v8313_v33  ;;  %3635 = vmatpush.msrb.mxu0 %v8337_v16  ;;  %3655 = vmatpush.msrb.mxu1 %v8340_v1 }
 0x31b   : > { %11845 = vst [vmem:[#allocation61_spill] sm:$0xff] %v8316_v14  ;;  %3146 = vmatpush.msrb.mxu3 %v8343_v56 }
 0x31c   : > { %11846 = vst [vmem:[#allocation62_spill] sm:$0xff] %v8319_v21  ;;  %3636 = vmatpush.msrb.mxu0 %v8346_v2  ;;  %3656 = vmatpush.msrb.mxu1 %v8349_v23 }
 0x31d   : > { %11847 = vst [vmem:[#allocation63_spill] sm:$0xff] %v8322_v13  ;;  %3147 = vmatpush.msrb.mxu3 %v8352_v5 }
 0x31e   : > { %11848 = vst [vmem:[#allocation64_spill] sm:$0xff] %v8325_v0  ;;  %3637 = vmatpush.msrb.mxu0 %v8355_v17  ;;  %3657 = vmatpush.msrb.mxu1 %v8358_v59 }
 0x31f   : > { %11849 = vst [vmem:[#allocation65_spill] sm:$0xff] %v8328_v34  ;;  %3148 = vmatpush.msrb.mxu3 %v8361_v28  ;;  %v11879_v34 = vld [vmem:[#allocation32_spill] sm:$0xff] }
 0x320   : > { %11850 = vst [vmem:[#allocation66_spill] sm:$0xff] %v8331_v58  ;;  %3638 = vmatpush.msrb.mxu0 %v8364_v51  ;;  %3658 = vmatpush.msrb.mxu1 %v8367_v40 }
 0x321   : > { %11851 = vst [vmem:[#allocation67_spill] sm:$0xff] %v8334_v46  ;;  %3149 = vmatpush.msrb.mxu3 %v8370_v20 }
 0x322   : > { %11852 = vst [vmem:[#allocation68_spill] sm:$0xff] %v8337_v16  ;;  %3639 = vmatpush.msrb.mxu0 %v8373_v31  ;;  %3659 = vmatpush.msrb.mxu1 %v8376_v30 }
 0x323   : > { %11853 = vst [vmem:[#allocation69_spill] sm:$0xff] %v8340_v1  ;;  %3150 = vmatpush.msrb.mxu3 %v8379_v39 }
 0x324   : > { %11854 = vst [vmem:[#allocation70_spill] sm:$0xff] %v8343_v56  ;;  %3640 = vmatpush.msrb.mxu0 %v8382_v10  ;;  %3660 = vmatpush.msrb.mxu1 %v8385_v25 }
 0x325   : > { %11855 = vst [vmem:[#allocation71_spill] sm:$0xff] %v8346_v2  ;;  %3151 = vmatpush.msrb.mxu3 %v8388_v36  ;;  %v11878_v2 = vld [vmem:[#allocation30_spill] sm:$0xff] }
 0x326   : > { %11856 = vst [vmem:[#allocation72_spill] sm:$0xff] %v8349_v23  ;;  %3641 = vmatpush.msrb.mxu0 %v8391_v27  ;;  %3661 = vmatpush.msrb.mxu1 %v8394_v53 }
 0x327   : > { %11857 = vst [vmem:[#allocation73_spill] sm:$0xff] %v8352_v5  ;;  %3152 = vmatpush.msrb.mxu3 %v8397_v63 }
 0x328   : > { %11858 = vst [vmem:[#allocation74_spill] sm:$0xff] %v8355_v17 }
 0x329   : > { %11859 = vst [vmem:[#allocation75_spill] sm:$0xff] %v8358_v59  ;;  %v11876_v59 = vld [vmem:[#allocation22_spill] sm:$0xff] }
 0x32a   : > { %11860 = vst [vmem:[#allocation76_spill] sm:$0xff] %v8361_v28 }
 0x32b   : > { %11861 = vst [vmem:[#allocation77_spill] sm:$0xff] %v8364_v51 }
 0x32c   : > { %11862 = vst [vmem:[#allocation78_spill] sm:$0xff] %v8367_v40 }
 0x32d   : > { %11863 = vst [vmem:[#allocation79_spill] sm:$0xff] %v8370_v20 }
 0x32e   : > { %11864 = vst [vmem:[#allocation80_spill] sm:$0xff] %v8373_v31 }
 0x32f   : > { %11865 = vst [vmem:[#allocation81_spill] sm:$0xff] %v8376_v30 }
 0x330   : > { %11866 = vst [vmem:[#allocation82_spill] sm:$0xff] %v8379_v39 }
 0x331   : > { %11867 = vst [vmem:[#allocation83_spill] sm:$0xff] %v8382_v10  ;;  %v8400_v10 = vld [vmem:[#allocation8] sm:$0xff] }
 0x332   : > { %11868 = vst [vmem:[#allocation84_spill] sm:$0xff] %v8385_v25  ;;  %3642 = vmatpush.msrb.mxu0 %v8400_v10  ;;  %v8403_v25 = vld [vmem:[#allocation8 + $0x8] sm:$0xff] }
 0x333   : > { %11869 = vst [vmem:[#allocation85_spill] sm:$0xff] %v8388_v36  ;;  %3662 = vmatpush.msrb.mxu1 %v8403_v25 }
 0x334   : > { %11870 = vst [vmem:[#allocation86_spill] sm:$0xff] %v8391_v27 }
 0x335   : > { %11871 = vst [vmem:[#allocation87_spill] sm:$0xff] %v8394_v53 }
 0x336   : > { %11872 = vst [vmem:[#allocation88_spill] sm:$0xff] %v8397_v63  ;;  %v11875_v63 = vld [vmem:[#allocation20_spill] sm:$0xff] }
 0x337   : > { %11873 = vst [vmem:[#allocation89_spill] sm:$0xff] %v8400_v10  ;;  %v11877_v10 = vld [vmem:[#allocation28_spill] sm:$0xff] }
 0x338   : > { %11874 = vst [vmem:[#allocation90_spill] sm:$0xff] %v8403_v25 }
 0x385   : > { %v2074_v36 = vpop.f32.mrf.mxu0 }
 0x386   : > { %v2274_v39 = vrot.slane %v2074_v36, 5  ;;  %v2275_v30 = vrot.slane %v2074_v36, 6  ;;  %v2276_v27 = vrot.slane %v2074_v36, 7  ;;  %v2277_v31 = vrot.slane %v2074_v36, 1 }
 0x387   : > { %v2278_v20 = vrot.slane %v2074_v36, 2  ;;  %v2279_v40 = vrot.slane %v2074_v36, 3  ;;  %v2292_v53 = vadd.f32 %v2074_v36, %v11758_v47  ;;  %v2280_v23 = vrot.slane %v2074_v36, 4 }
 0x388   : > { %v2289_v51 = vadd.f32 %v2274_v39, %v11755_v8  ;;  %v2290_v28 = vadd.f32 %v2275_v30, %v11875_v63  ;;  %v2291_v17 = vadd.f32 %v2276_v27, %v11876_v59  ;;  %v2293_v5 = vadd.f32 %v2277_v31, %v11877_v10  ;;  %v11880_v39 = vld [vmem:[#allocation16_spill] sm:$0xff] }
 0x389   : > { %v2294_v25 = vadd.f32 %v2278_v20, %v11878_v2  ;;  %v4892_v56 = vmul.f32 -1.442695, %v2292_v53  ;;  %v2295_v0 = vadd.f32 %v2279_v40, %v11879_v34  ;;  %v2296_v8 = vadd.f32 %v2280_v23, %v11880_v39  ;;  %v11883_v34 = vld [vmem:[#allocation17_spill] sm:$0xff] }
 0x38a   : > { %v4889_v1 = vmul.f32 -1.442695, %v2289_v51  ;;  %v4890_v16 = vmul.f32 -1.442695, %v2290_v28  ;;  %v4891_v46 = vmul.f32 -1.442695, %v2291_v17 }
 0x38b   : > { %5285 = vpow2.f32 %v4892_v56  ;;  %v4893_v58 = vmul.f32 -1.442695, %v2293_v5  ;;  %v4894_v47 = vmul.f32 -1.442695, %v2294_v25  ;;  %v2054_v30 = vpop.f32.mrf.mxu3  ;;  %v4895_v31 = vmul.f32 -1.442695, %v2295_v0 }
 0x38c   : > { %5287 = vpow2.f32 %v4889_v1  ;;  %v2098_v36 = vrot.slane %v2054_v30, 5  ;;  %v4896_v27 = vmul.f32 -1.442695, %v2296_v8  ;;  %v2099_v51 = vrot.slane %v2054_v30, 6  ;;  %v11882_v25 = vld [vmem:[#allocation15_spill] sm:$0xff] }
 0x38d   : > { %5289 = vpow2.f32 %v4890_v16  ;;  %v2100_v56 = vrot.slane %v2054_v30, 7  ;;  %v2101_v16 = vrot.slane %v2054_v30, 1  ;;  %v2102_v8 = vrot.slane %v2054_v30, 2 }
 0x38e   : > { %5291 = vpow2.f32 %v4891_v46  ;;  %v11881_v46 = vld [vmem:[#allocation13_spill] sm:$0xff]  ;;  %v2114_v53 = vadd.f32 %v2099_v51, %v11882_v25 }
 0x38f   : > { %5293 = vpow2.f32 %v4893_v58  ;;  %v2113_v58 = vadd.f32 %v2098_v36, %v11881_v46  ;;  %v11884_v36 = vld [vmem:[#allocation19_spill] sm:$0xff] }
 0x390   : > { %5295 = vpow2.f32 %v4894_v47  ;;  %v2116_v2 = vadd.f32 %v2054_v30, %v11884_v36  ;;  %v4882_v63 = vmul.f32 -1.442695, %v2114_v53  ;;  %v8445_v53 = vpop.f32.mrf.mxu1 }
 0x391   : > { %v5286_v20 = vpop.eup %5285  ;;  %5297 = vpow2.f32 %v4895_v31  ;;  %v2115_v31 = vadd.f32 %v2100_v56, %v11883_v34  ;;  %v4881_v51 = vmul.f32 -1.442695, %v2113_v58  ;;  %v11887_v56 = vld [vmem:[#allocation25_spill] sm:$0xff] }
 0x392   : > { %v5288_v28 = vpop.eup %5287  ;;  %v8414_v17 = vadd.f32 1.0, %v5286_v20  ;;  %5299 = vpow2.f32 %v4896_v27  ;;  %v2104_v27 = vrot.slane %v2054_v30, 4  ;;  %v4884_v36 = vmul.f32 -1.442695, %v2116_v2 }
 0x393   : > { %v5290_v5 = vpop.eup %5289  ;;  %v8416_v40 = vadd.f32 1.0, %v5288_v28  ;;  %v2103_v28 = vrot.slane %v2054_v30, 3  ;;  %v4883_v34 = vmul.f32 -1.442695, %v2115_v31 }
 0x394   : > { %v5292_v1 = vpop.eup %5291  ;;  %v8418_v23 = vadd.f32 1.0, %v5290_v5  ;;  %5301 = vrcp.f32 %v8414_v17 }
 0x395   : > { %v5294_v47 = vpop.eup %5293  ;;  %v8421_v0 = vadd.f32 1.0, %v5292_v1  ;;  %5303 = vrcp.f32 %v8416_v40  ;;  %v11885_v1 = vld [vmem:[#allocation21_spill] sm:$0xff]  ;;  %vm2334_vm9 = vweird.f32 %v8416_v40 }
 0x396   : > { %v5296_v20 = vpop.eup %5295  ;;  %v8424_v39 = vadd.f32 1.0, %v5294_v47  ;;  %5305 = vrcp.f32 %v8418_v23  ;;  %v2117_v10 = vadd.f32 %v2101_v16, %v11885_v1  ;;  %v11886_v47 = vld [vmem:[#allocation23_spill] sm:$0xff]  ;;  %v11888_v16 = vld [vmem:[#allocation14_spill] sm:$0xff] }
 0x397   : > { %v8428_v5 = vadd.f32 1.0, %v5296_v20  ;;  %5307 = vrcp.f32 %v8421_v0  ;;  %v2118_v59 = vadd.f32 %v2102_v8, %v11886_v47  ;;  %v5298_v25 = vpop.eup %5297  ;;  %v2119_v20 = vadd.f32 %v2103_v28, %v11887_v56 }
 0x398   : > { %5309 = vrcp.f32 %v8424_v39  ;;  %v5300_v46 = vpop.eup %5299  ;;  %v2120_v58 = vadd.f32 %v2104_v27, %v11888_v16  ;;  %v4885_v1 = vmul.f32 -1.442695, %v2117_v10  ;;  %v8455_v10 = vadd.f32 1.0, %v5298_v25 }
 0x399   : > { %5311 = vrcp.f32 %v8428_v5  ;;  %v4886_v47 = vmul.f32 -1.442695, %v2118_v59  ;;  %v4887_v2 = vmul.f32 -1.442695, %v2119_v20  ;;  %v2340_v16 = vand.u32 2147483648, %v8416_v40 }
 0x39a   : > { %v8439_v13 = vpop.eup %5301  ;;  %5313 = vpow2.f32 %v4881_v51  ;;  %v4888_v20 = vmul.f32 -1.442695, %v2120_v58  ;;  %v8472_v58 = vadd.f32 1.0, %v5300_v46 }
 0x39b   : > { %v8443_v8 = vpop.eup %5303  ;;  %5315 = vpow2.f32 %v4882_v63 }
 0x39c   : > { %v8449_v56 = vpop.eup %5305  ;;  %5317 = vpow2.f32 %v4883_v34  ;;  %v2375_v34 = vmul.f32 %v8439_v13, %v8414_v17  ;;  %v2330_v27 = vmul.f32 %v8443_v8, %v8416_v40  ;;  %vm2335_vm3 = vweird.f32 %v8443_v8 }
 0x39d   : > { %v8453_v51 = vpop.eup %5307  ;;  %5319 = vpow2.f32 %v4884_v36  ;;  %v2345_v46 = vmul.f32 %v8449_v56, %v8418_v23 }
 0x39e   : > { %v8459_v28 = vpop.eup %5309  ;;  %5321 = vpow2.f32 %v4885_v1  ;;  %v2360_v31 = vmul.f32 %v8453_v51, %v8421_v0  ;;  %v2331_v6 = vsub.f32 1.0, %v2330_v27 }
 0x39f   : > { %v8463_v30 = vpop.eup %5311  ;;  %5323 = vpow2.f32 %v4886_v47 }
 0x3a0   : > { %v5314_v63 = vpop.eup %5313  ;;  %5325 = vpow2.f32 %v4887_v2  ;;  %v2355_v2 = vand.u32 2147483648, %v8418_v23  ;;  %v2361_v27 = vsub.f32 1.0, %v2360_v31 }
 0x3a1   : > { %v5316_v1 = vpop.eup %5315  ;;  %5327 = vrcp.f32 %v8455_v10  ;;  %v8477_v25 = vadd.f32 1.0, %v5314_v63 }
 0x3a2   : > { %v5318_v47 = vpop.eup %5317  ;;  %5329 = vpow2.f32 %v4888_v20  ;;  %v8479_v36 = vadd.f32 1.0, %v5316_v1  ;;  %v2370_v20 = vand.u32 2147483648, %v8421_v0  ;;  %v2376_v1 = vsub.f32 1.0, %v2375_v34 }
 0x3a3   : > { %v5320_v59 = vpop.eup %5319  ;;  %v8487_v21 = vadd.f32 1.0, %v5318_v47  ;;  %5331 = vrcp.f32 %v8477_v25  ;;  %v2346_v34 = vsub.f32 1.0, %v2345_v46  ;;  %v8510_v57 = vor.u32 1.1754944e-38, %v2355_v2 }
 0x3a4   : > { %v5322_v63 = vpop.eup %5321  ;;  %v8490_v14 = vadd.f32 1.0, %v5320_v59  ;;  %5333 = vrcp.f32 %v8479_v36  ;;  %v8501_v59 = vor.u32 1.1754944e-38, %v2340_v16  ;;  %v2377_v16 = vmul.f32 %v8439_v13, %v2376_v1 }
 0x3a5   : > { %v5324_v33 = vpop.eup %5323  ;;  %5335 = vrcp.f32 %v8472_v58  ;;  %v8495_v52 = vadd.f32 1.0, %v5322_v63  ;;  %v8519_v46 = vmul.f32 %v8443_v8, %v2331_v6  ;;  %v2179_v1 = vand.u32 2147483648, %v8479_v36 }
 0x3a6   : > { %v5326_v47 = vpop.eup %5325  ;;  %v8498_v44 = vadd.f32 1.0, %v5324_v33  ;;  %5337 = vrcp.f32 %v8487_v21  ;;  %v8512_v33 = vor.u32 1.1754944e-38, %v2370_v20  ;;  %v2164_v20 = vand.u32 2147483648, %v8477_v25 }
 0x3a7   : > { %v8504_v4 = vpop.eup %5327  ;;  %v8506_v9 = vadd.f32 1.0, %v5326_v47  ;;  %5339 = vrcp.f32 %v8490_v14  ;;  %v8536_v47 = vmul.f32 %v8449_v56, %v2346_v34  ;;  %v8539_v31 = vmul.f32 %v8453_v51, %v2361_v27 }
 0x3a8   : > { %v5330_v62 = vpop.eup %5329  ;;  %5341 = vrcp.f32 %v8495_v52  ;;  %vm2158_vm10 = vweird.f32 %v8477_v25  ;;  %v2162_v18 = vand.u32 2147483647, %v8477_v25  ;;  %v8546_v55 = vadd.f32 %v8439_v13, %v2377_v16 }
 0x3a9   : > { %v8515_v41 = vpop.eup %5331  ;;  %5343 = vrcp.f32 %v8498_v44  ;;  %v8548_v54 = vadd.f32 1.0, %v5330_v62  ;;  %v2177_v37 = vand.u32 2147483647, %v8479_v36  ;;  %v8555_v32 = vor.u32 1.1754944e-38, %v2164_v20 }
 0x3aa   : > { %v8523_v63 = vpop.eup %5333  ;;  %v2154_v2 = vmul.f32 %v8515_v41, %v8477_v25  ;;  %5345 = vrcp.f32 %v8506_v9  ;;  %vm2173_vm11 = vweird.f32 %v8479_v36  ;;  %vm2188_vm12 = vweird.f32 %v8487_v21 }
 0x3ab   : > { %v8530_v22 = vpop.eup %5335  ;;  %v2169_v6 = vmul.f32 %v8523_v63, %v8479_v36  ;;  %v2192_v20 = vand.u32 2147483647, %v8487_v21  ;;  %v2194_v50 = vand.u32 2147483648, %v8487_v21  ;;  %v2207_v43 = vand.u32 2147483647, %v8490_v14 }
 0x3ac   : > { %v8541_v29 = vpop.eup %5337  ;;  %v2155_v45 = vsub.f32 1.0, %v2154_v2  ;;  %v8558_v2 = vor.u32 1.1754944e-38, %v2179_v1  ;;  %vm8576_vm13 = vcmp.eq.f32.partialorder %v2162_v18, 8.507059e+37  ;;  %vm8580_vm14 = vcmp.eq.f32.partialorder %v2177_v37, 8.507059e+37 }
 0x3ad   : > { %v2170_v12 = vsub.f32 1.0, %v2169_v6  ;;  %v2184_v34 = vmul.f32 %v8541_v29, %v8487_v21  ;;  %v8553_v27 = vpop.eup %5339  ;;  %5347 = vrcp.f32 %v8548_v54  ;;  %vm2203_vm15 = vweird.f32 %v8490_v14 }
 0x3ae   : > { %v8561_v16 = vpop.eup %5341  ;;  %v2156_v62 = vmul.f32 %v8515_v41, %v2155_v45  ;;  %v2199_v24 = vmul.f32 %v8553_v27, %v8490_v14  ;;  %vm2159_vm0 = vweird.f32 %v8515_v41  ;;  %v2209_v37 = vand.u32 2147483648, %v8490_v14 }
 0x3af   : > { %v2171_v6 = vmul.f32 %v8523_v63, %v2170_v12  ;;  %v2185_v26 = vsub.f32 1.0, %v2184_v34  ;;  %v8567_v48 = vpop.eup %5343  ;;  %v2214_v1 = vmul.f32 %v8561_v16, %v8495_v52  ;;  %vm2174_vm8 = vweird.f32 %v8523_v63  ;;  %vm8603_vm6 = vmor %vm2158_vm10, %vm2159_vm0 }
 0x3b0   : > { %v8574_v19 = vpop.eup %5345  ;;  %v2200_v49 = vsub.f32 1.0, %v2199_v24  ;;  %v2229_v42 = vmul.f32 %v8567_v48, %v8498_v44  ;;  %v2157_v60 = vadd.f32 %v8515_v41, %v2156_v62  ;;  %vm2189_vm5 = vweird.f32 %v8541_v29  ;;  %vm8615_vm2 = vmor %vm2173_vm11, %vm2174_vm8 }
 0x3b1   : > { %v2186_v34 = vmul.f32 %v8541_v29, %v2185_v26  ;;  %v2215_v18 = vsub.f32 1.0, %v2214_v1  ;;  %v2244_v3 = vmul.f32 %v8574_v19, %v8506_v9  ;;  %v2172_v26 = vadd.f32 %v8523_v63, %v2171_v6  ;;  %vm8638_vm11 = vmor %vm2188_vm12, %vm2189_vm5 }
 0x3b2   : > { %v2201_v24 = vmul.f32 %v8553_v27, %v2200_v49  ;;  %v2230_v1 = vsub.f32 1.0, %v2229_v42  ;;  %vm8607_vm7 = vcmp.eq.f32.partialorder %v2192_v20, 8.507059e+37  ;;  %v2195_v49 = vor.u32 1.1754944e-38, %v2194_v50 }
 0x3b3   : > { %v2187_v38 = vadd.f32 %v8541_v29, %v2186_v34  ;;  %v2216_v15 = vmul.f32 %v8561_v16, %v2215_v18  ;;  %v2245_v6 = vsub.f32 1.0, %v2244_v3  ;;  %v2222_v35 = vand.u32 2147483647, %v8495_v52  ;;  %v8626_v3 = vpop.eup %5347 }
 0x3b4   : > { %vm8619_vm10 = vcmp.eq.f32.partialorder %v2207_v43, 8.507059e+37  ;;  %v2210_v20 = vor.u32 1.1754944e-38, %v2209_v37  ;;  %v2224_v34 = vand.u32 2147483648, %v8495_v52  ;;  %v2237_v50 = vand.u32 2147483647, %v8498_v44 }
 0x3b5   : > { %vm2350_vm0 = vweird.f32 %v8449_v56  ;;  %v2161_v36 = vsel %vm8603_vm6, %v8515_v41, %v2157_v60  ;;  %v2176_v43 = vsel %vm8615_vm2, %v8523_v63, %v2172_v26  ;;  %v2202_v37 = vadd.f32 %v8553_v27, %v2201_v24 }
 0x3b6   : > { %vm2204_vm8 = vweird.f32 %v8553_v27  ;;  %v2191_v61 = vsel %vm8638_vm11, %v8541_v29, %v2187_v38  ;;  %v2217_v60 = vadd.f32 %v8561_v16, %v2216_v15  ;;  %vm2219_vm2 = vweird.f32 %v8561_v16 }
 0x3b7   : > { %v2231_v41 = vmul.f32 %v8567_v48, %v2230_v1  ;;  %vm2349_vm12 = vweird.f32 %v8418_v23  ;;  %vm2218_vm6 = vweird.f32 %v8495_v52  ;;  %vm8654_vm1 = vcmp.eq.f32.partialorder %v2222_v35, 8.507059e+37  ;;  %vm8675_vm5 = vmor %vm2203_vm15, %vm2204_vm8 }
 0x3b8   : > { %vm2233_vm4 = vweird.f32 %v8498_v44  ;;  %v2246_v38 = vmul.f32 %v8574_v19, %v2245_v6  ;;  %v8664_v15 = vsel %vm8576_vm13, %v8555_v32, %v2161_v36  ;;  %v8669_v29 = vsel %vm8580_vm14, %v8558_v2, %v2176_v43  ;;  %vm8691_vm14 = vmor %vm2218_vm6, %vm2219_vm2 }
 0x3b9   : > { %v2225_v52 = vor.u32 1.1754944e-38, %v2224_v34  ;;  %v2259_v63 = vmul.f32 %v8626_v3, %v8548_v54  ;;  %v8684_v32 = vsel %vm8607_vm7, %v2195_v49, %v2191_v61  ;;  %v2206_v2 = vsel %vm8675_vm5, %v8553_v27, %v2202_v37  ;;  %vm8738_vm13 = vmor %vm2334_vm9, %vm2335_vm3 }
 0x3ba   : > { %vm2234_vm15 = vweird.f32 %v8567_v48  ;;  %v2239_v45 = vand.u32 2147483648, %v8498_v44  ;;  %v2221_v12 = vsel %vm8691_vm14, %v8561_v16, %v2217_v60  ;;  %v2232_v26 = vadd.f32 %v8567_v48, %v2231_v41  ;;  %vm8789_vm9 = vmor %vm2349_vm12, %vm2350_vm0 }
 0x3bb   : > { %vm8701_vm7 = vcmp.eq.f32.partialorder %v2237_v50, 8.507059e+37  ;;  %v2260_v27 = vsub.f32 1.0, %v2259_v63  ;;  %v11911_v1 = vand.u32 2147483647, %v8416_v40  ;;  %v11914_v49 = vand.u32 2147483647, %v8418_v23  ;;  %vm8758_vm3 = vmor %vm2233_vm4, %vm2234_vm15 }
 0x3bc   : > { %v2247_v16 = vadd.f32 %v8574_v19, %v2246_v38  ;;  %vm2249_vm5 = vweird.f32 %v8574_v19  ;;  %v2254_v42 = vand.u32 2147483648, %v8506_v9  ;;  %v2333_v34 = vadd.f32 %v8443_v8, %v8519_v46 }
 0x3bd   : > { %vm8707_vm8 = vcmp.eq.f32.partialorder %v11911_v1, 8.507059e+37  ;;  %vm8713_vm2 = vcmp.eq.f32.partialorder %v11914_v49, 8.507059e+37  ;;  %v11917_v50 = vand.u32 2147483647, %v8421_v0  ;;  %v8730_v43 = vsel %vm8619_vm10, %v2210_v20, %v2206_v2 }
 0x3be   : > { %vm2248_vm14 = vweird.f32 %v8506_v9  ;;  %v2261_v18 = vmul.f32 %v8626_v3, %v2260_v27  ;;  %v2348_v37 = vadd.f32 %v8449_v56, %v8536_v47  ;;  %v11922_v61 = vand.u32 2147483647, %v8414_v17 }
 0x3bf   : > { %vm8724_vm6 = vcmp.eq.f32.partialorder %v11917_v50, 8.507059e+37  ;;  %v8752_v20 = vsel %vm8654_vm1, %v2225_v52, %v2221_v12  ;;  %v2240_v60 = vor.u32 1.1754944e-38, %v2239_v45  ;;  %v2252_v47 = vand.u32 2147483647, %v8506_v9  ;;  %vm8770_vm1 = vmor %vm2248_vm14, %vm2249_vm5  ;;  %v11954_v12 = vld [vmem:[#allocation24_spill] sm:$0xff] }
 0x3c0   : > { %vm8746_vm11 = vcmp.eq.f32.partialorder %v11922_v61, 8.507059e+37  ;;  %v2363_v41 = vadd.f32 %v8453_v51, %v8539_v31  ;;  %v2236_v21 = vsel %vm8758_vm3, %v8567_v48, %v2232_v26  ;;  %v2267_v44 = vand.u32 2147483647, %v8548_v54 }
 0x3c1   : > { %v2269_v35 = vand.u32 2147483648, %v8548_v54  ;;  %v2390_v9 = vmul.f32 %v8459_v28, %v8424_v39  ;;  %v2251_v31 = vsel %vm8770_vm1, %v8574_v19, %v2247_v16  ;;  %v2255_v52 = vor.u32 1.1754944e-38, %v2254_v42 }
 0x3c2   : > { %vm2264_vm4 = vweird.f32 %v8626_v3  ;;  %v2337_v48 = vsel %vm8738_vm13, %v8443_v8, %v2333_v34  ;;  %v2262_v2 = vadd.f32 %v8626_v3, %v2261_v18  ;;  %v2352_v19 = vsel %vm8789_vm9, %v8449_v56, %v2348_v37 }
 0x3c3   : > { %vm11931_vm10 = vweird.f32 %v8453_v51  ;;  %vm11932_vm15 = vweird.f32 %v8421_v0  ;;  %v2391_v14 = vsub.f32 1.0, %v2390_v9  ;;  %v2405_v23 = vmul.f32 %v8463_v30, %v8428_v5  ;;  %v11969_v9 = vld [vmem:[#allocation36_spill] sm:$0xff] }
 0x3c4   : > { %vm8801_vm5 = vmor %vm11932_vm15, %vm11931_vm10  ;;  %v2241_v45 = vsel %vm8701_vm7, %v2240_v60, %v2236_v21  ;;  %vm2253_vm0 = vcmp.eq.f32.partialorder %v2252_v47, 8.507059e+37  ;;  %vm2263_vm12 = vweird.f32 %v8548_v54  ;;  %vm11935_vm13 = vweird.f32 %v8439_v13  ;;  %v11956_v54 = vld [vmem:[#allocation27_spill] sm:$0xff] }
 0x3c5   : > { %v2367_v56 = vsel %vm8801_vm5, %v8453_v51, %v2363_v41  ;;  %vm11936_vm14 = vweird.f32 %v8414_v17  ;;  %v2256_v0 = vsel %vm2253_vm0, %v2255_v52, %v2251_v31  ;;  %vm8817_vm1 = vcmp.eq.f32.partialorder %v2267_v44, 8.507059e+37  ;;  %vm8825_vm7 = vmor %vm2263_vm12, %vm2264_vm4  ;;  %v11967_v47 = vld [vmem:[#allocation35_spill] sm:$0xff] }
 0x3c6   : > { %vm2381_vm3 = vmor %vm11936_vm14, %vm11935_vm13  ;;  %v2270_v26 = vor.u32 1.1754944e-38, %v2269_v35  ;;  %v8832_v51 = vsel %vm8707_vm8, %v8501_v59, %v2337_v48  ;;  %v8837_v27 = vsel %vm8713_vm2, %v8510_v57, %v2352_v19  ;;  %v11941_v1 = vand.u32 2147483648, %v8414_v17 }
 0x3c7   : > { %v2382_v24 = vsel %vm2381_vm3, %v8439_v13, %v8546_v55  ;;  %v2420_v55 = vmul.f32 %v8504_v4, %v8455_v10  ;;  %v2266_v13 = vsel %vm8825_vm7, %v8626_v3, %v2262_v2  ;;  %v8849_v59 = vsel %vm8724_vm6, %v8512_v33, %v2367_v56 }
 0x3c8   : > { %v2386_v49 = vor.u32 1.1754944e-38, %v11941_v1  ;;  %v2392_v62 = vmul.f32 %v8459_v28, %v2391_v14  ;;  %v2406_v6 = vsub.f32 1.0, %v2405_v23  ;;  %v2400_v17 = vand.u32 2147483648, %v8424_v39 }
 0x3c9   : > { %v2421_v16 = vsub.f32 1.0, %v2420_v55  ;;  %v2435_v42 = vmul.f32 %v8530_v22, %v8472_v58  ;;  %vm2394_vm8 = vweird.f32 %v8424_v39  ;;  %vm2395_vm2 = vweird.f32 %v8459_v28 }
 0x3ca   : > { %v8854_v57 = vsel %vm8746_vm11, %v2386_v49, %v2382_v24  ;;  %v2398_v33 = vand.u32 2147483647, %v8424_v39  ;;  %v2413_v3 = vand.u32 2147483647, %v8428_v5  ;;  %v2271_v34 = vsel %vm8817_vm1, %v2270_v26, %v2266_v13  ;;  %vm8896_vm5 = vmor %vm2394_vm8, %vm2395_vm2  ;;  %v11959_v49 = vld [vmem:[#allocation29_spill] sm:$0xff] }
 0x3cb   : > { %vm2409_vm11 = vweird.f32 %v8428_v5  ;;  %v2415_v50 = vand.u32 2147483648, %v8428_v5  ;;  %v2436_v36 = vsub.f32 1.0, %v2435_v42  ;;  %v2393_v18 = vadd.f32 %v8459_v28, %v2392_v62  ;;  %v11962_v62 = vld [vmem:[#allocation31_spill] sm:$0xff] }
 0x3cc   : > { %v2407_v46 = vmul.f32 %v8463_v30, %v2406_v6  ;;  %vm2410_vm6 = vweird.f32 %v8463_v30  ;;  %v2422_v37 = vmul.f32 %v8504_v4, %v2421_v16  ;;  %v2401_v61 = vor.u32 1.1754944e-38, %v2400_v17 }
 0x3cd   : > { %vm2424_vm4 = vweird.f32 %v8455_v10  ;;  %vm2425_vm9 = vweird.f32 %v8504_v4  ;;  %v11942_v25 = vrot.slane %v8445_v53, 5  ;;  %vm8876_vm10 = vcmp.eq.f32.partialorder %v2398_v33, 8.507059e+37  ;;  %vm8927_vm12 = vmor %vm2409_vm11, %vm2410_vm6  ;;  %v11966_v33 = vld [vmem:[#allocation34_spill] sm:$0xff] }
 0x3ce   : > { %vm8880_vm15 = vcmp.eq.f32.partialorder %v2413_v3, 8.507059e+37  ;;  %v2428_v41 = vand.u32 2147483647, %v8455_v10  ;;  %v2437_v21 = vmul.f32 %v8530_v22, %v2436_v36  ;;  %v11947_v38 = vrot.slane %v8445_v53, 6  ;;  %vm8941_vm14 = vmor %vm2424_vm4, %vm2425_vm9 }
 0x3cf   : > { %v2465_v40 = vmul.f32 %v11942_v25, %v8664_v15  ;;  %v11948_v35 = vrot.slane %v8445_v53, 7  ;;  %v2416_v31 = vor.u32 1.1754944e-38, %v2415_v50  ;;  %v2430_v52 = vand.u32 2147483648, %v8455_v10  ;;  %v11965_v10 = vld [vmem:[#allocation33_spill] sm:$0xff] }
 0x3d0   : > { %v2466_v44 = vmul.f32 %v11947_v38, %v8669_v29  ;;  %v2468_v48 = vmul.f32 %v8730_v43, %v8445_v53  ;;  %v11951_v29 = vrot.slane %v8445_v53, 1  ;;  %v2408_v39 = vadd.f32 %v8463_v30, %v2407_v46 }
 0x3d1   : > { %v2467_v15 = vmul.f32 %v11948_v35, %v8684_v32  ;;  %v2397_v32 = vsel %vm8896_vm5, %v8459_v28, %v2393_v18  ;;  %v2423_v2 = vadd.f32 %v8504_v4, %v2422_v37  ;;  %v11952_v19 = vrot.slane %v8445_v53, 2 }
 0x3d2   : > { %v2469_v63 = vmul.f32 %v11951_v29, %v8752_v20  ;;  %v11953_v14 = vrot.slane %v8445_v53, 3  ;;  %v2473_v43 = vadd.f32 %v2465_v40, %v6449_v7  ;;  %v2474_v56 = vadd.f32 %v2466_v44, %v6455_v11 }
 0x3d3   : > { %v2470_v8 = vmul.f32 %v11952_v19, %v2241_v45  ;;  %v2475_v20 = vadd.f32 %v2467_v15, %v11954_v12  ;;  %v2438_v26 = vadd.f32 %v8530_v22, %v2437_v21  ;;  %vm2440_vm0 = vweird.f32 %v8530_v22 }
 0x3d4   : > { %v2471_v23 = vmul.f32 %v11953_v14, %v2256_v0  ;;  %v11955_v28 = vrot.slane %v8445_v53, 4  ;;  %v2476_v1 = vadd.f32 %v2468_v48, %v11956_v54  ;;  %vm2439_vm13 = vweird.f32 %v8472_v58 }
 0x3d5   : > { %v2445_v0 = vand.u32 2147483648, %v8472_v58  ;;  %v2477_v55 = vadd.f32 %v2469_v63, %v11959_v49  ;;  %5349 = vtanh.f32 %v2473_v43  ;;  %v2412_v53 = vsel %vm8927_vm12, %v8463_v30, %v2408_v39  ;;  %vm8952_vm1 = vmor %vm2439_vm13, %vm2440_vm0 }
 0x3d6   : > { %v2472_v24 = vmul.f32 %v11955_v28, %v2271_v34  ;;  %v2443_v13 = vand.u32 2147483647, %v8472_v58  ;;  %v2478_v6 = vadd.f32 %v2470_v8, %v11962_v62  ;;  %5351 = vtanh.f32 %v2474_v56  ;;  %v11975_v28 = vld [vmem:[#allocation39_spill] sm:$0xff] }
 0x3d7   : > { %v2427_v17 = vsel %vm8941_vm14, %v8504_v4, %v2423_v2  ;;  %vm2429_vm3 = vcmp.eq.f32.partialorder %v2428_v41, 8.507059e+37  ;;  %v2479_v16 = vadd.f32 %v2471_v23, %v11965_v10  ;;  %5353 = vtanh.f32 %v2475_v20  ;;  %v11973_v23 = vld [vmem:[#allocation38_spill] sm:$0xff] }
 0x3d8   : > { %v2431_v42 = vor.u32 1.1754944e-38, %v2430_v52  ;;  %v2442_v58 = vsel %vm8952_vm1, %v8530_v22, %v2438_v26  ;;  %v2480_v3 = vadd.f32 %v2472_v24, %v11966_v33  ;;  %5355 = vtanh.f32 %v2476_v1 }
 0x3d9   : > { %v2402_v4 = vsel %vm8876_vm10, %v2401_v61, %v2397_v32  ;;  %v2417_v34 = vsel %vm8880_vm15, %v2416_v31, %v2412_v53  ;;  %v2446_v50 = vor.u32 1.1754944e-38, %v2445_v0  ;;  %5357 = vtanh.f32 %v2477_v55  ;;  %v11971_v32 = vld [vmem:[#allocation37_spill] sm:$0xff]  ;;  %v11977_v53 = vld [vmem:[#allocation40_spill] sm:$0xff] }
 0x3da   : > { %v2432_v36 = vsel %vm2429_vm3, %v2431_v42, %v2427_v17  ;;  %vm2444_vm7 = vcmp.eq.f32.partialorder %v2443_v13, 8.507059e+37  ;;  %5359 = vtanh.f32 %v2478_v6  ;;  %v2489_v18 = vsub.f32 1.0, %v8832_v51 }
 0x3db   : > { %v5350_v46 = vpop.eup %5349  ;;  %v2447_v37 = vsel %vm2444_vm7, %v2446_v50, %v2442_v58  ;;  %5361 = vtanh.f32 %v2479_v16  ;;  %v2490_v22 = vsub.f32 1.0, %v8837_v27  ;;  %v2491_v25 = vsub.f32 1.0, %v8849_v59  ;;  %v11979_v16 = vld [vmem:[#allocation41_spill] sm:$0xff]  ;;  %v11981_v50 = vld [vmem:[#allocation42_spill] sm:$0xff] }
 0x3dc   : > { %v5352_v40 = vpop.eup %5351  ;;  %5363 = vtanh.f32 %v2480_v3  ;;  %v2492_v61 = vsub.f32 1.0, %v8854_v57  ;;  %v2497_v60 = vmul.f32 %v5350_v46, %v2489_v18  ;;  %v11968_v41 = vrot.slane %v11967_v47, 7 }
 0x3dd   : > { %v5354_v38 = vpop.eup %5353  ;;  %v2493_v44 = vsub.f32 1.0, %v2402_v4  ;;  %v2494_v35 = vsub.f32 1.0, %v2417_v34  ;;  %v2498_v15 = vmul.f32 %v5352_v40, %v2490_v22  ;;  %v11970_v31 = vrot.slane %v11969_v9, 7  ;;  %v11990_v9 = vld [vmem:[#allocation43_spill] sm:$0xff] }
 0x3de   : > { %v2520_v21 = vmul.f32 %v11968_v41, %v8832_v51  ;;  %v5356_v48 = vpop.eup %5355  ;;  %v2495_v29 = vsub.f32 1.0, %v2432_v36  ;;  %v2499_v63 = vmul.f32 %v5354_v38, %v2491_v25  ;;  %v11972_v39 = vrot.slane %v11971_v32, 7  ;;  %v11996_v32 = vld [vmem:[#allocation49_spill] sm:$0xff] }
 0x3df   : > { %v2521_v52 = vmul.f32 %v11970_v31, %v8837_v27  ;;  %v5358_v51 = vpop.eup %5357  ;;  %v2496_v8 = vsub.f32 1.0, %v2447_v37  ;;  %v2500_v14 = vmul.f32 %v5356_v48, %v2492_v61  ;;  %v11974_v43 = vrot.slane %v11973_v23, 7  ;;  %v11991_v31 = vld [vmem:[#allocation44_spill] sm:$0xff]  ;;  %v11993_v48 = vld [vmem:[#allocation46_spill] sm:$0xff]  ;;  %v12002_v23 = vld [vmem:[#allocation55_spill] sm:$0xff] }
 0x3e0   : > { %v2522_v2 = vmul.f32 %v11972_v39, %v8849_v59  ;;  %v8978_v19 = vadd.f32 %v2520_v21, %v2497_v60  ;;  %v5360_v27 = vpop.eup %5359  ;;  %v2501_v26 = vmul.f32 %v5358_v51, %v2493_v44  ;;  %v11976_v24 = vrot.slane %v11975_v28, 7  ;;  %v11997_v39 = vld [vmem:[#allocation50_spill] sm:$0xff]  ;;  %v11999_v51 = vld [vmem:[#allocation52_spill] sm:$0xff] }
 0x3e1   : > { %v2523_v56 = vmul.f32 %v8854_v57, %v11974_v43  ;;  %v8983_v20 = vadd.f32 %v2521_v52, %v2498_v15  ;;  %v5362_v0 = vpop.eup %5361  ;;  %v2502_v55 = vmul.f32 %v5360_v27, %v2494_v35  ;;  %v11978_v5 = vrot.slane %v11977_v53, 7  ;;  %v11992_v52 = vld [vmem:[#allocation45_spill] sm:$0xff]  ;;  %v12003_v43 = vld [vmem:[#allocation56_spill] sm:$0xff]  ;;  %v12005_v27 = vld [vmem:[#allocation58_spill] sm:$0xff] }
 0x3e2   : > { %v2524_v1 = vmul.f32 %v11976_v24, %v2402_v4  ;;  %v8987_v45 = vadd.f32 %v2522_v2, %v2499_v63  ;;  %2536 = vst [vmem:[%s6102_s23] sm:$0x8] %v8978_v19  ;;  %v2552_v59 = vrot.slane %v8978_v19, 3  ;;  %v5364_v17 = vpop.eup %5363  ;;  %v2503_v30 = vmul.f32 %v5362_v0, %v2495_v29  ;;  %v11994_v29 = vld [vmem:[#allocation47_spill] sm:$0xff]  ;;  %v11995_v63 = vld [vmem:[#allocation48_spill] sm:$0xff]  ;;  %v12008_v24 = vld [vmem:[#allocation61_spill] sm:$0xff] }
 0x3e3   : > { %v2525_v57 = vmul.f32 %v11978_v5, %v2417_v34  ;;  %v8994_v13 = vadd.f32 %v2523_v56, %v2500_v14  ;;  %2537 = vst [vmem:[%s6102_s23 + $0x8] sm:$0x8] %v8983_v20  ;;  %v2553_v6 = vrot.slane %v8983_v20, 2  ;;  %v11980_v42 = vrot.slane %v11979_v16, 7  ;;  %v11998_v2 = vld [vmem:[#allocation51_spill] sm:$0xff]  ;;  %v12001_v14 = vld [vmem:[#allocation54_spill] sm:$0xff] }
 0x3e4   : > { %v9001_v3 = vadd.f32 %v2524_v1, %v2501_v26  ;;  %2538 = vst [vmem:[%s6102_s23 + $0x10] sm:$0x8] %v8987_v45  ;;  %v2555_v4 = vrot.slane %v8987_v45, 1  ;;  %v2504_v34 = vmul.f32 %v5364_v17, %v2496_v8  ;;  %v11982_v18 = vrot.slane %v11981_v50, 7  ;;  %v12000_v8 = vld [vmem:[#allocation53_spill] sm:$0xff]  ;;  %v12006_v26 = vld [vmem:[#allocation59_spill] sm:$0xff] }
 0x3e5   : > { %v2526_v58 = vmul.f32 %v11980_v42, %v2432_v36  ;;  %v9008_v22 = vadd.f32 %v2525_v57, %v2502_v55  ;;  %2539 = vst [vmem:[%s6102_s23 + $0x18] sm:$0x8] %v8994_v13  ;;  %vm11983_vm8 = vcmask 1041409   ;;  %vm11984_vm2 = vcmask 1042434   ;;  %v12004_v56 = vld [vmem:[#allocation57_spill] sm:$0xff]  ;;  %v12007_v28 = vld [vmem:[#allocation60_spill] sm:$0xff] }
 0x3e6   : > { %v2527_v46 = vmul.f32 %v11982_v18, %v2447_v37  ;;  %v2554_v25 = vsel %vm11983_vm8, %v2553_v6, %v2552_v59  ;;  %2540 = vst [vmem:[%s6102_s23 + $0x20] sm:$0x8] %v9001_v3  ;;  %v11528_v61 = vrot.slane %v9001_v3, 7  ;;  %vm11985_vm11 = vcmask 1043459   ;;  %v12009_v1 = vld [vmem:[#allocation62_spill] sm:$0xff]  ;;  %v12010_v59 = vld [vmem:[#allocation63_spill] sm:$0xff] }
 0x3e7   : > { %v9013_v40 = vadd.f32 %v2526_v58, %v2503_v30  ;;  %v2556_v36 = vsel %vm11984_vm2, %v2555_v4, %v2554_v25  ;;  %2541 = vst [vmem:[%s6102_s23 + $0x28] sm:$0x8] %v9008_v22  ;;  %v2560_v47 = vrot.slane %v9008_v22, 6  ;;  %vm11986_vm6 = vcmask 1044484   ;;  %v12011_v0 = vld [vmem:[#allocation64_spill] sm:$0xff]  ;;  %v12012_v55 = vld [vmem:[#allocation65_spill] sm:$0xff] }
 0x3e8   : > { %v9019_v60 = vadd.f32 %v2527_v46, %v2504_v34  ;;  %v2557_v37 = vsel %vm11985_vm11, %v8994_v13, %v2556_v36  ;;  %vm11987_vm4 = vcmask 1045509   ;;  %vm11988_vm9 = vcmask 1046534   ;;  %v12013_v53 = vld [vmem:[#allocation66_spill] sm:$0xff]  ;;  %v12014_v5 = vld [vmem:[#allocation67_spill] sm:$0xff]  ;;  %v12015_v57 = vld [vmem:[#allocation68_spill] sm:$0xff] }
 0x3e9   : > { %2542 = vst [vmem:[%s6102_s23 + $0x30] sm:$0x8] %v9013_v40  ;;  %v2559_v41 = vsel %vm11986_vm6, %v11528_v61, %v2557_v37  ;;  %v2562_v21 = vrot.slane %v9013_v40, 5  ;;  %vm11989_vm10 = vcmask 1047559   ;;  %v12016_v6 = vld [vmem:[#allocation69_spill] sm:$0xff]  ;;  %v12017_v17 = vld [vmem:[#allocation70_spill] sm:$0xff] }
 0x3ea   : > { %2543 = vst [vmem:[%s6102_s23 + $0x38] sm:$0x8] %v9019_v60  ;;  %v2561_v38 = vsel %vm11987_vm4, %v2560_v47, %v2559_v41  ;;  %v2564_v44 = vrot.slane %v9019_v60, 4  ;;  %v12018_v30 = vld [vmem:[#allocation71_spill] sm:$0xff]  ;;  %v12019_v16 = vld [vmem:[#allocation72_spill] sm:$0xff]  ;;  %v12020_v42 = vld [vmem:[#allocation73_spill] sm:$0xff] }
 0x3eb   : > { %v2563_v35 = vsel %vm11988_vm9, %v2562_v21, %v2561_v38  ;;  %v12021_v58 = vld [vmem:[#allocation74_spill] sm:$0xff]  ;;  %v12022_v4 = vld [vmem:[#allocation75_spill] sm:$0xff]  ;;  %v12023_v34 = vld [vmem:[#allocation76_spill] sm:$0xff] }
 0x3ec   : > { %v2565_v15 = vsel %vm11989_vm10, %v2564_v44, %v2563_v35  ;;  %v12024_v50 = vld [vmem:[#allocation77_spill] sm:$0xff]  ;;  %v12025_v18 = vld [vmem:[#allocation78_spill] sm:$0xff]  ;;  %v12026_v46 = vld [vmem:[#allocation79_spill] sm:$0xff] }
 0x3ed   : > { %2583 = vmatmul.f32.vlgmr.msrb.gmra.mxu2 %v2565_v15  ;;  %2603 = vmatmul.f32.vlgmr.msra.gmra.mxu3 %v2565_v15  ;;  %v12027_v25 = vld [vmem:[#allocation80_spill] sm:$0xff]  ;;  %v12028_v36 = vld [vmem:[#allocation81_spill] sm:$0xff]  ;;  %v12029_v37 = vld [vmem:[#allocation82_spill] sm:$0xff] }
 0x3ee   : > { %2623 = vmatmul.f32.vlgmr.msra.gmra.mxu0 %v2565_v15  ;;  %3667 = vmatpush.msrb.mxu2 %v11990_v9  ;;  %v12030_v47 = vld [vmem:[#allocation83_spill] sm:$0xff]  ;;  %v12031_v41 = vld [vmem:[#allocation84_spill] sm:$0xff]  ;;  %v12032_v21 = vld [vmem:[#allocation85_spill] sm:$0xff] }
 0x3ef   : > { %4157 = vmatpush.msra.mxu3 %v11991_v31  ;;  %4177 = vmatpush.msra.mxu0 %v11992_v52  ;;  %v12033_v38 = vld [vmem:[#allocation86_spill] sm:$0xff]  ;;  %v12034_v44 = vld [vmem:[#allocation87_spill] sm:$0xff]  ;;  %v12035_v35 = vld [vmem:[#allocation88_spill] sm:$0xff] }
 0x3f0   : > { %3668 = vmatpush.msrb.mxu2 %v11993_v48  ;;  %v12036_v15 = vld [vmem:[#allocation89_spill] sm:$0xff]  ;;  %v12037_v9 = vld [vmem:[#allocation90_spill] sm:$0xff] }
 0x3f1   : > { %4158 = vmatpush.msra.mxu3 %v11994_v29  ;;  %4178 = vmatpush.msra.mxu0 %v11995_v63 }
 0x3f2   : > { %3669 = vmatpush.msrb.mxu2 %v11996_v32 }
 0x3f3   : > { %4159 = vmatpush.msra.mxu3 %v11997_v39  ;;  %4179 = vmatpush.msra.mxu0 %v11998_v2 }
 0x3f4   : > { %3670 = vmatpush.msrb.mxu2 %v11999_v51  ;;  %v12038_v51 = vld [vmem:[#allocation21_spill] sm:$0xff] }
 0x3f5   : > { %4160 = vmatpush.msra.mxu3 %v12000_v8  ;;  %4180 = vmatpush.msra.mxu0 %v12001_v14  ;;  %v12039_v14 = vld [vmem:[#allocation13_spill] sm:$0xff] }
 0x3f6   : > { %3671 = vmatpush.msrb.mxu2 %v12002_v23 }
 0x3f7   : > { %4161 = vmatpush.msra.mxu3 %v12003_v43  ;;  %4181 = vmatpush.msra.mxu0 %v12004_v56  ;;  %v12040_v43 = vld [vmem:[#allocation15_spill] sm:$0xff] }
 0x3f8   : > { %3672 = vmatpush.msrb.mxu2 %v12005_v27  ;;  %v12041_v27 = vld [vmem:[#allocation17_spill] sm:$0xff] }
 0x3f9   : > { %4162 = vmatpush.msra.mxu3 %v12006_v26  ;;  %4182 = vmatpush.msra.mxu0 %v12007_v28  ;;  %v12042_v28 = vld [vmem:[#allocation19_spill] sm:$0xff] }
 0x3fa   : > { %3673 = vmatpush.msrb.mxu2 %v12008_v24 }
 0x3fb   : > { %4163 = vmatpush.msra.mxu3 %v12009_v1  ;;  %4183 = vmatpush.msra.mxu0 %v12010_v59  ;;  %v12043_v1 = vld [vmem:[#allocation23_spill] sm:$0xff] }
 0x3fc   : > { %3674 = vmatpush.msrb.mxu2 %v12011_v0  ;;  %v12044_v0 = vld [vmem:[#allocation25_spill] sm:$0xff] }
 0x3fd   : > { %4164 = vmatpush.msra.mxu3 %v12012_v55  ;;  %4184 = vmatpush.msra.mxu0 %v12013_v53 }
 0x3fe   : > { %3675 = vmatpush.msrb.mxu2 %v12014_v5 }
 0x3ff   : > { %4165 = vmatpush.msra.mxu3 %v12015_v57  ;;  %4185 = vmatpush.msra.mxu0 %v12016_v6 }
 0x400   : > { %3676 = vmatpush.msrb.mxu2 %v12017_v17 }
 0x401   : > { %4166 = vmatpush.msra.mxu3 %v12018_v30  ;;  %4186 = vmatpush.msra.mxu0 %v12019_v16  ;;  %v12045_v30 = vld [vmem:[#allocation14_spill] sm:$0xff] }
 0x402   : > { %3677 = vmatpush.msrb.mxu2 %v12020_v42 }
 0x403   : > { %4167 = vmatpush.msra.mxu3 %v12021_v58  ;;  %4187 = vmatpush.msra.mxu0 %v12022_v4 }
 0x404   : > { %3678 = vmatpush.msrb.mxu2 %v12023_v34 }
 0x405   : > { %4168 = vmatpush.msra.mxu3 %v12024_v50  ;;  %4188 = vmatpush.msra.mxu0 %v12025_v18  ;;  %v12053_v50 = vld [vmem:[#allocation16_spill] sm:$0xff] }
 0x406   : > { %3679 = vmatpush.msrb.mxu2 %v12026_v46 }
 0x407   : > { %4169 = vmatpush.msra.mxu3 %v12027_v25  ;;  %4189 = vmatpush.msra.mxu0 %v12028_v36 }
 0x408   : > { %3680 = vmatpush.msrb.mxu2 %v12029_v37 }
 0x409   : > { %4170 = vmatpush.msra.mxu3 %v12030_v47  ;;  %4190 = vmatpush.msra.mxu0 %v12031_v41  ;;  %v12046_v41 = vld [vmem:[#allocation18_spill] sm:$0xff] }
 0x40a   : > { %3681 = vmatpush.msrb.mxu2 %v12032_v21 }
 0x40b   : > { %4171 = vmatpush.msra.mxu3 %v12033_v38  ;;  %4191 = vmatpush.msra.mxu0 %v12034_v44  ;;  %v12052_v38 = vld [vmem:[#allocation32_spill] sm:$0xff] }
 0x40c   : > { %3682 = vmatpush.msrb.mxu2 %v12035_v35 }
 0x40d   : > { %4172 = vmatpush.msra.mxu3 %v12036_v15  ;;  %4192 = vmatpush.msra.mxu0 %v12037_v9 }
 0x46b   : > { %v9098_v18 = vpop.f32.mrf.mxu0 }
 0x470   : > { %v2584_v31 = vpop.f32.mrf.mxu2  ;;  %v9093_v17 = vpop.f32.mrf.mxu3 }
 0x471   : > { %v2628_v52 = vrot.slane %v2584_v31, 4  ;;  %v2629_v48 = vrot.slane %v2584_v31, 5  ;;  %v2630_v29 = vrot.slane %v2584_v31, 6  ;;  %v2631_v63 = vrot.slane %v2584_v31, 7 }
 0x472   : > { %v2632_v32 = vrot.slane %v2584_v31, 1  ;;  %v2633_v39 = vrot.slane %v2584_v31, 2  ;;  %v2634_v2 = vrot.slane %v2584_v31, 3  ;;  %v2647_v8 = vadd.f32 %v2584_v31, %v12038_v51 }
 0x473   : > { %v2643_v23 = vadd.f32 %v2628_v52, %v12039_v14  ;;  %v2644_v56 = vadd.f32 %v2629_v48, %v12040_v43  ;;  %v2645_v26 = vadd.f32 %v2630_v29, %v12041_v27  ;;  %v2646_v24 = vadd.f32 %v2631_v63, %v12042_v28 }
 0x474   : > { %v2648_v59 = vadd.f32 %v2632_v32, %v12043_v1  ;;  %v2649_v55 = vadd.f32 %v2633_v39, %v12044_v0  ;;  %v4901_v53 = vmul.f32 -1.442695, %v2647_v8  ;;  %v2650_v16 = vadd.f32 %v2634_v2, %v12045_v30 }
 0x475   : > { %v4897_v5 = vmul.f32 -1.442695, %v2643_v23  ;;  %v4898_v57 = vmul.f32 -1.442695, %v2644_v56  ;;  %v4899_v6 = vmul.f32 -1.442695, %v2645_v26 }
 0x476   : > { %v4900_v42 = vmul.f32 -1.442695, %v2646_v24  ;;  %5365 = vpow2.f32 %v4901_v53  ;;  %v4902_v58 = vmul.f32 -1.442695, %v2648_v59  ;;  %v4903_v4 = vmul.f32 -1.442695, %v2649_v55 }
 0x477   : > { %5367 = vpow2.f32 %v4897_v5  ;;  %v2804_v34 = vrot.slane %v9093_v17, 4  ;;  %v4904_v46 = vmul.f32 -1.442695, %v2650_v16  ;;  %v2805_v31 = vrot.slane %v9093_v17, 5 }
 0x478   : > { %5369 = vpow2.f32 %v4898_v57  ;;  %v2806_v63 = vrot.slane %v9093_v17, 6  ;;  %v2807_v32 = vrot.slane %v9093_v17, 7  ;;  %v2808_v23 = vrot.slane %v9093_v17, 1 }
 0x479   : > { %5371 = vpow2.f32 %v4899_v6  ;;  %v2819_v21 = vadd.f32 %v2804_v34, %v12046_v41  ;;  %v2809_v24 = vrot.slane %v9093_v17, 2  ;;  %v2810_v57 = vrot.slane %v9093_v17, 3 }
 0x47a   : > { %5373 = vpow2.f32 %v4900_v42  ;;  %v12047_v42 = vld [vmem:[#allocation20_spill] sm:$0xff] }
 0x47b   : > { %5375 = vpow2.f32 %v4902_v58  ;;  %v4905_v59 = vmul.f32 -1.442695, %v2819_v21  ;;  %v2820_v58 = vadd.f32 %v2805_v31, %v12047_v42  ;;  %v2825_v31 = vadd.f32 %v2809_v24, %v12052_v38 }
 0x47c   : > { %v5366_v47 = vpop.eup %5365  ;;  %5377 = vpow2.f32 %v4903_v4  ;;  %v12048_v4 = vld [vmem:[#allocation22_spill] sm:$0xff]  ;;  %v2826_v37 = vadd.f32 %v2810_v57, %v12053_v50 }
 0x47d   : > { %v5368_v35 = vpop.eup %5367  ;;  %v9107_v9 = vadd.f32 1.0, %v5366_v47  ;;  %5379 = vpow2.f32 %v4904_v46  ;;  %v2821_v34 = vadd.f32 %v2806_v63, %v12048_v4  ;;  %v12049_v46 = vld [vmem:[#allocation26_spill] sm:$0xff] }
 0x47e   : > { %v5370_v48 = vpop.eup %5369  ;;  %v9111_v29 = vadd.f32 1.0, %v5368_v35  ;;  %v2822_v47 = vadd.f32 %v2807_v32, %v12049_v46  ;;  %v4912_v2 = vmul.f32 -1.442695, %v2826_v37 }
 0x47f   : > { %v5372_v39 = vpop.eup %5371  ;;  %v9116_v8 = vadd.f32 1.0, %v5370_v48  ;;  %5381 = vrcp.f32 %v9107_v9  ;;  %v12050_v48 = vld [vmem:[#allocation28_spill] sm:$0xff]  ;;  %v4907_v25 = vmul.f32 -1.442695, %v2821_v34  ;;  %vm2748_vm0 = vweird.f32 %v9107_v9 }
 0x480   : > { %v5374_v56 = vpop.eup %5373  ;;  %v9120_v26 = vadd.f32 1.0, %v5372_v39  ;;  %5383 = vrcp.f32 %v9111_v29  ;;  %v2823_v39 = vadd.f32 %v9093_v17, %v12050_v48  ;;  %v4906_v17 = vmul.f32 -1.442695, %v2820_v58 }
 0x481   : > { %v5376_v55 = vpop.eup %5375  ;;  %v9125_v5 = vadd.f32 1.0, %v5374_v56  ;;  %5385 = vrcp.f32 %v9116_v8  ;;  %v4911_v58 = vmul.f32 -1.442695, %v2825_v31  ;;  %v2709_v53 = vand.u32 2147483648, %v9116_v8 }
 0x482   : > { %v5378_v6 = vpop.eup %5377  ;;  %v9129_v16 = vadd.f32 1.0, %v5376_v55  ;;  %5387 = vrcp.f32 %v9120_v26  ;;  %v12051_v55 = vld [vmem:[#allocation30_spill] sm:$0xff]  ;;  %v4909_v32 = vmul.f32 -1.442695, %v2823_v39  ;;  %vm2688_vm15 = vweird.f32 %v9111_v29 }
 0x483   : > { %v5380_v56 = vpop.eup %5379  ;;  %v2824_v44 = vadd.f32 %v2808_v23, %v12051_v55  ;;  %5389 = vpow2.f32 %v4905_v59  ;;  %v9145_v61 = vadd.f32 1.0, %v5378_v6  ;;  %v4908_v23 = vmul.f32 -1.442695, %v2822_v47 }
 0x484   : > { %5391 = vrcp.f32 %v9125_v5  ;;  %v2694_v59 = vand.u32 2147483648, %v9111_v29  ;;  %v9159_v35 = vadd.f32 1.0, %v5380_v56  ;;  %v2692_v39 = vand.u32 2147483647, %v9111_v29 }
 0x485   : > { %v9142_v63 = vpop.eup %5381  ;;  %5393 = vrcp.f32 %v9129_v16  ;;  %v4910_v21 = vmul.f32 -1.442695, %v2824_v44  ;;  %vm2703_vm5 = vweird.f32 %v9116_v8  ;;  %v2722_v46 = vand.u32 2147483647, %v9120_v26 }
 0x486   : > { %v9149_v36 = vpop.eup %5383  ;;  %v2744_v6 = vmul.f32 %v9142_v63, %v9107_v9  ;;  %5395 = vrcp.f32 %v9145_v61  ;;  %v9173_v31 = vor.u32 1.1754944e-38, %v2694_v59  ;;  %v9184_v59 = vor.u32 1.1754944e-38, %v2709_v53 }
 0x487   : > { %v9152_v52 = vpop.eup %5385  ;;  %v2684_v24 = vmul.f32 %v9149_v36, %v9111_v29  ;;  %5397 = vpow2.f32 %v4906_v17  ;;  %vm9188_vm12 = vcmp.eq.f32.partialorder %v2692_v39, 8.507059e+37  ;;  %vm2718_vm13 = vweird.f32 %v9120_v26 }
 0x488   : > { %v2699_v57 = vmul.f32 %v9152_v52, %v9116_v8  ;;  %v9163_v34 = vpop.eup %5387  ;;  %v2745_v38 = vsub.f32 1.0, %v2744_v6  ;;  %5399 = vpow2.f32 %v4907_v25  ;;  %vm2689_vm14 = vweird.f32 %v9149_v36 }
 0x489   : > { %v2685_v47 = vsub.f32 1.0, %v2684_v24  ;;  %v5390_v15 = vpop.eup %5389  ;;  %v2714_v50 = vmul.f32 %v9163_v34, %v9120_v26  ;;  %v2707_v24 = vand.u32 2147483647, %v9116_v8  ;;  %5401 = vrcp.f32 %v9159_v35  ;;  %vm9225_vm8 = vmor %vm2688_vm15, %vm2689_vm14 }
 0x48a   : > { %v2700_v56 = vsub.f32 1.0, %v2699_v57  ;;  %v9171_v44 = vpop.eup %5391  ;;  %5403 = vpow2.f32 %v4908_v23  ;;  %vm2704_vm3 = vweird.f32 %v9152_v52  ;;  %vm2733_vm7 = vweird.f32 %v9125_v5 }
 0x48b   : > { %v9177_v37 = vpop.eup %5393  ;;  %v2686_v55 = vmul.f32 %v9149_v36, %v2685_v47  ;;  %v2715_v48 = vsub.f32 1.0, %v2714_v50  ;;  %v2729_v57 = vmul.f32 %v9171_v44, %v9125_v5  ;;  %v2724_v50 = vand.u32 2147483648, %v9120_v26  ;;  %vm9240_vm11 = vmor %vm2703_vm5, %vm2704_vm3 }
 0x48c   : > { %v2701_v17 = vmul.f32 %v9152_v52, %v2700_v56  ;;  %5405 = vpow2.f32 %v4909_v32  ;;  %v9194_v47 = vadd.f32 1.0, %v5390_v15  ;;  %v9196_v56 = vpop.eup %5395  ;;  %vm9200_vm1 = vcmp.eq.f32.partialorder %v2707_v24, 8.507059e+37 }
 0x48d   : > { %v2730_v6 = vsub.f32 1.0, %v2729_v57  ;;  %v2759_v23 = vmul.f32 %v9177_v37, %v9129_v16  ;;  %5407 = vpow2.f32 %v4910_v21  ;;  %v5398_v39 = vpop.eup %5397  ;;  %v2687_v15 = vadd.f32 %v9149_v36, %v2686_v55 }
 0x48e   : > { %v2716_v32 = vmul.f32 %v9163_v34, %v2715_v48  ;;  %5409 = vpow2.f32 %v4911_v58  ;;  %v2746_v57 = vmul.f32 %v9142_v63, %v2745_v38  ;;  %v5400_v4 = vpop.eup %5399  ;;  %v2702_v24 = vadd.f32 %v9152_v52, %v2701_v17 }
 0x48f   : > { %v2731_v42 = vmul.f32 %v9171_v44, %v2730_v6  ;;  %5411 = vpow2.f32 %v4912_v2  ;;  %v9212_v41 = vadd.f32 1.0, %v5398_v39  ;;  %v9214_v30 = vpop.eup %5401  ;;  %v9216_v0 = vor.u32 1.1754944e-38, %v2724_v50 }
 0x490   : > { %v2739_v21 = vand.u32 2147483648, %v9125_v5  ;;  %5413 = vrcp.f32 %v9194_v47  ;;  %v2737_v48 = vand.u32 2147483647, %v9125_v5  ;;  %v5404_v55 = vpop.eup %5403  ;;  %v2760_v2 = vsub.f32 1.0, %v2759_v23 }
 0x491   : > { %v2774_v58 = vmul.f32 %v9196_v56, %v9145_v61  ;;  %5415 = vrcp.f32 %v9212_v41  ;;  %vm2749_vm2 = vweird.f32 %v9142_v63  ;;  %v2691_v50 = vsel %vm9225_vm8, %v9149_v36, %v2687_v15 }
 0x492   : > { %v5406_v17 = vpop.eup %5405  ;;  %v2717_v6 = vadd.f32 %v9163_v34, %v2716_v32  ;;  %vm2719_vm6 = vweird.f32 %v9163_v34  ;;  %v9246_v23 = vadd.f32 1.0, %v5400_v4  ;;  %v2706_v38 = vsel %vm9240_vm11, %v9152_v52, %v2702_v24  ;;  %vm9268_vm15 = vmor %vm2748_vm0, %vm2749_vm2 }
 0x493   : > { %v5408_v39 = vpop.eup %5407  ;;  %vm9251_vm4 = vcmp.eq.f32.partialorder %v2722_v46, 8.507059e+37  ;;  %vm2734_vm9 = vweird.f32 %v9171_v44  ;;  %v2732_v8 = vadd.f32 %v9171_v44, %v2731_v42  ;;  %v2747_v15 = vadd.f32 %v9142_v63, %v2746_v57  ;;  %vm9277_vm5 = vmor %vm2718_vm13, %vm2719_vm6 }
 0x494   : > { %v5410_v32 = vpop.eup %5409  ;;  %v2740_v51 = vor.u32 1.1754944e-38, %v2739_v21  ;;  %v9258_v28 = vadd.f32 1.0, %v5404_v55  ;;  %vm9260_vm10 = vcmp.eq.f32.partialorder %v2737_v48, 8.507059e+37  ;;  %v2752_v42 = vand.u32 2147483647, %v9107_v9  ;;  %vm9295_vm0 = vmor %vm2733_vm7, %vm2734_vm9 }
 0x495   : > { %v5412_v46 = vpop.eup %5411  ;;  %v2775_v24 = vsub.f32 1.0, %v2774_v58  ;;  %v9281_v21 = vadd.f32 1.0, %v5406_v17  ;;  %v9286_v48 = vsel %vm9188_vm12, %v9173_v31, %v2691_v50  ;;  %v2761_v55 = vmul.f32 %v9177_v37, %v2760_v2 }
 0x496   : > { %v9289_v29 = vpop.eup %5413  ;;  %5417 = vrcp.f32 %v9246_v23  ;;  %v9303_v25 = vsel %vm9200_vm1, %v9184_v59, %v2706_v38  ;;  %v2721_v31 = vsel %vm9277_vm5, %v9163_v34, %v2717_v6  ;;  %v2754_v2 = vand.u32 2147483648, %v9107_v9 }
 0x497   : > { %v9309_v58 = vpop.eup %5415  ;;  %v9311_v5 = vadd.f32 1.0, %v5408_v39  ;;  %v2860_v17 = vmul.f32 %v9289_v29, %v9194_v47  ;;  %v2736_v50 = vsel %vm9295_vm0, %v9171_v44, %v2732_v8  ;;  %v2751_v59 = vsel %vm9268_vm15, %v9142_v63, %v2747_v15 }
 0x498   : > { %v9321_v53 = vadd.f32 1.0, %v5410_v32  ;;  %5419 = vrcp.f32 %v9258_v28  ;;  %vm9324_vm12 = vcmp.eq.f32.partialorder %v2752_v42, 8.507059e+37  ;;  %vm2763_vm13 = vweird.f32 %v9129_v16 }
 0x499   : > { %v2875_v34 = vmul.f32 %v9309_v58, %v9212_v41  ;;  %5421 = vrcp.f32 %v9281_v21  ;;  %v2762_v44 = vadd.f32 %v9177_v37, %v2761_v55  ;;  %vm2764_vm14 = vweird.f32 %v9177_v37 }
 0x49a   : > { %v9334_v63 = vadd.f32 1.0, %v5412_v46  ;;  %v2755_v6 = vor.u32 1.1754944e-38, %v2754_v2  ;;  %v2769_v39 = vand.u32 2147483648, %v9129_v16  ;;  %v2776_v38 = vmul.f32 %v9196_v56, %v2775_v24  ;;  %vm9360_vm3 = vmor %vm2763_vm13, %vm2764_vm14 }
 0x49b   : > { %v2861_v8 = vsub.f32 1.0, %v2860_v17  ;;  %5423 = vrcp.f32 %v9311_v5  ;;  %v2767_v15 = vand.u32 2147483647, %v9129_v16  ;;  %v2789_v32 = vmul.f32 %v9214_v30, %v9159_v35 }
 0x49c   : > { %v9342_v52 = vpop.eup %5417  ;;  %5425 = vrcp.f32 %v9321_v53  ;;  %v9348_v42 = vsel %vm9251_vm4, %v9216_v0, %v2721_v31  ;;  %v9352_v46 = vsel %vm9260_vm10, %v2740_v51, %v2736_v50  ;;  %v9356_v57 = vsel %vm9324_vm12, %v2755_v6, %v2751_v59 }
 0x49d   : > { %v2876_v55 = vsub.f32 1.0, %v2875_v34  ;;  %v2766_v0 = vsel %vm9360_vm3, %v9177_v37, %v2762_v44  ;;  %v2782_v36 = vand.u32 2147483647, %v9145_v61  ;;  %v2790_v4 = vsub.f32 1.0, %v2789_v32 }
 0x49e   : > { %v9368_v51 = vpop.eup %5419  ;;  %5427 = vrcp.f32 %v9334_v63  ;;  %v2770_v26 = vor.u32 1.1754944e-38, %v2769_v39  ;;  %v2777_v31 = vadd.f32 %v9196_v56, %v2776_v38  ;;  %vm2779_vm1 = vweird.f32 %v9196_v56 }
 0x49f   : > { %v9373_v16 = vpop.eup %5421  ;;  %v2890_v2 = vmul.f32 %v9342_v52, %v9246_v23  ;;  %vm2768_vm7 = vcmp.eq.f32.partialorder %v2767_v15, 8.507059e+37  ;;  %v2791_v37 = vmul.f32 %v9214_v30, %v2790_v4  ;;  %v2862_v17 = vmul.f32 %v9289_v29, %v2861_v8 }
 0x4a0   : > { %v9379_v50 = vsel %vm2768_vm7, %v2770_v26, %v2766_v0  ;;  %vm2778_vm8 = vweird.f32 %v9145_v61  ;;  %v2784_v59 = vand.u32 2147483648, %v9145_v61  ;;  %v2797_v9 = vand.u32 2147483647, %v9159_v35 }
 0x4a1   : > { %v9384_v34 = vpop.eup %5423  ;;  %vm9386_vm2 = vmor %vm2778_vm8, %vm2779_vm1  ;;  %vm9390_vm11 = vcmp.eq.f32.partialorder %v2782_v36, 8.507059e+37  ;;  %vm2793_vm6 = vweird.f32 %v9159_v35  ;;  %vm2794_vm4 = vweird.f32 %v9214_v30  ;;  %v2877_v39 = vmul.f32 %v9309_v58, %v2876_v55 }
 0x4a2   : > { %v9397_v38 = vpop.eup %5425  ;;  %v2781_v61 = vsel %vm9386_vm2, %v9196_v56, %v2777_v31  ;;  %v2799_v8 = vand.u32 2147483648, %v9159_v35  ;;  %vm2865_vm9 = vweird.f32 %v9289_v29  ;;  %v2868_v15 = vand.u32 2147483647, %v9194_v47  ;;  %vm9420_vm5 = vmor %vm2793_vm6, %vm2794_vm4 }
 0x4a3   : > { %v2792_v32 = vadd.f32 %v9214_v30, %v2791_v37  ;;  %v2863_v24 = vadd.f32 %v9289_v29, %v2862_v17  ;;  %v2870_v0 = vand.u32 2147483648, %v9194_v47  ;;  %v2891_v36 = vsub.f32 1.0, %v2890_v2 }
 0x4a4   : > { %v9408_v55 = vpop.eup %5427  ;;  %v2785_v4 = vor.u32 1.1754944e-38, %v2784_v59  ;;  %vm9410_vm10 = vcmp.eq.f32.partialorder %v2797_v9, 8.507059e+37  ;;  %vm2864_vm15 = vweird.f32 %v9194_v47  ;;  %v2883_v56 = vand.u32 2147483647, %v9212_v41 }
 0x4a5   : > { %v2878_v2 = vadd.f32 %v9309_v58, %v2877_v39  ;;  %vm2880_vm0 = vweird.f32 %v9309_v58  ;;  %v2885_v37 = vand.u32 2147483648, %v9212_v41  ;;  %v2892_v17 = vmul.f32 %v9342_v52, %v2891_v36  ;;  %vm9434_vm12 = vmor %vm2864_vm15, %vm2865_vm9 }
 0x4a6   : > { %v9430_v47 = vsel %vm9390_vm11, %v2785_v4, %v2781_v61  ;;  %v2800_v59 = vor.u32 1.1754944e-38, %v2799_v8  ;;  %vm2879_vm13 = vweird.f32 %v9212_v41  ;;  %v2905_v9 = vmul.f32 %v9368_v51, %v9258_v28 }
 0x4a7   : > { %v2796_v44 = vsel %vm9420_vm5, %v9214_v30, %v2792_v32  ;;  %v2867_v6 = vsel %vm9434_vm12, %v9289_v29, %v2863_v24  ;;  %vm9447_vm14 = vcmp.eq.f32.partialorder %v2868_v15, 8.507059e+37  ;;  %v2871_v61 = vor.u32 1.1754944e-38, %v2870_v0  ;;  %vm9451_vm3 = vmor %vm2879_vm13, %vm2880_vm0 }
 0x4a8   : > { %vm9455_vm1 = vcmp.eq.f32.partialorder %v2883_v56, 8.507059e+37  ;;  %vm2894_vm7 = vweird.f32 %v9246_v23  ;;  %v2906_v30 = vsub.f32 1.0, %v2905_v9  ;;  %v2920_v32 = vmul.f32 %v9373_v16, %v9281_v21 }
 0x4a9   : > { %v2882_v29 = vsel %vm9451_vm3, %v9309_v58, %v2878_v2  ;;  %v2886_v15 = vor.u32 1.1754944e-38, %v2885_v37  ;;  %v2893_v24 = vadd.f32 %v9342_v52, %v2892_v17  ;;  %vm2895_vm8 = vweird.f32 %v9342_v52 }
 0x4aa   : > { %v2898_v0 = vand.u32 2147483647, %v9246_v23  ;;  %v2900_v36 = vand.u32 2147483648, %v9246_v23  ;;  %v2907_v4 = vmul.f32 %v9368_v51, %v2906_v30  ;;  %v2921_v56 = vsub.f32 1.0, %v2920_v32  ;;  %vm9487_vm2 = vmor %vm2894_vm7, %vm2895_vm8 }
 0x4ab   : > { %v9472_v31 = vsel %vm9410_vm10, %v2800_v59, %v2796_v44  ;;  %v9476_v35 = vsel %vm9447_vm14, %v2871_v61, %v2867_v6  ;;  %v2913_v58 = vand.u32 2147483647, %v9258_v28  ;;  %v2935_v2 = vmul.f32 %v9384_v34, %v9311_v5 }
 0x4ac   : > { %v9483_v37 = vsel %vm9455_vm1, %v2886_v15, %v2882_v29  ;;  %vm2909_vm11 = vweird.f32 %v9258_v28  ;;  %vm2910_vm6 = vweird.f32 %v9368_v51  ;;  %v2915_v26 = vand.u32 2147483648, %v9258_v28 }
 0x4ad   : > { %v2897_v59 = vsel %vm9487_vm2, %v9342_v52, %v2893_v24  ;;  %v2908_v9 = vadd.f32 %v9368_v51, %v2907_v4  ;;  %v2922_v44 = vmul.f32 %v9373_v16, %v2921_v56  ;;  %v2950_v23 = vmul.f32 %v9397_v38, %v9321_v53  ;;  %vm9514_vm15 = vmor %vm2909_vm11, %vm2910_vm6 }
 0x4ae   : > { %vm2899_vm4 = vcmp.eq.f32.partialorder %v2898_v0, 8.507059e+37  ;;  %v2901_v6 = vor.u32 1.1754944e-38, %v2900_v36  ;;  %v2928_v39 = vand.u32 2147483647, %v9281_v21  ;;  %v2936_v61 = vsub.f32 1.0, %v2935_v2 }
 0x4af   : > { %vm9502_vm9 = vcmp.eq.f32.partialorder %v2913_v58, 8.507059e+37  ;;  %vm2924_vm10 = vweird.f32 %v9281_v21  ;;  %v2930_v52 = vand.u32 2147483648, %v9281_v21  ;;  %v2951_v41 = vsub.f32 1.0, %v2950_v23 }
 0x4b0   : > { %v9508_v30 = vsel %vm2899_vm4, %v2901_v6, %v2897_v59  ;;  %v2916_v29 = vor.u32 1.1754944e-38, %v2915_v26  ;;  %vm2925_vm5 = vweird.f32 %v9373_v16  ;;  %v2945_v15 = vand.u32 2147483648, %v9311_v5 }
 0x4b1   : > { %v2912_v24 = vsel %vm9514_vm15, %v9368_v51, %v2908_v9  ;;  %v2923_v0 = vadd.f32 %v9373_v16, %v2922_v44  ;;  %v2943_v36 = vand.u32 2147483647, %v9311_v5  ;;  %v2965_v28 = vmul.f32 %v9408_v55, %v9334_v63  ;;  %vm9544_vm3 = vmor %vm2924_vm10, %vm2925_vm5 }
 0x4b2   : > { %vm9527_vm0 = vcmp.eq.f32.partialorder %v2928_v39, 8.507059e+37  ;;  %v2937_v56 = vmul.f32 %v9384_v34, %v2936_v61  ;;  %vm2939_vm12 = vweird.f32 %v9311_v5  ;;  %vm2940_vm13 = vweird.f32 %v9384_v34 }
 0x4b3   : > { %v2931_v58 = vor.u32 1.1754944e-38, %v2930_v52  ;;  %v2952_v51 = vmul.f32 %v9397_v38, %v2951_v41  ;;  %vm2954_vm14 = vweird.f32 %v9321_v53  ;;  %v2966_v2 = vsub.f32 1.0, %v2965_v28  ;;  %vm9589_vm2 = vmor %vm2939_vm12, %vm2940_vm13 }
 0x4b4   : > { %v9538_v17 = vsel %vm9502_vm9, %v2916_v29, %v2912_v24  ;;  %v2946_v59 = vor.u32 1.1754944e-38, %v2945_v15  ;;  %v12102_v9 = vrot.slane %v9098_v18, 4  ;;  %v12103_v23 = vrot.slane %v9098_v18, 5 }
 0x4b5   : > { %v2927_v39 = vsel %vm9544_vm3, %v9373_v16, %v2923_v0  ;;  %vm9557_vm1 = vcmp.eq.f32.partialorder %v2943_v36, 8.507059e+37  ;;  %vm2955_vm7 = vweird.f32 %v9397_v38  ;;  %v2967_v21 = vmul.f32 %v9408_v55, %v2966_v2 }
 0x4b6   : > { %v2995_v44 = vmul.f32 %v12102_v9, %v9286_v48  ;;  %v2996_v6 = vmul.f32 %v12103_v23, %v9303_v25  ;;  %v12106_v8 = vrot.slane %v9098_v18, 6  ;;  %v2938_v52 = vadd.f32 %v9384_v34, %v2937_v56  ;;  %vm9603_vm11 = vmor %vm2954_vm14, %vm2955_vm7 }
 0x4b7   : > { %v2958_v25 = vand.u32 2147483647, %v9321_v53  ;;  %v12107_v41 = vrot.slane %v9098_v18, 7  ;;  %v2999_v32 = vmul.f32 %v9356_v57, %v9098_v18  ;;  %v2953_v29 = vadd.f32 %v9397_v38, %v2952_v51 }
 0x4b8   : > { %v2997_v48 = vmul.f32 %v12106_v8, %v9348_v42  ;;  %v2968_v15 = vadd.f32 %v9408_v55, %v2967_v21  ;;  %vm2970_vm8 = vweird.f32 %v9408_v55  ;;  %v12108_v42 = vrot.slane %v9098_v18, 1 }
 0x4b9   : > { %v2998_v16 = vmul.f32 %v12107_v41, %v9352_v46  ;;  %v12109_v0 = vrot.slane %v9098_v18, 2  ;;  %v3003_v28 = vadd.f32 %v2995_v44, %v6449_v7  ;;  %v3004_v46 = vadd.f32 %v2996_v6, %v6455_v11 }
 0x4ba   : > { %v3000_v24 = vmul.f32 %v12108_v42, %v9379_v50  ;;  %v3005_v57 = vadd.f32 %v2997_v48, %v11954_v12  ;;  %v2960_v50 = vand.u32 2147483648, %v9321_v53  ;;  %v2975_v51 = vand.u32 2147483648, %v9334_v63 }
 0x4bb   : > { %v3001_v36 = vmul.f32 %v12109_v0, %v9430_v47  ;;  %v12112_v47 = vrot.slane %v9098_v18, 3  ;;  %v3006_v26 = vadd.f32 %v2998_v16, %v11956_v54  ;;  %vm2969_vm6 = vweird.f32 %v9334_v63 }
 0x4bc   : > { %v2973_v9 = vand.u32 2147483647, %v9334_v63  ;;  %v3007_v44 = vadd.f32 %v2999_v32, %v11959_v49  ;;  %5429 = vtanh.f32 %v3003_v28  ;;  %v2932_v18 = vsel %vm9527_vm0, %v2931_v58, %v2927_v39  ;;  %vm9617_vm4 = vmor %vm2969_vm6, %vm2970_vm8 }
 0x4bd   : > { %v3002_v2 = vmul.f32 %v12112_v47, %v9472_v31  ;;  %v2942_v31 = vsel %vm9589_vm2, %v9384_v34, %v2938_v52  ;;  %v3008_v23 = vadd.f32 %v3000_v24, %v11962_v62  ;;  %5431 = vtanh.f32 %v3004_v46 }
 0x4be   : > { %v2957_v63 = vsel %vm9603_vm11, %v9397_v38, %v2953_v29  ;;  %v2972_v4 = vsel %vm9617_vm4, %v9408_v55, %v2968_v15  ;;  %v3009_v58 = vadd.f32 %v3001_v36, %v11965_v10  ;;  %5433 = vtanh.f32 %v3005_v57 }
 0x4bf   : > { %v2961_v34 = vor.u32 1.1754944e-38, %v2960_v50  ;;  %v2976_v6 = vor.u32 1.1754944e-38, %v2975_v51  ;;  %v3010_v39 = vadd.f32 %v3002_v2, %v11966_v33  ;;  %5435 = vtanh.f32 %v3006_v26 }
 0x4c0   : > { %v2947_v21 = vsel %vm9557_vm1, %v2946_v59, %v2942_v31  ;;  %vm2959_vm9 = vcmp.eq.f32.partialorder %v2958_v25, 8.507059e+37  ;;  %vm2974_vm10 = vcmp.eq.f32.partialorder %v2973_v9, 8.507059e+37  ;;  %5437 = vtanh.f32 %v3007_v44 }
 0x4c1   : > { %v2962_v8 = vsel %vm2959_vm9, %v2961_v34, %v2957_v63  ;;  %v2977_v38 = vsel %vm2974_vm10, %v2976_v6, %v2972_v4  ;;  %5439 = vtanh.f32 %v3008_v23  ;;  %v3019_v48 = vsub.f32 1.0, %v9476_v35 }
 0x4c2   : > { %v5430_v55 = vpop.eup %5429  ;;  %5441 = vtanh.f32 %v3009_v58  ;;  %v3020_v52 = vsub.f32 1.0, %v9483_v37  ;;  %v3021_v41 = vsub.f32 1.0, %v9508_v30  ;;  %v3022_v16 = vsub.f32 1.0, %v9538_v17 }
 0x4c3   : > { %v5432_v32 = vpop.eup %5431  ;;  %5443 = vtanh.f32 %v3010_v39  ;;  %v3023_v61 = vsub.f32 1.0, %v2932_v18  ;;  %v3027_v59 = vmul.f32 %v5430_v55, %v3019_v48  ;;  %v12117_v25 = vrot.slane %v8978_v19, 7 }
 0x4c4   : > { %v5434_v15 = vpop.eup %5433  ;;  %v3024_v42 = vsub.f32 1.0, %v2947_v21  ;;  %v3025_v24 = vsub.f32 1.0, %v2962_v8  ;;  %v3028_v0 = vmul.f32 %v5432_v32, %v3020_v52  ;;  %v12118_v36 = vrot.slane %v8983_v20, 7 }
 0x4c5   : > { %v3050_v29 = vmul.f32 %v12117_v25, %v9476_v35  ;;  %v5436_v46 = vpop.eup %5435  ;;  %v3026_v57 = vsub.f32 1.0, %v2977_v38  ;;  %v3029_v56 = vmul.f32 %v5434_v15, %v3021_v41  ;;  %v12119_v50 = vrot.slane %v8987_v45, 7  ;;  %v5782_v15 = vld [vmem:[#allocation8 + $0x178] sm:$0xff] }
 0x4c6   : > { %v3051_v28 = vmul.f32 %v12118_v36, %v9483_v37  ;;  %v5438_v19 = vpop.eup %5437  ;;  %v3030_v35 = vmul.f32 %v5436_v46, %v3022_v16  ;;  %v12120_v2 = vrot.slane %v8994_v13, 7  ;;  %v12121_v20 = vrot.slane %v9001_v3, 7  ;;  %v5786_v36 = vld [vmem:[#allocation8 + $0x118] sm:$0xff]  ;;  %v5788_v46 = vld [vmem:[#allocation8 + $0xe8] sm:$0xff] }
 0x4c7   : > { %v3052_v51 = vmul.f32 %v12119_v50, %v9508_v30  ;;  %v9645_v47 = vadd.f32 %v3050_v29, %v3027_v59  ;;  %v5440_v9 = vpop.eup %5439  ;;  %v3031_v44 = vmul.f32 %v5438_v19, %v3023_v61  ;;  %v12122_v45 = vrot.slane %v9008_v22, 7  ;;  %v5791_v50 = vld [vmem:[#allocation8 + $0xa0] sm:$0xff]  ;;  %v5793_v19 = vld [vmem:[#allocation8 + $0x70] sm:$0xff] }
 0x4c8   : > { %v3053_v26 = vmul.f32 %v12120_v2, %v9538_v17  ;;  %v3054_v5 = vmul.f32 %v2932_v18, %v12121_v20  ;;  %v9652_v37 = vadd.f32 %v3051_v28, %v3028_v0  ;;  %v5442_v13 = vpop.eup %5441  ;;  %v3032_v17 = vmul.f32 %v5440_v9, %v3024_v42  ;;  %v5783_v42 = vld [vmem:[#allocation8 + $0x160] sm:$0xff]  ;;  %v5785_v0 = vld [vmem:[#allocation8 + $0x130] sm:$0xff] }
 0x4c9   : > { %v3055_v30 = vmul.f32 %v12122_v45, %v2947_v21  ;;  %v9656_v31 = vadd.f32 %v3052_v51, %v3029_v56  ;;  %3066 = vst [vmem:[%s6102_s23] sm:$0x10] %v9645_v47  ;;  %v3082_v53 = vrot.slane %v9645_v47, 4  ;;  %v12123_v3 = vrot.slane %v9013_v40, 7  ;;  %v5444_v63 = vpop.eup %5443  ;;  %v5787_v28 = vld [vmem:[#allocation8 + $0x100] sm:$0xff]  ;;  %v5790_v56 = vld [vmem:[#allocation8 + $0xb8] sm:$0xff]  ;;  %v5792_v51 = vld [vmem:[#allocation8 + $0x88] sm:$0xff] }
 0x4ca   : > { %v9663_v23 = vadd.f32 %v3053_v26, %v3030_v35  ;;  %3067 = vst [vmem:[%s6102_s23 + $0x8] sm:$0x10] %v9652_v37  ;;  %v3083_v22 = vrot.slane %v9652_v37, 3  ;;  %v3033_v4 = vmul.f32 %v5442_v13, %v3025_v24  ;;  %v12124_v58 = vrot.slane %v9019_v60, 7  ;;  %v5784_v24 = vld [vmem:[#allocation8 + $0x148] sm:$0xff]  ;;  %v5794_v35 = vld [vmem:[#allocation8 + $0x58] sm:$0xff] }
 0x4cb   : > { %v3056_v18 = vmul.f32 %v12123_v3, %v2962_v8  ;;  %v9670_v6 = vadd.f32 %v3054_v5, %v3031_v44  ;;  %3068 = vst [vmem:[%s6102_s23 + $0x10] sm:$0x10] %v9656_v31  ;;  %v3085_v40 = vrot.slane %v9656_v31, 2  ;;  %v3034_v39 = vmul.f32 %v5444_v63, %v3026_v57  ;;  %v5789_v57 = vld [vmem:[#allocation8 + $0xd0] sm:$0xff]  ;;  %v5795_v2 = vld [vmem:[#allocation8 + $0x40] sm:$0xff]  ;;  %v5796_v26 = vld [vmem:[#allocation8 + $0x28] sm:$0xff] }
 0x4cc   : > { %v3057_v34 = vmul.f32 %v12124_v58, %v2977_v38  ;;  %v9675_v21 = vadd.f32 %v3055_v30, %v3032_v17  ;;  %3069 = vst [vmem:[%s6102_s23 + $0x18] sm:$0x10] %v9663_v23  ;;  %vm12125_vm15 = vcmask 1041409   ;;  %v3087_v48 = vrot.slane %v9663_v23, 1  ;;  %v5797_v20 = vld [vmem:[#allocation8 + $0x10] sm:$0xff] }
 0x4cd   : > { %v3084_v8 = vsel %vm12125_vm15, %v3083_v22, %v3082_v53  ;;  %v9681_v55 = vadd.f32 %v3056_v18, %v3033_v4  ;;  %3070 = vst [vmem:[%s6102_s23 + $0x20] sm:$0x10] %v9670_v6  ;;  %vm12126_vm5 = vcmask 1042434   ;;  %vm12127_vm0 = vcmask 1043459   ;;  %v12132_v4 = vld [vmem:[#allocation19_spill] sm:$0xff] }
 0x4ce   : > { %v3086_v60 = vsel %vm12126_vm5, %v3085_v40, %v3084_v8  ;;  %v9686_v38 = vadd.f32 %v3057_v34, %v3034_v39  ;;  %3071 = vst [vmem:[%s6102_s23 + $0x28] sm:$0x10] %v9675_v21  ;;  %v11529_v41 = vrot.slane %v9675_v21, 7  ;;  %vm12128_vm12 = vcmask 1044484   ;;  %v12133_v34 = vld [vmem:[#allocation21_spill] sm:$0xff] }
 0x4cf   : > { %v3088_v52 = vsel %vm12127_vm0, %v3087_v48, %v3086_v60  ;;  %3072 = vst [vmem:[%s6102_s23 + $0x30] sm:$0x10] %v9681_v55  ;;  %v3092_v32 = vrot.slane %v9681_v55, 6  ;;  %vm12129_vm13 = vcmask 1045509   ;;  %vm12130_vm14 = vcmask 1046534   ;;  %v12134_v39 = vld [vmem:[#allocation25_spill] sm:$0xff] }
 0x4d0   : > { %v3089_v16 = vsel %vm12128_vm12, %v9670_v6, %v3088_v52  ;;  %3073 = vst [vmem:[%s6102_s23 + $0x38] sm:$0x10] %v9686_v38  ;;  %v3094_v59 = vrot.slane %v9686_v38, 5  ;;  %vm12131_vm3 = vcmask 1047559   ;;  %v12135_v48 = vld [vmem:[#allocation14_spill] sm:$0xff] }
 0x4d1   : > { %v3091_v61 = vsel %vm12129_vm13, %v11529_v41, %v3089_v16 }
 0x4d2   : > { %v3093_v25 = vsel %vm12130_vm14, %v3092_v32, %v3091_v61 }
 0x4d3   : > { %v3095_v29 = vsel %vm12131_vm3, %v3094_v59, %v3093_v25 }
 0x4d4   : > { %3113 = vmatmul.f32.vlgmr.msra.gmra.mxu1 %v3095_v29  ;;  %3133 = vmatmul.f32.vlgmr.msra.gmra.mxu2 %v3095_v29 }
 0x4d5   : > { %3153 = vmatmul.f32.vlgmr.msrb.gmra.mxu3 %v3095_v29  ;;  %4197 = vmatpush.msra.mxu1 %v5782_v15 }
 0x4d7   : > { %4198 = vmatpush.msra.mxu1 %v5783_v42 }
 0x4d9   : > { %4199 = vmatpush.msra.mxu1 %v5784_v24 }
 0x4db   : > { %4200 = vmatpush.msra.mxu1 %v5785_v0 }
 0x4dd   : > { %4201 = vmatpush.msra.mxu1 %v5786_v36 }
 0x4df   : > { %4202 = vmatpush.msra.mxu1 %v5787_v28 }
 0x4e1   : > { %4203 = vmatpush.msra.mxu1 %v5788_v46 }
 0x4e3   : > { %4204 = vmatpush.msra.mxu1 %v5789_v57 }
 0x4e5   : > { %4205 = vmatpush.msra.mxu1 %v5790_v56  ;;  %v12136_v56 = vld [vmem:[#allocation18_spill] sm:$0xff] }
 0x4e7   : > { %4206 = vmatpush.msra.mxu1 %v5791_v50 }
 0x4e9   : > { %4207 = vmatpush.msra.mxu1 %v5792_v51 }
 0x4eb   : > { %4208 = vmatpush.msra.mxu1 %v5793_v19 }
 0x4ed   : > { %4209 = vmatpush.msra.mxu1 %v5794_v35 }
 0x4ef   : > { %4210 = vmatpush.msra.mxu1 %v5795_v2 }
 0x4f1   : > { %4211 = vmatpush.msra.mxu1 %v5796_v26 }
 0x4f3   : > { %4212 = vmatpush.msra.mxu1 %v5797_v20 }
 0x551   : > { %v3114_v5 = vpop.f32.mrf.mxu1 }
 0x552   : > { %v3158_v9 = vrot.slane %v3114_v5, 3  ;;  %v3159_v44 = vrot.slane %v3114_v5, 4  ;;  %v3160_v45 = vrot.slane %v3114_v5, 5  ;;  %v3161_v30 = vrot.slane %v3114_v5, 6 }
 0x553   : > { %v3162_v53 = vrot.slane %v3114_v5, 7  ;;  %v3163_v13 = vrot.slane %v3114_v5, 1  ;;  %v3164_v17 = vrot.slane %v3114_v5, 2  ;;  %v3178_v3 = vadd.f32 %v3114_v5, %v12043_v1 }
 0x554   : > { %v3173_v18 = vadd.f32 %v3158_v9, %v12039_v14  ;;  %v3174_v22 = vadd.f32 %v3159_v44, %v12040_v43  ;;  %v3175_v63 = vadd.f32 %v3160_v45, %v12041_v27  ;;  %v3176_v58 = vadd.f32 %v3161_v30, %v12132_v4  ;;  %v12137_v44 = vld [vmem:[#allocation20_spill] sm:$0xff] }
 0x555   : > { %v3177_v40 = vadd.f32 %v3162_v53, %v12133_v34  ;;  %v3179_v8 = vadd.f32 %v3163_v13, %v12134_v39  ;;  %v3180_v60 = vadd.f32 %v3164_v17, %v12135_v48  ;;  %v4918_v52 = vmul.f32 -1.442695, %v3178_v3  ;;  %v12138_v17 = vld [vmem:[#allocation22_spill] sm:$0xff] }
 0x556   : > { %v4913_v16 = vmul.f32 -1.442695, %v3173_v18  ;;  %v4914_v32 = vmul.f32 -1.442695, %v3174_v22  ;;  %v4915_v61 = vmul.f32 -1.442695, %v3175_v63 }
 0x557   : > { %v4916_v25 = vmul.f32 -1.442695, %v3176_v58  ;;  %5445 = vpow2.f32 %v4918_v52  ;;  %v3134_v29 = vpop.f32.mrf.mxu2  ;;  %v4917_v15 = vmul.f32 -1.442695, %v3177_v40  ;;  %v4919_v0 = vmul.f32 -1.442695, %v3179_v8 }
 0x558   : > { %5447 = vpow2.f32 %v4913_v16  ;;  %v3334_v42 = vrot.slane %v3134_v29, 3  ;;  %v4920_v36 = vmul.f32 -1.442695, %v3180_v60  ;;  %v3335_v28 = vrot.slane %v3134_v29, 4  ;;  %v12139_v18 = vld [vmem:[#allocation26_spill] sm:$0xff]  ;;  %v12140_v40 = vld [vmem:[#allocation28_spill] sm:$0xff]  ;;  %v3154_v34 = vpop.f32.mrf.mxu3 }
 0x559   : > { %5449 = vpow2.f32 %v4914_v32  ;;  %v3336_v46 = vrot.slane %v3134_v29, 5  ;;  %v3337_v57 = vrot.slane %v3134_v29, 6  ;;  %v3338_v51 = vrot.slane %v3134_v29, 7  ;;  %v12141_v32 = vld [vmem:[#allocation30_spill] sm:$0xff] }
 0x55a   : > { %5451 = vpow2.f32 %v4915_v61  ;;  %v3349_v50 = vadd.f32 %v3334_v42, %v12136_v56  ;;  %v3339_v2 = vrot.slane %v3134_v29, 1  ;;  %v3340_v9 = vrot.slane %v3134_v29, 2 }
 0x55b   : > { %5453 = vpow2.f32 %v4916_v25  ;;  %v3350_v45 = vadd.f32 %v3335_v28, %v12137_v44  ;;  %v3351_v3 = vadd.f32 %v3336_v46, %v12138_v17  ;;  %v3352_v22 = vadd.f32 %v3337_v57, %v12139_v18  ;;  %v12142_v25 = vld [vmem:[#allocation32_spill] sm:$0xff] }
 0x55c   : > { %5455 = vpow2.f32 %v4917_v15  ;;  %v4921_v30 = vmul.f32 -1.442695, %v3349_v50  ;;  %v3353_v8 = vadd.f32 %v3338_v51, %v12140_v40  ;;  %v3354_v61 = vadd.f32 %v3134_v29, %v12141_v32 }
 0x55d   : > { %v5446_v5 = vpop.eup %5445  ;;  %5457 = vpow2.f32 %v4919_v0  ;;  %v3355_v15 = vadd.f32 %v3339_v2, %v12142_v25  ;;  %v4922_v46 = vmul.f32 -1.442695, %v3350_v45  ;;  %v4923_v51 = vmul.f32 -1.442695, %v3351_v3 }
 0x55e   : > { %v5448_v53 = vpop.eup %5447  ;;  %5459 = vpow2.f32 %v4920_v36  ;;  %v9721_v13 = vadd.f32 1.0, %v5446_v5  ;;  %v12143_v36 = vld [vmem:[#allocation16_spill] sm:$0xff]  ;;  %v4924_v5 = vmul.f32 -1.442695, %v3352_v22  ;;  %v4925_v29 = vmul.f32 -1.442695, %v3353_v8 }
 0x55f   : > { %v5450_v63 = vpop.eup %5449  ;;  %v9725_v58 = vadd.f32 1.0, %v5448_v53  ;;  %5461 = vpow2.f32 %v4921_v30  ;;  %v3356_v28 = vadd.f32 %v3340_v9, %v12143_v36  ;;  %v4926_v9 = vmul.f32 -1.442695, %v3354_v61 }
 0x560   : > { %v5452_v52 = vpop.eup %5451  ;;  %v9729_v16 = vadd.f32 1.0, %v5450_v63  ;;  %5463 = vrcp.f32 %v9721_v13  ;;  %v4927_v3 = vmul.f32 -1.442695, %v3355_v15  ;;  %v3297_v24 = vand.u32 2147483647, %v9721_v13 }
 0x561   : > { %v5454_v42 = vpop.eup %5453  ;;  %v9734_v0 = vadd.f32 1.0, %v5452_v52  ;;  %5465 = vrcp.f32 %v9725_v58  ;;  %v3224_v2 = vand.u32 2147483648, %v9725_v58  ;;  %v4928_v22 = vmul.f32 -1.442695, %v3356_v28 }
 0x562   : > { %v5456_v57 = vpop.eup %5455  ;;  %v9738_v50 = vadd.f32 1.0, %v5454_v42  ;;  %5467 = vrcp.f32 %v9729_v16  ;;  %v3239_v45 = vand.u32 2147483648, %v9729_v16  ;;  %vm3218_vm1 = vweird.f32 %v9725_v58 }
 0x563   : > { %v5458_v30 = vpop.eup %5457  ;;  %v9741_v53 = vadd.f32 1.0, %v5456_v57  ;;  %5469 = vrcp.f32 %v9734_v0  ;;  %v3222_v8 = vand.u32 2147483647, %v9725_v58  ;;  %vm3233_vm7 = vweird.f32 %v9729_v16 }
 0x564   : > { %v5460_v63 = vpop.eup %5459  ;;  %v9745_v52 = vadd.f32 1.0, %v5458_v30  ;;  %5471 = vrcp.f32 %v9738_v50  ;;  %v3237_v30 = vand.u32 2147483647, %v9729_v16  ;;  %v3252_v15 = vand.u32 2147483647, %v9734_v0 }
 0x565   : > { %v5462_v42 = vpop.eup %5461  ;;  %v9749_v60 = vadd.f32 1.0, %v5460_v63  ;;  %5473 = vrcp.f32 %v9741_v53  ;;  %v9761_v63 = vor.u32 1.1754944e-38, %v3224_v2  ;;  %v3254_v28 = vand.u32 2147483648, %v9734_v0 }
 0x566   : > { %v9752_v57 = vpop.eup %5463  ;;  %5475 = vrcp.f32 %v9745_v52  ;;  %v9768_v41 = vadd.f32 1.0, %v5462_v42  ;;  %v9772_v26 = vor.u32 1.1754944e-38, %v3239_v45  ;;  %vm3248_vm8 = vweird.f32 %v9734_v0 }
 0x567   : > { %v9758_v61 = vpop.eup %5465  ;;  %5477 = vrcp.f32 %v9749_v60  ;;  %v3267_v19 = vand.u32 2147483647, %v9738_v50  ;;  %vm9783_vm11 = vcmp.eq.f32.partialorder %v3222_v8, 8.507059e+37  ;;  %vm9788_vm4 = vcmp.eq.f32.partialorder %v3237_v30, 8.507059e+37 }
 0x568   : > { %v9766_v20 = vpop.eup %5467  ;;  %5479 = vpow2.f32 %v4922_v46  ;;  %v3214_v59 = vmul.f32 %v9758_v61, %v9725_v58  ;;  %vm3219_vm2 = vweird.f32 %v9758_v61  ;;  %vm9796_vm9 = vcmp.eq.f32.partialorder %v3252_v15, 8.507059e+37 }
 0x569   : > { %v9775_v2 = vpop.eup %5469  ;;  %5481 = vpow2.f32 %v4923_v51  ;;  %v3229_v35 = vmul.f32 %v9766_v20, %v9729_v16  ;;  %vm3234_vm6 = vweird.f32 %v9766_v20  ;;  %vm3263_vm10 = vweird.f32 %v9738_v50  ;;  %vm9821_vm0 = vmor %vm3218_vm1, %vm3219_vm2 }
 0x56a   : > { %v9781_v46 = vpop.eup %5471  ;;  %5483 = vpow2.f32 %v4924_v5  ;;  %v3215_v42 = vsub.f32 1.0, %v3214_v59  ;;  %v3244_v51 = vmul.f32 %v9775_v2, %v9734_v0  ;;  %v3255_v59 = vor.u32 1.1754944e-38, %v3254_v28  ;;  %vm9836_vm12 = vmor %vm3233_vm7, %vm3234_vm6 }
 0x56b   : > { %v9794_v36 = vpop.eup %5473  ;;  %5485 = vpow2.f32 %v4925_v29  ;;  %v3230_v25 = vsub.f32 1.0, %v3229_v35  ;;  %v3259_v8 = vmul.f32 %v9781_v46, %v9738_v50  ;;  %vm3249_vm15 = vweird.f32 %v9775_v2 }
 0x56c   : > { %v9803_v30 = vpop.eup %5475  ;;  %5487 = vpow2.f32 %v4926_v9  ;;  %v3216_v32 = vmul.f32 %v9758_v61, %v3215_v42  ;;  %v3245_v40 = vsub.f32 1.0, %v3244_v51  ;;  %vm3264_vm5 = vweird.f32 %v9781_v46  ;;  %vm9853_vm13 = vmor %vm3248_vm8, %vm3249_vm15 }
 0x56d   : > { %v9807_v29 = vpop.eup %5477  ;;  %5489 = vpow2.f32 %v4927_v3  ;;  %v3231_v35 = vmul.f32 %v9766_v20, %v3230_v25  ;;  %v3260_v15 = vsub.f32 1.0, %v3259_v8  ;;  %v3269_v9 = vand.u32 2147483648, %v9738_v50  ;;  %vm9891_vm3 = vmor %vm3263_vm10, %vm3264_vm5 }
 0x56e   : > { %v5480_v28 = vpop.eup %5479  ;;  %5491 = vpow2.f32 %v4928_v22  ;;  %v3217_v18 = vadd.f32 %v9758_v61, %v3216_v32  ;;  %v3246_v17 = vmul.f32 %v9775_v2, %v3245_v40  ;;  %vm9857_vm14 = vcmp.eq.f32.partialorder %v3267_v19, 8.507059e+37 }
 0x56f   : > { %v5482_v42 = vpop.eup %5481  ;;  %v9814_v51 = vadd.f32 1.0, %v5480_v28  ;;  %5493 = vrcp.f32 %v9768_v41  ;;  %v3232_v3 = vadd.f32 %v9766_v20, %v3231_v35  ;;  %v3261_v32 = vmul.f32 %v9781_v46, %v3260_v15 }
 0x570   : > { %v5484_v40 = vpop.eup %5483  ;;  %v9827_v22 = vadd.f32 1.0, %v5482_v42  ;;  %v3221_v8 = vsel %vm9821_vm0, %v9758_v61, %v3217_v18  ;;  %v3247_v28 = vadd.f32 %v9775_v2, %v3246_v17  ;;  %v3274_v35 = vmul.f32 %v9794_v36, %v9741_v53 }
 0x571   : > { %v5486_v15 = vpop.eup %5485  ;;  %v9843_v42 = vadd.f32 1.0, %v5484_v40  ;;  %5495 = vrcp.f32 %v9814_v51  ;;  %v3236_v18 = vsel %vm9836_vm12, %v9766_v20, %v3232_v3  ;;  %v3270_v3 = vor.u32 1.1754944e-38, %v3269_v9 }
 0x572   : > { %v5488_v61 = vpop.eup %5487  ;;  %v9861_v25 = vadd.f32 1.0, %v5486_v15  ;;  %5497 = vrcp.f32 %v9827_v22  ;;  %v3251_v20 = vsel %vm9853_vm13, %v9775_v2, %v3247_v28  ;;  %v9872_v19 = vsel %vm9783_vm11, %v9761_v63, %v3221_v8 }
 0x573   : > { %v5490_v40 = vpop.eup %5489  ;;  %v9867_v0 = vadd.f32 1.0, %v5488_v61  ;;  %v9877_v58 = vsel %vm9788_vm4, %v9772_v26, %v3236_v18  ;;  %v3262_v15 = vadd.f32 %v9781_v46, %v3261_v32  ;;  %5499 = vrcp.f32 %v9843_v42 }
 0x574   : > { %v5492_v44 = vpop.eup %5491  ;;  %v9880_v56 = vadd.f32 1.0, %v5490_v40  ;;  %v9885_v2 = vsel %vm9796_vm9, %v3255_v59, %v3251_v20  ;;  %v3275_v26 = vsub.f32 1.0, %v3274_v35  ;;  %5501 = vrcp.f32 %v9861_v25 }
 0x575   : > { %v9895_v63 = vpop.eup %5493  ;;  %v9897_v45 = vadd.f32 1.0, %v5492_v44  ;;  %v3266_v5 = vsel %vm9891_vm3, %v9781_v46, %v3262_v15  ;;  %vm3278_vm1 = vweird.f32 %v9741_v53  ;;  %5503 = vrcp.f32 %v9867_v0 }
 0x576   : > { %v9906_v50 = vmul.f32 %v9895_v63, %v9768_v41  ;;  %v3276_v59 = vmul.f32 %v9794_v36, %v3275_v26  ;;  %vm3279_vm7 = vweird.f32 %v9794_v36  ;;  %5505 = vrcp.f32 %v9880_v56 }
 0x577   : > { %v9911_v44 = vpop.eup %5495  ;;  %v3282_v9 = vand.u32 2147483647, %v9741_v53  ;;  %v3284_v46 = vand.u32 2147483648, %v9741_v53  ;;  %v3289_v32 = vmul.f32 %v9752_v57, %v9721_v13  ;;  %5507 = vrcp.f32 %v9897_v45  ;;  %vm9935_vm8 = vmor %vm3278_vm1, %vm3279_vm7 }
 0x578   : > { %v9918_v8 = vpop.eup %5497  ;;  %v9922_v28 = vmul.f32 %v9911_v44, %v9814_v51  ;;  %v3271_v35 = vsel %vm9857_vm14, %v3270_v3, %v3266_v5  ;;  %v3277_v18 = vadd.f32 %v9794_v36, %v3276_v59  ;;  %vm3293_vm2 = vweird.f32 %v9721_v13 }
 0x579   : > { %v9931_v61 = vmul.f32 %v9918_v8, %v9827_v22  ;;  %v3290_v40 = vsub.f32 1.0, %v3289_v32  ;;  %v9940_v15 = vpop.eup %5499  ;;  %vm3283_vm11 = vcmp.eq.f32.partialorder %v3282_v9, 8.507059e+37  ;;  %v3285_v3 = vor.u32 1.1754944e-38, %v3284_v46 }
 0x57a   : > { %v3281_v17 = vsel %vm9935_vm8, %v9794_v36, %v3277_v18  ;;  %v9946_v26 = vpop.eup %5501  ;;  %vm3294_vm6 = vweird.f32 %v9752_v57  ;;  %v3299_v5 = vand.u32 2147483648, %v9721_v13  ;;  %v3304_v59 = vmul.f32 %v9803_v30, %v9745_v52 }
 0x57b   : > { %v3291_v53 = vmul.f32 %v9752_v57, %v3290_v40  ;;  %v9953_v32 = vpop.eup %5503  ;;  %v3286_v36 = vsel %vm3283_vm11, %v3285_v3, %v3281_v17  ;;  %vm9956_vm4 = vcmp.eq.f32.partialorder %v3297_v24, 8.507059e+37  ;;  %v3312_v46 = vand.u32 2147483647, %v9745_v52  ;;  %vm3295_vm10 = vmor %vm3293_vm2, %vm3294_vm6 }
 0x57c   : > { %v9961_v18 = vpop.eup %5505  ;;  %v3305_v16 = vsub.f32 1.0, %v3304_v59  ;;  %vm3308_vm9 = vweird.f32 %v9745_v52  ;;  %v3314_v48 = vand.u32 2147483648, %v9745_v52  ;;  %v3300_v17 = vor.u32 1.1754944e-38, %v3299_v5 }
 0x57d   : > { %v3292_v40 = vadd.f32 %v9752_v57, %v3291_v53  ;;  %v9966_v1 = vpop.eup %5507  ;;  %vm3309_vm15 = vweird.f32 %v9803_v30  ;;  %vm9973_vm5 = vcmp.eq.f32.partialorder %v3312_v46, 8.507059e+37  ;;  %v3319_v24 = vmul.f32 %v9807_v29, %v9749_v60 }
 0x57e   : > { %v3306_v59 = vmul.f32 %v9803_v30, %v3305_v16  ;;  %vm3323_vm0 = vweird.f32 %v9749_v60  ;;  %v3327_v20 = vand.u32 2147483647, %v9749_v60  ;;  %v3315_v13 = vor.u32 1.1754944e-38, %v3314_v48  ;;  %vm3310_vm14 = vmor %vm3308_vm9, %vm3309_vm15 }
 0x57f   : > { %v3296_v53 = vsel %vm3295_vm10, %v9752_v57, %v3292_v40  ;;  %v3320_v4 = vsub.f32 1.0, %v3319_v24  ;;  %vm3324_vm12 = vweird.f32 %v9807_v29  ;;  %v3329_v5 = vand.u32 2147483648, %v9749_v60 }
 0x580   : > { %v3301_v46 = vsel %vm9956_vm4, %v3300_v17, %v3296_v53  ;;  %v3307_v27 = vadd.f32 %v9803_v30, %v3306_v59  ;;  %vm9988_vm13 = vcmp.eq.f32.partialorder %v3327_v20, 8.507059e+37  ;;  %v3510_v57 = vrot.slane %v3154_v34, 3  ;;  %vm3325_vm3 = vmor %vm3323_vm0, %vm3324_vm12 }
 0x581   : > { %v3321_v48 = vmul.f32 %v9807_v29, %v3320_v4  ;;  %v3330_v16 = vor.u32 1.1754944e-38, %v3329_v5  ;;  %v3511_v40 = vrot.slane %v3154_v34, 4  ;;  %v3512_v24 = vrot.slane %v3154_v34, 5 }
 0x582   : > { %v3311_v9 = vsel %vm3310_vm14, %v9803_v30, %v3307_v27  ;;  %v3513_v17 = vrot.slane %v3154_v34, 6  ;;  %v3514_v53 = vrot.slane %v3154_v34, 7  ;;  %v3525_v20 = vmul.f32 %v3510_v57, %v9872_v19 }
 0x583   : > { %v3316_v59 = vsel %vm9973_vm5, %v3315_v13, %v3311_v9  ;;  %v3322_v14 = vadd.f32 %v9807_v29, %v3321_v48  ;;  %v3526_v39 = vmul.f32 %v3511_v40, %v9877_v58  ;;  %v3527_v52 = vmul.f32 %v3512_v24, %v9885_v2 }
 0x584   : > { %v3515_v4 = vrot.slane %v3154_v34, 1  ;;  %v3528_v27 = vmul.f32 %v3513_v17, %v3271_v35  ;;  %v3529_v30 = vmul.f32 %v3514_v53, %v3286_v36  ;;  %v3530_v5 = vmul.f32 %v3301_v46, %v3154_v34 }
 0x585   : > { %v3326_v19 = vsel %vm3325_vm3, %v9807_v29, %v3322_v14  ;;  %v3533_v3 = vadd.f32 %v3525_v20, %v6449_v7  ;;  %v3534_v13 = vadd.f32 %v3526_v39, %v6455_v11  ;;  %v3535_v57 = vadd.f32 %v3527_v52, %v11954_v12 }
 0x586   : > { %v3331_v58 = vsel %vm9988_vm13, %v3330_v16, %v3326_v19  ;;  %v3516_v2 = vrot.slane %v3154_v34, 2  ;;  %v10014_v48 = vmul.f32 %v3515_v4, %v3316_v59  ;;  %v3536_v60 = vadd.f32 %v3528_v27, %v11956_v54 }
 0x587   : > { %v3537_v35 = vadd.f32 %v3529_v30, %v11959_v49  ;;  %v10019_v36 = vadd.f32 %v3530_v5, %v11962_v62  ;;  %5509 = vtanh.f32 %v3533_v3  ;;  %v12168_v14 = vsub.f32 1.0, %v9906_v50 }
 0x588   : > { %5511 = vtanh.f32 %v3534_v13  ;;  %vm3395_vm1 = vweird.f32 %v9895_v63  ;;  %v3398_v43 = vand.u32 2147483647, %v9768_v41  ;;  %v3400_v34 = vand.u32 2147483648, %v9768_v41 }
 0x589   : > { %v3392_v39 = vmul.f32 %v9895_v63, %v12168_v14  ;;  %5513 = vtanh.f32 %v3535_v57  ;;  %vm3394_vm7 = vweird.f32 %v9768_v41  ;;  %v12169_v46 = vsub.f32 1.0, %v9922_v28 }
 0x58a   : > { %v10032_v40 = vmul.f32 %v3516_v2, %v3331_v58  ;;  %5515 = vtanh.f32 %v3536_v60  ;;  %vm3396_vm8 = vmor %vm3394_vm7, %vm3395_vm1  ;;  %vm3409_vm2 = vweird.f32 %v9814_v51  ;;  %vm3410_vm11 = vweird.f32 %v9911_v44 }
 0x58b   : > { %v3393_v29 = vadd.f32 %v9895_v63, %v3392_v39  ;;  %v3407_v16 = vmul.f32 %v9911_v44, %v12169_v46  ;;  %v3401_v24 = vor.u32 1.1754944e-38, %v3400_v34  ;;  %v3413_v17 = vand.u32 2147483647, %v9814_v51  ;;  %vm10039_vm4 = vmor %vm3409_vm2, %vm3410_vm11 }
 0x58c   : > { %5517 = vtanh.f32 %v3537_v35  ;;  %vm3399_vm6 = vcmp.eq.f32.partialorder %v3398_v43, 8.507059e+37  ;;  %v3415_v28 = vand.u32 2147483648, %v9814_v51  ;;  %v3421_v53 = vsub.f32 1.0, %v9931_v61 }
 0x58d   : > { %v3397_v50 = vsel %vm3396_vm8, %v9895_v63, %v3393_v29  ;;  %v3408_v9 = vadd.f32 %v9911_v44, %v3407_v16  ;;  %v10045_v20 = vpop.eup %5509  ;;  %vm3424_vm9 = vweird.f32 %v9827_v22  ;;  %v3428_v52 = vand.u32 2147483647, %v9827_v22 }
 0x58e   : > { %v10047_v59 = vsel %vm3399_vm6, %v3401_v24, %v3397_v50  ;;  %v10054_v4 = vpop.eup %5511  ;;  %v3422_v27 = vmul.f32 %v9918_v8, %v3421_v53  ;;  %vm3425_vm10 = vweird.f32 %v9918_v8  ;;  %v3430_v51 = vand.u32 2147483648, %v9827_v22 }
 0x58f   : > { %v3412_v63 = vsel %vm10039_vm4, %v9911_v44, %v3408_v9  ;;  %v3435_v61 = vmul.f32 %v9940_v15, %v9843_v42  ;;  %v10061_v30 = vpop.eup %5513  ;;  %vm3414_vm15 = vcmp.eq.f32.partialorder %v3413_v17, 8.507059e+37  ;;  %v3416_v5 = vor.u32 1.1754944e-38, %v3415_v28  ;;  %vm3426_vm13 = vmor %vm3424_vm9, %vm3425_vm10 }
 0x590   : > { %vm10063_vm5 = vcmp.eq.f32.partialorder %v3428_v52, 8.507059e+37  ;;  %v3443_v19 = vand.u32 2147483647, %v9843_v42  ;;  %v10068_v3 = vpop.eup %5515  ;;  %v3423_v13 = vadd.f32 %v9918_v8, %v3422_v27  ;;  %vm3439_vm0 = vweird.f32 %v9843_v42 }
 0x591   : > { %v3436_v57 = vsub.f32 1.0, %v3435_v61  ;;  %vm3440_vm12 = vweird.f32 %v9940_v15  ;;  %v10073_v58 = vsel %vm3414_vm15, %v3416_v5, %v3412_v63  ;;  %v3431_v2 = vor.u32 1.1754944e-38, %v3430_v51 }
 0x592   : > { %v3445_v60 = vand.u32 2147483648, %v9843_v42  ;;  %v3450_v35 = vmul.f32 %v9946_v26, %v9861_v25  ;;  %v10080_v14 = vpop.eup %5517  ;;  %v3427_v39 = vsel %vm3426_vm13, %v9918_v8, %v3423_v13  ;;  %vm10084_vm14 = vcmp.eq.f32.partialorder %v3443_v19, 8.507059e+37  ;;  %vm3441_vm7 = vmor %vm3439_vm0, %vm3440_vm12 }
 0x593   : > { %v3437_v43 = vmul.f32 %v9940_v15, %v3436_v57  ;;  %v3458_v29 = vand.u32 2147483647, %v9861_v25  ;;  %vm3454_vm3 = vweird.f32 %v9861_v25  ;;  %vm3455_vm1 = vweird.f32 %v9946_v26 }
 0x594   : > { %v3451_v22 = vsub.f32 1.0, %v3450_v35  ;;  %v3460_v46 = vand.u32 2147483648, %v9861_v25  ;;  %v10094_v16 = vsel %vm10063_vm5, %v3431_v2, %v3427_v39  ;;  %v3446_v50 = vor.u32 1.1754944e-38, %v3445_v60  ;;  %vm3456_vm6 = vmor %vm3454_vm3, %vm3455_vm1 }
 0x595   : > { %v3438_v8 = vadd.f32 %v9940_v15, %v3437_v43  ;;  %v3465_v24 = vmul.f32 %v9953_v32, %v9867_v0  ;;  %vm10104_vm8 = vcmp.eq.f32.partialorder %v3458_v29, 8.507059e+37  ;;  %vm3469_vm2 = vweird.f32 %v9867_v0 }
 0x596   : > { %v3452_v9 = vmul.f32 %v9946_v26, %v3451_v22  ;;  %v3473_v41 = vand.u32 2147483647, %v9867_v0  ;;  %v3475_v63 = vand.u32 2147483648, %v9867_v0  ;;  %v3480_v52 = vmul.f32 %v9961_v18, %v9880_v56 }
 0x597   : > { %v3442_v28 = vsel %vm3441_vm7, %v9940_v15, %v3438_v8  ;;  %v3466_v53 = vsub.f32 1.0, %v3465_v24  ;;  %v3461_v51 = vor.u32 1.1754944e-38, %v3460_v46  ;;  %vm3470_vm11 = vweird.f32 %v9953_v32 }
 0x598   : > { %v10116_v42 = vsel %vm10084_vm14, %v3446_v50, %v3442_v28  ;;  %v3453_v27 = vadd.f32 %v9946_v26, %v3452_v9  ;;  %vm10125_vm4 = vcmp.eq.f32.partialorder %v3473_v41, 8.507059e+37  ;;  %v3481_v5 = vsub.f32 1.0, %v3480_v52  ;;  %vm3471_vm15 = vmor %vm3469_vm2, %vm3470_vm11 }
 0x599   : > { %v3467_v15 = vmul.f32 %v9953_v32, %v3466_v53  ;;  %vm3484_vm9 = vweird.f32 %v9880_v56  ;;  %v3476_v19 = vor.u32 1.1754944e-38, %v3475_v63  ;;  %v3490_v13 = vand.u32 2147483648, %v9880_v56 }
 0x59a   : > { %v3457_v44 = vsel %vm3456_vm6, %v9946_v26, %v3453_v27  ;;  %v3495_v57 = vmul.f32 %v9966_v1, %v9897_v45  ;;  %v3482_v2 = vmul.f32 %v9961_v18, %v3481_v5  ;;  %vm3485_vm10 = vweird.f32 %v9961_v18 }
 0x59b   : > { %v3468_v25 = vadd.f32 %v9953_v32, %v3467_v15  ;;  %v3488_v60 = vand.u32 2147483647, %v9880_v56  ;;  %v3462_v35 = vsel %vm10104_vm8, %v3461_v51, %v3457_v44  ;;  %v3491_v26 = vor.u32 1.1754944e-38, %v3490_v13  ;;  %vm3486_vm12 = vmor %vm3484_vm9, %vm3485_vm10 }
 0x59c   : > { %v3496_v39 = vsub.f32 1.0, %v3495_v57  ;;  %vm3499_vm5 = vweird.f32 %v9897_v45  ;;  %v3483_v34 = vadd.f32 %v9961_v18, %v3482_v2  ;;  %vm3500_vm0 = vweird.f32 %v9966_v1 }
 0x59d   : > { %v3472_v43 = vsel %vm3471_vm15, %v9953_v32, %v3468_v25  ;;  %v3505_v29 = vand.u32 2147483648, %v9897_v45  ;;  %v3503_v0 = vand.u32 2147483647, %v9897_v45  ;;  %v3539_v46 = vadd.f32 %v10014_v48, %v11965_v10  ;;  %vm3501_vm14 = vmor %vm3499_vm5, %vm3500_vm0 }
 0x59e   : > { %v3497_v22 = vmul.f32 %v9966_v1, %v3496_v39  ;;  %v3540_v8 = vadd.f32 %v10032_v40, %v11966_v33  ;;  %v3477_v32 = vsel %vm10125_vm4, %v3476_v19, %v3472_v43  ;;  %v3487_v50 = vsel %vm3486_vm12, %v9961_v18, %v3483_v34 }
 0x59f   : > { %vm3489_vm13 = vcmp.eq.f32.partialorder %v3488_v60, 8.507059e+37  ;;  %5519 = vtanh.f32 %v10019_v36  ;;  %v3506_v9 = vor.u32 1.1754944e-38, %v3505_v29  ;;  %v3549_v48 = vsub.f32 1.0, %v10047_v59 }
 0x5a0   : > { %v3492_v56 = vsel %vm3489_vm13, %v3491_v26, %v3487_v50  ;;  %v3498_v24 = vadd.f32 %v9966_v1, %v3497_v22  ;;  %5521 = vtanh.f32 %v3539_v46  ;;  %v3550_v40 = vsub.f32 1.0, %v10073_v58 }
 0x5a1   : > { %5523 = vtanh.f32 %v3540_v8  ;;  %v3551_v18 = vsub.f32 1.0, %v10094_v16  ;;  %vm3504_vm3 = vcmp.eq.f32.partialorder %v3503_v0, 8.507059e+37  ;;  %v3552_v36 = vsub.f32 1.0, %v10116_v42 }
 0x5a2   : > { %v3502_v17 = vsel %vm3501_vm14, %v9966_v1, %v3498_v24  ;;  %v3553_v41 = vsub.f32 1.0, %v3462_v35  ;;  %v3557_v53 = vmul.f32 %v10045_v20, %v3549_v48  ;;  %v3558_v63 = vmul.f32 %v10054_v4, %v3550_v40 }
 0x5a3   : > { %v3507_v28 = vsel %vm3504_vm3, %v3506_v9, %v3502_v17  ;;  %v3559_v45 = vmul.f32 %v10061_v30, %v3551_v18  ;;  %v3554_v52 = vsub.f32 1.0, %v3477_v32  ;;  %v3555_v27 = vsub.f32 1.0, %v3492_v56 }
 0x5a4   : > { %v3560_v51 = vmul.f32 %v10068_v3, %v3552_v36  ;;  %v3561_v15 = vmul.f32 %v10080_v14, %v3553_v41  ;;  %v3556_v5 = vsub.f32 1.0, %v3507_v28  ;;  %v12180_v1 = vrot.slane %v9645_v47, 7 }
 0x5a5   : > { %v5520_v61 = vpop.eup %5519  ;;  %v12181_v19 = vrot.slane %v9652_v37, 7  ;;  %v12182_v4 = vrot.slane %v9656_v31, 7  ;;  %v12183_v3 = vrot.slane %v9663_v23, 7  ;;  %v12184_v25 = vrot.slane %v9670_v6, 7 }
 0x5a6   : > { %v3580_v44 = vmul.f32 %v12180_v1, %v10047_v59  ;;  %v5522_v13 = vpop.eup %5521  ;;  %v3562_v57 = vmul.f32 %v5520_v61, %v3554_v52  ;;  %v12185_v47 = vrot.slane %v9675_v21, 7  ;;  %v12186_v23 = vrot.slane %v9681_v55, 7 }
 0x5a7   : > { %v3581_v20 = vmul.f32 %v12181_v19, %v10073_v58  ;;  %v3582_v30 = vmul.f32 %v12182_v4, %v10094_v16  ;;  %v3583_v14 = vmul.f32 %v12183_v3, %v10116_v42  ;;  %v3584_v2 = vmul.f32 %v12184_v25, %v3462_v35  ;;  %v5524_v60 = vpop.eup %5523 }
 0x5a8   : > { %v3585_v59 = vmul.f32 %v3477_v32, %v12185_v47  ;;  %v3563_v37 = vmul.f32 %v5522_v13, %v3555_v27  ;;  %v10192_v58 = vadd.f32 %v3580_v44, %v3557_v53  ;;  %v3564_v26 = vmul.f32 %v5524_v60, %v3556_v5  ;;  %v12195_v27 = vld [vmem:[#allocation25_spill] sm:$0xff]  ;;  %v12197_v5 = vld [vmem:[#allocation15_spill] sm:$0xff] }
 0x5a9   : > { %v10194_v31 = vadd.f32 %v3581_v20, %v3558_v63  ;;  %v10196_v16 = vadd.f32 %v3582_v30, %v3559_v45  ;;  %v3586_v42 = vmul.f32 %v12186_v23, %v3492_v56  ;;  %v10200_v6 = vadd.f32 %v3583_v14, %v3560_v51  ;;  %v12198_v44 = vld [vmem:[#allocation17_spill] sm:$0xff]  ;;  %v12199_v20 = vld [vmem:[#allocation19_spill] sm:$0xff]  ;;  %v12202_v14 = vld [vmem:[#allocation14_spill] sm:$0xff] }
 0x5aa   : > { %v10202_v35 = vadd.f32 %v3584_v2, %v3561_v15  ;;  %v12187_v21 = vrot.slane %v9686_v38, 7  ;;  %3596 = vst [vmem:[%s6102_s23] sm:$0x20] %v10192_v58  ;;  %v3612_v43 = vrot.slane %v10192_v58, 5  ;;  %v10211_v55 = vadd.f32 %v3585_v59, %v3562_v57  ;;  %v12196_v15 = vld [vmem:[#allocation13_spill] sm:$0xff]  ;;  %v12201_v57 = vld [vmem:[#allocation23_spill] sm:$0xff] }
 0x5ab   : > { %v3613_v34 = vrot.slane %v10194_v31, 4  ;;  %v3615_v29 = vrot.slane %v10196_v16, 3  ;;  %v10213_v22 = vadd.f32 %v3586_v42, %v3563_v37  ;;  %3597 = vst [vmem:[%s6102_s23 + $0x8] sm:$0x20] %v10194_v31  ;;  %vm12188_vm1 = vcmask 1041409   ;;  %v12200_v30 = vld [vmem:[#allocation21_spill] sm:$0xff] }
 0x5ac   : > { %v3587_v39 = vmul.f32 %v12187_v21, %v3507_v28  ;;  %3598 = vst [vmem:[%s6102_s23 + $0x10] sm:$0x20] %v10196_v16  ;;  %v3617_v46 = vrot.slane %v10200_v6, 2  ;;  %vm12189_vm7 = vcmask 1042434   ;;  %v3619_v32 = vrot.slane %v10202_v35, 1 }
 0x5ad   : > { %v3614_v0 = vsel %vm12188_vm1, %v3613_v34, %v3612_v43  ;;  %3599 = vst [vmem:[%s6102_s23 + $0x18] sm:$0x20] %v10200_v6  ;;  %vm12190_vm8 = vcmask 1043459   ;;  %vm12191_vm2 = vcmask 1044484   ;;  %v11534_v24 = vrot.slane %v10213_v22, 7 }
 0x5ae   : > { %v10217_v38 = vadd.f32 %v3587_v39, %v3564_v26  ;;  %v3616_v8 = vsel %vm12189_vm7, %v3615_v29, %v3614_v0  ;;  %3600 = vst [vmem:[%s6102_s23 + $0x20] sm:$0x20] %v10202_v35  ;;  %vm12192_vm11 = vcmask 1045509   ;;  %vm12193_vm6 = vcmask 1046534  }
 0x5af   : > { %v3618_v50 = vsel %vm12190_vm8, %v3617_v46, %v3616_v8  ;;  %3601 = vst [vmem:[%s6102_s23 + $0x28] sm:$0x20] %v10211_v55  ;;  %vm12194_vm4 = vcmask 1047559   ;;  %v12203_v8 = vld [vmem:[#allocation18_spill] sm:$0xff] }
 0x5b0   : > { %v3620_v56 = vsel %vm12191_vm2, %v3619_v32, %v3618_v50  ;;  %3602 = vst [vmem:[%s6102_s23 + $0x30] sm:$0x20] %v10213_v22  ;;  %v3624_v48 = vrot.slane %v10217_v38, 6 }
 0x5b1   : > { %v3621_v9 = vsel %vm12192_vm11, %v10211_v55, %v3620_v56  ;;  %3603 = vst [vmem:[%s6102_s23 + $0x38] sm:$0x20] %v10217_v38 }
 0x5b2   : > { %v3623_v40 = vsel %vm12193_vm6, %v11534_v24, %v3621_v9 }
 0x5b3   : > { %v3625_v18 = vsel %vm12194_vm4, %v3624_v48, %v3623_v40 }
 0x5b4   : > { %3643 = vmatmul.f32.vlgmr.msrb.gmra.mxu0 %v3625_v18  ;;  %3663 = vmatmul.f32.vlgmr.msrb.gmra.mxu1 %v3625_v18 }
 0x5b5   : > { %3683 = vmatmul.f32.vlgmr.msrb.gmra.mxu2 %v3625_v18 }
 0x631   : > { %v3644_v17 = vpop.f32.mrf.mxu0  ;;  %v3664_v47 = vpop.f32.mrf.mxu1 }
 0x632   : > { %v3688_v36 = vrot.slane %v3644_v17, 2  ;;  %v3689_v41 = vrot.slane %v3644_v17, 3  ;;  %v3690_v28 = vrot.slane %v3644_v17, 4  ;;  %v3691_v53 = vrot.slane %v3644_v17, 5 }
 0x633   : > { %v3692_v63 = vrot.slane %v3644_v17, 6  ;;  %v3693_v45 = vrot.slane %v3644_v17, 7  ;;  %v3694_v52 = vrot.slane %v3644_v17, 1  ;;  %v3709_v51 = vadd.f32 %v3644_v17, %v12195_v27 }
 0x634   : > { %v3703_v61 = vadd.f32 %v3688_v36, %v12196_v15  ;;  %v3704_v1 = vadd.f32 %v3689_v41, %v12197_v5  ;;  %v3705_v19 = vadd.f32 %v3690_v28, %v12198_v44  ;;  %v3706_v4 = vadd.f32 %v3691_v53, %v12199_v20  ;;  %v12204_v41 = vld [vmem:[#allocation20_spill] sm:$0xff] }
 0x635   : > { %v3707_v13 = vadd.f32 %v3692_v63, %v12200_v30  ;;  %v3708_v3 = vadd.f32 %v3693_v45, %v12201_v57  ;;  %v3710_v25 = vadd.f32 %v3694_v52, %v12202_v14  ;;  %v4935_v2 = vmul.f32 -1.442695, %v3709_v51  ;;  %v12205_v52 = vld [vmem:[#allocation22_spill] sm:$0xff] }
 0x636   : > { %v4929_v59 = vmul.f32 -1.442695, %v3703_v61  ;;  %v4930_v60 = vmul.f32 -1.442695, %v3704_v1  ;;  %v4931_v37 = vmul.f32 -1.442695, %v3705_v19 }
 0x637   : > { %v4932_v23 = vmul.f32 -1.442695, %v3706_v4  ;;  %5525 = vpow2.f32 %v4935_v2  ;;  %v4933_v42 = vmul.f32 -1.442695, %v3707_v13  ;;  %v3864_v21 = vrot.slane %v3664_v47, 2  ;;  %v12206_v61 = vld [vmem:[#allocation26_spill] sm:$0xff] }
 0x638   : > { %5527 = vpow2.f32 %v4929_v59  ;;  %v4934_v43 = vmul.f32 -1.442695, %v3708_v3  ;;  %v4936_v34 = vmul.f32 -1.442695, %v3710_v25  ;;  %v3865_v29 = vrot.slane %v3664_v47, 3  ;;  %v12207_v13 = vld [vmem:[#allocation28_spill] sm:$0xff] }
 0x639   : > { %5529 = vpow2.f32 %v4930_v60  ;;  %v3866_v0 = vrot.slane %v3664_v47, 4  ;;  %v3867_v46 = vrot.slane %v3664_v47, 5  ;;  %v3879_v32 = vadd.f32 %v3864_v21, %v12203_v8  ;;  %v12208_v60 = vld [vmem:[#allocation30_spill] sm:$0xff] }
 0x63a   : > { %5531 = vpow2.f32 %v4931_v37  ;;  %v3868_v50 = vrot.slane %v3664_v47, 6  ;;  %v3869_v48 = vrot.slane %v3664_v47, 7  ;;  %v3870_v36 = vrot.slane %v3664_v47, 1 }
 0x63b   : > { %5533 = vpow2.f32 %v4932_v23  ;;  %v3880_v28 = vadd.f32 %v3865_v29, %v12204_v41  ;;  %v4937_v53 = vmul.f32 -1.442695, %v3879_v32  ;;  %v3881_v51 = vadd.f32 %v3866_v0, %v12205_v52  ;;  %v12209_v23 = vld [vmem:[#allocation32_spill] sm:$0xff] }
 0x63c   : > { %5535 = vpow2.f32 %v4933_v42  ;;  %v3882_v1 = vadd.f32 %v3867_v46, %v12206_v61  ;;  %v3883_v3 = vadd.f32 %v3868_v50, %v12207_v13  ;;  %v3884_v37 = vadd.f32 %v3869_v48, %v12208_v60 }
 0x63d   : > { %v5526_v17 = vpop.eup %5525  ;;  %5537 = vpow2.f32 %v4934_v43  ;;  %v3885_v42 = vadd.f32 %v3664_v47, %v12209_v23  ;;  %v4938_v0 = vmul.f32 -1.442695, %v3880_v28  ;;  %v4939_v50 = vmul.f32 -1.442695, %v3881_v51 }
 0x63e   : > { %v5528_v63 = vpop.eup %5527  ;;  %5539 = vpow2.f32 %v4936_v34  ;;  %v10261_v45 = vadd.f32 1.0, %v5526_v17  ;;  %v12210_v34 = vld [vmem:[#allocation16_spill] sm:$0xff]  ;;  %v4940_v17 = vmul.f32 -1.442695, %v3882_v1  ;;  %v4941_v47 = vmul.f32 -1.442695, %v3883_v3 }
 0x63f   : > { %v5530_v19 = vpop.eup %5529  ;;  %v10265_v4 = vadd.f32 1.0, %v5528_v63  ;;  %5541 = vpow2.f32 %v4937_v53  ;;  %v3886_v29 = vadd.f32 %v3870_v36, %v12210_v34  ;;  %v4942_v36 = vmul.f32 -1.442695, %v3884_v37 }
 0x640   : > { %v5532_v2 = vpop.eup %5531  ;;  %v10269_v59 = vadd.f32 1.0, %v5530_v19  ;;  %5543 = vrcp.f32 %v10261_v45  ;;  %v4943_v51 = vmul.f32 -1.442695, %v3885_v42 }
 0x641   : > { %v5534_v21 = vpop.eup %5533  ;;  %v10274_v43 = vadd.f32 1.0, %v5532_v2  ;;  %5545 = vrcp.f32 %v10265_v4  ;;  %v3754_v48 = vand.u32 2147483648, %v10265_v4  ;;  %v4944_v1 = vmul.f32 -1.442695, %v3886_v29 }
 0x642   : > { %v5536_v46 = vpop.eup %5535  ;;  %v10278_v32 = vadd.f32 1.0, %v5534_v21  ;;  %5547 = vrcp.f32 %v10269_v59  ;;  %v3769_v28 = vand.u32 2147483648, %v10269_v59  ;;  %vm3748_vm9 = vweird.f32 %v10265_v4 }
 0x643   : > { %v5538_v53 = vpop.eup %5537  ;;  %v10281_v63 = vadd.f32 1.0, %v5536_v46  ;;  %5549 = vrcp.f32 %v10274_v43  ;;  %v3752_v3 = vand.u32 2147483647, %v10265_v4  ;;  %vm3763_vm10 = vweird.f32 %v10269_v59 }
 0x644   : > { %v5540_v19 = vpop.eup %5539  ;;  %v10285_v2 = vadd.f32 1.0, %v5538_v53  ;;  %5551 = vrcp.f32 %v10278_v32  ;;  %v3767_v53 = vand.u32 2147483647, %v10269_v59  ;;  %v3782_v42 = vand.u32 2147483647, %v10274_v43 }
 0x645   : > { %v5542_v21 = vpop.eup %5541  ;;  %v10289_v25 = vadd.f32 1.0, %v5540_v19  ;;  %5553 = vrcp.f32 %v10281_v63  ;;  %v10301_v19 = vor.u32 1.1754944e-38, %v3754_v48  ;;  %v3784_v29 = vand.u32 2147483648, %v10274_v43 }
 0x646   : > { %v10292_v46 = vpop.eup %5543  ;;  %5555 = vrcp.f32 %v10285_v2  ;;  %v10308_v26 = vadd.f32 1.0, %v5542_v21  ;;  %v10312_v40 = vor.u32 1.1754944e-38, %v3769_v28  ;;  %vm3778_vm15 = vweird.f32 %v10274_v43 }
 0x647   : > { %v10298_v37 = vpop.eup %5545  ;;  %5557 = vrcp.f32 %v10289_v25  ;;  %v3797_v56 = vand.u32 2147483647, %v10278_v32  ;;  %vm10323_vm0 = vcmp.eq.f32.partialorder %v3752_v3, 8.507059e+37  ;;  %vm10328_vm13 = vcmp.eq.f32.partialorder %v3767_v53, 8.507059e+37 }
 0x648   : > { %v10306_v24 = vpop.eup %5547  ;;  %5559 = vpow2.f32 %v4938_v0  ;;  %v3744_v18 = vmul.f32 %v10298_v37, %v10265_v4  ;;  %vm3749_vm5 = vweird.f32 %v10298_v37  ;;  %vm10336_vm14 = vcmp.eq.f32.partialorder %v3782_v42, 8.507059e+37 }
 0x649   : > { %v10315_v48 = vpop.eup %5549  ;;  %5561 = vpow2.f32 %v4939_v50  ;;  %v3759_v9 = vmul.f32 %v10306_v24, %v10269_v59  ;;  %vm3764_vm12 = vweird.f32 %v10306_v24  ;;  %vm3793_vm3 = vweird.f32 %v10278_v32  ;;  %vm10361_vm8 = vmor %vm3748_vm9, %vm3749_vm5 }
 0x64a   : > { %v10321_v0 = vpop.eup %5551  ;;  %5563 = vpow2.f32 %v4940_v17  ;;  %v3745_v21 = vsub.f32 1.0, %v3744_v18  ;;  %v3774_v50 = vmul.f32 %v10315_v48, %v10274_v43  ;;  %v3785_v18 = vor.u32 1.1754944e-38, %v3784_v29  ;;  %vm10376_vm2 = vmor %vm3763_vm10, %vm3764_vm12 }
 0x64b   : > { %v10334_v14 = vpop.eup %5553  ;;  %5565 = vpow2.f32 %v4941_v47  ;;  %v3760_v27 = vsub.f32 1.0, %v3759_v9  ;;  %v3789_v3 = vmul.f32 %v10321_v0, %v10278_v32  ;;  %vm3779_vm1 = vweird.f32 %v10315_v48 }
 0x64c   : > { %v10343_v53 = vpop.eup %5555  ;;  %5567 = vpow2.f32 %v4942_v36  ;;  %v3746_v57 = vmul.f32 %v10298_v37, %v3745_v21  ;;  %v3775_v30 = vsub.f32 1.0, %v3774_v50  ;;  %vm3794_vm7 = vweird.f32 %v10321_v0  ;;  %vm10393_vm11 = vmor %vm3778_vm15, %vm3779_vm1 }
 0x64d   : > { %v10347_v47 = vpop.eup %5557  ;;  %5569 = vpow2.f32 %v4943_v51  ;;  %v3761_v9 = vmul.f32 %v10306_v24, %v3760_v27  ;;  %v3790_v42 = vsub.f32 1.0, %v3789_v3  ;;  %v3799_v36 = vand.u32 2147483648, %v10278_v32  ;;  %vm10431_vm4 = vmor %vm3793_vm3, %vm3794_vm7 }
 0x64e   : > { %v5560_v29 = vpop.eup %5559  ;;  %5571 = vpow2.f32 %v4944_v1  ;;  %v3747_v20 = vadd.f32 %v10298_v37, %v3746_v57  ;;  %v3776_v44 = vmul.f32 %v10315_v48, %v3775_v30  ;;  %vm10397_vm6 = vcmp.eq.f32.partialorder %v3797_v56, 8.507059e+37 }
 0x64f   : > { %v5562_v21 = vpop.eup %5561  ;;  %v10354_v50 = vadd.f32 1.0, %v5560_v29  ;;  %5573 = vrcp.f32 %v10308_v26  ;;  %v3762_v51 = vadd.f32 %v10306_v24, %v3761_v9  ;;  %v3791_v57 = vmul.f32 %v10321_v0, %v3790_v42 }
 0x650   : > { %v5564_v30 = vpop.eup %5563  ;;  %v10367_v1 = vadd.f32 1.0, %v5562_v21  ;;  %v3751_v3 = vsel %vm10361_vm8, %v10298_v37, %v3747_v20  ;;  %v3777_v29 = vadd.f32 %v10315_v48, %v3776_v44  ;;  %v3804_v9 = vmul.f32 %v10334_v14, %v10281_v63 }
 0x651   : > { %v5566_v42 = vpop.eup %5565  ;;  %v10383_v21 = vadd.f32 1.0, %v5564_v30  ;;  %5575 = vrcp.f32 %v10354_v50  ;;  %v3766_v20 = vsel %vm10376_vm2, %v10306_v24, %v3762_v51  ;;  %v3800_v51 = vor.u32 1.1754944e-38, %v3799_v36 }
 0x652   : > { %v5568_v37 = vpop.eup %5567  ;;  %v10401_v27 = vadd.f32 1.0, %v5566_v42  ;;  %5577 = vrcp.f32 %v10367_v1  ;;  %v3781_v24 = vsel %vm10393_vm11, %v10315_v48, %v3777_v29  ;;  %v10412_v56 = vsel %vm10323_vm0, %v10301_v19, %v3751_v3 }
 0x653   : > { %v5570_v30 = vpop.eup %5569  ;;  %v10407_v43 = vadd.f32 1.0, %v5568_v37  ;;  %v10417_v4 = vsel %vm10328_vm13, %v10312_v40, %v3766_v20  ;;  %v3792_v42 = vadd.f32 %v10321_v0, %v3791_v57  ;;  %5579 = vrcp.f32 %v10383_v21 }
 0x654   : > { %v5572_v5 = vpop.eup %5571  ;;  %v10420_v15 = vadd.f32 1.0, %v5570_v30  ;;  %v10425_v48 = vsel %vm10336_vm14, %v3785_v18, %v3781_v24  ;;  %v3805_v40 = vsub.f32 1.0, %v3804_v9  ;;  %5581 = vrcp.f32 %v10401_v27 }
 0x655   : > { %v10435_v19 = vpop.eup %5573  ;;  %v10437_v28 = vadd.f32 1.0, %v5572_v5  ;;  %v3796_v17 = vsel %vm10431_vm4, %v10321_v0, %v3792_v42  ;;  %vm3808_vm9 = vweird.f32 %v10281_v63  ;;  %5583 = vrcp.f32 %v10407_v43 }
 0x656   : > { %v3920_v32 = vmul.f32 %v10435_v19, %v10308_v26  ;;  %v3806_v18 = vmul.f32 %v10334_v14, %v3805_v40  ;;  %vm3809_vm10 = vweird.f32 %v10334_v14  ;;  %5585 = vrcp.f32 %v10420_v15 }
 0x657   : > { %v10449_v36 = vpop.eup %5575  ;;  %v3812_v5 = vand.u32 2147483647, %v10281_v63  ;;  %v3814_v57 = vand.u32 2147483648, %v10281_v63  ;;  %v3819_v0 = vmul.f32 %v10343_v53, %v10285_v2  ;;  %v10462_v20 = vsel %vm10397_vm6, %v3800_v51, %v3796_v17  ;;  %vm10471_vm15 = vmor %vm3808_vm9, %vm3809_vm10 }
 0x658   : > { %v10456_v3 = vpop.eup %5577  ;;  %v3921_v29 = vsub.f32 1.0, %v3920_v32  ;;  %v3935_v9 = vmul.f32 %v10449_v36, %v10354_v50  ;;  %v3807_v59 = vadd.f32 %v10334_v14, %v3806_v18  ;;  %vm3823_vm0 = vweird.f32 %v10285_v2 }
 0x659   : > { %v10467_v37 = vmul.f32 %v10456_v3, %v10367_v1  ;;  %vm3813_vm5 = vcmp.eq.f32.partialorder %v3812_v5, 8.507059e+37  ;;  %v3820_v30 = vsub.f32 1.0, %v3819_v0  ;;  %vm3838_vm12 = vweird.f32 %v10261_v45  ;;  %v10477_v44 = vpop.eup %5579 }
 0x65a   : > { %v3936_v51 = vsub.f32 1.0, %v3935_v9  ;;  %v3811_v42 = vsel %vm10471_vm15, %v10334_v14, %v3807_v59  ;;  %v3815_v39 = vor.u32 1.1754944e-38, %v3814_v57  ;;  %v3827_v63 = vand.u32 2147483647, %v10285_v2  ;;  %v10483_v40 = vpop.eup %5581 }
 0x65b   : > { %v3821_v17 = vmul.f32 %v10343_v53, %v3820_v30  ;;  %vm3824_vm13 = vweird.f32 %v10343_v53  ;;  %v3829_v32 = vand.u32 2147483648, %v10285_v2  ;;  %v3834_v18 = vmul.f32 %v10292_v46, %v10261_v45  ;;  %v10490_v5 = vpop.eup %5583 }
 0x65c   : > { %v10492_v0 = vsel %vm3813_vm5, %v3815_v39, %v3811_v42  ;;  %vm10494_vm14 = vcmp.eq.f32.partialorder %v3827_v63, 8.507059e+37  ;;  %v3842_v57 = vand.u32 2147483647, %v10261_v45  ;;  %v3844_v9 = vand.u32 2147483648, %v10261_v45  ;;  %v10500_v59 = vpop.eup %5585  ;;  %vm3825_vm1 = vmor %vm3823_vm0, %vm3824_vm13 }
 0x65d   : > { %v3822_v24 = vadd.f32 %v10343_v53, %v3821_v17  ;;  %v3835_v30 = vsub.f32 1.0, %v3834_v18  ;;  %vm3839_vm3 = vweird.f32 %v10292_v46  ;;  %v3849_v23 = vmul.f32 %v10347_v47, %v10289_v25 }
 0x65e   : > { %v3830_v42 = vor.u32 1.1754944e-38, %v3829_v32  ;;  %vm10508_vm7 = vcmp.eq.f32.partialorder %v3842_v57, 8.507059e+37  ;;  %v3845_v63 = vor.u32 1.1754944e-38, %v3844_v9  ;;  %vm3853_vm8 = vweird.f32 %v10289_v25  ;;  %vm10529_vm4 = vmor %vm3838_vm12, %vm3839_vm3 }
 0x65f   : > { %v3826_v34 = vsel %vm3825_vm1, %v10343_v53, %v3822_v24  ;;  %v3836_v17 = vmul.f32 %v10292_v46, %v3835_v30  ;;  %v3850_v18 = vsub.f32 1.0, %v3849_v23  ;;  %v3857_v60 = vand.u32 2147483647, %v10289_v25 }
 0x660   : > { %v3831_v13 = vsel %vm10494_vm14, %v3830_v42, %v3826_v34  ;;  %vm3854_vm2 = vweird.f32 %v10347_v47  ;;  %v3859_v2 = vand.u32 2147483648, %v10289_v25  ;;  %v3922_v32 = vmul.f32 %v10435_v19, %v3921_v29 }
 0x661   : > { %v3837_v57 = vadd.f32 %v10292_v46, %v3836_v17  ;;  %v3851_v9 = vmul.f32 %v10347_v47, %v3850_v18  ;;  %vm3924_vm11 = vweird.f32 %v10308_v26  ;;  %vm3925_vm6 = vweird.f32 %v10435_v19  ;;  %vm3855_vm15 = vmor %vm3853_vm8, %vm3854_vm2 }
 0x662   : > { %vm10533_vm9 = vcmp.eq.f32.partialorder %v3857_v60, 8.507059e+37  ;;  %v3923_v53 = vadd.f32 %v10435_v19, %v3922_v32  ;;  %v3928_v29 = vand.u32 2147483647, %v10308_v26  ;;  %v3930_v14 = vand.u32 2147483648, %v10308_v26  ;;  %vm3926_vm10 = vmor %vm3924_vm11, %vm3925_vm6  ;;  %v3684_v60 = vpop.f32.mrf.mxu2 }
 0x663   : > { %v3841_v24 = vsel %vm10529_vm4, %v10292_v46, %v3837_v57  ;;  %v3852_v45 = vadd.f32 %v10347_v47, %v3851_v9  ;;  %v3860_v30 = vor.u32 1.1754944e-38, %v3859_v2  ;;  %v3937_v42 = vmul.f32 %v10449_v36, %v3936_v51 }
 0x664   : > { %v3927_v17 = vsel %vm3926_vm10, %v10435_v19, %v3923_v53  ;;  %vm3929_vm5 = vcmp.eq.f32.partialorder %v3928_v29, 8.507059e+37  ;;  %v3931_v26 = vor.u32 1.1754944e-38, %v3930_v14  ;;  %vm3939_vm0 = vweird.f32 %v10354_v50 }
 0x665   : > { %v3856_v46 = vsel %vm3855_vm15, %v10347_v47, %v3852_v45  ;;  %v3938_v18 = vadd.f32 %v10449_v36, %v3937_v42  ;;  %vm3940_vm12 = vweird.f32 %v10449_v36  ;;  %v3943_v51 = vand.u32 2147483647, %v10354_v50 }
 0x666   : > { %v3846_v2 = vsel %vm10508_vm7, %v3845_v63, %v3841_v24  ;;  %v3861_v25 = vsel %vm10533_vm9, %v3860_v30, %v3856_v46  ;;  %v10559_v32 = vsel %vm3929_vm5, %v3931_v26, %v3927_v17  ;;  %vm10561_vm13 = vmor %vm3939_vm0, %vm3940_vm12  ;;  %v3945_v47 = vand.u32 2147483648, %v10354_v50 }
 0x667   : > { %v3942_v57 = vsel %vm10561_vm13, %v10449_v36, %v3938_v18  ;;  %v4040_v9 = vrot.slane %v3684_v60, 2  ;;  %v4041_v23 = vrot.slane %v3684_v60, 3  ;;  %v4042_v53 = vrot.slane %v3684_v60, 4 }
 0x668   : > { %vm3944_vm14 = vcmp.eq.f32.partialorder %v3943_v51, 8.507059e+37  ;;  %v4043_v39 = vrot.slane %v3684_v60, 5  ;;  %v4044_v63 = vrot.slane %v3684_v60, 6  ;;  %v4045_v34 = vrot.slane %v3684_v60, 7 }
 0x669   : > { %v3946_v29 = vor.u32 1.1754944e-38, %v3945_v47  ;;  %v4055_v14 = vmul.f32 %v4040_v9, %v10412_v56  ;;  %v4056_v24 = vmul.f32 %v4041_v23, %v10417_v4  ;;  %v4057_v45 = vmul.f32 %v4042_v53, %v10425_v48 }
 0x66a   : > { %v4046_v30 = vrot.slane %v3684_v60, 1  ;;  %v4058_v50 = vmul.f32 %v4043_v39, %v10462_v20  ;;  %v4059_v42 = vmul.f32 %v4044_v63, %v10492_v0  ;;  %v4060_v36 = vmul.f32 %v4045_v34, %v3831_v13 }
 0x66b   : > { %v10574_v17 = vsel %vm3944_vm14, %v3946_v29, %v3942_v57  ;;  %v4061_v26 = vmul.f32 %v3846_v2, %v3684_v60  ;;  %v4063_v46 = vadd.f32 %v4055_v14, %v6449_v7  ;;  %v4064_v18 = vadd.f32 %v4056_v24, %v6455_v11 }
 0x66c   : > { %5587 = vrcp.f32 %v10437_v28  ;;  %v10579_v56 = vmul.f32 %v4046_v30, %v3861_v25  ;;  %v4065_v4 = vadd.f32 %v4057_v45, %v11954_v12  ;;  %v4066_v48 = vadd.f32 %v4058_v50, %v11956_v54 }
 0x66d   : > { %v4067_v20 = vadd.f32 %v4059_v42, %v11959_v49  ;;  %v4068_v0 = vadd.f32 %v4060_v36, %v11962_v62  ;;  %v4069_v13 = vadd.f32 %v4061_v26, %v11965_v10  ;;  %5589 = vtanh.f32 %v4063_v46 }
 0x66e   : > { %5591 = vtanh.f32 %v4064_v18  ;;  %v4079_v60 = vsub.f32 1.0, %v10559_v32  ;;  %v4080_v51 = vsub.f32 1.0, %v10574_v17  ;;  %v3951_v2 = vsub.f32 1.0, %v10467_v37 }
 0x66f   : > { %5593 = vtanh.f32 %v4065_v4  ;;  %v3958_v25 = vand.u32 2147483647, %v10367_v1  ;;  %v3960_v19 = vand.u32 2147483648, %v10367_v1  ;;  %v3965_v47 = vmul.f32 %v10477_v44, %v10383_v21 }
 0x670   : > { %5595 = vtanh.f32 %v4066_v48  ;;  %v3952_v57 = vmul.f32 %v10456_v3, %v3951_v2  ;;  %vm3954_vm3 = vweird.f32 %v10367_v1  ;;  %vm3955_vm1 = vweird.f32 %v10456_v3 }
 0x671   : > { %5597 = vtanh.f32 %v4067_v20  ;;  %v3966_v9 = vsub.f32 1.0, %v3965_v47  ;;  %vm3969_vm7 = vweird.f32 %v10383_v21  ;;  %vm3970_vm8 = vweird.f32 %v10477_v44  ;;  %vm10607_vm11 = vmor %vm3954_vm3, %vm3955_vm1 }
 0x672   : > { %v10598_v37 = vpop.eup %5587  ;;  %v3953_v23 = vadd.f32 %v10456_v3, %v3952_v57  ;;  %vm10601_vm2 = vcmp.eq.f32.partialorder %v3958_v25, 8.507059e+37  ;;  %v3973_v39 = vand.u32 2147483647, %v10383_v21  ;;  %v3975_v1 = vand.u32 2147483648, %v10383_v21  ;;  %vm3971_vm9 = vmor %vm3969_vm7, %vm3970_vm8 }
 0x673   : > { %v5590_v63 = vpop.eup %5589  ;;  %5599 = vtanh.f32 %v4068_v0  ;;  %v3961_v29 = vor.u32 1.1754944e-38, %v3960_v19  ;;  %v3967_v14 = vmul.f32 %v10477_v44, %v3966_v9  ;;  %v3980_v24 = vmul.f32 %v10483_v40, %v10401_v27 }
 0x674   : > { %v5592_v45 = vpop.eup %5591  ;;  %5601 = vtanh.f32 %v4069_v13  ;;  %v10614_v30 = vmul.f32 %v5590_v63, %v4079_v60  ;;  %v3957_v50 = vsel %vm10607_vm11, %v10456_v3, %v3953_v23  ;;  %vm3984_vm6 = vweird.f32 %v10401_v27 }
 0x675   : > { %v10620_v42 = vpop.eup %5593  ;;  %v3968_v36 = vadd.f32 %v10477_v44, %v3967_v14  ;;  %vm3974_vm4 = vcmp.eq.f32.partialorder %v3973_v39, 8.507059e+37  ;;  %v3976_v26 = vor.u32 1.1754944e-38, %v3975_v1  ;;  %v3981_v46 = vsub.f32 1.0, %v3980_v24 }
 0x676   : > { %v10623_v18 = vpop.eup %5595  ;;  %v10625_v4 = vmul.f32 %v5592_v45, %v4080_v51  ;;  %v3988_v3 = vand.u32 2147483647, %v10401_v27  ;;  %v3990_v48 = vand.u32 2147483648, %v10401_v27  ;;  %v3995_v20 = vmul.f32 %v10490_v5, %v10407_v43 }
 0x677   : > { %v5598_v0 = vpop.eup %5597  ;;  %v10637_v13 = vsel %vm10601_vm2, %v3961_v29, %v3957_v50  ;;  %v3972_v60 = vsel %vm3971_vm9, %v10477_v44, %v3968_v36  ;;  %v3982_v51 = vmul.f32 %v10483_v40, %v3981_v46  ;;  %vm3985_vm10 = vweird.f32 %v10483_v40 }
 0x678   : > { %v3977_v21 = vsel %vm3974_vm4, %v3976_v26, %v3972_v60  ;;  %v3996_v2 = vsub.f32 1.0, %v3995_v20  ;;  %vm3999_vm15 = vweird.f32 %v10407_v43  ;;  %vm4000_vm5 = vweird.f32 %v10490_v5  ;;  %vm3986_vm0 = vmor %vm3984_vm6, %vm3985_vm10 }
 0x679   : > { %v5600_v25 = vpop.eup %5599  ;;  %v3983_v19 = vadd.f32 %v10483_v40, %v3982_v51  ;;  %v4003_v47 = vand.u32 2147483647, %v10407_v43  ;;  %v4005_v57 = vand.u32 2147483648, %v10407_v43  ;;  %v4010_v44 = vmul.f32 %v10500_v59, %v10420_v15  ;;  %vm4001_vm1 = vmor %vm3999_vm15, %vm4000_vm5 }
 0x67a   : > { %v5602_v9 = vpop.eup %5601  ;;  %vm3989_vm12 = vcmp.eq.f32.partialorder %v3988_v3, 8.507059e+37  ;;  %v3991_v23 = vor.u32 1.1754944e-38, %v3990_v48  ;;  %v3997_v53 = vmul.f32 %v10490_v5, %v3996_v2  ;;  %v4018_v39 = vand.u32 2147483647, %v10420_v15 }
 0x67b   : > { %v3987_v1 = vsel %vm3986_vm0, %v10483_v40, %v3983_v19  ;;  %v4011_v63 = vsub.f32 1.0, %v4010_v44  ;;  %vm4014_vm13 = vweird.f32 %v10420_v15  ;;  %vm4015_vm14 = vweird.f32 %v10500_v59 }
 0x67c   : > { %v3998_v34 = vadd.f32 %v10490_v5, %v3997_v53  ;;  %vm4004_vm3 = vcmp.eq.f32.partialorder %v4003_v47, 8.507059e+37  ;;  %v4006_v29 = vor.u32 1.1754944e-38, %v4005_v57  ;;  %v4020_v27 = vand.u32 2147483648, %v10420_v15  ;;  %vm4016_vm2 = vmor %vm4014_vm13, %vm4015_vm14 }
 0x67d   : > { %v3992_v14 = vsel %vm3989_vm12, %v3991_v23, %v3987_v1  ;;  %v4012_v24 = vmul.f32 %v10500_v59, %v4011_v63  ;;  %vm10663_vm7 = vcmp.eq.f32.partialorder %v4018_v39, 8.507059e+37  ;;  %v4025_v45 = vmul.f32 %v10598_v37, %v10437_v28 }
 0x67e   : > { %v4002_v50 = vsel %vm4001_vm1, %v10490_v5, %v3998_v34  ;;  %vm4029_vm8 = vweird.f32 %v10437_v28  ;;  %v4033_v36 = vand.u32 2147483647, %v10437_v28  ;;  %v4035_v26 = vand.u32 2147483648, %v10437_v28 }
 0x67f   : > { %v4007_v46 = vsel %vm4004_vm3, %v4006_v29, %v4002_v50  ;;  %v4013_v43 = vadd.f32 %v10500_v59, %v4012_v24  ;;  %v4026_v3 = vsub.f32 1.0, %v4025_v45  ;;  %v4070_v48 = vadd.f32 %v10579_v56, %v11966_v33 }
 0x680   : > { %v4021_v20 = vor.u32 1.1754944e-38, %v4020_v27  ;;  %vm4030_vm11 = vweird.f32 %v10598_v37  ;;  %vm10681_vm6 = vcmp.eq.f32.partialorder %v4033_v36, 8.507059e+37  ;;  %v4081_v60 = vsub.f32 1.0, %v10637_v13 }
 0x681   : > { %v4017_v51 = vsel %vm4016_vm2, %v10500_v59, %v4013_v43  ;;  %v4027_v2 = vmul.f32 %v10598_v37, %v4026_v3  ;;  %5603 = vtanh.f32 %v4070_v48  ;;  %v4082_v56 = vsub.f32 1.0, %v3977_v21  ;;  %vm4031_vm4 = vmor %vm4029_vm8, %vm4030_vm11 }
 0x682   : > { %v4022_v19 = vsel %vm10663_vm7, %v4021_v20, %v4017_v51  ;;  %v4036_v15 = vor.u32 1.1754944e-38, %v4035_v26  ;;  %v4083_v47 = vsub.f32 1.0, %v3992_v14  ;;  %v4084_v57 = vsub.f32 1.0, %v4007_v46 }
 0x683   : > { %v4028_v44 = vadd.f32 %v10598_v37, %v4027_v2  ;;  %v4085_v23 = vsub.f32 1.0, %v4022_v19  ;;  %v4089_v53 = vmul.f32 %v10620_v42, %v4081_v60  ;;  %v4090_v39 = vmul.f32 %v10623_v18, %v4082_v56 }
 0x684   : > { %v4091_v59 = vmul.f32 %v5598_v0, %v4083_v47  ;;  %v4092_v1 = vmul.f32 %v5600_v25, %v4084_v57  ;;  %v12247_v63 = vrot.slane %v10192_v58, 7  ;;  %v12248_v29 = vrot.slane %v10194_v31, 7 }
 0x685   : > { %v4032_v24 = vsel %vm4031_vm4, %v10598_v37, %v4028_v44  ;;  %v4093_v42 = vmul.f32 %v5602_v9, %v4085_v23  ;;  %v12249_v18 = vrot.slane %v10196_v16, 7  ;;  %v12250_v28 = vrot.slane %v10200_v6, 7 }
 0x686   : > { %v4110_v34 = vmul.f32 %v12247_v63, %v10559_v32  ;;  %v4111_v27 = vmul.f32 %v12248_v29, %v10574_v17  ;;  %v4037_v25 = vsel %vm10681_vm6, %v4036_v15, %v4032_v24  ;;  %v12251_v58 = vrot.slane %v10202_v35, 7 }
 0x687   : > { %v4112_v40 = vmul.f32 %v12249_v18, %v10637_v13  ;;  %v4113_v0 = vmul.f32 %v12250_v28, %v3977_v21  ;;  %v5604_v37 = vpop.eup %5603  ;;  %v4086_v16 = vsub.f32 1.0, %v4037_v25  ;;  %v12252_v13 = vrot.slane %v10211_v55, 7 }
 0x688   : > { %v4114_v32 = vmul.f32 %v12251_v58, %v3992_v14  ;;  %v10714_v31 = vadd.f32 %v4110_v34, %v10614_v30  ;;  %v10717_v17 = vadd.f32 %v4111_v27, %v10625_v4  ;;  %v12254_v35 = vrot.slane %v10213_v22, 7 }
 0x689   : > { %v4115_v6 = vmul.f32 %v12252_v13, %v4007_v46  ;;  %v10721_v21 = vadd.f32 %v4112_v40, %v4089_v53  ;;  %v10723_v9 = vadd.f32 %v4113_v0, %v4090_v39  ;;  %v12255_v30 = vrot.slane %v10217_v38, 7 }
 0x68a   : > { %v4116_v14 = vmul.f32 %v4022_v19, %v12254_v35  ;;  %v10729_v4 = vadd.f32 %v4114_v32, %v4091_v59  ;;  %4126 = vst [vmem:[%s6102_s23] sm:$0x40] %v10714_v31  ;;  %v4142_v55 = vrot.slane %v10714_v31, 6  ;;  %v4094_v50 = vmul.f32 %v5604_v37, %v4086_v16  ;;  %v12270_v35 = vld [vmem:[#allocation32_spill] sm:$0xff] }
 0x68b   : > { %12253 = vst [vmem:[#allocation24_spill] sm:$0xff] %v10723_v9  ;;  %v4117_v45 = vmul.f32 %v12255_v30, %v4037_v25  ;;  %v10734_v36 = vadd.f32 %v4115_v6, %v4092_v1  ;;  %v4143_v22 = vrot.slane %v10717_v17, 5  ;;  %v4145_v38 = vrot.slane %v10721_v21, 4  ;;  %v12268_v25 = vld [vmem:[#allocation30_spill] sm:$0xff] }
 0x68c   : > { %12256 = vst [vmem:[#allocation27_spill] sm:$0xff] %v10729_v4  ;;  %v10740_v26 = vadd.f32 %v4116_v14, %v4093_v42  ;;  %vm12260_vm9 = vcmask 1041409   ;;  %v4147_v3 = vrot.slane %v10723_v9, 3  ;;  %vm12261_vm10 = vcmask 1042434   ;;  %v12267_v42 = vld [vmem:[#allocation28_spill] sm:$0xff] }
 0x68d   : > { %12257 = vst [vmem:[#allocation29_spill] sm:$0xff] %v10734_v36  ;;  %v10744_v46 = vadd.f32 %v4117_v45, %v4094_v50  ;;  %v4144_v43 = vsel %vm12260_vm9, %v4143_v22, %v4142_v55  ;;  %v4149_v20 = vrot.slane %v10729_v4, 2  ;;  %vm12262_vm15 = vcmask 1043459  }
 0x68e   : > { %4127 = vst [vmem:[%s6102_s23 + $0x8] sm:$0x40] %v10717_v17  ;;  %v4146_v48 = vsel %vm12261_vm10, %v4145_v38, %v4144_v43  ;;  %v4151_v60 = vrot.slane %v10734_v36, 1  ;;  %vm12263_vm5 = vcmask 1044484   ;;  %vm12264_vm0 = vcmask 1045509  }
 0x68f   : > { %12258 = vst [vmem:[#allocation31_spill] sm:$0xff] %v10740_v26  ;;  %v4148_v5 = vsel %vm12262_vm15, %v4147_v3, %v4146_v48  ;;  %v11535_v56 = vrot.slane %v10744_v46, 7  ;;  %vm12265_vm12 = vcmask 1046534   ;;  %vm12266_vm13 = vcmask 1047559  }
 0x690   : > { %4128 = vst [vmem:[%s6102_s23 + $0x10] sm:$0x40] %v10721_v21  ;;  %v4150_v51 = vsel %vm12263_vm5, %v4149_v20, %v4148_v5 }
 0x691   : > { %12259 = vst [vmem:[#allocation33_spill] sm:$0xff] %v10744_v46  ;;  %v4152_v2 = vsel %vm12264_vm0, %v4151_v60, %v4150_v51 }
 0x692   : > { %4129 = vst [vmem:[%s6102_s23 + $0x18] sm:$0x40] %v10723_v9  ;;  %v4153_v19 = vsel %vm12265_vm12, %v10740_v26, %v4152_v2 }
 0x693   : > { %4130 = vst [vmem:[%s6102_s23 + $0x20] sm:$0x40] %v10729_v4  ;;  %v4155_v15 = vsel %vm12266_vm13, %v11535_v56, %v4153_v19  ;;  %v12275_v56 = vld [vmem:[#allocation21_spill] sm:$0xff] }
 0x694   : > { %4131 = vst [vmem:[%s6102_s23 + $0x28] sm:$0x40] %v10734_v36  ;;  %4173 = vmatmul.f32.vlgmr.msra.gmra.mxu3 %v4155_v15  ;;  %4193 = vmatmul.f32.vlgmr.msra.gmra.mxu0 %v4155_v15 }
 0x695   : > { %4132 = vst [vmem:[%s6102_s23 + $0x30] sm:$0x40] %v10740_v26  ;;  %4213 = vmatmul.f32.vlgmr.msra.gmra.mxu1 %v4155_v15 }
 0x696   : > { %4133 = vst [vmem:[%s6102_s23 + $0x38] sm:$0x40] %v10744_v46 }
 0x711   : > { %v4194_v47 = vpop.f32.mrf.mxu0 }
 0x712   : > { %v4394_v57 = vrot.slane %v4194_v47, 1  ;;  %v4395_v44 = vrot.slane %v4194_v47, 2  ;;  %v4396_v23 = vrot.slane %v4194_v47, 3  ;;  %v4397_v53 = vrot.slane %v4194_v47, 4  ;;  %v10790_v3 = vpop.f32.mrf.mxu1 }
 0x713   : > { %v4398_v63 = vrot.slane %v4194_v47, 5  ;;  %v4399_v28 = vrot.slane %v4194_v47, 6  ;;  %v4400_v58 = vrot.slane %v4194_v47, 7 }
 0x714   : > { %v4409_v39 = vadd.f32 %v4394_v57, %v12203_v8  ;;  %v4410_v59 = vadd.f32 %v4395_v44, %v12204_v41  ;;  %v4411_v1 = vadd.f32 %v4396_v23, %v12205_v52  ;;  %v4412_v34 = vadd.f32 %v4397_v53, %v12206_v61  ;;  %v12269_v52 = vld [vmem:[#allocation16_spill] sm:$0xff] }
 0x715   : > { %v4413_v18 = vadd.f32 %v4398_v63, %v12267_v42  ;;  %v4414_v41 = vadd.f32 %v4399_v28, %v12268_v25  ;;  %v4416_v32 = vadd.f32 %v4194_v47, %v12269_v52  ;;  %v4415_v14 = vadd.f32 %v4400_v58, %v12270_v35 }
 0x716   : > { %v4953_v29 = vmul.f32 -1.442695, %v4409_v39  ;;  %v4954_v27 = vmul.f32 -1.442695, %v4410_v59  ;;  %v4955_v24 = vmul.f32 -1.442695, %v4411_v1 }
 0x717   : > { %v4956_v40 = vmul.f32 -1.442695, %v4412_v34  ;;  %v4957_v0 = vmul.f32 -1.442695, %v4413_v18  ;;  %v4958_v13 = vmul.f32 -1.442695, %v4414_v41  ;;  %v4174_v48 = vpop.f32.mrf.mxu3 }
 0x718   : > { %5605 = vpow2.f32 %v4953_v29  ;;  %v4960_v30 = vmul.f32 -1.442695, %v4416_v32  ;;  %v4959_v38 = vmul.f32 -1.442695, %v4415_v14  ;;  %v4218_v53 = vrot.slane %v4174_v48, 1  ;;  %v12271_v32 = vld [vmem:[#allocation13_spill] sm:$0xff] }
 0x719   : > { %5607 = vpow2.f32 %v4954_v27  ;;  %v4219_v1 = vrot.slane %v4174_v48, 2  ;;  %v4220_v63 = vrot.slane %v4174_v48, 3  ;;  %v4221_v34 = vrot.slane %v4174_v48, 4  ;;  %v12273_v14 = vld [vmem:[#allocation17_spill] sm:$0xff] }
 0x71a   : > { %5609 = vpow2.f32 %v4955_v24  ;;  %v4222_v24 = vrot.slane %v4174_v48, 5  ;;  %v4223_v42 = vrot.slane %v4174_v48, 6 }
 0x71b   : > { %5611 = vpow2.f32 %v4956_v40 }
 0x71c   : > { %5613 = vpow2.f32 %v4957_v0  ;;  %v10836_v57 = vadd.f32 %v4222_v24, %v12275_v56  ;;  %v12278_v24 = vld [vmem:[#allocation14_spill] sm:$0xff] }
 0x71e   : > { %v5606_v8 = vpop.eup %5605 }
 0x71f   : > { %v5608_v37 = vpop.eup %5607  ;;  %v10777_v61 = vadd.f32 1.0, %v5606_v8  ;;  %v4224_v8 = vrot.slane %v4174_v48, 7 }
 0x720   : > { %v5610_v16 = vpop.eup %5609  ;;  %v10780_v45 = vadd.f32 1.0, %v5608_v37  ;;  %v4233_v37 = vadd.f32 %v4218_v53, %v12271_v32  ;;  %v12276_v53 = vld [vmem:[#allocation23_spill] sm:$0xff] }
 0x721   : > { %v5612_v6 = vpop.eup %5611  ;;  %v10782_v55 = vadd.f32 1.0, %v5610_v16  ;;  %5615 = vrcp.f32 %v10777_v61  ;;  %v10839_v32 = vadd.f32 %v4223_v42, %v12276_v53  ;;  %v4460_v15 = vand.u32 2147483648, %v10777_v61 }
 0x722   : > { %5617 = vpow2.f32 %v4958_v13  ;;  %v10785_v50 = vadd.f32 1.0, %v5612_v6  ;;  %v5614_v22 = vpop.eup %5613  ;;  %v12272_v6 = vld [vmem:[#allocation15_spill] sm:$0xff]  ;;  %v4475_v56 = vand.u32 2147483648, %v10780_v45  ;;  %v10855_v42 = vadd.f32 %v4174_v48, %v12278_v24 }
 0x723   : > { %5619 = vpow2.f32 %v4960_v30  ;;  %v10794_v60 = vadd.f32 1.0, %v5614_v22  ;;  %v4234_v35 = vadd.f32 %v4219_v1, %v12272_v6  ;;  %v10828_v30 = vadd.f32 %v4220_v63, %v12273_v14  ;;  %v12274_v22 = vld [vmem:[#allocation19_spill] sm:$0xff]  ;;  %v12277_v63 = vld [vmem:[#allocation25_spill] sm:$0xff] }
 0x724   : > { %5621 = vrcp.f32 %v10780_v45  ;;  %v4458_v14 = vand.u32 2147483647, %v10777_v61  ;;  %v4490_v53 = vand.u32 2147483648, %v10782_v55  ;;  %vm4454_vm14 = vweird.f32 %v10777_v61 }
 0x725   : > { %5623 = vrcp.f32 %v10782_v55  ;;  %v4461_v2 = vor.u32 1.1754944e-38, %v4460_v15  ;;  %v4473_v5 = vand.u32 2147483647, %v10780_v45  ;;  %vm4469_vm3 = vweird.f32 %v10780_v45 }
 0x726   : > { %5625 = vrcp.f32 %v10785_v50  ;;  %v4488_v24 = vand.u32 2147483647, %v10782_v55  ;;  %vm10875_vm7 = vcmp.eq.f32.partialorder %v4458_v14, 8.507059e+37  ;;  %vm4484_vm8 = vweird.f32 %v10782_v55 }
 0x727   : > { %v10797_v51 = vpop.eup %5615  ;;  %5627 = vpow2.f32 %v4959_v38  ;;  %v10831_v38 = vadd.f32 %v4221_v34, %v12274_v22  ;;  %v10846_v34 = vadd.f32 %v4224_v8, %v12277_v63  ;;  %v4505_v63 = vand.u32 2147483648, %v10785_v50 }
 0x728   : > { %v5618_v47 = vpop.eup %5617  ;;  %v4450_v27 = vmul.f32 %v10797_v51, %v10777_v61  ;;  %5629 = vrcp.f32 %v10794_v60  ;;  %vm4455_vm1 = vweird.f32 %v10797_v51  ;;  %v4503_v43 = vand.u32 2147483647, %v10785_v50 }
 0x729   : > { %v5620_v39 = vpop.eup %5619  ;;  %v10813_v40 = vadd.f32 1.0, %v5618_v47  ;;  %vm4499_vm11 = vweird.f32 %v10785_v50  ;;  %v10890_v14 = vor.u32 1.1754944e-38, %v4505_v63  ;;  %v4518_v0 = vand.u32 2147483647, %v10794_v60  ;;  %vm10909_vm9 = vmor %vm4454_vm14, %vm4455_vm1 }
 0x72a   : > { %v10806_v29 = vpop.eup %5621  ;;  %v10819_v41 = vadd.f32 1.0, %v5620_v39  ;;  %v4451_v47 = vsub.f32 1.0, %v4450_v27  ;;  %vm10895_vm4 = vcmp.eq.f32.partialorder %v4473_v5, 8.507059e+37  ;;  %vm10914_vm10 = vcmp.eq.f32.partialorder %v4488_v24, 8.507059e+37 }
 0x72b   : > { %v10811_v18 = vpop.eup %5623  ;;  %v4465_v13 = vmul.f32 %v10806_v29, %v10780_v45  ;;  %5631 = vrcp.f32 %v10813_v40  ;;  %vm4470_vm2 = vweird.f32 %v10806_v29  ;;  %v4535_v63 = vand.u32 2147483648, %v10813_v40 }
 0x72c   : > { %v10817_v25 = vpop.eup %5625  ;;  %v4480_v39 = vmul.f32 %v10811_v18, %v10782_v55  ;;  %5633 = vrcp.f32 %v10819_v41  ;;  %v4452_v8 = vmul.f32 %v10797_v51, %v4451_v47  ;;  %v4520_v47 = vand.u32 2147483648, %v10794_v60  ;;  %vm10942_vm12 = vmor %vm4469_vm3, %vm4470_vm2 }
 0x72d   : > { %v5628_v16 = vpop.eup %5627  ;;  %v4495_v1 = vmul.f32 %v10817_v25, %v10785_v50  ;;  %v4466_v22 = vsub.f32 1.0, %v4465_v13  ;;  %v10867_v13 = vor.u32 1.1754944e-38, %v4475_v56  ;;  %v10881_v56 = vor.u32 1.1754944e-38, %v4490_v53 }
 0x72e   : > { %v10848_v27 = vpop.eup %5629  ;;  %v10850_v6 = vadd.f32 1.0, %v5628_v16  ;;  %v4481_v16 = vsub.f32 1.0, %v4480_v39  ;;  %v4453_v52 = vadd.f32 %v10797_v51, %v4452_v8  ;;  %vm4485_vm6 = vweird.f32 %v10811_v18 }
 0x72f   : > { %v4496_v20 = vsub.f32 1.0, %v4495_v1  ;;  %v4510_v48 = vmul.f32 %v10848_v27, %v10794_v60  ;;  %v4467_v1 = vmul.f32 %v10806_v29, %v4466_v22  ;;  %v10899_v8 = vor.u32 1.1754944e-38, %v4520_v47  ;;  %vm10966_vm3 = vmor %vm4484_vm8, %vm4485_vm6 }
 0x730   : > { %5635 = vrcp.f32 %v10850_v6  ;;  %v4482_v58 = vmul.f32 %v10811_v18, %v4481_v16  ;;  %vm4500_vm15 = vweird.f32 %v10817_v25  ;;  %vm4514_vm5 = vweird.f32 %v10794_v60 }
 0x731   : > { %v10872_v39 = vpop.eup %5631  ;;  %v4497_v22 = vmul.f32 %v10817_v25, %v4496_v20  ;;  %v4511_v53 = vsub.f32 1.0, %v4510_v48  ;;  %v4468_v5 = vadd.f32 %v10806_v29, %v4467_v1  ;;  %v4945_v47 = vmul.f32 -1.442695, %v4233_v37 }
 0x732   : > { %v10884_v19 = vpop.eup %5633  ;;  %v4525_v16 = vmul.f32 %v10872_v39, %v10813_v40  ;;  %v4946_v23 = vmul.f32 -1.442695, %v4234_v35  ;;  %v4457_v61 = vsel %vm10909_vm9, %v10797_v51, %v4453_v52  ;;  %v4483_v59 = vadd.f32 %v10811_v18, %v4482_v58 }
 0x733   : > { %vm10926_vm0 = vcmp.eq.f32.partialorder %v4503_v43, 8.507059e+37  ;;  %v4947_v24 = vmul.f32 -1.442695, %v10828_v30  ;;  %v4948_v46 = vmul.f32 -1.442695, %v10831_v38  ;;  %v4498_v26 = vadd.f32 %v10817_v25, %v4497_v22 }
 0x734   : > { %v4512_v37 = vmul.f32 %v10848_v27, %v4511_v53  ;;  %5637 = vpow2.f32 %v4945_v47  ;;  %v4949_v35 = vmul.f32 -1.442695, %v10836_v57  ;;  %v4526_v36 = vsub.f32 1.0, %v4525_v16 }
 0x735   : > { %v4555_v51 = vmul.f32 %v10884_v19, %v10819_v41  ;;  %5639 = vpow2.f32 %v4946_v23  ;;  %v4950_v43 = vmul.f32 -1.442695, %v10839_v32  ;;  %vm4515_vm13 = vweird.f32 %v10848_v27 }
 0x736   : > { %v10920_v44 = vpop.eup %5635  ;;  %vm10947_vm14 = vcmp.eq.f32.partialorder %v4518_v0, 8.507059e+37  ;;  %v10951_v57 = vor.u32 1.1754944e-38, %v4535_v63  ;;  %5641 = vpow2.f32 %v4947_v24  ;;  %v10957_v30 = vsel %vm10875_vm7, %v4461_v2, %v4457_v61  ;;  %vm10979_vm7 = vmor %vm4499_vm11, %vm4500_vm15 }
 0x737   : > { %v4540_v23 = vmul.f32 %v10920_v44, %v10850_v6  ;;  %v4472_v45 = vsel %vm10942_vm12, %v10806_v29, %v4468_v5  ;;  %vm4529_vm1 = vweird.f32 %v10813_v40  ;;  %5643 = vpow2.f32 %v4948_v46  ;;  %vm11005_vm2 = vmor %vm4514_vm5, %vm4515_vm13 }
 0x738   : > { %v4951_v38 = vmul.f32 -1.442695, %v10846_v34  ;;  %v4487_v2 = vsel %vm10966_vm3, %v10811_v18, %v4483_v59  ;;  %v4513_v55 = vadd.f32 %v10848_v27, %v4512_v37  ;;  %5645 = vpow2.f32 %v4949_v35 }
 0x739   : > { %v4952_v32 = vmul.f32 -1.442695, %v10855_v42  ;;  %v4502_v46 = vsel %vm10979_vm7, %v10817_v25, %v4498_v26  ;;  %v4527_v34 = vmul.f32 %v10872_v39, %v4526_v36  ;;  %v4556_v59 = vsub.f32 1.0, %v4555_v51 }
 0x73a   : > { %5647 = vpow2.f32 %v4950_v43  ;;  %v5638_v18 = vpop.eup %5637  ;;  %v10992_v50 = vsel %vm10895_vm4, %v10867_v13, %v4472_v45  ;;  %vm4530_vm8 = vweird.f32 %v10872_v39  ;;  %v4541_v15 = vsub.f32 1.0, %v4540_v23 }
 0x73b   : > { %v5640_v42 = vpop.eup %5639  ;;  %v10999_v26 = vsel %vm10914_vm10, %v10881_v56, %v4487_v2  ;;  %v4550_v28 = vand.u32 2147483648, %v10850_v6  ;;  %5649 = vpow2.f32 %v4951_v38  ;;  %v11010_v25 = vadd.f32 1.0, %v5638_v18  ;;  %vm11048_vm11 = vmor %vm4529_vm1, %vm4530_vm8 }
 0x73c   : > { %v5642_v13 = vpop.eup %5641  ;;  %v11015_v53 = vsel %vm10926_vm0, %v10890_v14, %v4502_v46  ;;  %v4517_v56 = vsel %vm11005_vm2, %v10848_v27, %v4513_v55  ;;  %5651 = vpow2.f32 %v4952_v32  ;;  %v11020_v60 = vadd.f32 1.0, %v5640_v42 }
 0x73d   : > { %v5644_v16 = vpop.eup %5643  ;;  %v11023_v63 = vadd.f32 %v10872_v39, %v4527_v34  ;;  %v4557_v20 = vmul.f32 %v10884_v19, %v4556_v59  ;;  %v11026_v5 = vadd.f32 1.0, %v5642_v13  ;;  %5653 = vrcp.f32 %v11010_v25 }
 0x73e   : > { %v5646_v48 = vpop.eup %5645  ;;  %v4542_v14 = vmul.f32 %v10920_v44, %v4541_v15  ;;  %v4565_v47 = vand.u32 2147483648, %v10819_v41  ;;  %v11031_v61 = vadd.f32 1.0, %v5644_v16  ;;  %5655 = vrcp.f32 %v11020_v60 }
 0x73f   : > { %v11037_v1 = vsel %vm10947_vm14, %v10899_v8, %v4517_v56  ;;  %v11039_v24 = vor.u32 1.1754944e-38, %v4550_v28  ;;  %v11042_v35 = vadd.f32 1.0, %v5646_v48  ;;  %v4284_v8 = vand.u32 2147483648, %v11010_v25 }
 0x740   : > { %v5648_v27 = vpop.eup %5647  ;;  %5657 = vrcp.f32 %v11026_v5  ;;  %v11061_v45 = vadd.f32 %v10884_v19, %v4557_v20  ;;  %v4299_v38 = vand.u32 2147483648, %v11020_v60  ;;  %v11066_v29 = vadd.f32 %v10920_v44, %v4542_v14 }
 0x741   : > { %v5650_v52 = vpop.eup %5649  ;;  %v11068_v55 = vor.u32 1.1754944e-38, %v4565_v47  ;;  %v11070_v32 = vadd.f32 1.0, %v5648_v27  ;;  %5659 = vrcp.f32 %v11031_v61  ;;  %vm4278_vm6 = vweird.f32 %v11010_v25 }
 0x742   : > { %v5652_v2 = vpop.eup %5651  ;;  %v4282_v34 = vand.u32 2147483647, %v11010_v25  ;;  %v4314_v59 = vand.u32 2147483648, %v11026_v5  ;;  %5661 = vrcp.f32 %v11042_v35  ;;  %v11081_v15 = vadd.f32 1.0, %v5650_v52 }
 0x743   : > { %12301 = vst [vmem:[#allocation35_spill] sm:$0xff] %v11068_v55  ;;  %v11073_v46 = vpop.eup %5653  ;;  %v4285_v36 = vor.u32 1.1754944e-38, %v4284_v8  ;;  %vm4293_vm4 = vweird.f32 %v11020_v60  ;;  %v4297_v28 = vand.u32 2147483647, %v11020_v60  ;;  %v4300_v56 = vor.u32 1.1754944e-38, %v4299_v38 }
 0x744   : > { %v11079_v18 = vpop.eup %5655  ;;  %v4274_v42 = vmul.f32 %v11073_v46, %v11010_v25  ;;  %vm4308_vm9 = vweird.f32 %v11026_v5  ;;  %v4312_v16 = vand.u32 2147483647, %v11026_v5  ;;  %v4327_v20 = vand.u32 2147483647, %v11031_v61 }
 0x745   : > { %v4289_v13 = vmul.f32 %v11079_v18, %v11020_v60  ;;  %v11094_v14 = vadd.f32 1.0, %v5652_v2  ;;  %v4329_v27 = vand.u32 2147483648, %v11031_v61  ;;  %5663 = vrcp.f32 %v11070_v32 }
 0x746   : > { %v11092_v48 = vpop.eup %5657  ;;  %v4275_v47 = vsub.f32 1.0, %v4274_v42  ;;  %vm4279_vm10 = vweird.f32 %v11073_v46  ;;  %vm11099_vm15 = vcmp.eq.f32.partialorder %v4282_v34, 8.507059e+37  ;;  %v4315_v0 = vor.u32 1.1754944e-38, %v4314_v59 }
 0x747   : > { %v4290_v52 = vsub.f32 1.0, %v4289_v13  ;;  %v4304_v38 = vmul.f32 %v11092_v48, %v11026_v5  ;;  %vm4323_vm5 = vweird.f32 %v11031_v61  ;;  %v5660_v2 = vpop.eup %5659  ;;  %vm4294_vm0 = vweird.f32 %v11079_v18  ;;  %vm11134_vm7 = vmor %vm4278_vm6, %vm4279_vm10 }
 0x748   : > { %v4276_v42 = vmul.f32 %v11073_v46, %v4275_v47  ;;  %vm11108_vm12 = vcmp.eq.f32.partialorder %v4297_v28, 8.507059e+37  ;;  %vm4338_vm13 = vweird.f32 %v11042_v35  ;;  %v4342_v34 = vand.u32 2147483647, %v11042_v35  ;;  %v5662_v13 = vpop.eup %5661  ;;  %vm11151_vm6 = vmor %vm4293_vm4, %vm4294_vm0 }
 0x749   : > { %v4291_v43 = vmul.f32 %v11079_v18, %v4290_v52  ;;  %v4305_v37 = vsub.f32 1.0, %v4304_v38  ;;  %vm11115_vm14 = vcmp.eq.f32.partialorder %v4312_v16, 8.507059e+37  ;;  %v4319_v47 = vmul.f32 %v5660_v2, %v11031_v61 }
 0x74a   : > { %vm11120_vm3 = vcmp.eq.f32.partialorder %v4327_v20, 8.507059e+37  ;;  %v4277_v28 = vadd.f32 %v11073_v46, %v4276_v42  ;;  %v4330_v22 = vor.u32 1.1754944e-38, %v4329_v27  ;;  %v4334_v55 = vmul.f32 %v5662_v13, %v11042_v35 }
 0x74b   : > { %v4344_v33 = vand.u32 2147483648, %v11042_v35  ;;  %v4292_v52 = vadd.f32 %v11079_v18, %v4291_v43  ;;  %v4306_v16 = vmul.f32 %v11092_v48, %v4305_v37  ;;  %vm4309_vm1 = vweird.f32 %v11092_v48  ;;  %v5664_v4 = vpop.eup %5663 }
 0x74c   : > { %v4320_v38 = vsub.f32 1.0, %v4319_v47  ;;  %v4335_v27 = vsub.f32 1.0, %v4334_v55  ;;  %vm11138_vm8 = vcmp.eq.f32.partialorder %v4342_v34, 8.507059e+37  ;;  %5665 = vrcp.f32 %v11081_v15  ;;  %vm11161_vm2 = vmor %vm4308_vm9, %vm4309_vm1 }
 0x74d   : > { %v4281_v37 = vsel %vm11134_vm7, %v11073_v46, %v4277_v28  ;;  %v4307_v43 = vadd.f32 %v11092_v48, %v4306_v16  ;;  %vm4324_vm10 = vweird.f32 %v5660_v2  ;;  %v4296_v34 = vsel %vm11151_vm6, %v11079_v18, %v4292_v52 }
 0x74e   : > { %v4321_v55 = vmul.f32 %v5660_v2, %v4320_v38  ;;  %v4336_v47 = vmul.f32 %v5662_v13, %v4335_v27  ;;  %vm4339_vm7 = vweird.f32 %v5662_v13  ;;  %v4349_v60 = vmul.f32 %v5664_v4, %v11070_v32  ;;  %vm4325_vm4 = vmor %vm4323_vm5, %vm4324_vm10 }
 0x74f   : > { %v4311_v28 = vsel %vm11161_vm2, %v11092_v48, %v4307_v43  ;;  %v4357_v38 = vand.u32 2147483647, %v11070_v32  ;;  %v4359_v20 = vand.u32 2147483648, %v11070_v32  ;;  %v4286_v5 = vsel %vm11099_vm15, %v4285_v36, %v4281_v37  ;;  %vm4340_vm9 = vmor %vm4338_vm13, %vm4339_vm7 }
 0x750   : > { %v4322_v16 = vadd.f32 %v5660_v2, %v4321_v55  ;;  %v4337_v18 = vadd.f32 %v5662_v13, %v4336_v47  ;;  %v4345_v52 = vor.u32 1.1754944e-38, %v4344_v33  ;;  %v4350_v27 = vsub.f32 1.0, %v4349_v60 }
 0x751   : > { %v4301_v25 = vsel %vm11108_vm12, %v4300_v56, %v4296_v34  ;;  %vm4354_vm0 = vweird.f32 %v5664_v4  ;;  %5667 = vrcp.f32 %v11094_v14  ;;  %vm4560_vm1 = vweird.f32 %v10884_v19 }
 0x752   : > { %v4326_v9 = vsel %vm4325_vm4, %v5660_v2, %v4322_v16  ;;  %v5666_v48 = vpop.eup %5665  ;;  %v4316_v61 = vsel %vm11115_vm14, %v4315_v0, %v4311_v28  ;;  %v4341_v36 = vsel %vm4340_vm9, %v5662_v13, %v4337_v18  ;;  %v4351_v8 = vmul.f32 %v5664_v4, %v4350_v27 }
 0x753   : > { %v4331_v33 = vsel %vm11120_vm3, %v4330_v22, %v4326_v9  ;;  %vm4545_vm15 = vweird.f32 %v10920_v44  ;;  %v4346_v35 = vsel %vm11138_vm8, %v4345_v52, %v4341_v36  ;;  %vm11188_vm5 = vcmp.eq.f32.partialorder %v4357_v38, 8.507059e+37 }
 0x754   : > { %v4360_v56 = vor.u32 1.1754944e-38, %v4359_v20  ;;  %v4364_v2 = vmul.f32 %v5666_v48, %v11081_v15  ;;  %v12320_v59 = vand.u32 2147483647, %v10813_v40  ;;  %vm4559_vm13 = vweird.f32 %v10819_v41 }
 0x755   : > { %v4352_v9 = vadd.f32 %v5664_v4, %v4351_v8  ;;  %v4372_v22 = vand.u32 2147483647, %v11081_v15  ;;  %v12323_v23 = vrot.slane %v10790_v3, 1  ;;  %v12324_v42 = vrot.slane %v10790_v3, 2 }
 0x756   : > { %vm11195_vm12 = vcmp.eq.f32.partialorder %v12320_v59, 8.507059e+37  ;;  %vm4544_vm14 = vweird.f32 %v10850_v6  ;;  %vm12325_vm3 = vweird.f32 %v11070_v32  ;;  %v4365_v40 = vsub.f32 1.0, %v4364_v2 }
 0x757   : > { %v4585_v13 = vmul.f32 %v12323_v23, %v4286_v5  ;;  %v4586_v37 = vmul.f32 %v12324_v42, %v4301_v25  ;;  %vm4355_vm8 = vmor %vm12325_vm3, %vm4354_vm0  ;;  %v4374_v43 = vand.u32 2147483648, %v11081_v15  ;;  %v12326_v55 = vrot.slane %v10790_v3, 3  ;;  %v5668_v20 = vpop.eup %5667 }
 0x758   : > { %v12327_v46 = vrot.slane %v10790_v3, 4  ;;  %v4356_v60 = vsel %vm4355_vm8, %v5664_v4, %v4352_v9  ;;  %vm4369_vm2 = vweird.f32 %v5666_v48  ;;  %v12328_v28 = vrot.slane %v10790_v3, 5  ;;  %vm11249_vm0 = vmor %vm4559_vm13, %vm4560_vm1 }
 0x759   : > { %v4587_v34 = vmul.f32 %v12326_v55, %v4316_v61  ;;  %v4593_v38 = vadd.f32 %v4585_v13, %v6449_v7  ;;  %v4361_v32 = vsel %vm11188_vm5, %v4360_v56, %v4356_v60  ;;  %v4366_v5 = vmul.f32 %v5666_v48, %v4365_v40 }
 0x75a   : > { %v4588_v47 = vmul.f32 %v12327_v46, %v4331_v33  ;;  %v4589_v16 = vmul.f32 %v12328_v28, %v4346_v35  ;;  %v4594_v18 = vadd.f32 %v4586_v37, %v6455_v11  ;;  %vm4368_vm6 = vweird.f32 %v11081_v15 }
 0x75b   : > { %v4595_v52 = vadd.f32 %v4587_v34, %v11954_v12  ;;  %v4379_v27 = vmul.f32 %v5668_v20, %v11094_v14  ;;  %v12329_v4 = vrot.slane %v10790_v3, 6  ;;  %v4367_v33 = vadd.f32 %v5666_v48, %v4366_v5  ;;  %vm4370_vm4 = vmor %vm4368_vm6, %vm4369_vm2 }
 0x75c   : > { %v4596_v61 = vadd.f32 %v4588_v47, %v11956_v54  ;;  %vm4373_vm10 = vcmp.eq.f32.partialorder %v4372_v22, 8.507059e+37  ;;  %v4597_v7 = vadd.f32 %v4589_v16, %v11959_v49  ;;  %5669 = vtanh.f32 %v4593_v38 }
 0x75d   : > { %v4590_v25 = vmul.f32 %v12329_v4, %v4361_v32  ;;  %v12330_v36 = vand.u32 2147483647, %v10850_v6  ;;  %v4375_v12 = vor.u32 1.1754944e-38, %v4374_v43  ;;  %v4380_v15 = vsub.f32 1.0, %v4379_v27 }
 0x75e   : > { %5671 = vtanh.f32 %v4594_v18  ;;  %v4371_v35 = vsel %vm4370_vm4, %v5666_v48, %v4367_v33  ;;  %v4387_v54 = vand.u32 2147483647, %v11094_v14  ;;  %v4389_v58 = vand.u32 2147483648, %v11094_v14 }
 0x75f   : > { %vm11229_vm7 = vcmp.eq.f32.partialorder %v12330_v36, 8.507059e+37  ;;  %v4598_v8 = vadd.f32 %v4590_v25, %v11962_v62  ;;  %5673 = vtanh.f32 %v4595_v52  ;;  %v4376_v49 = vsel %vm4373_vm10, %v4375_v12, %v4371_v35  ;;  %v12353_v25 = vld [vmem:[#allocation34_spill] sm:$0xff] }
 0x760   : > { %v4381_v56 = vmul.f32 %v5668_v20, %v4380_v15  ;;  %vm4384_vm9 = vweird.f32 %v5668_v20  ;;  %5675 = vtanh.f32 %v4596_v61  ;;  %v12333_v2 = vsel %vm11048_vm11, %v10872_v39, %v11023_v63  ;;  %vm11260_vm11 = vmor %vm4544_vm14, %vm4545_vm15 }
 0x761   : > { %v4537_v62 = vsel %vm11195_vm12, %v10951_v57, %v12333_v2  ;;  %v4613_v59 = vsub.f32 1.0, %v11037_v1  ;;  %v12336_v9 = vrot.slane %v10790_v3, 7  ;;  %5677 = vtanh.f32 %v4597_v7 }
 0x762   : > { %v12339_v57 = vand.u32 2147483647, %v10819_v41  ;;  %v12342_v0 = vrot.slane %v10714_v31, 7  ;;  %v4382_v23 = vadd.f32 %v5668_v20, %v4381_v56  ;;  %vm4383_vm5 = vweird.f32 %v11094_v14  ;;  %v5670_v13 = vpop.eup %5669 }
 0x763   : > { %v4591_v51 = vmul.f32 %v12336_v9, %v4376_v49  ;;  %5679 = vtanh.f32 %v4598_v8  ;;  %v4562_v6 = vsel %vm11249_vm0, %v10884_v19, %v11061_v45  ;;  %v12343_v41 = vrot.slane %v10717_v17, 7  ;;  %vm4385_vm15 = vmor %vm4383_vm5, %vm4384_vm9 }
 0x764   : > { %vm11266_vm1 = vcmp.eq.f32.partialorder %v12339_v57, 8.507059e+37  ;;  %v4640_v22 = vmul.f32 %v12342_v0, %v10957_v30  ;;  %v4390_v37 = vor.u32 1.1754944e-38, %v4389_v58  ;;  %v5672_v40 = vpop.eup %5671  ;;  %v4547_v14 = vsel %vm11260_vm11, %v10920_v44, %v11066_v29  ;;  %v12356_v58 = vld [vmem:[#allocation35_spill] sm:$0xff] }
 0x765   : > { %v4641_v42 = vmul.f32 %v12343_v41, %v10992_v50  ;;  %v4599_v31 = vadd.f32 %v4591_v51, %v11965_v10  ;;  %v4386_v43 = vsel %vm4385_vm15, %v5668_v20, %v4382_v23  ;;  %vm4388_vm12 = vcmp.eq.f32.partialorder %v4387_v54, 8.507059e+37  ;;  %v5674_v45 = vpop.eup %5673  ;;  %v12348_v20 = vld [vmem:[#allocation24_spill] sm:$0xff] }
 0x766   : > { %v12344_v55 = vsub.f32 1.0, %v10957_v30  ;;  %v4614_v34 = vsub.f32 1.0, %v4537_v62  ;;  %v4391_v17 = vsel %vm4388_vm12, %v4390_v37, %v4386_v43  ;;  %v12345_v46 = vsub.f32 1.0, %v10992_v50  ;;  %v5676_v10 = vpop.eup %5675 }
 0x767   : > { %5681 = vtanh.f32 %v4599_v31  ;;  %v12346_v60 = vrot.slane %v10721_v21, 7  ;;  %v4592_v44 = vmul.f32 %v4391_v17, %v10790_v3  ;;  %v12347_v29 = vsub.f32 1.0, %v10999_v26  ;;  %v5678_v38 = vpop.eup %5677 }
 0x768   : > { %v4617_v19 = vmul.f32 %v5670_v13, %v12344_v55  ;;  %v4618_v47 = vmul.f32 %v5672_v40, %v12345_v46  ;;  %v4552_v50 = vsel %vm11229_vm7, %v11039_v24, %v4547_v14  ;;  %v12349_v32 = vrot.slane %v12348_v20, 7  ;;  %v12354_v24 = vld [vmem:[#allocation29_spill] sm:$0xff] }
 0x769   : > { %v4642_v28 = vmul.f32 %v12346_v60, %v10999_v26  ;;  %v4619_v16 = vmul.f32 %v5674_v45, %v12347_v29  ;;  %v12350_v21 = vsub.f32 1.0, %v11015_v53  ;;  %v5680_v3 = vpop.eup %5679  ;;  %v12351_v26 = vld [vmem:[#allocation27_spill] sm:$0xff]  ;;  %v4600_v61 = vadd.f32 %v4592_v44, %v12353_v25 }
 0x76a   : > { %v4648_v30 = vadd.f32 %v4640_v22, %v4617_v19  ;;  %v4643_v5 = vmul.f32 %v12349_v32, %v11015_v53  ;;  %v4649_v52 = vadd.f32 %v4641_v42, %v4618_v47  ;;  %v12352_v27 = vrot.slane %v12351_v26, 7  ;;  %v12363_v42 = vld [vmem:[#allocation33_spill] sm:$0xff] }
 0x76b   : > { %v4620_v18 = vmul.f32 %v5676_v10, %v12350_v21  ;;  %v4621_v33 = vmul.f32 %v5678_v38, %v4613_v59  ;;  %v4650_v7 = vadd.f32 %v4642_v28, %v4619_v16  ;;  %v12355_v36 = vrot.slane %v12354_v24, 7 }
 0x76c   : > { %v4644_v4 = vmul.f32 %v12352_v27, %v11037_v1  ;;  %4656 = vst [vmem:[%s6102_s23] sm:$0x80] %v4648_v30  ;;  %v4622_v12 = vmul.f32 %v5680_v3, %v4614_v34  ;;  %v4672_v53 = vrot.slane %v4649_v52, 7  ;;  %v4615_v8 = vsub.f32 1.0, %v4552_v50 }
 0x76d   : > { %v4645_v11 = vmul.f32 %v12355_v36, %v4537_v62  ;;  %v4651_v15 = vadd.f32 %v4643_v5, %v4620_v18  ;;  %4657 = vst [vmem:[%s6102_s23 + $0x8] sm:$0x80] %v4649_v52  ;;  %5683 = vtanh.f32 %v4600_v61  ;;  %v4673_v1 = vrot.slane %v4650_v7, 6  ;;  %v5682_v54 = vpop.eup %5681  ;;  %v12357_v62 = vld [vmem:[#allocation31_spill] sm:$0xff] }
 0x76e   : > { %v4652_v35 = vadd.f32 %v4644_v4, %v4621_v33  ;;  %4658 = vst [vmem:[%s6102_s23 + $0x10] sm:$0x80] %v4650_v7  ;;  %v4567_v49 = vsel %vm11266_vm1, %v12356_v58, %v4562_v6  ;;  %v12358_v48 = vrot.slane %v12357_v62, 7  ;;  %v4623_v9 = vmul.f32 %v5682_v54, %v4615_v8 }
 0x76f   : > { %v4653_v56 = vadd.f32 %v4645_v11, %v4622_v12  ;;  %4659 = vst [vmem:[%s6102_s23 + $0x18] sm:$0x80] %v4651_v15  ;;  %v4675_v2 = vrot.slane %v4651_v15, 5  ;;  %vm12359_vm13 = vcmask 1041409   ;;  %vm12360_vm14 = vcmask 1042434  }
 0x770   : > { %v4646_v59 = vmul.f32 %v12358_v48, %v4552_v50  ;;  %4660 = vst [vmem:[%s6102_s23 + $0x20] sm:$0x80] %v4652_v35  ;;  %v4674_v51 = vsel %vm12359_vm13, %v4673_v1, %v4672_v53  ;;  %v4677_v39 = vrot.slane %v4652_v35, 4  ;;  %vm12361_vm3 = vcmask 1043459  }
 0x771   : > { %4661 = vst [vmem:[%s6102_s23 + $0x28] sm:$0x80] %v4653_v56  ;;  %v4676_v57 = vsel %vm12360_vm14, %v4675_v2, %v4674_v51  ;;  %v4679_v63 = vrot.slane %v4653_v56, 3  ;;  %v4616_v23 = vsub.f32 1.0, %v4567_v49  ;;  %vm12362_vm8 = vcmask 1044484  }
 0x772   : > { %v4654_v0 = vadd.f32 %v4646_v59, %v4623_v9  ;;  %v4678_v22 = vsel %vm12361_vm3, %v4677_v39, %v4676_v57  ;;  %4687 = vst [vmem:[#allocation2 - $0x7] sm:$0x80] %v4648_v30  ;;  %v12364_v37 = vrot.slane %v12363_v42, 7  ;;  %vm12365_vm2 = vcmask 1045509  }
 0x773   : > { %v4680_v13 = vsel %vm12362_vm8, %v4679_v63, %v4678_v22  ;;  %v5684_v6 = vpop.eup %5683 }
 0x774   : > { %4662 = vst [vmem:[%s6102_s23 + $0x30] sm:$0x80] %v4654_v0  ;;  %v4681_v41 = vrot.slane %v4654_v0, 2  ;;  %v4647_v31 = vmul.f32 %v4567_v49, %v12364_v37  ;;  %v4624_v40 = vmul.f32 %v5684_v6, %v4616_v23 }
 0x776   : > { %v4682_v14 = vsel %vm12365_vm2, %v4681_v41, %v4680_v13  ;;  %v4655_v43 = vadd.f32 %v4647_v31, %v4624_v40 }
 0x778   : > { %4663 = vst [vmem:[%s6102_s23 + $0x38] sm:$0x80] %v4655_v43  ;;  %v4683_v55 = vrot.slane %v4655_v43, 1 }
 0x779   : > { %5915 = shalt.err (!%p5912_p13)
}
 0x77a   : > { %s5968_s24 = smov 128   ;;  %s5969_s25 = smov 256   ;;  %vm12366_vm6 = vcmask 1046534  }
 0x77b   : > { %s5970_s30 = smov 8   ;;  %v4684_v19 = vsel %vm12366_vm6, %v4683_v55, %v4682_v14 }
 0x77c   : > { %4979 = dma.vmem_to_hbm [thread:$0]  (%p6058_p5), %s4702_s28, 1024, %s4704_s29, %s4690_s5, %s5968_s24, %s5969_s25, %s5970_s30   ;;  %4688 = vst [vmem:[#allocation2 + $0x1] sm:$0x7f] %v4684_v19 }
 0x77d PF: > { %s4718_s4 = sand.u32 1, %s5946_s12   ;;  %p12367_p0 = scmp.ge.s32.totalorder %s5958_s15, 2 }
 0x77e   : > { %s4719_s23 = scalar_lea.sflag [#allocation5], %s4718_s4 }
 0x77f   : > { %p4993_p3 = pnand %p12367_p0, %p6026_p6 }
 0x781   : > { %p4994_p7 = pneg %p4993_p3 }
 0x783   : > { %5941 = dma.done.wait (%p4994_p7), %s4719_s23, 1024  }
 0x784   : > { %5943 = vsyncadd (%p4994_p7), %s4719_s23, 4294966272  ;;  %p17_p5 = scmp.ge.s32.totalorder %s6048_s6, 4   ;;  %s12368_s12 = smov %s5950_s13 }
 0x785   : > { %s12369_s13 = smov %s5954_s14  ;;  %s12370_s14 = smov %s6064_s10 }
 0x786   : > { %s12371_s15 = smov %s6048_s6  ;;  %19 = sbr.rel (!%p17_p5) target bundleno = 6 (0x6), region = 89 }
 0x78b   :  { %4725 = vsyncpa [#allocation4], 1 }
 0x78c   :  { %4727 = vsyncpa [#allocation4 + $0x1], 1 }
 0x78d   :  { %4728 = vsyncpa [#allocation7], 1 }
 0x78e   :  { %4729 = vsyncpa [#allocation5], 1 }
 0x78f   :  { %4731 = vsyncpa [#allocation5 + $0x1], 1 }

</bundles_post_ra>
